<compile_context>
chip_gen: v7x
topology: tpu7x:2x2x1
jax: 0.10.0
libtpu: 0.0.40
codegen_flags: <defaults>
</compile_context>

<pallas_src>
import functools

import numpy as np

import jax
import jax.numpy as jnp
from jax import lax
from jax.experimental import pallas as pl
from jax.experimental.pallas import tpu as pltpu


CONV_PARAMS = [
    dict(in_channels=11, out_channels=16, kernel_size=3, stride=2, padding=1),
    dict(in_channels=16, out_channels=32, kernel_size=3, stride=2, padding=1),
    dict(in_channels=32, out_channels=64, kernel_size=3, stride=2, padding=1),
]
FC_LAYERS = [256]


# -----------------------------------------------------------------------------
# Fused Pallas kernel: the whole forward is 5 dense matmuls (+bias/ReLU)
# -----------------------------------------------------------------------------
def _fused_kernel(x_ref, t1x_ref, b1_ref, t2_ref, b2_ref, t3_ref, b3_ref,
                  wf1c_ref, bf1_ref, wf2_ref, bf2_ref, o_ref, *, n1):
    f32, bf16 = jnp.float32, jnp.bfloat16

    h0 = x_ref[...]                                             # (Bt, H*W*C) bf16

    # conv1 (Toeplitz) and the pooled-extra-feature fc1 contribution share one
    # matmul over h0: t1x = [Toeplitz_1 | pool(x[:,1:]) @ fc1_extra].
    z1x = jnp.dot(h0, t1x_ref[...], preferred_element_type=f32)  # (Bt, n1 + fc_hidden)
    h1 = jnp.maximum(z1x[:, :n1] + b1_ref[...], 0.0).astype(bf16)
    pre_x = z1x[:, n1:]                                          # (Bt, fc_hidden) f32

    # conv2, conv3 as dense Toeplitz matmuls (channels-last flatten) + bias + ReLU
    h2 = jnp.maximum(
        jnp.dot(h1, t2_ref[...], preferred_element_type=f32) + b2_ref[...], 0.0
    ).astype(bf16)
    h3 = jnp.maximum(
        jnp.dot(h2, t3_ref[...], preferred_element_type=f32) + b3_ref[...], 0.0
    ).astype(bf16)

    # fc1: conv features (rows permuted host-side to PyTorch's NCHW flatten order)
    # + extra-feature contribution + bias, ReLU
    hf = jnp.maximum(
        jnp.dot(h3, wf1c_ref[...], preferred_element_type=f32) + pre_x + bf1_ref[...],
        0.0,
    ).astype(bf16)

    # fc2 (no ReLU, dont_aplly_last=True), lane-dense 128-padded store
    o_ref[...] = jnp.dot(hf, wf2_ref[...], preferred_element_type=f32) + bf2_ref[...]


# -----------------------------------------------------------------------------
# Host-side weight preparation (pure layout plumbing, done once)
# -----------------------------------------------------------------------------
def _conv_out_hw(h, w, cp):
    k, s, p = cp["kernel_size"], cp["stride"], cp["padding"]
    return (h + 2 * p - k) // s + 1, (w + 2 * p - k) // s + 1


def _toeplitz_indices(hin, win, ho, wo, cin, cout, k, stride, pad):
    """Static gather indices + validity mask mapping flattened (co,ci,kh,kw) conv
    weights onto the dense (hin*win*cin, ho*wo*cout) channels-last conv matrix."""
    r = np.arange(hin * win * cin)
    iy = (r // cin) // win
    ix = (r // cin) % win
    ci = r % cin
    c = np.arange(ho * wo * cout)
    oy = (c // cout) // wo
    ox = (c // cout) % wo
    co = c % cout
    kh = iy[:, None] - stride * oy[None, :] + pad
    kw = ix[:, None] - stride * ox[None, :] + pad
    valid = (kh >= 0) & (kh < k) & (kw >= 0) & (kw < k)
    kh = np.clip(kh, 0, k - 1)
    kw = np.clip(kw, 0, k - 1)
    flat = ((co[None, :] * cin + ci[:, None]) * k + kh) * k + kw
    return jnp.asarray(flat.astype(np.int32)), jnp.asarray(valid)


def prepare_kernel_params(params, input_shape):
    """Build the bf16 Toeplitz / FC weight slabs consumed by the fused kernel."""
    C, H, W = input_shape
    conv_dims, h_, w_ = [], H, W
    for cp in CONV_PARAMS:
        ho, wo = _conv_out_hw(h_, w_, cp)
        conv_dims.append((h_, w_, ho, wo))
        h_, w_ = ho, wo
    n_sp_last = h_ * w_
    c_last = CONV_PARAMS[-1]["out_channels"]
    n_feat = n_sp_last * c_last

    toeps, biases = [], []
    for (wgt, bias), cp, (hin, win, ho, wo) in zip(params["conv"], CONV_PARAMS, conv_dims):
        k, ci, co = cp["kernel_size"], cp["in_channels"], cp["out_channels"]
        flat_idx, valid = _toeplitz_indices(hin, win, ho, wo, ci, co, k,
                                            cp["stride"], cp["padding"])
        t = jnp.where(valid, wgt.reshape(-1)[flat_idx], 0.0).astype(jnp.bfloat16)
        toeps.append(t)                                          # (hin*win*ci, ho*wo*co)
        biases.append(jnp.tile(bias, ho * wo).reshape(1, ho * wo * co)
                      .astype(jnp.float32))

    # fc1: conv-feature rows permuted from PyTorch NCHW flatten (c, sp) to our
    # channels-last flatten (sp, c); extra-feature half is AdaptiveAvgPool2d(1)
    # over channels 1..C-1 folded into fc1, expressed on the flattened input
    # (zero row drops channel 0).
    w_fc1, b_fc1 = params["fc"][0]
    fc_hidden = w_fc1.shape[1]
    idx = np.array([c * n_sp_last + sp
                    for sp in range(n_sp_last) for c in range(c_last)], np.int32)
    wf1c = w_fc1[idx].astype(jnp.bfloat16)                       # (n_feat, fc_hidden)
    ext = jnp.concatenate([jnp.zeros((1, fc_hidden), jnp.float32),
                           w_fc1[n_feat:]], axis=0) / float(H * W)   # (C, fc_hidden)
    wf1x = jnp.tile(ext, (H * W, 1)).astype(jnp.bfloat16)        # (H*W*C, fc_hidden)
    t1x = jnp.concatenate([toeps[0], wf1x], axis=1)              # (H*W*C, n1+fc_hidden)
    bf1 = b_fc1.reshape(1, fc_hidden).astype(jnp.float32)

    # fc2: zero-pad output dim to a lane-dense multiple of 128
    w_fc2, b_fc2 = params["fc"][1]
    n_out = w_fc2.shape[1]
    n_pad = ((n_out + 127) // 128) * 128
    wf2 = (jnp.zeros((fc_hidden, n_pad), jnp.float32)
           .at[:, :n_out].set(w_fc2).astype(jnp.bfloat16))
    bf2 = jnp.zeros((1, n_pad), jnp.float32).at[:, :n_out].set(b_fc2.reshape(1, n_out))

    n1 = conv_dims[0][2] * conv_dims[0][3] * CONV_PARAMS[0]["out_channels"]
    geom = dict(C=C, H=H, W=W, n1=n1, n_out=n_out, n_pad=n_pad)
    weights = (t1x, biases[0], toeps[1], biases[1], toeps[2], biases[2],
               wf1c, bf1, wf2, bf2)
    return weights, geom


# -----------------------------------------------------------------------------
# pallas_call wrapper
# -----------------------------------------------------------------------------
def cnn_dqn_forward(weights, geom, x):
    """x: (B, C, H, W) float32 -> (B, output_size). Single fused Pallas kernel."""
    B = x.shape[0]
    C, H, W = geom["C"], geom["H"], geom["W"]
    n1, n_pad, n_out = geom["n1"], geom["n_pad"], geom["n_out"]
    hwc = H * W * C

    # channels-last flattened input rows, bf16 for the MXU
    x_flat = jnp.transpose(x, (0, 2, 3, 1)).reshape(B, hwc).astype(jnp.bfloat16)

    # batch blocking: up to 128 samples per grid step (real M for every matmul)
    Bt = min(128, ((B + 7) // 8) * 8)
    B_pad = ((B + Bt - 1) // Bt) * Bt
    if B_pad != B:
        x_flat = jnp.pad(x_flat, ((0, B_pad - B), (0, 0)))

    kernel = functools.partial(_fused_kernel, n1=n1)

    def _const_spec(shape):
        return pl.BlockSpec(shape, lambda b: (0, 0))

    out_pad = pl.pallas_call(
        kernel,
        out_shape=jax.ShapeDtypeStruct((B_pad, n_pad), jnp.float32),
        grid=(B_pad // Bt,),
        in_specs=[pl.BlockSpec((Bt, hwc), lambda b: (b, 0))]
                 + [_const_spec(w.shape) for w in weights],
        out_specs=pl.BlockSpec((Bt, n_pad), lambda b: (b, 0)),
        compiler_params=pltpu.CompilerParams(
            dimension_semantics=("parallel",),
            vmem_limit_bytes=40 * 1024 * 1024),
    )(x_flat, *weights)

    return out_pad[:B, :n_out]


def make_forward(params, input_shape):
    weights, geom = prepare_kernel_params(params, input_shape)

    @jax.jit
    def forward(x):
        return cnn_dqn_forward(weights, geom, x)

    return forward


# -----------------------------------------------------------------------------
# Parameter construction + plain-JAX reference (for correctness check)
# -----------------------------------------------------------------------------
def init_params(key, input_shape, output_size):
    C, H, W = input_shape
    params = {"conv": [], "fc": []}
    h, w = H, W
    for cp in CONV_PARAMS:
        key, k1, k2 = jax.random.split(key, 3)
        co, ci, k = cp["out_channels"], cp["in_channels"], cp["kernel_size"]
        wgt = jax.random.normal(k1, (co, ci, k, k), jnp.float32) * 0.05
        bias = jax.random.normal(k2, (co,), jnp.float32) * 0.05
        params["conv"].append((wgt, bias))
        h, w = _conv_out_hw(h, w, cp)
    feat = CONV_PARAMS[-1]["out_channels"] * h * w
    fc_in = feat + (C - 1)  # reconnect_extra_features
    dims = [fc_in] + FC_LAYERS + [output_size]
    for i in range(len(dims) - 1):
        key, k1, k2 = jax.random.split(key, 3)
        wgt = jax.random.normal(k1, (dims[i], dims[i + 1]), jnp.float32) * 0.05
        bias = jax.random.normal(k2, (dims[i + 1],), jnp.float32) * 0.05
        params["fc"].append((wgt, bias))
    return params


def reference_forward(params, x):
    B, C, H, W = x.shape
    x_extra = jnp.mean(x[:, 1:, :, :], axis=(2, 3))
    h = x
    for (wgt, bias), cp in zip(params["conv"], CONV_PARAMS):
        s, p = cp["stride"], cp["padding"]
        h = lax.conv_general_dilated(
            h, wgt, window_strides=(s, s), padding=[(p, p), (p, p)],
            dimension_numbers=("NCHW", "OIHW", "NCHW"))
        h = jax.nn.relu(h + bias.reshape(1, -1, 1, 1))
    feat = h.reshape(B, -1)
    feat = jnp.concatenate([feat, x_extra], axis=1)
    n_fc = len(params["fc"])
    for i, (wgt, bias) in enumerate(params["fc"]):
        feat = feat @ wgt + bias
        if i < n_fc - 1:
            feat = jax.nn.relu(feat)
    return feat


# -----------------------------------------------------------------------------
if __name__ == "__main__":
    key = jax.random.PRNGKey(0)
    input_shape = (11, 16, 16)      # (C, H, W) — C must match conv_layers_params[0]
    output_size = 5
    batch = 2

    key, kx = jax.random.split(key)
    x = jax.random.normal(kx, (batch,) + input_shape, jnp.float32)
    params = init_params(key, input_shape, output_size)

    forward = make_forward(params, input_shape)
    q_vals = jax.block_until_ready(forward(x))
    q_ref = jax.block_until_ready(reference_forward(params, x))

    assert q_vals.shape == (batch, output_size)
    max_err = float(jnp.max(jnp.abs(q_vals - q_ref)))
    # bf16 matmul operands (f32 accumulation): slightly looser tolerance than pure f32
    assert jnp.allclose(q_vals, q_ref, atol=5e-3, rtol=1e-2), f"max abs err {max_err}"
    print("KERNEL_OK")
</pallas_src>

<mosaic_0001>
module attributes {stable_mosaic.version = 11 : i64} {
  func.func @_fused_kernel(%arg0: i32, %arg1: memref<8x2816xbf16, #tpu.memory_space<vmem>>, %arg2: memref<2816x1280xbf16, #tpu.memory_space<vmem>>, %arg3: memref<1x1024xf32, #tpu.memory_space<vmem>>, %arg4: memref<1024x512xbf16, #tpu.memory_space<vmem>>, %arg5: memref<1x512xf32, #tpu.memory_space<vmem>>, %arg6: memref<512x256xbf16, #tpu.memory_space<vmem>>, %arg7: memref<1x256xf32, #tpu.memory_space<vmem>>, %arg8: memref<256x256xbf16, #tpu.memory_space<vmem>>, %arg9: memref<1x256xf32, #tpu.memory_space<vmem>>, %arg10: memref<256x128xbf16, #tpu.memory_space<vmem>>, %arg11: memref<1x128xf32, #tpu.memory_space<vmem>>, %arg12: memref<8x128xf32, #tpu.memory_space<vmem>>) attributes {dimension_semantics = [#tpu.dimension_semantics<parallel>], iteration_bounds = array<i64: 1>, scalar_prefetch = 0 : i64, scratch_operands = 0 : i64, tpu.core_type = #tpu.core_type<tc>, window_params = [{transform_indices = @transform_0, window_bounds = array<i64: 8, 2816>}, {pipeline_mode = #tpu.pipeline_mode<synchronous>, transform_indices = @transform_1, window_bounds = array<i64: 2816, 1280>}, {pipeline_mode = #tpu.pipeline_mode<synchronous>, transform_indices = @transform_2, window_bounds = array<i64: 1, 1024>}, {pipeline_mode = #tpu.pipeline_mode<synchronous>, transform_indices = @transform_3, window_bounds = array<i64: 1024, 512>}, {pipeline_mode = #tpu.pipeline_mode<synchronous>, transform_indices = @transform_4, window_bounds = array<i64: 1, 512>}, {pipeline_mode = #tpu.pipeline_mode<synchronous>, transform_indices = @transform_5, window_bounds = array<i64: 512, 256>}, {pipeline_mode = #tpu.pipeline_mode<synchronous>, transform_indices = @transform_6, window_bounds = array<i64: 1, 256>}, {pipeline_mode = #tpu.pipeline_mode<synchronous>, transform_indices = @transform_7, window_bounds = array<i64: 256, 256>}, {pipeline_mode = #tpu.pipeline_mode<synchronous>, transform_indices = @transform_8, window_bounds = array<i64: 1, 256>}, {pipeline_mode = #tpu.pipeline_mode<synchronous>, transform_indices = @transform_9, window_bounds = array<i64: 256, 128>}, {pipeline_mode = #tpu.pipeline_mode<synchronous>, transform_indices = @transform_10, window_bounds = array<i64: 1, 128>}, {transform_indices = @transform_11, window_bounds = array<i64: 8, 128>}]} {
    %c0 = arith.constant 0 : index
    %c0_0 = arith.constant 0 : index
    %0 = vector.load %arg1[%c0, %c0_0] : memref<8x2816xbf16, #tpu.memory_space<vmem>>, vector<8x2816xbf16>
    %c0_1 = arith.constant 0 : index
    %c0_2 = arith.constant 0 : index
    %1 = vector.load %arg2[%c0_1, %c0_2] : memref<2816x1280xbf16, #tpu.memory_space<vmem>>, vector<2816x1280xbf16>
    %cst = arith.constant dense<0.000000e+00> : vector<8x1280xf32>
    %2 = tpu.matmul %0, %1, %cst {dimension_numbers = #tpu.dot_dimension_numbers<[1], [0], [0], [1], [0, 0, 1, 1], [], []>} : vector<8x2816xbf16>, vector<2816x1280xbf16>, vector<8x1280xf32> -> vector<8x1280xf32>
    %3 = vector.extract_strided_slice %2 {offsets = [0, 0], sizes = [8, 1024], strides = [1, 1]} : vector<8x1280xf32> to vector<8x1024xf32>
    %c0_3 = arith.constant 0 : index
    %c0_4 = arith.constant 0 : index
    %4 = vector.load %arg3[%c0_3, %c0_4] : memref<1x1024xf32, #tpu.memory_space<vmem>>, vector<1x1024xf32>
    %5 = vector.broadcast %4 : vector<1x1024xf32> to vector<8x1024xf32>
    %6 = arith.addf %3, %5 : vector<8x1024xf32>
    %cst_5 = arith.constant 0.000000e+00 : f32
    %7 = vector.broadcast %cst_5 : f32 to vector<8x1024xf32>
    %8 = arith.maximumf %6, %7 : vector<8x1024xf32>
    %9 = arith.truncf %8 : vector<8x1024xf32> to vector<8x1024xbf16>
    %10 = vector.extract_strided_slice %2 {offsets = [0, 1024], sizes = [8, 256], strides = [1, 1]} : vector<8x1280xf32> to vector<8x256xf32>
    %c0_6 = arith.constant 0 : index
    %c0_7 = arith.constant 0 : index
    %11 = vector.load %arg4[%c0_6, %c0_7] : memref<1024x512xbf16, #tpu.memory_space<vmem>>, vector<1024x512xbf16>
    %cst_8 = arith.constant dense<0.000000e+00> : vector<8x512xf32>
    %12 = tpu.matmul %9, %11, %cst_8 {dimension_numbers = #tpu.dot_dimension_numbers<[1], [0], [0], [1], [0, 0, 1, 1], [], []>} : vector<8x1024xbf16>, vector<1024x512xbf16>, vector<8x512xf32> -> vector<8x512xf32>
    %c0_9 = arith.constant 0 : index
    %c0_10 = arith.constant 0 : index
    %13 = vector.load %arg5[%c0_9, %c0_10] : memref<1x512xf32, #tpu.memory_space<vmem>>, vector<1x512xf32>
    %14 = vector.broadcast %13 : vector<1x512xf32> to vector<8x512xf32>
    %15 = arith.addf %12, %14 : vector<8x512xf32>
    %cst_11 = arith.constant 0.000000e+00 : f32
    %16 = vector.broadcast %cst_11 : f32 to vector<8x512xf32>
    %17 = arith.maximumf %15, %16 : vector<8x512xf32>
    %18 = arith.truncf %17 : vector<8x512xf32> to vector<8x512xbf16>
    %c0_12 = arith.constant 0 : index
    %c0_13 = arith.constant 0 : index
    %19 = vector.load %arg6[%c0_12, %c0_13] : memref<512x256xbf16, #tpu.memory_space<vmem>>, vector<512x256xbf16>
    %cst_14 = arith.constant dense<0.000000e+00> : vector<8x256xf32>
    %20 = tpu.matmul %18, %19, %cst_14 {dimension_numbers = #tpu.dot_dimension_numbers<[1], [0], [0], [1], [0, 0, 1, 1], [], []>} : vector<8x512xbf16>, vector<512x256xbf16>, vector<8x256xf32> -> vector<8x256xf32>
    %c0_15 = arith.constant 0 : index
    %c0_16 = arith.constant 0 : index
    %21 = vector.load %arg7[%c0_15, %c0_16] : memref<1x256xf32, #tpu.memory_space<vmem>>, vector<1x256xf32>
    %22 = vector.broadcast %21 : vector<1x256xf32> to vector<8x256xf32>
    %23 = arith.addf %20, %22 : vector<8x256xf32>
    %cst_17 = arith.constant 0.000000e+00 : f32
    %24 = vector.broadcast %cst_17 : f32 to vector<8x256xf32>
    %25 = arith.maximumf %23, %24 : vector<8x256xf32>
    %26 = arith.truncf %25 : vector<8x256xf32> to vector<8x256xbf16>
    %c0_18 = arith.constant 0 : index
    %c0_19 = arith.constant 0 : index
    %27 = vector.load %arg8[%c0_18, %c0_19] : memref<256x256xbf16, #tpu.memory_space<vmem>>, vector<256x256xbf16>
    %cst_20 = arith.constant dense<0.000000e+00> : vector<8x256xf32>
    %28 = tpu.matmul %26, %27, %cst_20 {dimension_numbers = #tpu.dot_dimension_numbers<[1], [0], [0], [1], [0, 0, 1, 1], [], []>} : vector<8x256xbf16>, vector<256x256xbf16>, vector<8x256xf32> -> vector<8x256xf32>
    %29 = arith.addf %28, %10 : vector<8x256xf32>
    %c0_21 = arith.constant 0 : index
    %c0_22 = arith.constant 0 : index
    %30 = vector.load %arg9[%c0_21, %c0_22] : memref<1x256xf32, #tpu.memory_space<vmem>>, vector<1x256xf32>
    %31 = vector.broadcast %30 : vector<1x256xf32> to vector<8x256xf32>
    %32 = arith.addf %29, %31 : vector<8x256xf32>
    %cst_23 = arith.constant 0.000000e+00 : f32
    %33 = vector.broadcast %cst_23 : f32 to vector<8x256xf32>
    %34 = arith.maximumf %32, %33 : vector<8x256xf32>
    %35 = arith.truncf %34 : vector<8x256xf32> to vector<8x256xbf16>
    %c0_24 = arith.constant 0 : index
    %c0_25 = arith.constant 0 : index
    %36 = vector.load %arg10[%c0_24, %c0_25] : memref<256x128xbf16, #tpu.memory_space<vmem>>, vector<256x128xbf16>
    %cst_26 = arith.constant dense<0.000000e+00> : vector<8x128xf32>
    %37 = tpu.matmul %35, %36, %cst_26 {dimension_numbers = #tpu.dot_dimension_numbers<[1], [0], [0], [1], [0, 0, 1, 1], [], []>} : vector<8x256xbf16>, vector<256x128xbf16>, vector<8x128xf32> -> vector<8x128xf32>
    %c0_27 = arith.constant 0 : index
    %c0_28 = arith.constant 0 : index
    %38 = vector.load %arg11[%c0_27, %c0_28] : memref<1x128xf32, #tpu.memory_space<vmem>>, vector<1x128xf32>
    %39 = vector.broadcast %38 : vector<1x128xf32> to vector<8x128xf32>
    %40 = arith.addf %37, %39 : vector<8x128xf32>
    %c0_29 = arith.constant 0 : index
    %c0_30 = arith.constant 0 : index
    %41 = vector.load %arg12[%c0_29, %c0_30] : memref<8x128xf32, #tpu.memory_space<vmem>>, vector<8x128xf32>
    tpu.vector_store %arg12[%c0_29, %c0_30], %40 {strides = array<i32>} : memref<8x128xf32, #tpu.memory_space<vmem>>, vector<8x128xf32>,
    return
  }
  func.func @transform_0(%arg0: i32) -> (i32, i32) {
    %c0_i32 = arith.constant 0 : i32
    %c0_i32_0 = arith.constant 0 : i32
    return %arg0, %c0_i32 : i32, i32
  }
  func.func @transform_1(%arg0: i32) -> (i32, i32) {
    %c0_i32 = arith.constant 0 : i32
    %c0_i32_0 = arith.constant 0 : i32
    %c0_i32_1 = arith.constant 0 : i32
    return %c0_i32, %c0_i32_0 : i32, i32
  }
  func.func @transform_2(%arg0: i32) -> (i32, i32) {
    %c0_i32 = arith.constant 0 : i32
    %c0_i32_0 = arith.constant 0 : i32
    %c0_i32_1 = arith.constant 0 : i32
    return %c0_i32, %c0_i32_0 : i32, i32
  }
  func.func @transform_3(%arg0: i32) -> (i32, i32) {
    %c0_i32 = arith.constant 0 : i32
    %c0_i32_0 = arith.constant 0 : i32
    %c0_i32_1 = arith.constant 0 : i32
    return %c0_i32, %c0_i32_0 : i32, i32
  }
  func.func @transform_4(%arg0: i32) -> (i32, i32) {
    %c0_i32 = arith.constant 0 : i32
    %c0_i32_0 = arith.constant 0 : i32
    %c0_i32_1 = arith.constant 0 : i32
    return %c0_i32, %c0_i32_0 : i32, i32
  }
  func.func @transform_5(%arg0: i32) -> (i32, i32) {
    %c0_i32 = arith.constant 0 : i32
    %c0_i32_0 = arith.constant 0 : i32
    %c0_i32_1 = arith.constant 0 : i32
    return %c0_i32, %c0_i32_0 : i32, i32
  }
  func.func @transform_6(%arg0: i32) -> (i32, i32) {
    %c0_i32 = arith.constant 0 : i32
    %c0_i32_0 = arith.constant 0 : i32
    %c0_i32_1 = arith.constant 0 : i32
    return %c0_i32, %c0_i32_0 : i32, i32
  }
  func.func @transform_7(%arg0: i32) -> (i32, i32) {
    %c0_i32 = arith.constant 0 : i32
    %c0_i32_0 = arith.constant 0 : i32
    %c0_i32_1 = arith.constant 0 : i32
    return %c0_i32, %c0_i32_0 : i32, i32
  }
  func.func @transform_8(%arg0: i32) -> (i32, i32) {
    %c0_i32 = arith.constant 0 : i32
    %c0_i32_0 = arith.constant 0 : i32
    %c0_i32_1 = arith.constant 0 : i32
    return %c0_i32, %c0_i32_0 : i32, i32
  }
  func.func @transform_9(%arg0: i32) -> (i32, i32) {
    %c0_i32 = arith.constant 0 : i32
    %c0_i32_0 = arith.constant 0 : i32
    %c0_i32_1 = arith.constant 0 : i32
    return %c0_i32, %c0_i32_0 : i32, i32
  }
  func.func @transform_10(%arg0: i32) -> (i32, i32) {
    %c0_i32 = arith.constant 0 : i32
    %c0_i32_0 = arith.constant 0 : i32
    %c0_i32_1 = arith.constant 0 : i32
    return %c0_i32, %c0_i32_0 : i32, i32
  }
  func.func @transform_11(%arg0: i32) -> (i32, i32) {
    %c0_i32 = arith.constant 0 : i32
    %c0_i32_0 = arith.constant 0 : i32
    return %arg0, %c0_i32 : i32, i32
  }
}

</mosaic_0001>

<bundles_post_ra>
// kernel: forward.1
= control target key start
LH: loop header
LB: loop body
LE: loop exit
PB: predicated region body
PF: predicated region fallthrough
CT: control target
= control target key end

     0   :  { %s28192_s1 = inlined_call_operand.vmem [shape: bf16[2816,1280], index: 1, kind: input, shape index: {}]   ;;  %s28193_s0 = inlined_call_operand.vmem [shape: bf16[8,2816], index: 0, kind: input, shape index: {}]   ;;  %s28194_s3 = inlined_call_operand.vmem [shape: bf16[1024,512], index: 3, kind: input, shape index: {}]   ;;  %s28195_s2 = inlined_call_operand.vmem [shape: f32[1,1024], index: 2, kind: input, shape index: {}]   ;;  %s28196_s5 = inlined_call_operand.vmem [shape: bf16[512,256], index: 5, kind: input, shape index: {}]   ;;  %s28197_s7 = inlined_call_operand.vmem [shape: bf16[256,256], index: 7, kind: input, shape index: {}]   ;;  %s28198_s4 = inlined_call_operand.vmem [shape: f32[1,512], index: 4, kind: input, shape index: {}]   ;;  %s28199_s9 = inlined_call_operand.vmem [shape: bf16[256,128], index: 9, kind: input, shape index: {}]   ;;  %s28200_s6 = inlined_call_operand.vmem [shape: f32[1,256], index: 6, kind: input, shape index: {}]   ;;  %s28201_s8 = inlined_call_operand.vmem [shape: f32[1,256], index: 8, kind: input, shape index: {}]   ;;  %s28202_s10 = inlined_call_operand.vmem [shape: f32[1,128], index: 10, kind: input, shape index: {}]   ;;  %s28203_s11 = inlined_call_operand.vmem [shape: f32[8,128], index: 11, kind: output, shape index: {}]  }
   0x1   :  { %v18022_v0 = vld [vmem:[%s28192_s1 + $0x4] ss:$40 sps:$4 sm:$0xff]   ;;  %v18026_v2 = vld [vmem:[%s28192_s1] ss:$40 sps:$4 sm:$0xff]   ;;  %v18028_v4 = vld [vmem:[%s28192_s1 + $0x54] ss:$40 sps:$4 sm:$0xff]  }
   0x2   :  { %v18024_v1 = vld [vmem:[%s28192_s1 + $0x504] ss:$40 sps:$4 sm:$0xff]   ;;  %10687 = vmatprep.subr.bf16.mxu0 %v18022_v0  ;;  %v18027_v3 = vld [vmem:[%s28192_s1 + $0x500] ss:$40 sps:$4 sm:$0xff]   ;;  %v18030_v5 = vld [vmem:[%s28192_s1 + $0x554] ss:$40 sps:$4 sm:$0xff]  }
   0x3   :  { %10728 = vmatprep.subr.bf16.mxu1 %v18024_v1  ;;  %10688 = vmatpush1.bf16.msra.mxu0 %v18026_v2  ;;  %v18032_v6 = vld [vmem:[%s28192_s1 + $0x50] ss:$40 sps:$4 sm:$0xff]   ;;  %v18034_v8 = vld [vmem:[%s28192_s1 + $0xa4] ss:$40 sps:$4 sm:$0xff]   ;;  %v18038_v10 = vld [vmem:[%s28192_s1 + $0xa0] ss:$40 sps:$4 sm:$0xff]  }
   0x4   :  { %10729 = vmatpush1.bf16.msra.mxu1 %v18027_v3  ;;  %10689 = vmatprep.subr.bf16.mxu0 %v18028_v4  ;;  %v18033_v7 = vld [vmem:[%s28192_s1 + $0x550] ss:$40 sps:$4 sm:$0xff]   ;;  %v18036_v9 = vld [vmem:[%s28192_s1 + $0x5a4] ss:$40 sps:$4 sm:$0xff]   ;;  %v18039_v11 = vld [vmem:[%s28192_s1 + $0x5a0] ss:$40 sps:$4 sm:$0xff]  }
   0x5   :  { %10730 = vmatprep.subr.bf16.mxu1 %v18030_v5  ;;  %v18040_v12 = vld [vmem:[%s28192_s1 + $0xf4] ss:$40 sps:$4 sm:$0xff]   ;;  %v18044_v14 = vld [vmem:[%s28192_s1 + $0xf0] ss:$40 sps:$4 sm:$0xff]   ;;  %v18046_v16 = vld [vmem:[%s28192_s1 + $0x144] ss:$40 sps:$4 sm:$0xff]  }
   0x6   :  { %v18042_v13 = vld [vmem:[%s28192_s1 + $0x5f4] ss:$40 sps:$4 sm:$0xff]   ;;  %v18045_v15 = vld [vmem:[%s28192_s1 + $0x5f0] ss:$40 sps:$4 sm:$0xff]   ;;  %v18048_v17 = vld [vmem:[%s28192_s1 + $0x644] ss:$40 sps:$4 sm:$0xff]  }
   0x7   :  { %10690 = vmatpush1.bf16.msra.mxu0 %v18032_v6  ;;  %v18050_v18 = vld [vmem:[%s28192_s1 + $0x140] ss:$40 sps:$4 sm:$0xff]   ;;  %v18052_v20 = vld [vmem:[%s28192_s1 + $0x194] ss:$40 sps:$4 sm:$0xff]   ;;  %v18056_v22 = vld [vmem:[%s28192_s1 + $0x190] ss:$40 sps:$4 sm:$0xff]  }
   0x8   :  { %10731 = vmatpush1.bf16.msra.mxu1 %v18033_v7  ;;  %10691 = vmatprep.subr.bf16.mxu0 %v18034_v8  ;;  %v18051_v19 = vld [vmem:[%s28192_s1 + $0x640] ss:$40 sps:$4 sm:$0xff]   ;;  %v18054_v21 = vld [vmem:[%s28192_s1 + $0x694] ss:$40 sps:$4 sm:$0xff]   ;;  %v18057_v23 = vld [vmem:[%s28192_s1 + $0x690] ss:$40 sps:$4 sm:$0xff]  }
   0x9   :  { %10732 = vmatprep.subr.bf16.mxu1 %v18036_v9  ;;  %v18058_v24 = vld [vmem:[%s28192_s1 + $0x1e4] ss:$40 sps:$4 sm:$0xff]   ;;  %v18062_v26 = vld [vmem:[%s28192_s1 + $0x1e0] ss:$40 sps:$4 sm:$0xff]   ;;  %v18064_v28 = vld [vmem:[%s28192_s1 + $0x234] ss:$40 sps:$4 sm:$0xff]  }
   0xa   :  { %v18060_v25 = vld [vmem:[%s28192_s1 + $0x6e4] ss:$40 sps:$4 sm:$0xff]   ;;  %v18063_v27 = vld [vmem:[%s28192_s1 + $0x6e0] ss:$40 sps:$4 sm:$0xff]   ;;  %v18066_v29 = vld [vmem:[%s28192_s1 + $0x734] ss:$40 sps:$4 sm:$0xff]  }
   0xb   :  { %10692 = vmatpush1.bf16.msra.mxu0 %v18038_v10  ;;  %v18068_v30 = vld [vmem:[%s28192_s1 + $0x230] ss:$40 sps:$4 sm:$0xff]   ;;  %v18070_v32 = vld [vmem:[%s28192_s1 + $0x284] ss:$40 sps:$4 sm:$0xff]   ;;  %v18074_v34 = vld [vmem:[%s28192_s1 + $0x280] ss:$40 sps:$4 sm:$0xff]  }
   0xc   :  { %10733 = vmatpush1.bf16.msra.mxu1 %v18039_v11  ;;  %10693 = vmatprep.subr.bf16.mxu0 %v18040_v12  ;;  %v18069_v31 = vld [vmem:[%s28192_s1 + $0x730] ss:$40 sps:$4 sm:$0xff]   ;;  %v18072_v33 = vld [vmem:[%s28192_s1 + $0x784] ss:$40 sps:$4 sm:$0xff]   ;;  %v18075_v35 = vld [vmem:[%s28192_s1 + $0x780] ss:$40 sps:$4 sm:$0xff]  }
   0xd   :  { %10734 = vmatprep.subr.bf16.mxu1 %v18042_v13  ;;  %v18076_v36 = vld [vmem:[%s28192_s1 + $0x2d4] ss:$40 sps:$4 sm:$0xff]   ;;  %v18080_v38 = vld [vmem:[%s28192_s1 + $0x2d0] ss:$40 sps:$4 sm:$0xff]   ;;  %v18082_v40 = vld [vmem:[%s28192_s1 + $0x324] ss:$40 sps:$4 sm:$0xff]  }
   0xe   :  { %v18078_v37 = vld [vmem:[%s28192_s1 + $0x7d4] ss:$40 sps:$4 sm:$0xff]   ;;  %v18081_v39 = vld [vmem:[%s28192_s1 + $0x7d0] ss:$40 sps:$4 sm:$0xff]   ;;  %v18084_v41 = vld [vmem:[%s28192_s1 + $0x824] ss:$40 sps:$4 sm:$0xff]  }
   0xf   :  { %10694 = vmatpush1.bf16.msra.mxu0 %v18044_v14  ;;  %v18086_v42 = vld [vmem:[%s28192_s1 + $0x320] ss:$40 sps:$4 sm:$0xff]   ;;  %v18088_v44 = vld [vmem:[%s28192_s1 + $0x374] ss:$40 sps:$4 sm:$0xff]   ;;  %v18092_v49 = vld [vmem:[%s28192_s1 + $0x370] ss:$40 sps:$4 sm:$0xff]  }
  0x10   :  { %10735 = vmatpush1.bf16.msra.mxu1 %v18045_v15  ;;  %10695 = vmatprep.subr.bf16.mxu0 %v18046_v16  ;;  %v18087_v43 = vld [vmem:[%s28192_s1 + $0x820] ss:$40 sps:$4 sm:$0xff]   ;;  %v18090_v45 = vld [vmem:[%s28192_s1 + $0x874] ss:$40 sps:$4 sm:$0xff]   ;;  %v18093_v50 = vld [vmem:[%s28192_s1 + $0x870] ss:$40 sps:$4 sm:$0xff]  }
  0x11   :  { %10736 = vmatprep.subr.bf16.mxu1 %v18048_v17  ;;  %v39_v46 = vld [vmem:[%s28193_s0] sm:$0xff]  ;;  %v40_v48 = vld [vmem:[%s28193_s0 + $0x8] sm:$0xff]  ;;  %v18100_v56 = vld [vmem:[%s28192_s1 + $0x414] ss:$40 sps:$4 sm:$0xff]  }
  0x12   :  { %v21430_v47 = vcombine.high %v39_v46, %v39_v46  ;;  %v21441_v51 = vcombine.high %v40_v48, %v40_v48  ;;  %v18094_v52 = vld [vmem:[%s28192_s1 + $0x3c4] ss:$40 sps:$4 sm:$0xff]   ;;  %v18098_v54 = vld [vmem:[%s28192_s1 + $0x3c0] ss:$40 sps:$4 sm:$0xff]   ;;  %v18102_v57 = vld [vmem:[%s28192_s1 + $0x914] ss:$40 sps:$4 sm:$0xff]   ;;  %v21499_v6 = vcombine.low %v39_v46, %v39_v46  ;;  %v21501_v7 = vcombine.low %v40_v48, %v40_v48 }
  0x13   :  { %10696 = vmatpush1.bf16.msra.mxu0 %v18050_v18  ;;  %v18096_v53 = vld [vmem:[%s28192_s1 + $0x8c4] ss:$40 sps:$4 sm:$0xff]   ;;  %v18099_v55 = vld [vmem:[%s28192_s1 + $0x8c0] ss:$40 sps:$4 sm:$0xff]   ;;  %v18104_v58 = vld [vmem:[%s28192_s1 + $0x410] ss:$40 sps:$4 sm:$0xff]  }
  0x14   :  { %10737 = vmatpush1.bf16.msra.mxu1 %v18051_v19  ;;  %10697 = vmatprep.subr.bf16.mxu0 %v18052_v20  ;;  %v18105_v59 = vld [vmem:[%s28192_s1 + $0x910] ss:$40 sps:$4 sm:$0xff]   ;;  %v18106_v60 = vld [vmem:[%s28192_s1 + $0x464] ss:$40 sps:$4 sm:$0xff]   ;;  %v18110_v62 = vld [vmem:[%s28192_s1 + $0x460] ss:$40 sps:$4 sm:$0xff]  }
  0x15   :  { %10738 = vmatprep.subr.bf16.mxu1 %v18054_v21  ;;  %10719 = vmatprep.mubr.bf16.mxu0 %v21430_v47  ;;  %v18108_v61 = vld [vmem:[%s28192_s1 + $0x964] ss:$40 sps:$4 sm:$0xff]   ;;  %v18111_v63 = vld [vmem:[%s28192_s1 + $0x960] ss:$40 sps:$4 sm:$0xff]   ;;  %v18112_v0 = vld [vmem:[%s28192_s1 + $0x4b4] ss:$40 sps:$4 sm:$0xff]  }
  0x16   :  { %10760 = vmatprep.mubr.bf16.mxu1 %v21441_v51  ;;  %v18114_v1 = vld [vmem:[%s28192_s1 + $0x9b4] ss:$40 sps:$4 sm:$0xff]   ;;  %v18116_v2 = vld [vmem:[%s28192_s1 + $0x4b0] ss:$40 sps:$4 sm:$0xff]   ;;  %v18124_v4 = vld [vmem:[%s28192_s1 + $0xa04] ss:$40 sps:$4 sm:$0xff]  }
  0x17   :  { %10698 = vmatpush1.bf16.msra.mxu0 %v18056_v22  ;;  %v18117_v3 = vld [vmem:[%s28192_s1 + $0x9b0] ss:$40 sps:$4 sm:$0xff]   ;;  %v18127_v5 = vld [vmem:[%s28192_s1 + $0xf04] ss:$40 sps:$4 sm:$0xff]   ;;  %v18122_v8 = vld [vmem:[%s28192_s1 + $0xa00] ss:$40 sps:$4 sm:$0xff]  }
  0x18   :  { %10739 = vmatpush1.bf16.msra.mxu1 %v18057_v23  ;;  %10699 = vmatprep.subr.bf16.mxu0 %v18058_v24  ;;  %v18125_v9 = vld [vmem:[%s28192_s1 + $0xf00] ss:$40 sps:$4 sm:$0xff]   ;;  %v18130_v10 = vld [vmem:[%s28192_s1 + $0xa54] ss:$40 sps:$4 sm:$0xff]   ;;  %v18128_v12 = vld [vmem:[%s28192_s1 + $0xa50] ss:$40 sps:$4 sm:$0xff]  }
  0x19   :  { %10740 = vmatprep.subr.bf16.mxu1 %v18060_v25  ;;  %v18133_v11 = vld [vmem:[%s28192_s1 + $0xf54] ss:$40 sps:$4 sm:$0xff]   ;;  %v18131_v13 = vld [vmem:[%s28192_s1 + $0xf50] ss:$40 sps:$4 sm:$0xff]   ;;  %v18136_v14 = vld [vmem:[%s28192_s1 + $0xaa4] ss:$40 sps:$4 sm:$0xff]  }
  0x1a   :  { %v18139_v15 = vld [vmem:[%s28192_s1 + $0xfa4] ss:$40 sps:$4 sm:$0xff]   ;;  %v18134_v16 = vld [vmem:[%s28192_s1 + $0xaa0] ss:$40 sps:$4 sm:$0xff]   ;;  %v18142_v18 = vld [vmem:[%s28192_s1 + $0xaf4] ss:$40 sps:$4 sm:$0xff]  }
  0x1b   :  { %10700 = vmatpush1.bf16.msra.mxu0 %v18062_v26  ;;  %v18137_v17 = vld [vmem:[%s28192_s1 + $0xfa0] ss:$40 sps:$4 sm:$0xff]   ;;  %v18145_v19 = vld [vmem:[%s28192_s1 + $0xff4] ss:$40 sps:$4 sm:$0xff]   ;;  %v18140_v20 = vld [vmem:[%s28192_s1 + $0xaf0] ss:$40 sps:$4 sm:$0xff]  }
  0x1c   :  { %10741 = vmatpush1.bf16.msra.mxu1 %v18063_v27  ;;  %10701 = vmatprep.subr.bf16.mxu0 %v18064_v28  ;;  %v18143_v21 = vld [vmem:[%s28192_s1 + $0xff0] ss:$40 sps:$4 sm:$0xff]   ;;  %v18148_v22 = vld [vmem:[%s28192_s1 + $0xb44] ss:$40 sps:$4 sm:$0xff]   ;;  %v18146_v24 = vld [vmem:[%s28192_s1 + $0xb40] ss:$40 sps:$4 sm:$0xff]  }
  0x1d   :  { %10742 = vmatprep.subr.bf16.mxu1 %v18066_v29  ;;  %v18151_v23 = vld [vmem:[%s28192_s1 + $0x1044] ss:$40 sps:$4 sm:$0xff]   ;;  %v18149_v25 = vld [vmem:[%s28192_s1 + $0x1040] ss:$40 sps:$4 sm:$0xff]   ;;  %v18154_v26 = vld [vmem:[%s28192_s1 + $0xb94] ss:$40 sps:$4 sm:$0xff]  }
  0x1e   :  { %v18157_v27 = vld [vmem:[%s28192_s1 + $0x1094] ss:$40 sps:$4 sm:$0xff]   ;;  %v18152_v28 = vld [vmem:[%s28192_s1 + $0xb90] ss:$40 sps:$4 sm:$0xff]  }
  0x1f   :  { %10702 = vmatpush1.bf16.msra.mxu0 %v18068_v30  ;;  %v18155_v29 = vld [vmem:[%s28192_s1 + $0x1090] ss:$40 sps:$4 sm:$0xff]   ;;  %v18160_v30 = vld [vmem:[%s28192_s1 + $0xbe4] ss:$40 sps:$4 sm:$0xff]   ;;  %v18178_v46 = vld [vmem:[%s28192_s1 + $0xcd4] ss:$40 sps:$4 sm:$0xff]  }
  0x20   :  { %10743 = vmatpush1.bf16.msra.mxu1 %v18069_v31  ;;  %10703 = vmatprep.subr.bf16.mxu0 %v18070_v32  ;;  %v18163_v31 = vld [vmem:[%s28192_s1 + $0x10e4] ss:$40 sps:$4 sm:$0xff]   ;;  %v21580_v32 = vld [vmem:[%s28193_s0 + $0x10] sm:$0xff] }
  0x21   :  { %10744 = vmatprep.subr.bf16.mxu1 %v18072_v33  ;;  %v21585_v33 = vld [vmem:[%s28193_s0 + $0x18] sm:$0xff] }
  0x22   :  { %v18181_v48 = vld [vmem:[%s28192_s1 + $0x11d4] ss:$40 sps:$4 sm:$0xff]  }
  0x23   :  { %10704 = vmatpush1.bf16.msra.mxu0 %v18074_v34  ;;  %v18158_v34 = vld [vmem:[%s28192_s1 + $0xbe0] ss:$40 sps:$4 sm:$0xff]  }
  0x24   :  { %10745 = vmatpush1.bf16.msra.mxu1 %v18075_v35  ;;  %10705 = vmatprep.subr.bf16.mxu0 %v18076_v36  ;;  %v18161_v35 = vld [vmem:[%s28192_s1 + $0x10e0] ss:$40 sps:$4 sm:$0xff]   ;;  %v21595_v36 = vcombine.high %v21580_v32, %v21580_v32 }
  0x25   :  { %10746 = vmatprep.subr.bf16.mxu1 %v18078_v37  ;;  %v21599_v37 = vcombine.high %v21585_v33, %v21585_v33 }
  0x27   :  { %10706 = vmatpush1.bf16.msra.mxu0 %v18080_v38  ;;  %v18166_v38 = vld [vmem:[%s28192_s1 + $0xc34] ss:$40 sps:$4 sm:$0xff]  }
  0x28   :  { %10747 = vmatpush1.bf16.msra.mxu1 %v18081_v39  ;;  %10707 = vmatprep.subr.bf16.mxu0 %v18082_v40  ;;  %v18169_v39 = vld [vmem:[%s28192_s1 + $0x1134] ss:$40 sps:$4 sm:$0xff]   ;;  %v18164_v40 = vld [vmem:[%s28192_s1 + $0xc30] ss:$40 sps:$4 sm:$0xff]  }
  0x29   :  { %10748 = vmatprep.subr.bf16.mxu1 %v18084_v41  ;;  %v18167_v41 = vld [vmem:[%s28192_s1 + $0x1130] ss:$40 sps:$4 sm:$0xff]  }
  0x2b   :  { %10708 = vmatpush1.bf16.msra.mxu0 %v18086_v42  ;;  %v18172_v42 = vld [vmem:[%s28192_s1 + $0xc84] ss:$40 sps:$4 sm:$0xff]  }
  0x2c   :  { %10749 = vmatpush1.bf16.msra.mxu1 %v18087_v43  ;;  %10709 = vmatprep.subr.bf16.mxu0 %v18088_v44  ;;  %v18175_v43 = vld [vmem:[%s28192_s1 + $0x1184] ss:$40 sps:$4 sm:$0xff]   ;;  %v18170_v44 = vld [vmem:[%s28192_s1 + $0xc80] ss:$40 sps:$4 sm:$0xff]  }
  0x2d   :  { %10750 = vmatprep.subr.bf16.mxu1 %v18090_v45  ;;  %v18173_v45 = vld [vmem:[%s28192_s1 + $0x1180] ss:$40 sps:$4 sm:$0xff]  }
  0x2f   :  { %10710 = vmatpush1.bf16.msra.mxu0 %v18092_v49  ;;  %v18176_v49 = vld [vmem:[%s28192_s1 + $0xcd0] ss:$40 sps:$4 sm:$0xff]  }
  0x30   :  { %10751 = vmatpush1.bf16.msra.mxu1 %v18093_v50  ;;  %10711 = vmatprep.subr.bf16.mxu0 %v18094_v52  ;;  %v18179_v50 = vld [vmem:[%s28192_s1 + $0x11d0] ss:$40 sps:$4 sm:$0xff]   ;;  %v18184_v52 = vld [vmem:[%s28192_s1 + $0xd24] ss:$40 sps:$4 sm:$0xff]  }
  0x31   :  { %10752 = vmatprep.subr.bf16.mxu1 %v18096_v53  ;;  %v18187_v53 = vld [vmem:[%s28192_s1 + $0x1224] ss:$40 sps:$4 sm:$0xff]  }
  0x33   :  { %10712 = vmatpush1.bf16.msra.mxu0 %v18098_v54  ;;  %v18182_v54 = vld [vmem:[%s28192_s1 + $0xd20] ss:$40 sps:$4 sm:$0xff]  }
  0x34   :  { %10753 = vmatpush1.bf16.msra.mxu1 %v18099_v55  ;;  %10713 = vmatprep.subr.bf16.mxu0 %v18100_v56  ;;  %v18185_v55 = vld [vmem:[%s28192_s1 + $0x1220] ss:$40 sps:$4 sm:$0xff]   ;;  %v18190_v56 = vld [vmem:[%s28192_s1 + $0xd74] ss:$40 sps:$4 sm:$0xff]  }
  0x35   :  { %10754 = vmatprep.subr.bf16.mxu1 %v18102_v57  ;;  %v18193_v57 = vld [vmem:[%s28192_s1 + $0x1274] ss:$40 sps:$4 sm:$0xff]  }
  0x37   :  { %10714 = vmatpush1.bf16.msra.mxu0 %v18104_v58  ;;  %v18188_v58 = vld [vmem:[%s28192_s1 + $0xd70] ss:$40 sps:$4 sm:$0xff]  }
  0x38   :  { %10755 = vmatpush1.bf16.msra.mxu1 %v18105_v59  ;;  %10715 = vmatprep.subr.bf16.mxu0 %v18106_v60  ;;  %v18191_v59 = vld [vmem:[%s28192_s1 + $0x1270] ss:$40 sps:$4 sm:$0xff]   ;;  %v18196_v60 = vld [vmem:[%s28192_s1 + $0xdc4] ss:$40 sps:$4 sm:$0xff]  }
  0x39   :  { %10756 = vmatprep.subr.bf16.mxu1 %v18108_v61  ;;  %v18199_v61 = vld [vmem:[%s28192_s1 + $0x12c4] ss:$40 sps:$4 sm:$0xff]  }
  0x3b   :  { %10716 = vmatpush1.bf16.msra.mxu0 %v18110_v62  ;;  %v18194_v62 = vld [vmem:[%s28192_s1 + $0xdc0] ss:$40 sps:$4 sm:$0xff]  }
  0x3c   :  { %10757 = vmatpush1.bf16.msra.mxu1 %v18111_v63  ;;  %10717 = vmatprep.subr.bf16.mxu0 %v18112_v0  ;;  %v18197_v63 = vld [vmem:[%s28192_s1 + $0x12c0] ss:$40 sps:$4 sm:$0xff]   ;;  %v18202_v0 = vld [vmem:[%s28192_s1 + $0xe14] ss:$40 sps:$4 sm:$0xff]  }
  0x3d   :  { %10758 = vmatprep.subr.bf16.mxu1 %v18114_v1  ;;  %v18205_v1 = vld [vmem:[%s28192_s1 + $0x1314] ss:$40 sps:$4 sm:$0xff]  }
  0x3f   :  { %10718 = vmatpush1.bf16.msra.mxu0 %v18116_v2  ;;  %v18200_v2 = vld [vmem:[%s28192_s1 + $0xe10] ss:$40 sps:$4 sm:$0xff]  }
  0x40   :  { %10759 = vmatpush1.bf16.msra.mxu1 %v18117_v3  ;;  %10769 = vmatprep.subr.bf16.mxu0 %v18124_v4  ;;  %v18203_v3 = vld [vmem:[%s28192_s1 + $0x1310] ss:$40 sps:$4 sm:$0xff]   ;;  %v18208_v4 = vld [vmem:[%s28192_s1 + $0xe64] ss:$40 sps:$4 sm:$0xff]  }
  0x41   :  { %10810 = vmatprep.subr.bf16.mxu1 %v18127_v5  ;;  %v18211_v5 = vld [vmem:[%s28192_s1 + $0x1364] ss:$40 sps:$4 sm:$0xff]  }
  0x42   :  { %10720 = vmatmul.mubr.bf16.vlgmr.msra.gmra.mrb[0].mxu0 %v21499_v6 }
  0x43   :  { %10761 = vmatmul.mubr.bf16.vlgmr.msra.gmra.mrb[0].mxu1 %v21501_v7  ;;  %10770 = vmatpush1.bf16.msra.mxu0 %v18122_v8  ;;  %v18206_v8 = vld [vmem:[%s28192_s1 + $0xe60] ss:$40 sps:$4 sm:$0xff]  }
  0x44   :  { %10811 = vmatpush1.bf16.msra.mxu1 %v18125_v9  ;;  %10771 = vmatprep.subr.bf16.mxu0 %v18130_v10  ;;  %v18209_v9 = vld [vmem:[%s28192_s1 + $0x1360] ss:$40 sps:$4 sm:$0xff]   ;;  %v18214_v10 = vld [vmem:[%s28192_s1 + $0xeb4] ss:$40 sps:$4 sm:$0xff]  }
  0x45   :  { %10812 = vmatprep.subr.bf16.mxu1 %v18133_v11  ;;  %10801 = vmatprep.mubr.bf16.mxu0 %v21595_v36  ;;  %v18217_v11 = vld [vmem:[%s28192_s1 + $0x13b4] ss:$40 sps:$4 sm:$0xff]  }
  0x46   :  { %10842 = vmatprep.mubr.bf16.mxu1 %v21599_v37 }
  0x47   :  { %10772 = vmatpush1.bf16.msra.mxu0 %v18128_v12  ;;  %v18212_v12 = vld [vmem:[%s28192_s1 + $0xeb0] ss:$40 sps:$4 sm:$0xff]  }
  0x48   :  { %10813 = vmatpush1.bf16.msra.mxu1 %v18131_v13  ;;  %10773 = vmatprep.subr.bf16.mxu0 %v18136_v14  ;;  %v18215_v13 = vld [vmem:[%s28192_s1 + $0x13b0] ss:$40 sps:$4 sm:$0xff]   ;;  %v18224_v14 = vld [vmem:[%s28192_s1 + $0x1404] ss:$40 sps:$4 sm:$0xff]  }
  0x49   :  { %10814 = vmatprep.subr.bf16.mxu1 %v18139_v15  ;;  %v18227_v15 = vld [vmem:[%s28192_s1 + $0x1904] ss:$40 sps:$4 sm:$0xff]  }
  0x4b   :  { %10774 = vmatpush1.bf16.msra.mxu0 %v18134_v16  ;;  %v21719_v16 = vcombine.low %v21580_v32, %v21580_v32  ;;  %v18242_v32 = vld [vmem:[%s28192_s1 + $0x14f4] ss:$40 sps:$4 sm:$0xff]  }
  0x4c   :  { %10815 = vmatpush1.bf16.msra.mxu1 %v18137_v17  ;;  %10775 = vmatprep.subr.bf16.mxu0 %v18142_v18  ;;  %v21723_v17 = vcombine.low %v21585_v33, %v21585_v33  ;;  %v18222_v18 = vld [vmem:[%s28192_s1 + $0x1400] ss:$40 sps:$4 sm:$0xff]   ;;  %v18245_v33 = vld [vmem:[%s28192_s1 + $0x19f4] ss:$40 sps:$4 sm:$0xff]  }
  0x4d   :  { %10816 = vmatprep.subr.bf16.mxu1 %v18145_v19  ;;  %v18225_v19 = vld [vmem:[%s28192_s1 + $0x1900] ss:$40 sps:$4 sm:$0xff]  }
  0x4f   :  { %10776 = vmatpush1.bf16.msra.mxu0 %v18140_v20  ;;  %v18230_v20 = vld [vmem:[%s28192_s1 + $0x1454] ss:$40 sps:$4 sm:$0xff]  }
  0x50   :  { %10817 = vmatpush1.bf16.msra.mxu1 %v18143_v21  ;;  %10777 = vmatprep.subr.bf16.mxu0 %v18148_v22  ;;  %v18233_v21 = vld [vmem:[%s28192_s1 + $0x1954] ss:$40 sps:$4 sm:$0xff]   ;;  %v21740_v22 = vld [vmem:[%s28193_s0 + $0x20] sm:$0xff] }
  0x51   :  { %10818 = vmatprep.subr.bf16.mxu1 %v18151_v23  ;;  %v21745_v23 = vld [vmem:[%s28193_s0 + $0x28] sm:$0xff] }
  0x53   :  { %10778 = vmatpush1.bf16.msra.mxu0 %v18146_v24  ;;  %v21749_v24 = vcombine.high %v21740_v22, %v21740_v22 }
  0x54   :  { %10819 = vmatpush1.bf16.msra.mxu1 %v18149_v25  ;;  %10779 = vmatprep.subr.bf16.mxu0 %v18154_v26  ;;  %v21753_v25 = vcombine.high %v21745_v23, %v21745_v23  ;;  %v18228_v26 = vld [vmem:[%s28192_s1 + $0x1450] ss:$40 sps:$4 sm:$0xff]  }
  0x55   :  { %10820 = vmatprep.subr.bf16.mxu1 %v18157_v27  ;;  %v18231_v27 = vld [vmem:[%s28192_s1 + $0x1950] ss:$40 sps:$4 sm:$0xff]  }
  0x57   :  { %10780 = vmatpush1.bf16.msra.mxu0 %v18152_v28  ;;  %v18236_v28 = vld [vmem:[%s28192_s1 + $0x14a4] ss:$40 sps:$4 sm:$0xff]  }
  0x58   :  { %10821 = vmatpush1.bf16.msra.mxu1 %v18155_v29  ;;  %10781 = vmatprep.subr.bf16.mxu0 %v18160_v30  ;;  %v18239_v29 = vld [vmem:[%s28192_s1 + $0x19a4] ss:$40 sps:$4 sm:$0xff]   ;;  %v18234_v30 = vld [vmem:[%s28192_s1 + $0x14a0] ss:$40 sps:$4 sm:$0xff]  }
  0x59   :  { %10822 = vmatprep.subr.bf16.mxu1 %v18163_v31  ;;  %v18237_v31 = vld [vmem:[%s28192_s1 + $0x19a0] ss:$40 sps:$4 sm:$0xff]  }
  0x5b   :  { %10782 = vmatpush1.bf16.msra.mxu0 %v18158_v34  ;;  %v18240_v34 = vld [vmem:[%s28192_s1 + $0x14f0] ss:$40 sps:$4 sm:$0xff]  }
  0x5c   :  { %10823 = vmatpush1.bf16.msra.mxu1 %v18161_v35  ;;  %10783 = vmatprep.subr.bf16.mxu0 %v18166_v38  ;;  %v18243_v35 = vld [vmem:[%s28192_s1 + $0x19f0] ss:$40 sps:$4 sm:$0xff]   ;;  %v18248_v38 = vld [vmem:[%s28192_s1 + $0x1544] ss:$40 sps:$4 sm:$0xff]  }
  0x5d   :  { %10824 = vmatprep.subr.bf16.mxu1 %v18169_v39  ;;  %v18251_v39 = vld [vmem:[%s28192_s1 + $0x1a44] ss:$40 sps:$4 sm:$0xff]  }
  0x5f   :  { %10784 = vmatpush1.bf16.msra.mxu0 %v18164_v40  ;;  %v18246_v40 = vld [vmem:[%s28192_s1 + $0x1540] ss:$40 sps:$4 sm:$0xff]  }
  0x60   :  { %10825 = vmatpush1.bf16.msra.mxu1 %v18167_v41  ;;  %10785 = vmatprep.subr.bf16.mxu0 %v18172_v42  ;;  %v18249_v41 = vld [vmem:[%s28192_s1 + $0x1a40] ss:$40 sps:$4 sm:$0xff]   ;;  %v18254_v42 = vld [vmem:[%s28192_s1 + $0x1594] ss:$40 sps:$4 sm:$0xff]  }
  0x61   :  { %10826 = vmatprep.subr.bf16.mxu1 %v18175_v43  ;;  %v18257_v43 = vld [vmem:[%s28192_s1 + $0x1a94] ss:$40 sps:$4 sm:$0xff]  }
  0x63   :  { %10786 = vmatpush1.bf16.msra.mxu0 %v18170_v44  ;;  %v18252_v44 = vld [vmem:[%s28192_s1 + $0x1590] ss:$40 sps:$4 sm:$0xff]  }
  0x64   :  { %10827 = vmatpush1.bf16.msra.mxu1 %v18173_v45  ;;  %10787 = vmatprep.subr.bf16.mxu0 %v18178_v46  ;;  %v18255_v45 = vld [vmem:[%s28192_s1 + $0x1a90] ss:$40 sps:$4 sm:$0xff]   ;;  %v18260_v46 = vld [vmem:[%s28192_s1 + $0x15e4] ss:$40 sps:$4 sm:$0xff]  }
  0x65   :  { %10828 = vmatprep.subr.bf16.mxu1 %v18181_v48  ;;  %v18263_v48 = vld [vmem:[%s28192_s1 + $0x1ae4] ss:$40 sps:$4 sm:$0xff]  }
  0x67   :  { %10788 = vmatpush1.bf16.msra.mxu0 %v18176_v49  ;;  %v18258_v49 = vld [vmem:[%s28192_s1 + $0x15e0] ss:$40 sps:$4 sm:$0xff]  }
  0x68   :  { %10829 = vmatpush1.bf16.msra.mxu1 %v18179_v50  ;;  %10789 = vmatprep.subr.bf16.mxu0 %v18184_v52  ;;  %v18261_v50 = vld [vmem:[%s28192_s1 + $0x1ae0] ss:$40 sps:$4 sm:$0xff]   ;;  %v18266_v52 = vld [vmem:[%s28192_s1 + $0x1634] ss:$40 sps:$4 sm:$0xff]  }
  0x69   :  { %10830 = vmatprep.subr.bf16.mxu1 %v18187_v53  ;;  %v18269_v53 = vld [vmem:[%s28192_s1 + $0x1b34] ss:$40 sps:$4 sm:$0xff]  }
  0x6b   :  { %10790 = vmatpush1.bf16.msra.mxu0 %v18182_v54  ;;  %v18264_v54 = vld [vmem:[%s28192_s1 + $0x1630] ss:$40 sps:$4 sm:$0xff]  }
  0x6c   :  { %10831 = vmatpush1.bf16.msra.mxu1 %v18185_v55  ;;  %10791 = vmatprep.subr.bf16.mxu0 %v18190_v56  ;;  %v18267_v55 = vld [vmem:[%s28192_s1 + $0x1b30] ss:$40 sps:$4 sm:$0xff]   ;;  %v18272_v56 = vld [vmem:[%s28192_s1 + $0x1684] ss:$40 sps:$4 sm:$0xff]  }
  0x6d   :  { %10832 = vmatprep.subr.bf16.mxu1 %v18193_v57  ;;  %v18275_v57 = vld [vmem:[%s28192_s1 + $0x1b84] ss:$40 sps:$4 sm:$0xff]  }
  0x6f   :  { %10792 = vmatpush1.bf16.msra.mxu0 %v18188_v58  ;;  %v18270_v58 = vld [vmem:[%s28192_s1 + $0x1680] ss:$40 sps:$4 sm:$0xff]  }
  0x70   :  { %10833 = vmatpush1.bf16.msra.mxu1 %v18191_v59  ;;  %10793 = vmatprep.subr.bf16.mxu0 %v18196_v60  ;;  %v18273_v59 = vld [vmem:[%s28192_s1 + $0x1b80] ss:$40 sps:$4 sm:$0xff]   ;;  %v18278_v60 = vld [vmem:[%s28192_s1 + $0x16d4] ss:$40 sps:$4 sm:$0xff]  }
  0x71   :  { %10834 = vmatprep.subr.bf16.mxu1 %v18199_v61  ;;  %v18281_v61 = vld [vmem:[%s28192_s1 + $0x1bd4] ss:$40 sps:$4 sm:$0xff]  }
  0x73   :  { %10794 = vmatpush1.bf16.msra.mxu0 %v18194_v62  ;;  %v18276_v62 = vld [vmem:[%s28192_s1 + $0x16d0] ss:$40 sps:$4 sm:$0xff]  }
  0x74   :  { %10835 = vmatpush1.bf16.msra.mxu1 %v18197_v63  ;;  %10795 = vmatprep.subr.bf16.mxu0 %v18202_v0  ;;  %v18279_v63 = vld [vmem:[%s28192_s1 + $0x1bd0] ss:$40 sps:$4 sm:$0xff]   ;;  %v18284_v0 = vld [vmem:[%s28192_s1 + $0x1724] ss:$40 sps:$4 sm:$0xff]  }
  0x75   :  { %10836 = vmatprep.subr.bf16.mxu1 %v18205_v1  ;;  %v18287_v1 = vld [vmem:[%s28192_s1 + $0x1c24] ss:$40 sps:$4 sm:$0xff]  }
  0x77   :  { %10796 = vmatpush1.bf16.msra.mxu0 %v18200_v2  ;;  %v18282_v2 = vld [vmem:[%s28192_s1 + $0x1720] ss:$40 sps:$4 sm:$0xff]  }
  0x78   :  { %10837 = vmatpush1.bf16.msra.mxu1 %v18203_v3  ;;  %10797 = vmatprep.subr.bf16.mxu0 %v18208_v4  ;;  %v18285_v3 = vld [vmem:[%s28192_s1 + $0x1c20] ss:$40 sps:$4 sm:$0xff]   ;;  %v18290_v4 = vld [vmem:[%s28192_s1 + $0x1774] ss:$40 sps:$4 sm:$0xff]  }
  0x79   :  { %10838 = vmatprep.subr.bf16.mxu1 %v18211_v5  ;;  %v18293_v5 = vld [vmem:[%s28192_s1 + $0x1c74] ss:$40 sps:$4 sm:$0xff]  }
  0x7b   :  { %10798 = vmatpush1.bf16.msra.mxu0 %v18206_v8  ;;  %v18288_v8 = vld [vmem:[%s28192_s1 + $0x1770] ss:$40 sps:$4 sm:$0xff]  }
  0x7c   :  { %10839 = vmatpush1.bf16.msra.mxu1 %v18209_v9  ;;  %10799 = vmatprep.subr.bf16.mxu0 %v18214_v10  ;;  %v18291_v9 = vld [vmem:[%s28192_s1 + $0x1c70] ss:$40 sps:$4 sm:$0xff]   ;;  %v18296_v10 = vld [vmem:[%s28192_s1 + $0x17c4] ss:$40 sps:$4 sm:$0xff]  }
  0x7d   :  { %10840 = vmatprep.subr.bf16.mxu1 %v18217_v11  ;;  %v18299_v11 = vld [vmem:[%s28192_s1 + $0x1cc4] ss:$40 sps:$4 sm:$0xff]  }
  0x7f   :  { %10800 = vmatpush1.bf16.msra.mxu0 %v18212_v12  ;;  %v18294_v12 = vld [vmem:[%s28192_s1 + $0x17c0] ss:$40 sps:$4 sm:$0xff]  }
  0x80   :  { %10841 = vmatpush1.bf16.msra.mxu1 %v18215_v13  ;;  %10851 = vmatprep.subr.bf16.mxu0 %v18224_v14  ;;  %v18297_v13 = vld [vmem:[%s28192_s1 + $0x1cc0] ss:$40 sps:$4 sm:$0xff]   ;;  %v18302_v14 = vld [vmem:[%s28192_s1 + $0x1814] ss:$40 sps:$4 sm:$0xff]  }
  0x81   :  { %10892 = vmatprep.subr.bf16.mxu1 %v18227_v15  ;;  %v18305_v15 = vld [vmem:[%s28192_s1 + $0x1d14] ss:$40 sps:$4 sm:$0xff]  }
  0x82   :  { %10802 = vmatmul.mubr.bf16.vlgmr.msra.gmra.mrb[4].mxu0 %v21719_v16 }
  0x83   :  { %10843 = vmatmul.mubr.bf16.vlgmr.msra.gmra.mrb[4].mxu1 %v21723_v17  ;;  %10852 = vmatpush1.bf16.msra.mxu0 %v18222_v18  ;;  %v18300_v18 = vld [vmem:[%s28192_s1 + $0x1810] ss:$40 sps:$4 sm:$0xff]  }
  0x84   :  { %10893 = vmatpush1.bf16.msra.mxu1 %v18225_v19  ;;  %10853 = vmatprep.subr.bf16.mxu0 %v18230_v20  ;;  %v18303_v19 = vld [vmem:[%s28192_s1 + $0x1d10] ss:$40 sps:$4 sm:$0xff]   ;;  %v18308_v20 = vld [vmem:[%s28192_s1 + $0x1864] ss:$40 sps:$4 sm:$0xff]  }
  0x85   :  { %10894 = vmatprep.subr.bf16.mxu1 %v18233_v21  ;;  %10883 = vmatprep.mubr.bf16.mxu0 %v21749_v24  ;;  %v18311_v21 = vld [vmem:[%s28192_s1 + $0x1d64] ss:$40 sps:$4 sm:$0xff]  }
  0x86   :  { %10924 = vmatprep.mubr.bf16.mxu1 %v21753_v25 }
  0x87   :  { %10854 = vmatpush1.bf16.msra.mxu0 %v18228_v26  ;;  %v18306_v26 = vld [vmem:[%s28192_s1 + $0x1860] ss:$40 sps:$4 sm:$0xff]  }
  0x88   :  { %10895 = vmatpush1.bf16.msra.mxu1 %v18231_v27  ;;  %10855 = vmatprep.subr.bf16.mxu0 %v18236_v28  ;;  %v18309_v27 = vld [vmem:[%s28192_s1 + $0x1d60] ss:$40 sps:$4 sm:$0xff]   ;;  %v18314_v28 = vld [vmem:[%s28192_s1 + $0x18b4] ss:$40 sps:$4 sm:$0xff]  }
  0x89   :  { %10896 = vmatprep.subr.bf16.mxu1 %v18239_v29  ;;  %v18317_v29 = vld [vmem:[%s28192_s1 + $0x1db4] ss:$40 sps:$4 sm:$0xff]  }
  0x8b   :  { %10856 = vmatpush1.bf16.msra.mxu0 %v18234_v30  ;;  %v18312_v30 = vld [vmem:[%s28192_s1 + $0x18b0] ss:$40 sps:$4 sm:$0xff]  }
  0x8c   :  { %10897 = vmatpush1.bf16.msra.mxu1 %v18237_v31  ;;  %10857 = vmatprep.subr.bf16.mxu0 %v18242_v32  ;;  %v18315_v31 = vld [vmem:[%s28192_s1 + $0x1db0] ss:$40 sps:$4 sm:$0xff]   ;;  %v18324_v32 = vld [vmem:[%s28192_s1 + $0x1e04] ss:$40 sps:$4 sm:$0xff]  }
  0x8d   :  { %10898 = vmatprep.subr.bf16.mxu1 %v18245_v33  ;;  %v18327_v33 = vld [vmem:[%s28192_s1 + $0x2304] ss:$40 sps:$4 sm:$0xff]  }
  0x8f   :  { %10858 = vmatpush1.bf16.msra.mxu0 %v18240_v34  ;;  %v18322_v34 = vld [vmem:[%s28192_s1 + $0x1e00] ss:$40 sps:$4 sm:$0xff]  }
  0x90   :  { %10899 = vmatpush1.bf16.msra.mxu1 %v18243_v35  ;;  %10859 = vmatprep.subr.bf16.mxu0 %v18248_v38  ;;  %v18325_v35 = vld [vmem:[%s28192_s1 + $0x2300] ss:$40 sps:$4 sm:$0xff]   ;;  %v21947_v38 = vcombine.low %v21740_v22, %v21740_v22  ;;  %v18330_v22 = vld [vmem:[%s28192_s1 + $0x1e54] ss:$40 sps:$4 sm:$0xff]  }
  0x91   :  { %10900 = vmatprep.subr.bf16.mxu1 %v18251_v39  ;;  %v21951_v39 = vcombine.low %v21745_v23, %v21745_v23  ;;  %v18333_v23 = vld [vmem:[%s28192_s1 + $0x2354] ss:$40 sps:$4 sm:$0xff]  }
  0x93   :  { %10860 = vmatpush1.bf16.msra.mxu0 %v18246_v40  ;;  %v21956_v40 = vld [vmem:[%s28193_s0 + $0x30] sm:$0xff] }
  0x94   :  { %10901 = vmatpush1.bf16.msra.mxu1 %v18249_v41  ;;  %10861 = vmatprep.subr.bf16.mxu0 %v18254_v42  ;;  %v21961_v41 = vld [vmem:[%s28193_s0 + $0x38] sm:$0xff]  ;;  %v21971_v42 = vcombine.high %v21956_v40, %v21956_v40 }
  0x95   :  { %10902 = vmatprep.subr.bf16.mxu1 %v18257_v43  ;;  %v21975_v43 = vcombine.high %v21961_v41, %v21961_v41 }
  0x97   :  { %10862 = vmatpush1.bf16.msra.mxu0 %v18252_v44  ;;  %v18328_v44 = vld [vmem:[%s28192_s1 + $0x1e50] ss:$40 sps:$4 sm:$0xff]  }
  0x98   :  { %10903 = vmatpush1.bf16.msra.mxu1 %v18255_v45  ;;  %10863 = vmatprep.subr.bf16.mxu0 %v18260_v46  ;;  %v18331_v45 = vld [vmem:[%s28192_s1 + $0x2350] ss:$40 sps:$4 sm:$0xff]   ;;  %v18336_v46 = vld [vmem:[%s28192_s1 + $0x1ea4] ss:$40 sps:$4 sm:$0xff]  }
  0x99   :  { %10904 = vmatprep.subr.bf16.mxu1 %v18263_v48  ;;  %v18339_v48 = vld [vmem:[%s28192_s1 + $0x23a4] ss:$40 sps:$4 sm:$0xff]  }
  0x9b   :  { %10864 = vmatpush1.bf16.msra.mxu0 %v18258_v49  ;;  %v18334_v49 = vld [vmem:[%s28192_s1 + $0x1ea0] ss:$40 sps:$4 sm:$0xff]  }
  0x9c   :  { %10905 = vmatpush1.bf16.msra.mxu1 %v18261_v50  ;;  %10865 = vmatprep.subr.bf16.mxu0 %v18266_v52  ;;  %v18337_v50 = vld [vmem:[%s28192_s1 + $0x23a0] ss:$40 sps:$4 sm:$0xff]   ;;  %v18342_v52 = vld [vmem:[%s28192_s1 + $0x1ef4] ss:$40 sps:$4 sm:$0xff]  }
  0x9d   :  { %10906 = vmatprep.subr.bf16.mxu1 %v18269_v53  ;;  %v18345_v53 = vld [vmem:[%s28192_s1 + $0x23f4] ss:$40 sps:$4 sm:$0xff]  }
  0x9f   :  { %10866 = vmatpush1.bf16.msra.mxu0 %v18264_v54  ;;  %v18340_v54 = vld [vmem:[%s28192_s1 + $0x1ef0] ss:$40 sps:$4 sm:$0xff]  }
  0xa0   :  { %10907 = vmatpush1.bf16.msra.mxu1 %v18267_v55  ;;  %10867 = vmatprep.subr.bf16.mxu0 %v18272_v56  ;;  %v18343_v55 = vld [vmem:[%s28192_s1 + $0x23f0] ss:$40 sps:$4 sm:$0xff]   ;;  %v18348_v56 = vld [vmem:[%s28192_s1 + $0x1f44] ss:$40 sps:$4 sm:$0xff]  }
  0xa1   :  { %10908 = vmatprep.subr.bf16.mxu1 %v18275_v57  ;;  %v18351_v57 = vld [vmem:[%s28192_s1 + $0x2444] ss:$40 sps:$4 sm:$0xff]  }
  0xa3   :  { %10868 = vmatpush1.bf16.msra.mxu0 %v18270_v58  ;;  %v18346_v58 = vld [vmem:[%s28192_s1 + $0x1f40] ss:$40 sps:$4 sm:$0xff]  }
  0xa4   :  { %10909 = vmatpush1.bf16.msra.mxu1 %v18273_v59  ;;  %10869 = vmatprep.subr.bf16.mxu0 %v18278_v60  ;;  %v18349_v59 = vld [vmem:[%s28192_s1 + $0x2440] ss:$40 sps:$4 sm:$0xff]   ;;  %v18354_v60 = vld [vmem:[%s28192_s1 + $0x1f94] ss:$40 sps:$4 sm:$0xff]  }
  0xa5   :  { %10910 = vmatprep.subr.bf16.mxu1 %v18281_v61  ;;  %v18357_v61 = vld [vmem:[%s28192_s1 + $0x2494] ss:$40 sps:$4 sm:$0xff]  }
  0xa7   :  { %10870 = vmatpush1.bf16.msra.mxu0 %v18276_v62  ;;  %v18352_v62 = vld [vmem:[%s28192_s1 + $0x1f90] ss:$40 sps:$4 sm:$0xff]  }
  0xa8   :  { %10911 = vmatpush1.bf16.msra.mxu1 %v18279_v63  ;;  %10871 = vmatprep.subr.bf16.mxu0 %v18284_v0  ;;  %v18355_v63 = vld [vmem:[%s28192_s1 + $0x2490] ss:$40 sps:$4 sm:$0xff]   ;;  %v18360_v0 = vld [vmem:[%s28192_s1 + $0x1fe4] ss:$40 sps:$4 sm:$0xff]  }
  0xa9   :  { %10912 = vmatprep.subr.bf16.mxu1 %v18287_v1  ;;  %v18363_v1 = vld [vmem:[%s28192_s1 + $0x24e4] ss:$40 sps:$4 sm:$0xff]  }
  0xab   :  { %10872 = vmatpush1.bf16.msra.mxu0 %v18282_v2  ;;  %v18358_v2 = vld [vmem:[%s28192_s1 + $0x1fe0] ss:$40 sps:$4 sm:$0xff]  }
  0xac   :  { %10913 = vmatpush1.bf16.msra.mxu1 %v18285_v3  ;;  %10873 = vmatprep.subr.bf16.mxu0 %v18290_v4  ;;  %v18361_v3 = vld [vmem:[%s28192_s1 + $0x24e0] ss:$40 sps:$4 sm:$0xff]   ;;  %v18366_v4 = vld [vmem:[%s28192_s1 + $0x2034] ss:$40 sps:$4 sm:$0xff]  }
  0xad   :  { %10914 = vmatprep.subr.bf16.mxu1 %v18293_v5  ;;  %v18369_v5 = vld [vmem:[%s28192_s1 + $0x2534] ss:$40 sps:$4 sm:$0xff]  }
  0xaf   :  { %10874 = vmatpush1.bf16.msra.mxu0 %v18288_v8  ;;  %v18364_v8 = vld [vmem:[%s28192_s1 + $0x2030] ss:$40 sps:$4 sm:$0xff]  }
  0xb0   :  { %10915 = vmatpush1.bf16.msra.mxu1 %v18291_v9  ;;  %10875 = vmatprep.subr.bf16.mxu0 %v18296_v10  ;;  %v18367_v9 = vld [vmem:[%s28192_s1 + $0x2530] ss:$40 sps:$4 sm:$0xff]   ;;  %v18372_v10 = vld [vmem:[%s28192_s1 + $0x2084] ss:$40 sps:$4 sm:$0xff]  }
  0xb1   :  { %10916 = vmatprep.subr.bf16.mxu1 %v18299_v11  ;;  %v18375_v11 = vld [vmem:[%s28192_s1 + $0x2584] ss:$40 sps:$4 sm:$0xff]  }
  0xb3   :  { %10876 = vmatpush1.bf16.msra.mxu0 %v18294_v12  ;;  %v18370_v12 = vld [vmem:[%s28192_s1 + $0x2080] ss:$40 sps:$4 sm:$0xff]  }
  0xb4   :  { %10917 = vmatpush1.bf16.msra.mxu1 %v18297_v13  ;;  %10877 = vmatprep.subr.bf16.mxu0 %v18302_v14  ;;  %v18373_v13 = vld [vmem:[%s28192_s1 + $0x2580] ss:$40 sps:$4 sm:$0xff]   ;;  %v18378_v14 = vld [vmem:[%s28192_s1 + $0x20d4] ss:$40 sps:$4 sm:$0xff]  }
  0xb5   :  { %10918 = vmatprep.subr.bf16.mxu1 %v18305_v15  ;;  %v18381_v15 = vld [vmem:[%s28192_s1 + $0x25d4] ss:$40 sps:$4 sm:$0xff]  }
  0xb7   :  { %10878 = vmatpush1.bf16.msra.mxu0 %v18300_v18  ;;  %v18376_v18 = vld [vmem:[%s28192_s1 + $0x20d0] ss:$40 sps:$4 sm:$0xff]  }
  0xb8   :  { %10919 = vmatpush1.bf16.msra.mxu1 %v18303_v19  ;;  %10879 = vmatprep.subr.bf16.mxu0 %v18308_v20  ;;  %v18379_v19 = vld [vmem:[%s28192_s1 + $0x25d0] ss:$40 sps:$4 sm:$0xff]   ;;  %v18384_v20 = vld [vmem:[%s28192_s1 + $0x2124] ss:$40 sps:$4 sm:$0xff]  }
  0xb9   :  { %10920 = vmatprep.subr.bf16.mxu1 %v18311_v21  ;;  %v18387_v21 = vld [vmem:[%s28192_s1 + $0x2624] ss:$40 sps:$4 sm:$0xff]  }
  0xbb   :  { %10880 = vmatpush1.bf16.msra.mxu0 %v18306_v26  ;;  %v18382_v26 = vld [vmem:[%s28192_s1 + $0x2120] ss:$40 sps:$4 sm:$0xff]  }
  0xbc   :  { %10921 = vmatpush1.bf16.msra.mxu1 %v18309_v27  ;;  %10881 = vmatprep.subr.bf16.mxu0 %v18314_v28  ;;  %v18385_v27 = vld [vmem:[%s28192_s1 + $0x2620] ss:$40 sps:$4 sm:$0xff]   ;;  %v18390_v28 = vld [vmem:[%s28192_s1 + $0x2174] ss:$40 sps:$4 sm:$0xff]  }
  0xbd   :  { %10922 = vmatprep.subr.bf16.mxu1 %v18317_v29  ;;  %v18393_v29 = vld [vmem:[%s28192_s1 + $0x2674] ss:$40 sps:$4 sm:$0xff]  }
  0xbf   :  { %10882 = vmatpush1.bf16.msra.mxu0 %v18312_v30  ;;  %v18388_v30 = vld [vmem:[%s28192_s1 + $0x2170] ss:$40 sps:$4 sm:$0xff]  }
  0xc0   :  { %10923 = vmatpush1.bf16.msra.mxu1 %v18315_v31  ;;  %10933 = vmatprep.subr.bf16.mxu0 %v18324_v32  ;;  %v18391_v31 = vld [vmem:[%s28192_s1 + $0x2670] ss:$40 sps:$4 sm:$0xff]   ;;  %v18396_v32 = vld [vmem:[%s28192_s1 + $0x21c4] ss:$40 sps:$4 sm:$0xff]  }
  0xc1   :  { %10974 = vmatprep.subr.bf16.mxu1 %v18327_v33  ;;  %v18399_v33 = vld [vmem:[%s28192_s1 + $0x26c4] ss:$40 sps:$4 sm:$0xff]  }
  0xc2   :  { %10884 = vmatmul.mubr.bf16.vlgmr.msra.gmra.mrb[8].mxu0 %v21947_v38 }
  0xc3   :  { %10925 = vmatmul.mubr.bf16.vlgmr.msra.gmra.mrb[8].mxu1 %v21951_v39  ;;  %10934 = vmatpush1.bf16.msra.mxu0 %v18322_v34  ;;  %v18394_v34 = vld [vmem:[%s28192_s1 + $0x21c0] ss:$40 sps:$4 sm:$0xff]  }
  0xc4   :  { %10975 = vmatpush1.bf16.msra.mxu1 %v18325_v35  ;;  %10935 = vmatprep.subr.bf16.mxu0 %v18330_v22  ;;  %v18397_v35 = vld [vmem:[%s28192_s1 + $0x26c0] ss:$40 sps:$4 sm:$0xff]   ;;  %v18402_v22 = vld [vmem:[%s28192_s1 + $0x2214] ss:$40 sps:$4 sm:$0xff]  }
  0xc5   :  { %10976 = vmatprep.subr.bf16.mxu1 %v18333_v23  ;;  %10965 = vmatprep.mubr.bf16.mxu0 %v21971_v42  ;;  %v18405_v23 = vld [vmem:[%s28192_s1 + $0x2714] ss:$40 sps:$4 sm:$0xff]  }
  0xc6   :  { %11006 = vmatprep.mubr.bf16.mxu1 %v21975_v43 }
  0xc7   :  { %10936 = vmatpush1.bf16.msra.mxu0 %v18328_v44  ;;  %v18400_v44 = vld [vmem:[%s28192_s1 + $0x2210] ss:$40 sps:$4 sm:$0xff]  }
  0xc8   :  { %10977 = vmatpush1.bf16.msra.mxu1 %v18331_v45  ;;  %10937 = vmatprep.subr.bf16.mxu0 %v18336_v46  ;;  %v18403_v45 = vld [vmem:[%s28192_s1 + $0x2710] ss:$40 sps:$4 sm:$0xff]   ;;  %v18408_v46 = vld [vmem:[%s28192_s1 + $0x2264] ss:$40 sps:$4 sm:$0xff]  }
  0xc9   :  { %10978 = vmatprep.subr.bf16.mxu1 %v18339_v48  ;;  %v18411_v48 = vld [vmem:[%s28192_s1 + $0x2764] ss:$40 sps:$4 sm:$0xff]  }
  0xcb   :  { %10938 = vmatpush1.bf16.msra.mxu0 %v18334_v49  ;;  %v18406_v49 = vld [vmem:[%s28192_s1 + $0x2260] ss:$40 sps:$4 sm:$0xff]  }
  0xcc   :  { %10979 = vmatpush1.bf16.msra.mxu1 %v18337_v50  ;;  %10939 = vmatprep.subr.bf16.mxu0 %v18342_v52  ;;  %v18409_v50 = vld [vmem:[%s28192_s1 + $0x2760] ss:$40 sps:$4 sm:$0xff]   ;;  %v18414_v52 = vld [vmem:[%s28192_s1 + $0x22b4] ss:$40 sps:$4 sm:$0xff]  }
  0xcd   :  { %10980 = vmatprep.subr.bf16.mxu1 %v18345_v53  ;;  %v18417_v53 = vld [vmem:[%s28192_s1 + $0x27b4] ss:$40 sps:$4 sm:$0xff]  }
  0xcf   :  { %10940 = vmatpush1.bf16.msra.mxu0 %v18340_v54  ;;  %v18412_v54 = vld [vmem:[%s28192_s1 + $0x22b0] ss:$40 sps:$4 sm:$0xff]  }
  0xd0   :  { %10981 = vmatpush1.bf16.msra.mxu1 %v18343_v55  ;;  %10941 = vmatprep.subr.bf16.mxu0 %v18348_v56  ;;  %v18415_v55 = vld [vmem:[%s28192_s1 + $0x27b0] ss:$40 sps:$4 sm:$0xff]   ;;  %v18424_v56 = vld [vmem:[%s28192_s1 + $0x2804] ss:$40 sps:$4 sm:$0xff]  }
  0xd1   :  { %10982 = vmatprep.subr.bf16.mxu1 %v18351_v57  ;;  %v18427_v57 = vld [vmem:[%s28192_s1 + $0x2d04] ss:$40 sps:$4 sm:$0xff]  }
  0xd3   :  { %10942 = vmatpush1.bf16.msra.mxu0 %v18346_v58  ;;  %v22164_v58 = vld [vmem:[%s28193_s0 + $0x40] sm:$0xff] }
  0xd4   :  { %10983 = vmatpush1.bf16.msra.mxu1 %v18349_v59  ;;  %10943 = vmatprep.subr.bf16.mxu0 %v18354_v60  ;;  %v22168_v59 = vcombine.low %v21956_v40, %v21956_v40  ;;  %v22172_v60 = vcombine.low %v21961_v41, %v21961_v41  ;;  %v18425_v40 = vld [vmem:[%s28192_s1 + $0x2d00] ss:$40 sps:$4 sm:$0xff]   ;;  %v18430_v41 = vld [vmem:[%s28192_s1 + $0x2854] ss:$40 sps:$4 sm:$0xff]  }
  0xd5   :  { %10984 = vmatprep.subr.bf16.mxu1 %v18357_v61  ;;  %v22177_v61 = vld [vmem:[%s28193_s0 + $0x48] sm:$0xff] }
  0xd7   :  { %10944 = vmatpush1.bf16.msra.mxu0 %v18352_v62  ;;  %v18422_v62 = vld [vmem:[%s28192_s1 + $0x2800] ss:$40 sps:$4 sm:$0xff]  }
  0xd8   :  { %10985 = vmatpush1.bf16.msra.mxu1 %v18355_v63  ;;  %10945 = vmatprep.subr.bf16.mxu0 %v18360_v0  ;;  %v18433_v63 = vld [vmem:[%s28192_s1 + $0x2d54] ss:$40 sps:$4 sm:$0xff]   ;;  %v22193_v0 = vcombine.high %v22164_v58, %v22164_v58 }
  0xd9   :  { %10986 = vmatprep.subr.bf16.mxu1 %v18363_v1  ;;  %v22197_v1 = vcombine.high %v22177_v61, %v22177_v61 }
  0xdb   :  { %10946 = vmatpush1.bf16.msra.mxu0 %v18358_v2  ;;  %v18428_v2 = vld [vmem:[%s28192_s1 + $0x2850] ss:$40 sps:$4 sm:$0xff]  }
  0xdc   :  { %10987 = vmatpush1.bf16.msra.mxu1 %v18361_v3  ;;  %10947 = vmatprep.subr.bf16.mxu0 %v18366_v4  ;;  %v18431_v3 = vld [vmem:[%s28192_s1 + $0x2d50] ss:$40 sps:$4 sm:$0xff]   ;;  %v18436_v4 = vld [vmem:[%s28192_s1 + $0x28a4] ss:$40 sps:$4 sm:$0xff]  }
  0xdd   :  { %10988 = vmatprep.subr.bf16.mxu1 %v18369_v5  ;;  %v18439_v5 = vld [vmem:[%s28192_s1 + $0x2da4] ss:$40 sps:$4 sm:$0xff]  }
  0xdf   :  { %10948 = vmatpush1.bf16.msra.mxu0 %v18364_v8  ;;  %v18434_v8 = vld [vmem:[%s28192_s1 + $0x28a0] ss:$40 sps:$4 sm:$0xff]  }
  0xe0   :  { %10989 = vmatpush1.bf16.msra.mxu1 %v18367_v9  ;;  %10949 = vmatprep.subr.bf16.mxu0 %v18372_v10  ;;  %v18437_v9 = vld [vmem:[%s28192_s1 + $0x2da0] ss:$40 sps:$4 sm:$0xff]   ;;  %v18442_v10 = vld [vmem:[%s28192_s1 + $0x28f4] ss:$40 sps:$4 sm:$0xff]  }
  0xe1   :  { %10990 = vmatprep.subr.bf16.mxu1 %v18375_v11  ;;  %v18445_v11 = vld [vmem:[%s28192_s1 + $0x2df4] ss:$40 sps:$4 sm:$0xff]  }
  0xe3   :  { %10950 = vmatpush1.bf16.msra.mxu0 %v18370_v12  ;;  %v18440_v12 = vld [vmem:[%s28192_s1 + $0x28f0] ss:$40 sps:$4 sm:$0xff]  }
  0xe4   :  { %10991 = vmatpush1.bf16.msra.mxu1 %v18373_v13  ;;  %10951 = vmatprep.subr.bf16.mxu0 %v18378_v14  ;;  %v18443_v13 = vld [vmem:[%s28192_s1 + $0x2df0] ss:$40 sps:$4 sm:$0xff]   ;;  %v18448_v14 = vld [vmem:[%s28192_s1 + $0x2944] ss:$40 sps:$4 sm:$0xff]  }
  0xe5   :  { %10992 = vmatprep.subr.bf16.mxu1 %v18381_v15  ;;  %v18451_v15 = vld [vmem:[%s28192_s1 + $0x2e44] ss:$40 sps:$4 sm:$0xff]  }
  0xe7   :  { %10952 = vmatpush1.bf16.msra.mxu0 %v18376_v18  ;;  %v18446_v18 = vld [vmem:[%s28192_s1 + $0x2940] ss:$40 sps:$4 sm:$0xff]  }
  0xe8   :  { %10993 = vmatpush1.bf16.msra.mxu1 %v18379_v19  ;;  %10953 = vmatprep.subr.bf16.mxu0 %v18384_v20  ;;  %v18449_v19 = vld [vmem:[%s28192_s1 + $0x2e40] ss:$40 sps:$4 sm:$0xff]   ;;  %v18454_v20 = vld [vmem:[%s28192_s1 + $0x2994] ss:$40 sps:$4 sm:$0xff]  }
  0xe9   :  { %10994 = vmatprep.subr.bf16.mxu1 %v18387_v21  ;;  %v18457_v21 = vld [vmem:[%s28192_s1 + $0x2e94] ss:$40 sps:$4 sm:$0xff]  }
  0xeb   :  { %10954 = vmatpush1.bf16.msra.mxu0 %v18382_v26  ;;  %v18452_v26 = vld [vmem:[%s28192_s1 + $0x2990] ss:$40 sps:$4 sm:$0xff]  }
  0xec   :  { %10995 = vmatpush1.bf16.msra.mxu1 %v18385_v27  ;;  %10955 = vmatprep.subr.bf16.mxu0 %v18390_v28  ;;  %v18455_v27 = vld [vmem:[%s28192_s1 + $0x2e90] ss:$40 sps:$4 sm:$0xff]   ;;  %v18460_v28 = vld [vmem:[%s28192_s1 + $0x29e4] ss:$40 sps:$4 sm:$0xff]  }
  0xed   :  { %10996 = vmatprep.subr.bf16.mxu1 %v18393_v29  ;;  %v18463_v29 = vld [vmem:[%s28192_s1 + $0x2ee4] ss:$40 sps:$4 sm:$0xff]  }
  0xef   :  { %10956 = vmatpush1.bf16.msra.mxu0 %v18388_v30 }
  0xf0   :  { %10997 = vmatpush1.bf16.msra.mxu1 %v18391_v31  ;;  %10957 = vmatprep.subr.bf16.mxu0 %v18396_v32  ;;  %v18458_v32 = vld [vmem:[%s28192_s1 + $0x29e0] ss:$40 sps:$4 sm:$0xff]  }
  0xf1   :  { %10998 = vmatprep.subr.bf16.mxu1 %v18399_v33  ;;  %v18461_v33 = vld [vmem:[%s28192_s1 + $0x2ee0] ss:$40 sps:$4 sm:$0xff]  }
  0xf3   :  { %10958 = vmatpush1.bf16.msra.mxu0 %v18394_v34 }
  0xf4   :  { %10999 = vmatpush1.bf16.msra.mxu1 %v18397_v35  ;;  %10959 = vmatprep.subr.bf16.mxu0 %v18402_v22 }
  0xf5   :  { %11000 = vmatprep.subr.bf16.mxu1 %v18405_v23 }
  0xf7   :  { %10960 = vmatpush1.bf16.msra.mxu0 %v18400_v44 }
  0xf8   :  { %11001 = vmatpush1.bf16.msra.mxu1 %v18403_v45  ;;  %10961 = vmatprep.subr.bf16.mxu0 %v18408_v46 }
  0xf9   :  { %11002 = vmatprep.subr.bf16.mxu1 %v18411_v48 }
  0xfb   :  { %10962 = vmatpush1.bf16.msra.mxu0 %v18406_v49  ;;  %v18466_v49 = vld [vmem:[%s28192_s1 + $0x2a34] ss:$40 sps:$4 sm:$0xff]  }
  0xfc   :  { %11003 = vmatpush1.bf16.msra.mxu1 %v18409_v50  ;;  %10963 = vmatprep.subr.bf16.mxu0 %v18414_v52  ;;  %v18469_v50 = vld [vmem:[%s28192_s1 + $0x2f34] ss:$40 sps:$4 sm:$0xff]   ;;  %v18464_v52 = vld [vmem:[%s28192_s1 + $0x2a30] ss:$40 sps:$4 sm:$0xff]  }
  0xfd   :  { %11004 = vmatprep.subr.bf16.mxu1 %v18417_v53  ;;  %v18467_v53 = vld [vmem:[%s28192_s1 + $0x2f30] ss:$40 sps:$4 sm:$0xff]  }
  0xff   :  { %10964 = vmatpush1.bf16.msra.mxu0 %v18412_v54  ;;  %v18472_v54 = vld [vmem:[%s28192_s1 + $0x2a84] ss:$40 sps:$4 sm:$0xff]  }
 0x100   :  { %11005 = vmatpush1.bf16.msra.mxu1 %v18415_v55  ;;  %11015 = vmatprep.subr.bf16.mxu0 %v18424_v56  ;;  %v18475_v55 = vld [vmem:[%s28192_s1 + $0x2f84] ss:$40 sps:$4 sm:$0xff]   ;;  %v18470_v56 = vld [vmem:[%s28192_s1 + $0x2a80] ss:$40 sps:$4 sm:$0xff]  }
 0x101   :  { %11056 = vmatprep.subr.bf16.mxu1 %v18427_v57  ;;  %v18473_v57 = vld [vmem:[%s28192_s1 + $0x2f80] ss:$40 sps:$4 sm:$0xff]  }
 0x102   :  { %10966 = vmatmul.mubr.bf16.vlgmr.msra.gmra.mrb[12].mxu0 %v22168_v59 }
 0x103   :  { %11007 = vmatmul.mubr.bf16.vlgmr.msra.gmra.mrb[12].mxu1 %v22172_v60  ;;  %11016 = vmatpush1.bf16.msra.mxu0 %v18422_v62  ;;  %v18478_v62 = vld [vmem:[%s28192_s1 + $0x2ad4] ss:$40 sps:$4 sm:$0xff]  }
 0x104   :  { %11057 = vmatpush1.bf16.msra.mxu1 %v18425_v40  ;;  %11017 = vmatprep.subr.bf16.mxu0 %v18430_v41  ;;  %v18481_v40 = vld [vmem:[%s28192_s1 + $0x2fd4] ss:$40 sps:$4 sm:$0xff]   ;;  %v18476_v41 = vld [vmem:[%s28192_s1 + $0x2ad0] ss:$40 sps:$4 sm:$0xff]  }
 0x105   :  { %11058 = vmatprep.subr.bf16.mxu1 %v18433_v63  ;;  %11047 = vmatprep.mubr.bf16.mxu0 %v22193_v0  ;;  %v18479_v63 = vld [vmem:[%s28192_s1 + $0x2fd0] ss:$40 sps:$4 sm:$0xff]  }
 0x106   :  { %11088 = vmatprep.mubr.bf16.mxu1 %v22197_v1 }
 0x107   :  { %11018 = vmatpush1.bf16.msra.mxu0 %v18428_v2  ;;  %v18484_v2 = vld [vmem:[%s28192_s1 + $0x2b24] ss:$40 sps:$4 sm:$0xff]  }
 0x108   :  { %11059 = vmatpush1.bf16.msra.mxu1 %v18431_v3  ;;  %11019 = vmatprep.subr.bf16.mxu0 %v18436_v4  ;;  %v18487_v3 = vld [vmem:[%s28192_s1 + $0x3024] ss:$40 sps:$4 sm:$0xff]   ;;  %v18482_v4 = vld [vmem:[%s28192_s1 + $0x2b20] ss:$40 sps:$4 sm:$0xff]  }
 0x109   :  { %11060 = vmatprep.subr.bf16.mxu1 %v18439_v5  ;;  %v18485_v5 = vld [vmem:[%s28192_s1 + $0x3020] ss:$40 sps:$4 sm:$0xff]  }
 0x10b   :  { %11020 = vmatpush1.bf16.msra.mxu0 %v18434_v8  ;;  %v18490_v8 = vld [vmem:[%s28192_s1 + $0x2b74] ss:$40 sps:$4 sm:$0xff]  }
 0x10c   :  { %11061 = vmatpush1.bf16.msra.mxu1 %v18437_v9  ;;  %11021 = vmatprep.subr.bf16.mxu0 %v18442_v10  ;;  %v18493_v9 = vld [vmem:[%s28192_s1 + $0x3074] ss:$40 sps:$4 sm:$0xff]   ;;  %v18488_v10 = vld [vmem:[%s28192_s1 + $0x2b70] ss:$40 sps:$4 sm:$0xff]  }
 0x10d   :  { %11062 = vmatprep.subr.bf16.mxu1 %v18445_v11  ;;  %v18491_v11 = vld [vmem:[%s28192_s1 + $0x3070] ss:$40 sps:$4 sm:$0xff]  }
 0x10f   :  { %11022 = vmatpush1.bf16.msra.mxu0 %v18440_v12  ;;  %v18496_v12 = vld [vmem:[%s28192_s1 + $0x2bc4] ss:$40 sps:$4 sm:$0xff]  }
 0x110   :  { %11063 = vmatpush1.bf16.msra.mxu1 %v18443_v13  ;;  %11023 = vmatprep.subr.bf16.mxu0 %v18448_v14  ;;  %v18499_v13 = vld [vmem:[%s28192_s1 + $0x30c4] ss:$40 sps:$4 sm:$0xff]   ;;  %v18494_v14 = vld [vmem:[%s28192_s1 + $0x2bc0] ss:$40 sps:$4 sm:$0xff]  }
 0x111   :  { %11064 = vmatprep.subr.bf16.mxu1 %v18451_v15  ;;  %v18497_v15 = vld [vmem:[%s28192_s1 + $0x30c0] ss:$40 sps:$4 sm:$0xff]  }
 0x113   :  { %11024 = vmatpush1.bf16.msra.mxu0 %v18446_v18  ;;  %v18502_v18 = vld [vmem:[%s28192_s1 + $0x2c14] ss:$40 sps:$4 sm:$0xff]  }
 0x114   :  { %11065 = vmatpush1.bf16.msra.mxu1 %v18449_v19  ;;  %11025 = vmatprep.subr.bf16.mxu0 %v18454_v20  ;;  %v18505_v19 = vld [vmem:[%s28192_s1 + $0x3114] ss:$40 sps:$4 sm:$0xff]   ;;  %v18500_v20 = vld [vmem:[%s28192_s1 + $0x2c10] ss:$40 sps:$4 sm:$0xff]  }
 0x115   :  { %11066 = vmatprep.subr.bf16.mxu1 %v18457_v21  ;;  %v10721_v30 = vpop.f32.mrb[0].mxu0  ;;  %v18503_v21 = vld [vmem:[%s28192_s1 + $0x3110] ss:$40 sps:$4 sm:$0xff]  }
 0x116   :  { %v10762_v31 = vpop.f32.mrb[0].mxu1  ;;  %v10723_v35 = vpop.f32.mrb[1].mxu0 }
 0x117   :  { %v22269_v34 = vadd.f32 %v10762_v31, %v10721_v30  ;;  %v10764_v22 = vpop.f32.mrb[1].mxu1  ;;  %v10725_v44 = vpop.f32.mrb[2].mxu0  ;;  %11026 = vmatpush1.bf16.msra.mxu0 %v18452_v26  ;;  %v18508_v26 = vld [vmem:[%s28192_s1 + $0x2c64] ss:$40 sps:$4 sm:$0xff]   ;;  %v18514_v30 = vld [vmem:[%s28192_s1 + $0x2cb4] ss:$40 sps:$4 sm:$0xff]  }
 0x118   :  { %v22271_v23 = vadd.f32 %v10764_v22, %v10723_v35  ;;  %v10766_v45 = vpop.f32.mrb[2].mxu1  ;;  %11067 = vmatpush1.bf16.msra.mxu1 %v18455_v27  ;;  %v10726_v46 = vpop.f32.mrb[3].mxu0  ;;  %11027 = vmatprep.subr.bf16.mxu0 %v18460_v28  ;;  %v18511_v27 = vld [vmem:[%s28192_s1 + $0x3164] ss:$40 sps:$4 sm:$0xff]   ;;  %v18506_v28 = vld [vmem:[%s28192_s1 + $0x2c60] ss:$40 sps:$4 sm:$0xff]  }
 0x119   :  { %v10767_v48 = vpop.f32.mrb[3].mxu1  ;;  %11068 = vmatprep.subr.bf16.mxu1 %v18463_v29  ;;  %v18509_v29 = vld [vmem:[%s28192_s1 + $0x3160] ss:$40 sps:$4 sm:$0xff]   ;;  %v18517_v31 = vld [vmem:[%s28192_s1 + $0x31b4] ss:$40 sps:$4 sm:$0xff]  }
 0x11a   :  { %v18524_v35 = vld [vmem:[%s28192_s1 + $0x3204] ss:$40 sps:$4 sm:$0xff]   ;;  %v22390_v44 = vld [vmem:[%s28193_s0 + $0x50] sm:$0xff]  ;;  %v18522_v45 = vld [vmem:[%s28192_s1 + $0x3200] ss:$40 sps:$4 sm:$0xff]   ;;  %v22400_v48 = vcombine.low %v22164_v58, %v22164_v58 }
 0x11b   :  { %11028 = vmatpush1.bf16.msra.mxu0 %v18458_v32  ;;  %v18512_v32 = vld [vmem:[%s28192_s1 + $0x2cb0] ss:$40 sps:$4 sm:$0xff]   ;;  %v18527_v22 = vld [vmem:[%s28192_s1 + $0xc] ss:$40 sps:$4 sm:$0xff]   ;;  %v22414_v58 = vcombine.high %v22390_v44, %v22390_v44 }
 0x11c   :  { %11069 = vmatpush1.bf16.msra.mxu1 %v18461_v33  ;;  %11029 = vmatprep.subr.bf16.mxu0 %v18466_v49  ;;  %v18515_v33 = vld [vmem:[%s28192_s1 + $0x31b0] ss:$40 sps:$4 sm:$0xff]   ;;  %v22404_v49 = vcombine.low %v22177_v61, %v22177_v61 }
 0x11d   :  { %11070 = vmatprep.subr.bf16.mxu1 %v18469_v50  ;;  %v18525_v46 = vld [vmem:[%s28192_s1 + $0x8] ss:$40 sps:$4 sm:$0xff]   ;;  %v18530_v50 = vld [vmem:[%s28192_s1 + $0x3254] ss:$40 sps:$4 sm:$0xff]  }
 0x11e   :  { %v18528_v61 = vld [vmem:[%s28192_s1 + $0x3250] ss:$40 sps:$4 sm:$0xff]  }
 0x11f   :  { %11030 = vmatpush1.bf16.msra.mxu0 %v18464_v52  ;;  %v18533_v52 = vld [vmem:[%s28192_s1 + $0x5c] ss:$40 sps:$4 sm:$0xff]  }
 0x120   :  { %11071 = vmatpush1.bf16.msra.mxu1 %v18467_v53  ;;  %11031 = vmatprep.subr.bf16.mxu0 %v18472_v54  ;;  %v18531_v53 = vld [vmem:[%s28192_s1 + $0x58] ss:$40 sps:$4 sm:$0xff]   ;;  %v18536_v54 = vld [vmem:[%s28192_s1 + $0x32a4] ss:$40 sps:$4 sm:$0xff]  }
 0x121   :  { %11072 = vmatprep.subr.bf16.mxu1 %v18475_v55  ;;  %v18539_v55 = vld [vmem:[%s28192_s1 + $0xac] ss:$40 sps:$4 sm:$0xff]  }
 0x123   :  { %11032 = vmatpush1.bf16.msra.mxu0 %v18470_v56  ;;  %v18534_v56 = vld [vmem:[%s28192_s1 + $0x32a0] ss:$40 sps:$4 sm:$0xff]  }
 0x124   :  { %11073 = vmatpush1.bf16.msra.mxu1 %v18473_v57  ;;  %11033 = vmatprep.subr.bf16.mxu0 %v18478_v62  ;;  %v18537_v57 = vld [vmem:[%s28192_s1 + $0xa8] ss:$40 sps:$4 sm:$0xff]   ;;  %v18542_v62 = vld [vmem:[%s28192_s1 + $0x32f4] ss:$40 sps:$4 sm:$0xff]  }
 0x125   :  { %11074 = vmatprep.subr.bf16.mxu1 %v18481_v40  ;;  %v18545_v40 = vld [vmem:[%s28192_s1 + $0xfc] ss:$40 sps:$4 sm:$0xff]  }
 0x127   :  { %11034 = vmatpush1.bf16.msra.mxu0 %v18476_v41  ;;  %v18540_v41 = vld [vmem:[%s28192_s1 + $0x32f0] ss:$40 sps:$4 sm:$0xff]  }
 0x128   :  { %11075 = vmatpush1.bf16.msra.mxu1 %v18479_v63  ;;  %11035 = vmatprep.subr.bf16.mxu0 %v18484_v2  ;;  %v18543_v63 = vld [vmem:[%s28192_s1 + $0xf8] ss:$40 sps:$4 sm:$0xff]   ;;  %v18548_v2 = vld [vmem:[%s28192_s1 + $0x3344] ss:$40 sps:$4 sm:$0xff]  }
 0x129   :  { %11076 = vmatprep.subr.bf16.mxu1 %v18487_v3  ;;  %v18551_v3 = vld [vmem:[%s28192_s1 + $0x14c] ss:$40 sps:$4 sm:$0xff]  }
 0x12b   :  { %11036 = vmatpush1.bf16.msra.mxu0 %v18482_v4  ;;  %v18546_v4 = vld [vmem:[%s28192_s1 + $0x3340] ss:$40 sps:$4 sm:$0xff]  }
 0x12c   :  { %11077 = vmatpush1.bf16.msra.mxu1 %v18485_v5  ;;  %11037 = vmatprep.subr.bf16.mxu0 %v18490_v8  ;;  %v18549_v5 = vld [vmem:[%s28192_s1 + $0x148] ss:$40 sps:$4 sm:$0xff]   ;;  %v18554_v8 = vld [vmem:[%s28192_s1 + $0x3394] ss:$40 sps:$4 sm:$0xff]  }
 0x12d   :  { %11078 = vmatprep.subr.bf16.mxu1 %v18493_v9  ;;  %v18557_v9 = vld [vmem:[%s28192_s1 + $0x19c] ss:$40 sps:$4 sm:$0xff]  }
 0x12f   :  { %11038 = vmatpush1.bf16.msra.mxu0 %v18488_v10  ;;  %v18552_v10 = vld [vmem:[%s28192_s1 + $0x3390] ss:$40 sps:$4 sm:$0xff]  }
 0x130   :  { %11079 = vmatpush1.bf16.msra.mxu1 %v18491_v11  ;;  %11039 = vmatprep.subr.bf16.mxu0 %v18496_v12  ;;  %v18555_v11 = vld [vmem:[%s28192_s1 + $0x198] ss:$40 sps:$4 sm:$0xff]   ;;  %v18560_v12 = vld [vmem:[%s28192_s1 + $0x33e4] ss:$40 sps:$4 sm:$0xff]  }
 0x131   :  { %11080 = vmatprep.subr.bf16.mxu1 %v18499_v13  ;;  %v18563_v13 = vld [vmem:[%s28192_s1 + $0x1ec] ss:$40 sps:$4 sm:$0xff]  }
 0x133   :  { %11040 = vmatpush1.bf16.msra.mxu0 %v18494_v14 }
 0x134   :  { %11081 = vmatpush1.bf16.msra.mxu1 %v18497_v15  ;;  %11041 = vmatprep.subr.bf16.mxu0 %v18502_v18  ;;  %v18558_v18 = vld [vmem:[%s28192_s1 + $0x33e0] ss:$40 sps:$4 sm:$0xff]  }
 0x135   :  { %11082 = vmatprep.subr.bf16.mxu1 %v18505_v19  ;;  %v18561_v19 = vld [vmem:[%s28192_s1 + $0x1e8] ss:$40 sps:$4 sm:$0xff]  }
 0x137   :  { %11042 = vmatpush1.bf16.msra.mxu0 %v18500_v20 }
 0x138   :  { %11083 = vmatpush1.bf16.msra.mxu1 %v18503_v21  ;;  %11043 = vmatprep.subr.bf16.mxu0 %v18508_v26 }
 0x139   :  { %11084 = vmatprep.subr.bf16.mxu1 %v18511_v27 }
 0x13b   :  { %11044 = vmatpush1.bf16.msra.mxu0 %v18506_v28 }
 0x13c   :  { %11085 = vmatpush1.bf16.msra.mxu1 %v18509_v29  ;;  %11045 = vmatprep.subr.bf16.mxu0 %v18514_v30 }
 0x13d   :  { %11086 = vmatprep.subr.bf16.mxu1 %v18517_v31 }
 0x13f   :  { %11046 = vmatpush1.bf16.msra.mxu0 %v18512_v32 }
 0x140   :  { %11087 = vmatpush1.bf16.msra.mxu1 %v18515_v33  ;;  %11097 = vmatprep.subr.bf16.mxu0 %v18524_v35  ;;  %v18566_v33 = vld [vmem:[%s28192_s1 + $0x3434] ss:$40 sps:$4 sm:$0xff]  }
 0x141   :  { %11138 = vmatprep.subr.bf16.mxu1 %v18527_v22  ;;  %v18567_v22 = vld [vmem:[%s28192_s1 + $0x238] ss:$40 sps:$4 sm:$0xff]  }
 0x142   :  { %11048 = vmatmul.mubr.bf16.vlgmr.msra.gmra.mrb[16].mxu0 %v22400_v48 }
 0x143   :  { %11089 = vmatmul.mubr.bf16.vlgmr.msra.gmra.mrb[16].mxu1 %v22404_v49  ;;  %11098 = vmatpush1.bf16.msra.mxu0 %v18522_v45  ;;  %v18572_v45 = vld [vmem:[%s28192_s1 + $0x3484] ss:$40 sps:$4 sm:$0xff]  }
 0x144   :  { %11139 = vmatpush1.bf16.msra.mxu1 %v18525_v46  ;;  %11099 = vmatprep.subr.bf16.mxu0 %v18530_v50  ;;  %v18575_v46 = vld [vmem:[%s28192_s1 + $0x28c] ss:$40 sps:$4 sm:$0xff]   ;;  %v18570_v50 = vld [vmem:[%s28192_s1 + $0x3480] ss:$40 sps:$4 sm:$0xff]  }
 0x145   :  { %11140 = vmatprep.subr.bf16.mxu1 %v18533_v52  ;;  %11129 = vmatprep.mubr.bf16.mxu0 %v22414_v58  ;;  %v18573_v52 = vld [vmem:[%s28192_s1 + $0x288] ss:$40 sps:$4 sm:$0xff]  }
 0x146   :  { %11170 = vmatprep.mubr.bf16.mxu1 %v21430_v47 }
 0x147   :  { %11100 = vmatpush1.bf16.msra.mxu0 %v18528_v61  ;;  %v18578_v61 = vld [vmem:[%s28192_s1 + $0x34d4] ss:$40 sps:$4 sm:$0xff]  }
 0x148   :  { %11141 = vmatpush1.bf16.msra.mxu1 %v18531_v53  ;;  %11101 = vmatprep.subr.bf16.mxu0 %v18536_v54  ;;  %v18581_v53 = vld [vmem:[%s28192_s1 + $0x2dc] ss:$40 sps:$4 sm:$0xff]   ;;  %v18576_v54 = vld [vmem:[%s28192_s1 + $0x34d0] ss:$40 sps:$4 sm:$0xff]  }
 0x149   :  { %11142 = vmatprep.subr.bf16.mxu1 %v18539_v55  ;;  %v18579_v55 = vld [vmem:[%s28192_s1 + $0x2d8] ss:$40 sps:$4 sm:$0xff]  }
 0x14b   :  { %11102 = vmatpush1.bf16.msra.mxu0 %v18534_v56  ;;  %v18584_v56 = vld [vmem:[%s28192_s1 + $0x3524] ss:$40 sps:$4 sm:$0xff]  }
 0x14c   :  { %11143 = vmatpush1.bf16.msra.mxu1 %v18537_v57  ;;  %11103 = vmatprep.subr.bf16.mxu0 %v18542_v62  ;;  %v18587_v57 = vld [vmem:[%s28192_s1 + $0x32c] ss:$40 sps:$4 sm:$0xff]   ;;  %v18582_v62 = vld [vmem:[%s28192_s1 + $0x3520] ss:$40 sps:$4 sm:$0xff]  }
 0x14d   :  { %11144 = vmatprep.subr.bf16.mxu1 %v18545_v40  ;;  %v18585_v40 = vld [vmem:[%s28192_s1 + $0x328] ss:$40 sps:$4 sm:$0xff]  }
 0x14f   :  { %11104 = vmatpush1.bf16.msra.mxu0 %v18540_v41  ;;  %v18590_v41 = vld [vmem:[%s28192_s1 + $0x3574] ss:$40 sps:$4 sm:$0xff]  }
 0x150   :  { %11145 = vmatpush1.bf16.msra.mxu1 %v18543_v63  ;;  %11105 = vmatprep.subr.bf16.mxu0 %v18548_v2  ;;  %v18593_v63 = vld [vmem:[%s28192_s1 + $0x37c] ss:$40 sps:$4 sm:$0xff]   ;;  %v18588_v2 = vld [vmem:[%s28192_s1 + $0x3570] ss:$40 sps:$4 sm:$0xff]  }
 0x151   :  { %11146 = vmatprep.subr.bf16.mxu1 %v18551_v3  ;;  %v18591_v3 = vld [vmem:[%s28192_s1 + $0x378] ss:$40 sps:$4 sm:$0xff]  }
 0x153   :  { %11106 = vmatpush1.bf16.msra.mxu0 %v18546_v4  ;;  %v18596_v4 = vld [vmem:[%s28192_s1 + $0x35c4] ss:$40 sps:$4 sm:$0xff]  }
 0x154   :  { %11147 = vmatpush1.bf16.msra.mxu1 %v18549_v5  ;;  %11107 = vmatprep.subr.bf16.mxu0 %v18554_v8  ;;  %v18599_v5 = vld [vmem:[%s28192_s1 + $0x3cc] ss:$40 sps:$4 sm:$0xff]   ;;  %v18594_v8 = vld [vmem:[%s28192_s1 + $0x35c0] ss:$40 sps:$4 sm:$0xff]  }
 0x155   :  { %11148 = vmatprep.subr.bf16.mxu1 %v18557_v9  ;;  %v10803_v14 = vpop.f32.mrb[4].mxu0  ;;  %v18597_v9 = vld [vmem:[%s28192_s1 + $0x3c8] ss:$40 sps:$4 sm:$0xff]  }
 0x156   :  { %v10844_v15 = vpop.f32.mrb[4].mxu1  ;;  %v10804_v20 = vadd.f32 %v10803_v14, %v22269_v34  ;;  %v10805_v21 = vpop.f32.mrb[5].mxu0  ;;  %v18569_v34 = vld [vmem:[%s28192_s1 + $0x23c] ss:$40 sps:$4 sm:$0xff]  }
 0x157   :  { %v10846_v26 = vpop.f32.mrb[5].mxu1  ;;  %v10806_v27 = vadd.f32 %v10805_v21, %v22271_v23  ;;  %v10807_v28 = vpop.f32.mrb[6].mxu0  ;;  %11108 = vmatpush1.bf16.msra.mxu0 %v18552_v10  ;;  %v18564_v23 = vld [vmem:[%s28192_s1 + $0x3430] ss:$40 sps:$4 sm:$0xff]   ;;  %v18602_v10 = vld [vmem:[%s28192_s1 + $0x3614] ss:$40 sps:$4 sm:$0xff]  }
 0x158   :  { %v10848_v29 = vpop.f32.mrb[6].mxu1  ;;  %11149 = vmatpush1.bf16.msra.mxu1 %v18555_v11  ;;  %v22488_v30 = vadd.f32 %v10844_v15, %v10804_v20  ;;  %v10808_v31 = vpop.f32.mrb[7].mxu0  ;;  %11109 = vmatprep.subr.bf16.mxu0 %v18560_v12  ;;  %v18605_v11 = vld [vmem:[%s28192_s1 + $0x41c] ss:$40 sps:$4 sm:$0xff]   ;;  %v18600_v12 = vld [vmem:[%s28192_s1 + $0x3610] ss:$40 sps:$4 sm:$0xff]  }
 0x159   :  { %v10849_v32 = vpop.f32.mrb[7].mxu1  ;;  %11150 = vmatprep.subr.bf16.mxu1 %v18563_v13  ;;  %v22496_v35 = vadd.f32 %v10846_v26, %v10806_v27  ;;  %v18603_v13 = vld [vmem:[%s28192_s1 + $0x418] ss:$40 sps:$4 sm:$0xff]   ;;  %v18608_v14 = vld [vmem:[%s28192_s1 + $0x3664] ss:$40 sps:$4 sm:$0xff]  }
 0x15a   :  { %v18611_v15 = vld [vmem:[%s28192_s1 + $0x46c] ss:$40 sps:$4 sm:$0xff]   ;;  %v18617_v21 = vld [vmem:[%s28192_s1 + $0x4bc] ss:$40 sps:$4 sm:$0xff]   ;;  %v18612_v26 = vld [vmem:[%s28192_s1 + $0x36b0] ss:$40 sps:$4 sm:$0xff]  }
 0x15b   :  { %11110 = vmatpush1.bf16.msra.mxu0 %v18558_v18  ;;  %v18606_v18 = vld [vmem:[%s28192_s1 + $0x3660] ss:$40 sps:$4 sm:$0xff]   ;;  %v18614_v20 = vld [vmem:[%s28192_s1 + $0x36b4] ss:$40 sps:$4 sm:$0xff]  }
 0x15c   :  { %11151 = vmatpush1.bf16.msra.mxu1 %v18561_v19  ;;  %11111 = vmatprep.subr.bf16.mxu0 %v18566_v33  ;;  %v18609_v19 = vld [vmem:[%s28192_s1 + $0x468] ss:$40 sps:$4 sm:$0xff]   ;;  %v18615_v27 = vld [vmem:[%s28192_s1 + $0x4b8] ss:$40 sps:$4 sm:$0xff]   ;;  %v18622_v28 = vld [vmem:[%s28192_s1 + $0x50c] ss:$40 sps:$4 sm:$0xff]   ;;  %v22614_v33 = vcombine.low %v22390_v44, %v22390_v44 }
 0x15d   :  { %11152 = vmatprep.subr.bf16.mxu1 %v18569_v34  ;;  %v18625_v29 = vld [vmem:[%s28192_s1 + $0xa0c] ss:$40 sps:$4 sm:$0xff]   ;;  %v18620_v31 = vld [vmem:[%s28192_s1 + $0x508] ss:$40 sps:$4 sm:$0xff]   ;;  %v18628_v34 = vld [vmem:[%s28192_s1 + $0x55c] ss:$40 sps:$4 sm:$0xff]  }
 0x15e   :  { %v18623_v32 = vld [vmem:[%s28192_s1 + $0xa08] ss:$40 sps:$4 sm:$0xff]   ;;  %v18626_v44 = vld [vmem:[%s28192_s1 + $0x558] ss:$40 sps:$4 sm:$0xff]  }
 0x15f   :  { %11112 = vmatpush1.bf16.msra.mxu0 %v18564_v23  ;;  %v18631_v23 = vld [vmem:[%s28192_s1 + $0xa5c] ss:$40 sps:$4 sm:$0xff]  }
 0x160   :  { %11153 = vmatpush1.bf16.msra.mxu1 %v18567_v22  ;;  %11113 = vmatprep.subr.bf16.mxu0 %v18572_v45  ;;  %v18629_v22 = vld [vmem:[%s28192_s1 + $0xa58] ss:$40 sps:$4 sm:$0xff]   ;;  %v18634_v45 = vld [vmem:[%s28192_s1 + $0x5ac] ss:$40 sps:$4 sm:$0xff]  }
 0x161   :  { %11154 = vmatprep.subr.bf16.mxu1 %v18575_v46  ;;  %v18637_v46 = vld [vmem:[%s28192_s1 + $0xaac] ss:$40 sps:$4 sm:$0xff]  }
 0x163   :  { %11114 = vmatpush1.bf16.msra.mxu0 %v18570_v50  ;;  %v18632_v50 = vld [vmem:[%s28192_s1 + $0x5a8] ss:$40 sps:$4 sm:$0xff]  }
 0x164   :  { %11155 = vmatpush1.bf16.msra.mxu1 %v18573_v52  ;;  %11115 = vmatprep.subr.bf16.mxu0 %v18578_v61  ;;  %v18635_v52 = vld [vmem:[%s28192_s1 + $0xaa8] ss:$40 sps:$4 sm:$0xff]   ;;  %v18640_v61 = vld [vmem:[%s28192_s1 + $0x5fc] ss:$40 sps:$4 sm:$0xff]  }
 0x165   :  { %11156 = vmatprep.subr.bf16.mxu1 %v18581_v53  ;;  %v18643_v53 = vld [vmem:[%s28192_s1 + $0xafc] ss:$40 sps:$4 sm:$0xff]  }
 0x167   :  { %11116 = vmatpush1.bf16.msra.mxu0 %v18576_v54  ;;  %v18638_v54 = vld [vmem:[%s28192_s1 + $0x5f8] ss:$40 sps:$4 sm:$0xff]  }
 0x168   :  { %11157 = vmatpush1.bf16.msra.mxu1 %v18579_v55  ;;  %11117 = vmatprep.subr.bf16.mxu0 %v18584_v56  ;;  %v18641_v55 = vld [vmem:[%s28192_s1 + $0xaf8] ss:$40 sps:$4 sm:$0xff]   ;;  %v18646_v56 = vld [vmem:[%s28192_s1 + $0x64c] ss:$40 sps:$4 sm:$0xff]  }
 0x169   :  { %11158 = vmatprep.subr.bf16.mxu1 %v18587_v57  ;;  %v18649_v57 = vld [vmem:[%s28192_s1 + $0xb4c] ss:$40 sps:$4 sm:$0xff]  }
 0x16b   :  { %11118 = vmatpush1.bf16.msra.mxu0 %v18582_v62  ;;  %v18644_v62 = vld [vmem:[%s28192_s1 + $0x648] ss:$40 sps:$4 sm:$0xff]  }
 0x16c   :  { %11159 = vmatpush1.bf16.msra.mxu1 %v18585_v40  ;;  %11119 = vmatprep.subr.bf16.mxu0 %v18590_v41  ;;  %v18647_v40 = vld [vmem:[%s28192_s1 + $0xb48] ss:$40 sps:$4 sm:$0xff]   ;;  %v18652_v41 = vld [vmem:[%s28192_s1 + $0x69c] ss:$40 sps:$4 sm:$0xff]  }
 0x16d   :  { %11160 = vmatprep.subr.bf16.mxu1 %v18593_v63  ;;  %v18655_v63 = vld [vmem:[%s28192_s1 + $0xb9c] ss:$40 sps:$4 sm:$0xff]  }
 0x16f   :  { %11120 = vmatpush1.bf16.msra.mxu0 %v18588_v2  ;;  %v18650_v2 = vld [vmem:[%s28192_s1 + $0x698] ss:$40 sps:$4 sm:$0xff]  }
 0x170   :  { %11161 = vmatpush1.bf16.msra.mxu1 %v18591_v3  ;;  %11121 = vmatprep.subr.bf16.mxu0 %v18596_v4  ;;  %v18653_v3 = vld [vmem:[%s28192_s1 + $0xb98] ss:$40 sps:$4 sm:$0xff]   ;;  %v18658_v4 = vld [vmem:[%s28192_s1 + $0x6ec] ss:$40 sps:$4 sm:$0xff]  }
 0x171   :  { %11162 = vmatprep.subr.bf16.mxu1 %v18599_v5  ;;  %v18661_v5 = vld [vmem:[%s28192_s1 + $0xbec] ss:$40 sps:$4 sm:$0xff]  }
 0x173   :  { %11122 = vmatpush1.bf16.msra.mxu0 %v18594_v8 }
 0x174   :  { %11163 = vmatpush1.bf16.msra.mxu1 %v18597_v9  ;;  %11123 = vmatprep.subr.bf16.mxu0 %v18602_v10  ;;  %v18656_v10 = vld [vmem:[%s28192_s1 + $0x6e8] ss:$40 sps:$4 sm:$0xff]  }
 0x175   :  { %11164 = vmatprep.subr.bf16.mxu1 %v18605_v11  ;;  %v18659_v11 = vld [vmem:[%s28192_s1 + $0xbe8] ss:$40 sps:$4 sm:$0xff]  }
 0x177   :  { %11124 = vmatpush1.bf16.msra.mxu0 %v18600_v12 }
 0x178   :  { %11165 = vmatpush1.bf16.msra.mxu1 %v18603_v13  ;;  %11125 = vmatprep.subr.bf16.mxu0 %v18608_v14 }
 0x179   :  { %11166 = vmatprep.subr.bf16.mxu1 %v18611_v15 }
 0x17b   :  { %11126 = vmatpush1.bf16.msra.mxu0 %v18606_v18 }
 0x17c   :  { %11167 = vmatpush1.bf16.msra.mxu1 %v18609_v19  ;;  %11127 = vmatprep.subr.bf16.mxu0 %v18614_v20 }
 0x17d   :  { %11168 = vmatprep.subr.bf16.mxu1 %v18617_v21 }
 0x17f   :  { %11128 = vmatpush1.bf16.msra.mxu0 %v18612_v26 }
 0x180   :  { %11169 = vmatpush1.bf16.msra.mxu1 %v18615_v27  ;;  %11179 = vmatprep.subr.bf16.mxu0 %v18622_v28  ;;  %v18664_v27 = vld [vmem:[%s28192_s1 + $0x73c] ss:$40 sps:$4 sm:$0xff]  }
 0x181   :  { %11220 = vmatprep.subr.bf16.mxu1 %v18625_v29  ;;  %v18665_v29 = vld [vmem:[%s28192_s1 + $0xc38] ss:$40 sps:$4 sm:$0xff]  }
 0x182   :  { %11130 = vmatmul.mubr.bf16.vlgmr.msra.gmra.mrb[20].mxu0 %v22614_v33 }
 0x183   :  { %11171 = vmatmul.mubr.bf16.vlgmr.msra.gmra.mrb[20].mxu1 %v21499_v6  ;;  %11180 = vmatpush1.bf16.msra.mxu0 %v18620_v31  ;;  %v18670_v31 = vld [vmem:[%s28192_s1 + $0x78c] ss:$40 sps:$4 sm:$0xff]  }
 0x184   :  { %11221 = vmatpush1.bf16.msra.mxu1 %v18623_v32  ;;  %11181 = vmatprep.subr.bf16.mxu0 %v18628_v34  ;;  %v18673_v32 = vld [vmem:[%s28192_s1 + $0xc8c] ss:$40 sps:$4 sm:$0xff]   ;;  %v18668_v34 = vld [vmem:[%s28192_s1 + $0x788] ss:$40 sps:$4 sm:$0xff]  }
 0x185   :  { %11222 = vmatprep.subr.bf16.mxu1 %v18631_v23  ;;  %11211 = vmatprep.mubr.bf16.mxu0 %v21441_v51  ;;  %v18671_v23 = vld [vmem:[%s28192_s1 + $0xc88] ss:$40 sps:$4 sm:$0xff]  }
 0x186   :  { %11252 = vmatprep.mubr.bf16.mxu1 %v21595_v36 }
 0x187   :  { %11182 = vmatpush1.bf16.msra.mxu0 %v18626_v44  ;;  %v18676_v44 = vld [vmem:[%s28192_s1 + $0x7dc] ss:$40 sps:$4 sm:$0xff]  }
 0x188   :  { %11223 = vmatpush1.bf16.msra.mxu1 %v18629_v22  ;;  %11183 = vmatprep.subr.bf16.mxu0 %v18634_v45  ;;  %v18679_v22 = vld [vmem:[%s28192_s1 + $0xcdc] ss:$40 sps:$4 sm:$0xff]   ;;  %v18674_v45 = vld [vmem:[%s28192_s1 + $0x7d8] ss:$40 sps:$4 sm:$0xff]  }
 0x189   :  { %11224 = vmatprep.subr.bf16.mxu1 %v18637_v46  ;;  %v18677_v46 = vld [vmem:[%s28192_s1 + $0xcd8] ss:$40 sps:$4 sm:$0xff]  }
 0x18b   :  { %11184 = vmatpush1.bf16.msra.mxu0 %v18632_v50  ;;  %v18682_v50 = vld [vmem:[%s28192_s1 + $0x82c] ss:$40 sps:$4 sm:$0xff]  }
 0x18c   :  { %11225 = vmatpush1.bf16.msra.mxu1 %v18635_v52  ;;  %11185 = vmatprep.subr.bf16.mxu0 %v18640_v61  ;;  %v18685_v52 = vld [vmem:[%s28192_s1 + $0xd2c] ss:$40 sps:$4 sm:$0xff]   ;;  %v18680_v61 = vld [vmem:[%s28192_s1 + $0x828] ss:$40 sps:$4 sm:$0xff]  }
 0x18d   :  { %11226 = vmatprep.subr.bf16.mxu1 %v18643_v53  ;;  %v18683_v53 = vld [vmem:[%s28192_s1 + $0xd28] ss:$40 sps:$4 sm:$0xff]  }
 0x18f   :  { %11186 = vmatpush1.bf16.msra.mxu0 %v18638_v54  ;;  %v18688_v54 = vld [vmem:[%s28192_s1 + $0x87c] ss:$40 sps:$4 sm:$0xff]  }
 0x190   :  { %11227 = vmatpush1.bf16.msra.mxu1 %v18641_v55  ;;  %11187 = vmatprep.subr.bf16.mxu0 %v18646_v56  ;;  %v18691_v55 = vld [vmem:[%s28192_s1 + $0xd7c] ss:$40 sps:$4 sm:$0xff]   ;;  %v18686_v56 = vld [vmem:[%s28192_s1 + $0x878] ss:$40 sps:$4 sm:$0xff]  }
 0x191   :  { %11228 = vmatprep.subr.bf16.mxu1 %v18649_v57  ;;  %v18689_v57 = vld [vmem:[%s28192_s1 + $0xd78] ss:$40 sps:$4 sm:$0xff]  }
 0x193   :  { %11188 = vmatpush1.bf16.msra.mxu0 %v18644_v62  ;;  %v18694_v62 = vld [vmem:[%s28192_s1 + $0x8cc] ss:$40 sps:$4 sm:$0xff]  }
 0x194   :  { %11229 = vmatpush1.bf16.msra.mxu1 %v18647_v40  ;;  %11189 = vmatprep.subr.bf16.mxu0 %v18652_v41  ;;  %v18697_v40 = vld [vmem:[%s28192_s1 + $0xdcc] ss:$40 sps:$4 sm:$0xff]   ;;  %v18692_v41 = vld [vmem:[%s28192_s1 + $0x8c8] ss:$40 sps:$4 sm:$0xff]  }
 0x195   :  { %11230 = vmatprep.subr.bf16.mxu1 %v18655_v63  ;;  %v10885_v8 = vpop.f32.mrb[8].mxu0  ;;  %v18695_v63 = vld [vmem:[%s28192_s1 + $0xdc8] ss:$40 sps:$4 sm:$0xff]  }
 0x196   :  { %v10926_v9 = vpop.f32.mrb[8].mxu1  ;;  %v10886_v12 = vadd.f32 %v10885_v8, %v22488_v30  ;;  %v10887_v13 = vpop.f32.mrb[9].mxu0  ;;  %v18667_v30 = vld [vmem:[%s28192_s1 + $0xc3c] ss:$40 sps:$4 sm:$0xff]   ;;  %v18706_v8 = vld [vmem:[%s28192_s1 + $0x96c] ss:$40 sps:$4 sm:$0xff]  }
 0x197   :  { %v10928_v14 = vpop.f32.mrb[9].mxu1  ;;  %v10888_v15 = vadd.f32 %v10887_v13, %v22496_v35  ;;  %v10889_v18 = vpop.f32.mrb[10].mxu0  ;;  %11190 = vmatpush1.bf16.msra.mxu0 %v18650_v2  ;;  %v18662_v35 = vld [vmem:[%s28192_s1 + $0x738] ss:$40 sps:$4 sm:$0xff]   ;;  %v18700_v2 = vld [vmem:[%s28192_s1 + $0x91c] ss:$40 sps:$4 sm:$0xff]  }
 0x198   :  { %v10930_v19 = vpop.f32.mrb[10].mxu1  ;;  %11231 = vmatpush1.bf16.msra.mxu1 %v18653_v3  ;;  %v22694_v20 = vadd.f32 %v10926_v9, %v10886_v12  ;;  %v10890_v21 = vpop.f32.mrb[11].mxu0  ;;  %11191 = vmatprep.subr.bf16.mxu0 %v18658_v4  ;;  %v18703_v3 = vld [vmem:[%s28192_s1 + $0xe1c] ss:$40 sps:$4 sm:$0xff]   ;;  %v18698_v4 = vld [vmem:[%s28192_s1 + $0x918] ss:$40 sps:$4 sm:$0xff]  }
 0x199   :  { %v10931_v26 = vpop.f32.mrb[11].mxu1  ;;  %11232 = vmatprep.subr.bf16.mxu1 %v18661_v5  ;;  %v22702_v28 = vadd.f32 %v10928_v14, %v10888_v15  ;;  %v18701_v5 = vld [vmem:[%s28192_s1 + $0xe18] ss:$40 sps:$4 sm:$0xff]   ;;  %v18709_v9 = vld [vmem:[%s28192_s1 + $0xe6c] ss:$40 sps:$4 sm:$0xff]  }
 0x19a   :  { %v18712_v12 = vld [vmem:[%s28192_s1 + $0x9bc] ss:$40 sps:$4 sm:$0xff]   ;;  %v18710_v14 = vld [vmem:[%s28192_s1 + $0x9b8] ss:$40 sps:$4 sm:$0xff]   ;;  %v18718_v18 = vld [vmem:[%s28192_s1 + $0xf0c] ss:$40 sps:$4 sm:$0xff]  }
 0x19b   :  { %11192 = vmatpush1.bf16.msra.mxu0 %v18656_v10  ;;  %v18704_v10 = vld [vmem:[%s28192_s1 + $0x968] ss:$40 sps:$4 sm:$0xff]   ;;  %v18715_v13 = vld [vmem:[%s28192_s1 + $0xebc] ss:$40 sps:$4 sm:$0xff]   ;;  %v18713_v15 = vld [vmem:[%s28192_s1 + $0xeb8] ss:$40 sps:$4 sm:$0xff]  }
 0x19c   :  { %11233 = vmatpush1.bf16.msra.mxu1 %v18659_v11  ;;  %11193 = vmatprep.subr.bf16.mxu0 %v18664_v27  ;;  %v18707_v11 = vld [vmem:[%s28192_s1 + $0xe68] ss:$40 sps:$4 sm:$0xff]   ;;  %v18721_v19 = vld [vmem:[%s28192_s1 + $0x140c] ss:$40 sps:$4 sm:$0xff]   ;;  %v18724_v27 = vld [vmem:[%s28192_s1 + $0xf5c] ss:$40 sps:$4 sm:$0xff]  }
 0x19d   :  { %11234 = vmatprep.subr.bf16.mxu1 %v18667_v30  ;;  %v18716_v21 = vld [vmem:[%s28192_s1 + $0xf08] ss:$40 sps:$4 sm:$0xff]   ;;  %v18727_v30 = vld [vmem:[%s28192_s1 + $0x145c] ss:$40 sps:$4 sm:$0xff]  }
 0x19e   :  { %v18719_v26 = vld [vmem:[%s28192_s1 + $0x1408] ss:$40 sps:$4 sm:$0xff]  }
 0x19f   :  { %11194 = vmatpush1.bf16.msra.mxu0 %v18662_v35  ;;  %v18722_v35 = vld [vmem:[%s28192_s1 + $0xf58] ss:$40 sps:$4 sm:$0xff]  }
 0x1a0   :  { %11235 = vmatpush1.bf16.msra.mxu1 %v18665_v29  ;;  %11195 = vmatprep.subr.bf16.mxu0 %v18670_v31  ;;  %v18725_v29 = vld [vmem:[%s28192_s1 + $0x1458] ss:$40 sps:$4 sm:$0xff]   ;;  %v18730_v31 = vld [vmem:[%s28192_s1 + $0xfac] ss:$40 sps:$4 sm:$0xff]  }
 0x1a1   :  { %11236 = vmatprep.subr.bf16.mxu1 %v18673_v32  ;;  %v18733_v32 = vld [vmem:[%s28192_s1 + $0x14ac] ss:$40 sps:$4 sm:$0xff]  }
 0x1a3   :  { %11196 = vmatpush1.bf16.msra.mxu0 %v18668_v34  ;;  %v18728_v34 = vld [vmem:[%s28192_s1 + $0xfa8] ss:$40 sps:$4 sm:$0xff]  }
 0x1a4   :  { %11237 = vmatpush1.bf16.msra.mxu1 %v18671_v23  ;;  %11197 = vmatprep.subr.bf16.mxu0 %v18676_v44  ;;  %v18731_v23 = vld [vmem:[%s28192_s1 + $0x14a8] ss:$40 sps:$4 sm:$0xff]   ;;  %v18736_v44 = vld [vmem:[%s28192_s1 + $0xffc] ss:$40 sps:$4 sm:$0xff]  }
 0x1a5   :  { %11238 = vmatprep.subr.bf16.mxu1 %v18679_v22  ;;  %v18739_v22 = vld [vmem:[%s28192_s1 + $0x14fc] ss:$40 sps:$4 sm:$0xff]  }
 0x1a7   :  { %11198 = vmatpush1.bf16.msra.mxu0 %v18674_v45  ;;  %v18734_v45 = vld [vmem:[%s28192_s1 + $0xff8] ss:$40 sps:$4 sm:$0xff]  }
 0x1a8   :  { %11239 = vmatpush1.bf16.msra.mxu1 %v18677_v46  ;;  %11199 = vmatprep.subr.bf16.mxu0 %v18682_v50  ;;  %v18737_v46 = vld [vmem:[%s28192_s1 + $0x14f8] ss:$40 sps:$4 sm:$0xff]   ;;  %v18742_v50 = vld [vmem:[%s28192_s1 + $0x104c] ss:$40 sps:$4 sm:$0xff]  }
 0x1a9   :  { %11240 = vmatprep.subr.bf16.mxu1 %v18685_v52  ;;  %v18745_v52 = vld [vmem:[%s28192_s1 + $0x154c] ss:$40 sps:$4 sm:$0xff]  }
 0x1ab   :  { %11200 = vmatpush1.bf16.msra.mxu0 %v18680_v61  ;;  %v18740_v61 = vld [vmem:[%s28192_s1 + $0x1048] ss:$40 sps:$4 sm:$0xff]  }
 0x1ac   :  { %11241 = vmatpush1.bf16.msra.mxu1 %v18683_v53  ;;  %11201 = vmatprep.subr.bf16.mxu0 %v18688_v54  ;;  %v18743_v53 = vld [vmem:[%s28192_s1 + $0x1548] ss:$40 sps:$4 sm:$0xff]   ;;  %v18748_v54 = vld [vmem:[%s28192_s1 + $0x109c] ss:$40 sps:$4 sm:$0xff]  }
 0x1ad   :  { %11242 = vmatprep.subr.bf16.mxu1 %v18691_v55  ;;  %v18751_v55 = vld [vmem:[%s28192_s1 + $0x159c] ss:$40 sps:$4 sm:$0xff]  }
 0x1af   :  { %11202 = vmatpush1.bf16.msra.mxu0 %v18686_v56  ;;  %v18746_v56 = vld [vmem:[%s28192_s1 + $0x1098] ss:$40 sps:$4 sm:$0xff]  }
 0x1b0   :  { %11243 = vmatpush1.bf16.msra.mxu1 %v18689_v57  ;;  %11203 = vmatprep.subr.bf16.mxu0 %v18694_v62  ;;  %v18749_v57 = vld [vmem:[%s28192_s1 + $0x1598] ss:$40 sps:$4 sm:$0xff]   ;;  %v18754_v62 = vld [vmem:[%s28192_s1 + $0x10ec] ss:$40 sps:$4 sm:$0xff]  }
 0x1b1   :  { %11244 = vmatprep.subr.bf16.mxu1 %v18697_v40  ;;  %v18757_v40 = vld [vmem:[%s28192_s1 + $0x15ec] ss:$40 sps:$4 sm:$0xff]  }
 0x1b3   :  { %11204 = vmatpush1.bf16.msra.mxu0 %v18692_v41 }
 0x1b4   :  { %11245 = vmatpush1.bf16.msra.mxu1 %v18695_v63  ;;  %11205 = vmatprep.subr.bf16.mxu0 %v18700_v2  ;;  %v18752_v2 = vld [vmem:[%s28192_s1 + $0x10e8] ss:$40 sps:$4 sm:$0xff]  }
 0x1b5   :  { %11246 = vmatprep.subr.bf16.mxu1 %v18703_v3 }
 0x1b7   :  { %11206 = vmatpush1.bf16.msra.mxu0 %v18698_v4 }
 0x1b8   :  { %11247 = vmatpush1.bf16.msra.mxu1 %v18701_v5  ;;  %11207 = vmatprep.subr.bf16.mxu0 %v18706_v8  ;;  %v18755_v8 = vld [vmem:[%s28192_s1 + $0x15e8] ss:$40 sps:$4 sm:$0xff]  }
 0x1b9   :  { %11248 = vmatprep.subr.bf16.mxu1 %v18709_v9 }
 0x1bb   :  { %11208 = vmatpush1.bf16.msra.mxu0 %v18704_v10 }
 0x1bc   :  { %11249 = vmatpush1.bf16.msra.mxu1 %v18707_v11  ;;  %11209 = vmatprep.subr.bf16.mxu0 %v18712_v12 }
 0x1bd   :  { %11250 = vmatprep.subr.bf16.mxu1 %v18715_v13 }
 0x1bf   :  { %11210 = vmatpush1.bf16.msra.mxu0 %v18710_v14 }
 0x1c0   :  { %11251 = vmatpush1.bf16.msra.mxu1 %v18713_v15  ;;  %11261 = vmatprep.subr.bf16.mxu0 %v18718_v18  ;;  %v18763_v15 = vld [vmem:[%s28192_s1 + $0x163c] ss:$40 sps:$4 sm:$0xff]  }
 0x1c1   :  { %11302 = vmatprep.subr.bf16.mxu1 %v18721_v19  ;;  %v18761_v19 = vld [vmem:[%s28192_s1 + $0x1638] ss:$40 sps:$4 sm:$0xff]  }
 0x1c2   :  { %11212 = vmatmul.mubr.bf16.vlgmr.msra.gmra.mrb[24].mxu0 %v21501_v7 }
 0x1c3   :  { %11253 = vmatmul.mubr.bf16.vlgmr.msra.gmra.mrb[24].mxu1 %v21719_v16  ;;  %11262 = vmatpush1.bf16.msra.mxu0 %v18716_v21  ;;  %v18766_v21 = vld [vmem:[%s28192_s1 + $0x118c] ss:$40 sps:$4 sm:$0xff]  }
 0x1c4   :  { %11303 = vmatpush1.bf16.msra.mxu1 %v18719_v26  ;;  %11263 = vmatprep.subr.bf16.mxu0 %v18724_v27  ;;  %v18769_v26 = vld [vmem:[%s28192_s1 + $0x168c] ss:$40 sps:$4 sm:$0xff]   ;;  %v18764_v27 = vld [vmem:[%s28192_s1 + $0x1188] ss:$40 sps:$4 sm:$0xff]  }
 0x1c5   :  { %11304 = vmatprep.subr.bf16.mxu1 %v18727_v30  ;;  %11293 = vmatprep.mubr.bf16.mxu0 %v21599_v37  ;;  %v18767_v30 = vld [vmem:[%s28192_s1 + $0x1688] ss:$40 sps:$4 sm:$0xff]  }
 0x1c6   :  { %11334 = vmatprep.mubr.bf16.mxu1 %v21749_v24 }
 0x1c7   :  { %11264 = vmatpush1.bf16.msra.mxu0 %v18722_v35  ;;  %v18772_v35 = vld [vmem:[%s28192_s1 + $0x11dc] ss:$40 sps:$4 sm:$0xff]  }
 0x1c8   :  { %11305 = vmatpush1.bf16.msra.mxu1 %v18725_v29  ;;  %11265 = vmatprep.subr.bf16.mxu0 %v18730_v31  ;;  %v18775_v29 = vld [vmem:[%s28192_s1 + $0x16dc] ss:$40 sps:$4 sm:$0xff]   ;;  %v18770_v31 = vld [vmem:[%s28192_s1 + $0x11d8] ss:$40 sps:$4 sm:$0xff]  }
 0x1c9   :  { %11306 = vmatprep.subr.bf16.mxu1 %v18733_v32  ;;  %v18773_v32 = vld [vmem:[%s28192_s1 + $0x16d8] ss:$40 sps:$4 sm:$0xff]  }
 0x1cb   :  { %11266 = vmatpush1.bf16.msra.mxu0 %v18728_v34  ;;  %v18778_v34 = vld [vmem:[%s28192_s1 + $0x122c] ss:$40 sps:$4 sm:$0xff]  }
 0x1cc   :  { %11307 = vmatpush1.bf16.msra.mxu1 %v18731_v23  ;;  %11267 = vmatprep.subr.bf16.mxu0 %v18736_v44  ;;  %v18781_v23 = vld [vmem:[%s28192_s1 + $0x172c] ss:$40 sps:$4 sm:$0xff]   ;;  %v18776_v44 = vld [vmem:[%s28192_s1 + $0x1228] ss:$40 sps:$4 sm:$0xff]  }
 0x1cd   :  { %11308 = vmatprep.subr.bf16.mxu1 %v18739_v22  ;;  %v18779_v22 = vld [vmem:[%s28192_s1 + $0x1728] ss:$40 sps:$4 sm:$0xff]  }
 0x1cf   :  { %11268 = vmatpush1.bf16.msra.mxu0 %v18734_v45  ;;  %v18784_v45 = vld [vmem:[%s28192_s1 + $0x127c] ss:$40 sps:$4 sm:$0xff]  }
 0x1d0   :  { %11309 = vmatpush1.bf16.msra.mxu1 %v18737_v46  ;;  %11269 = vmatprep.subr.bf16.mxu0 %v18742_v50  ;;  %v18787_v46 = vld [vmem:[%s28192_s1 + $0x177c] ss:$40 sps:$4 sm:$0xff]   ;;  %v18782_v50 = vld [vmem:[%s28192_s1 + $0x1278] ss:$40 sps:$4 sm:$0xff]  }
 0x1d1   :  { %11310 = vmatprep.subr.bf16.mxu1 %v18745_v52  ;;  %v18785_v52 = vld [vmem:[%s28192_s1 + $0x1778] ss:$40 sps:$4 sm:$0xff]  }
 0x1d3   :  { %11270 = vmatpush1.bf16.msra.mxu0 %v18740_v61  ;;  %v18790_v61 = vld [vmem:[%s28192_s1 + $0x12cc] ss:$40 sps:$4 sm:$0xff]  }
 0x1d4   :  { %11311 = vmatpush1.bf16.msra.mxu1 %v18743_v53  ;;  %11271 = vmatprep.subr.bf16.mxu0 %v18748_v54  ;;  %v18793_v53 = vld [vmem:[%s28192_s1 + $0x17cc] ss:$40 sps:$4 sm:$0xff]   ;;  %v18788_v54 = vld [vmem:[%s28192_s1 + $0x12c8] ss:$40 sps:$4 sm:$0xff]  }
 0x1d5   :  { %11312 = vmatprep.subr.bf16.mxu1 %v18751_v55  ;;  %v10967_v41 = vpop.f32.mrb[12].mxu0  ;;  %v18791_v55 = vld [vmem:[%s28192_s1 + $0x17c8] ss:$40 sps:$4 sm:$0xff]  }
 0x1d6   :  { %v11008_v63 = vpop.f32.mrb[12].mxu1  ;;  %v10968_v3 = vadd.f32 %v10967_v41, %v22694_v20  ;;  %v10969_v4 = vpop.f32.mrb[13].mxu0  ;;  %v18760_v20 = vld [vmem:[%s28192_s1 + $0x113c] ss:$40 sps:$4 sm:$0xff]   ;;  %v18802_v41 = vld [vmem:[%s28192_s1 + $0x136c] ss:$40 sps:$4 sm:$0xff]  }
 0x1d7   :  { %v11010_v5 = vpop.f32.mrb[13].mxu1  ;;  %v10970_v9 = vadd.f32 %v10969_v4, %v22702_v28  ;;  %v10971_v10 = vpop.f32.mrb[14].mxu0  ;;  %11272 = vmatpush1.bf16.msra.mxu0 %v18746_v56  ;;  %v18758_v28 = vld [vmem:[%s28192_s1 + $0x1138] ss:$40 sps:$4 sm:$0xff]   ;;  %v18796_v56 = vld [vmem:[%s28192_s1 + $0x131c] ss:$40 sps:$4 sm:$0xff]  }
 0x1d8   :  { %v11012_v11 = vpop.f32.mrb[14].mxu1  ;;  %11313 = vmatpush1.bf16.msra.mxu1 %v18749_v57  ;;  %v22896_v12 = vadd.f32 %v11008_v63, %v10968_v3  ;;  %v10972_v13 = vpop.f32.mrb[15].mxu0  ;;  %11273 = vmatprep.subr.bf16.mxu0 %v18754_v62  ;;  %v18799_v57 = vld [vmem:[%s28192_s1 + $0x181c] ss:$40 sps:$4 sm:$0xff]   ;;  %v18794_v62 = vld [vmem:[%s28192_s1 + $0x1318] ss:$40 sps:$4 sm:$0xff]  }
 0x1d9   :  { %v11013_v14 = vpop.f32.mrb[15].mxu1  ;;  %11314 = vmatprep.subr.bf16.mxu1 %v18757_v40  ;;  %v22904_v18 = vadd.f32 %v11010_v5, %v10970_v9  ;;  %v18797_v40 = vld [vmem:[%s28192_s1 + $0x1818] ss:$40 sps:$4 sm:$0xff]   ;;  %v18805_v63 = vld [vmem:[%s28192_s1 + $0x186c] ss:$40 sps:$4 sm:$0xff]  }
 0x1da   :  { %v18803_v3 = vld [vmem:[%s28192_s1 + $0x1868] ss:$40 sps:$4 sm:$0xff]   ;;  %v18808_v4 = vld [vmem:[%s28192_s1 + $0x13bc] ss:$40 sps:$4 sm:$0xff]   ;;  %v18809_v9 = vld [vmem:[%s28192_s1 + $0x18b8] ss:$40 sps:$4 sm:$0xff]  }
 0x1db   :  { %11274 = vmatpush1.bf16.msra.mxu0 %v18752_v2  ;;  %v18800_v2 = vld [vmem:[%s28192_s1 + $0x1368] ss:$40 sps:$4 sm:$0xff]   ;;  %v18811_v5 = vld [vmem:[%s28192_s1 + $0x18bc] ss:$40 sps:$4 sm:$0xff]   ;;  %v18814_v10 = vld [vmem:[%s28192_s1 + $0x190c] ss:$40 sps:$4 sm:$0xff]  }
 0x1dc   :  { %11315 = vmatpush1.bf16.msra.mxu1 %v18755_v8  ;;  %11275 = vmatprep.subr.bf16.mxu0 %v18760_v20  ;;  %v18806_v8 = vld [vmem:[%s28192_s1 + $0x13b8] ss:$40 sps:$4 sm:$0xff]   ;;  %v18817_v11 = vld [vmem:[%s28192_s1 + $0x1e0c] ss:$40 sps:$4 sm:$0xff]   ;;  %v18812_v13 = vld [vmem:[%s28192_s1 + $0x1908] ss:$40 sps:$4 sm:$0xff]  }
 0x1dd   :  { %11316 = vmatprep.subr.bf16.mxu1 %v18763_v15  ;;  %v18815_v14 = vld [vmem:[%s28192_s1 + $0x1e08] ss:$40 sps:$4 sm:$0xff]   ;;  %v18820_v20 = vld [vmem:[%s28192_s1 + $0x195c] ss:$40 sps:$4 sm:$0xff]  }
 0x1de   :  { %v18823_v15 = vld [vmem:[%s28192_s1 + $0x1e5c] ss:$40 sps:$4 sm:$0xff]  }
 0x1df   :  { %11276 = vmatpush1.bf16.msra.mxu0 %v18758_v28  ;;  %v18818_v28 = vld [vmem:[%s28192_s1 + $0x1958] ss:$40 sps:$4 sm:$0xff]  }
 0x1e0   :  { %11317 = vmatpush1.bf16.msra.mxu1 %v18761_v19  ;;  %11277 = vmatprep.subr.bf16.mxu0 %v18766_v21  ;;  %v18821_v19 = vld [vmem:[%s28192_s1 + $0x1e58] ss:$40 sps:$4 sm:$0xff]   ;;  %v18826_v21 = vld [vmem:[%s28192_s1 + $0x19ac] ss:$40 sps:$4 sm:$0xff]  }
 0x1e1   :  { %11318 = vmatprep.subr.bf16.mxu1 %v18769_v26  ;;  %v18829_v26 = vld [vmem:[%s28192_s1 + $0x1eac] ss:$40 sps:$4 sm:$0xff]  }
 0x1e3   :  { %11278 = vmatpush1.bf16.msra.mxu0 %v18764_v27  ;;  %v18824_v27 = vld [vmem:[%s28192_s1 + $0x19a8] ss:$40 sps:$4 sm:$0xff]  }
 0x1e4   :  { %11319 = vmatpush1.bf16.msra.mxu1 %v18767_v30  ;;  %11279 = vmatprep.subr.bf16.mxu0 %v18772_v35  ;;  %v18827_v30 = vld [vmem:[%s28192_s1 + $0x1ea8] ss:$40 sps:$4 sm:$0xff]   ;;  %v18832_v35 = vld [vmem:[%s28192_s1 + $0x19fc] ss:$40 sps:$4 sm:$0xff]  }
 0x1e5   :  { %11320 = vmatprep.subr.bf16.mxu1 %v18775_v29  ;;  %v18835_v29 = vld [vmem:[%s28192_s1 + $0x1efc] ss:$40 sps:$4 sm:$0xff]  }
 0x1e7   :  { %11280 = vmatpush1.bf16.msra.mxu0 %v18770_v31  ;;  %v18830_v31 = vld [vmem:[%s28192_s1 + $0x19f8] ss:$40 sps:$4 sm:$0xff]  }
 0x1e8   :  { %11321 = vmatpush1.bf16.msra.mxu1 %v18773_v32  ;;  %11281 = vmatprep.subr.bf16.mxu0 %v18778_v34  ;;  %v18833_v32 = vld [vmem:[%s28192_s1 + $0x1ef8] ss:$40 sps:$4 sm:$0xff]   ;;  %v18838_v34 = vld [vmem:[%s28192_s1 + $0x1a4c] ss:$40 sps:$4 sm:$0xff]  }
 0x1e9   :  { %11322 = vmatprep.subr.bf16.mxu1 %v18781_v23  ;;  %v18841_v23 = vld [vmem:[%s28192_s1 + $0x1f4c] ss:$40 sps:$4 sm:$0xff]  }
 0x1eb   :  { %11282 = vmatpush1.bf16.msra.mxu0 %v18776_v44  ;;  %v18836_v44 = vld [vmem:[%s28192_s1 + $0x1a48] ss:$40 sps:$4 sm:$0xff]  }
 0x1ec   :  { %11323 = vmatpush1.bf16.msra.mxu1 %v18779_v22  ;;  %11283 = vmatprep.subr.bf16.mxu0 %v18784_v45  ;;  %v18839_v22 = vld [vmem:[%s28192_s1 + $0x1f48] ss:$40 sps:$4 sm:$0xff]   ;;  %v18844_v45 = vld [vmem:[%s28192_s1 + $0x1a9c] ss:$40 sps:$4 sm:$0xff]  }
 0x1ed   :  { %11324 = vmatprep.subr.bf16.mxu1 %v18787_v46  ;;  %v18847_v46 = vld [vmem:[%s28192_s1 + $0x1f9c] ss:$40 sps:$4 sm:$0xff]  }
 0x1ef   :  { %11284 = vmatpush1.bf16.msra.mxu0 %v18782_v50  ;;  %v18842_v50 = vld [vmem:[%s28192_s1 + $0x1a98] ss:$40 sps:$4 sm:$0xff]  }
 0x1f0   :  { %11325 = vmatpush1.bf16.msra.mxu1 %v18785_v52  ;;  %11285 = vmatprep.subr.bf16.mxu0 %v18790_v61  ;;  %v18845_v52 = vld [vmem:[%s28192_s1 + $0x1f98] ss:$40 sps:$4 sm:$0xff]   ;;  %v18850_v61 = vld [vmem:[%s28192_s1 + $0x1aec] ss:$40 sps:$4 sm:$0xff]  }
 0x1f1   :  { %11326 = vmatprep.subr.bf16.mxu1 %v18793_v53  ;;  %v18853_v53 = vld [vmem:[%s28192_s1 + $0x1fec] ss:$40 sps:$4 sm:$0xff]  }
 0x1f3   :  { %11286 = vmatpush1.bf16.msra.mxu0 %v18788_v54 }
 0x1f4   :  { %11327 = vmatpush1.bf16.msra.mxu1 %v18791_v55  ;;  %11287 = vmatprep.subr.bf16.mxu0 %v18796_v56  ;;  %v18848_v56 = vld [vmem:[%s28192_s1 + $0x1ae8] ss:$40 sps:$4 sm:$0xff]  }
 0x1f5   :  { %11328 = vmatprep.subr.bf16.mxu1 %v18799_v57  ;;  %v18851_v57 = vld [vmem:[%s28192_s1 + $0x1fe8] ss:$40 sps:$4 sm:$0xff]  }
 0x1f7   :  { %11288 = vmatpush1.bf16.msra.mxu0 %v18794_v62 }
 0x1f8   :  { %11329 = vmatpush1.bf16.msra.mxu1 %v18797_v40  ;;  %11289 = vmatprep.subr.bf16.mxu0 %v18802_v41 }
 0x1f9   :  { %11330 = vmatprep.subr.bf16.mxu1 %v18805_v63 }
 0x1fb   :  { %11290 = vmatpush1.bf16.msra.mxu0 %v18800_v2 }
 0x1fc   :  { %11331 = vmatpush1.bf16.msra.mxu1 %v18803_v3  ;;  %11291 = vmatprep.subr.bf16.mxu0 %v18808_v4 }
 0x1fd   :  { %11332 = vmatprep.subr.bf16.mxu1 %v18811_v5 }
 0x1ff   :  { %11292 = vmatpush1.bf16.msra.mxu0 %v18806_v8 }
 0x200   :  { %11333 = vmatpush1.bf16.msra.mxu1 %v18809_v9  ;;  %11343 = vmatprep.subr.bf16.mxu0 %v18814_v10  ;;  %v18856_v9 = vld [vmem:[%s28192_s1 + $0x1b3c] ss:$40 sps:$4 sm:$0xff]  }
 0x201   :  { %11384 = vmatprep.subr.bf16.mxu1 %v18817_v11  ;;  %v18857_v11 = vld [vmem:[%s28192_s1 + $0x2038] ss:$40 sps:$4 sm:$0xff]  }
 0x202   :  { %11294 = vmatmul.mubr.bf16.vlgmr.msra.gmra.mrb[28].mxu0 %v21723_v17 }
 0x203   :  { %11335 = vmatmul.mubr.bf16.vlgmr.msra.gmra.mrb[28].mxu1 %v21947_v38  ;;  %11344 = vmatpush1.bf16.msra.mxu0 %v18812_v13  ;;  %v18862_v13 = vld [vmem:[%s28192_s1 + $0x1b8c] ss:$40 sps:$4 sm:$0xff]  }
 0x204   :  { %11385 = vmatpush1.bf16.msra.mxu1 %v18815_v14  ;;  %11345 = vmatprep.subr.bf16.mxu0 %v18820_v20  ;;  %v18865_v14 = vld [vmem:[%s28192_s1 + $0x208c] ss:$40 sps:$4 sm:$0xff]   ;;  %v18860_v20 = vld [vmem:[%s28192_s1 + $0x1b88] ss:$40 sps:$4 sm:$0xff]  }
 0x205   :  { %11386 = vmatprep.subr.bf16.mxu1 %v18823_v15  ;;  %11375 = vmatprep.mubr.bf16.mxu0 %v21753_v25  ;;  %v18863_v15 = vld [vmem:[%s28192_s1 + $0x2088] ss:$40 sps:$4 sm:$0xff]  }
 0x206   :  { %11416 = vmatprep.mubr.bf16.mxu1 %v21971_v42 }
 0x207   :  { %11346 = vmatpush1.bf16.msra.mxu0 %v18818_v28  ;;  %v18868_v28 = vld [vmem:[%s28192_s1 + $0x1bdc] ss:$40 sps:$4 sm:$0xff]  }
 0x208   :  { %11387 = vmatpush1.bf16.msra.mxu1 %v18821_v19  ;;  %11347 = vmatprep.subr.bf16.mxu0 %v18826_v21  ;;  %v18871_v19 = vld [vmem:[%s28192_s1 + $0x20dc] ss:$40 sps:$4 sm:$0xff]   ;;  %v18866_v21 = vld [vmem:[%s28192_s1 + $0x1bd8] ss:$40 sps:$4 sm:$0xff]  }
 0x209   :  { %11388 = vmatprep.subr.bf16.mxu1 %v18829_v26  ;;  %v18869_v26 = vld [vmem:[%s28192_s1 + $0x20d8] ss:$40 sps:$4 sm:$0xff]  }
 0x20b   :  { %11348 = vmatpush1.bf16.msra.mxu0 %v18824_v27  ;;  %v18874_v27 = vld [vmem:[%s28192_s1 + $0x1c2c] ss:$40 sps:$4 sm:$0xff]  }
 0x20c   :  { %11389 = vmatpush1.bf16.msra.mxu1 %v18827_v30  ;;  %11349 = vmatprep.subr.bf16.mxu0 %v18832_v35  ;;  %v18877_v30 = vld [vmem:[%s28192_s1 + $0x212c] ss:$40 sps:$4 sm:$0xff]   ;;  %v18872_v35 = vld [vmem:[%s28192_s1 + $0x1c28] ss:$40 sps:$4 sm:$0xff]  }
 0x20d   :  { %11390 = vmatprep.subr.bf16.mxu1 %v18835_v29  ;;  %v18875_v29 = vld [vmem:[%s28192_s1 + $0x2128] ss:$40 sps:$4 sm:$0xff]  }
 0x20f   :  { %11350 = vmatpush1.bf16.msra.mxu0 %v18830_v31  ;;  %v18880_v31 = vld [vmem:[%s28192_s1 + $0x1c7c] ss:$40 sps:$4 sm:$0xff]  }
 0x210   :  { %11391 = vmatpush1.bf16.msra.mxu1 %v18833_v32  ;;  %11351 = vmatprep.subr.bf16.mxu0 %v18838_v34  ;;  %v18883_v32 = vld [vmem:[%s28192_s1 + $0x217c] ss:$40 sps:$4 sm:$0xff]   ;;  %v18878_v34 = vld [vmem:[%s28192_s1 + $0x1c78] ss:$40 sps:$4 sm:$0xff]  }
 0x211   :  { %11392 = vmatprep.subr.bf16.mxu1 %v18841_v23  ;;  %v18881_v23 = vld [vmem:[%s28192_s1 + $0x2178] ss:$40 sps:$4 sm:$0xff]  }
 0x213   :  { %11352 = vmatpush1.bf16.msra.mxu0 %v18836_v44  ;;  %v18886_v44 = vld [vmem:[%s28192_s1 + $0x1ccc] ss:$40 sps:$4 sm:$0xff]  }
 0x214   :  { %11393 = vmatpush1.bf16.msra.mxu1 %v18839_v22  ;;  %11353 = vmatprep.subr.bf16.mxu0 %v18844_v45  ;;  %v18889_v22 = vld [vmem:[%s28192_s1 + $0x21cc] ss:$40 sps:$4 sm:$0xff]   ;;  %v18884_v45 = vld [vmem:[%s28192_s1 + $0x1cc8] ss:$40 sps:$4 sm:$0xff]  }
 0x215   :  { %11394 = vmatprep.subr.bf16.mxu1 %v18847_v46  ;;  %v11049_v54 = vpop.f32.mrb[16].mxu0  ;;  %v18887_v46 = vld [vmem:[%s28192_s1 + $0x21c8] ss:$40 sps:$4 sm:$0xff]  }
 0x216   :  { %v11090_v55 = vpop.f32.mrb[16].mxu1  ;;  %v11050_v62 = vadd.f32 %v11049_v54, %v22896_v12  ;;  %v11051_v40 = vpop.f32.mrb[17].mxu0  ;;  %v18859_v12 = vld [vmem:[%s28192_s1 + $0x203c] ss:$40 sps:$4 sm:$0xff]   ;;  %v18898_v54 = vld [vmem:[%s28192_s1 + $0x1d6c] ss:$40 sps:$4 sm:$0xff]  }
 0x217   :  { %v11092_v41 = vpop.f32.mrb[17].mxu1  ;;  %v11052_v63 = vadd.f32 %v11051_v40, %v22904_v18  ;;  %v11053_v2 = vpop.f32.mrb[18].mxu0  ;;  %11354 = vmatpush1.bf16.msra.mxu0 %v18842_v50  ;;  %v18854_v18 = vld [vmem:[%s28192_s1 + $0x1b38] ss:$40 sps:$4 sm:$0xff]   ;;  %v18892_v50 = vld [vmem:[%s28192_s1 + $0x1d1c] ss:$40 sps:$4 sm:$0xff]  }
 0x218   :  { %v11094_v3 = vpop.f32.mrb[18].mxu1  ;;  %11395 = vmatpush1.bf16.msra.mxu1 %v18845_v52  ;;  %v23098_v4 = vadd.f32 %v11090_v55, %v11050_v62  ;;  %v11054_v5 = vpop.f32.mrb[19].mxu0  ;;  %11355 = vmatprep.subr.bf16.mxu0 %v18850_v61  ;;  %v18895_v52 = vld [vmem:[%s28192_s1 + $0x221c] ss:$40 sps:$4 sm:$0xff]   ;;  %v18890_v61 = vld [vmem:[%s28192_s1 + $0x1d18] ss:$40 sps:$4 sm:$0xff]  }
 0x219   :  { %v11095_v8 = vpop.f32.mrb[19].mxu1  ;;  %11396 = vmatprep.subr.bf16.mxu1 %v18853_v53  ;;  %v23106_v10 = vadd.f32 %v11092_v41, %v11052_v63  ;;  %v18893_v53 = vld [vmem:[%s28192_s1 + $0x2218] ss:$40 sps:$4 sm:$0xff]   ;;  %v18901_v55 = vld [vmem:[%s28192_s1 + $0x226c] ss:$40 sps:$4 sm:$0xff]  }
 0x21a   :  { %v18904_v62 = vld [vmem:[%s28192_s1 + $0x1dbc] ss:$40 sps:$4 sm:$0xff]   ;;  %v18902_v41 = vld [vmem:[%s28192_s1 + $0x1db8] ss:$40 sps:$4 sm:$0xff]   ;;  %v18910_v2 = vld [vmem:[%s28192_s1 + $0x230c] ss:$40 sps:$4 sm:$0xff]  }
 0x21b   :  { %11356 = vmatpush1.bf16.msra.mxu0 %v18848_v56  ;;  %v18896_v56 = vld [vmem:[%s28192_s1 + $0x1d68] ss:$40 sps:$4 sm:$0xff]   ;;  %v18907_v40 = vld [vmem:[%s28192_s1 + $0x22bc] ss:$40 sps:$4 sm:$0xff]   ;;  %v18905_v63 = vld [vmem:[%s28192_s1 + $0x22b8] ss:$40 sps:$4 sm:$0xff]  }
 0x21c   :  { %11397 = vmatpush1.bf16.msra.mxu1 %v18851_v57  ;;  %11357 = vmatprep.subr.bf16.mxu0 %v18856_v9  ;;  %v18899_v57 = vld [vmem:[%s28192_s1 + $0x2268] ss:$40 sps:$4 sm:$0xff]   ;;  %v18913_v3 = vld [vmem:[%s28192_s1 + $0x280c] ss:$40 sps:$4 sm:$0xff]   ;;  %v18916_v9 = vld [vmem:[%s28192_s1 + $0x235c] ss:$40 sps:$4 sm:$0xff]  }
 0x21d   :  { %11398 = vmatprep.subr.bf16.mxu1 %v18859_v12  ;;  %v18908_v5 = vld [vmem:[%s28192_s1 + $0x2308] ss:$40 sps:$4 sm:$0xff]   ;;  %v18919_v12 = vld [vmem:[%s28192_s1 + $0x285c] ss:$40 sps:$4 sm:$0xff]  }
 0x21e   :  { %v18911_v8 = vld [vmem:[%s28192_s1 + $0x2808] ss:$40 sps:$4 sm:$0xff]  }
 0x21f   :  { %11358 = vmatpush1.bf16.msra.mxu0 %v18854_v18  ;;  %v18914_v18 = vld [vmem:[%s28192_s1 + $0x2358] ss:$40 sps:$4 sm:$0xff]  }
 0x220   :  { %11399 = vmatpush1.bf16.msra.mxu1 %v18857_v11  ;;  %11359 = vmatprep.subr.bf16.mxu0 %v18862_v13  ;;  %v18917_v11 = vld [vmem:[%s28192_s1 + $0x2858] ss:$40 sps:$4 sm:$0xff]   ;;  %v18922_v13 = vld [vmem:[%s28192_s1 + $0x23ac] ss:$40 sps:$4 sm:$0xff]  }
 0x221   :  { %11400 = vmatprep.subr.bf16.mxu1 %v18865_v14  ;;  %v18925_v14 = vld [vmem:[%s28192_s1 + $0x28ac] ss:$40 sps:$4 sm:$0xff]  }
 0x223   :  { %11360 = vmatpush1.bf16.msra.mxu0 %v18860_v20  ;;  %v18920_v20 = vld [vmem:[%s28192_s1 + $0x23a8] ss:$40 sps:$4 sm:$0xff]  }
 0x224   :  { %11401 = vmatpush1.bf16.msra.mxu1 %v18863_v15  ;;  %11361 = vmatprep.subr.bf16.mxu0 %v18868_v28  ;;  %v18923_v15 = vld [vmem:[%s28192_s1 + $0x28a8] ss:$40 sps:$4 sm:$0xff]   ;;  %v18928_v28 = vld [vmem:[%s28192_s1 + $0x23fc] ss:$40 sps:$4 sm:$0xff]  }
 0x225   :  { %11402 = vmatprep.subr.bf16.mxu1 %v18871_v19  ;;  %v18931_v19 = vld [vmem:[%s28192_s1 + $0x28fc] ss:$40 sps:$4 sm:$0xff]  }
 0x227   :  { %11362 = vmatpush1.bf16.msra.mxu0 %v18866_v21  ;;  %v18926_v21 = vld [vmem:[%s28192_s1 + $0x23f8] ss:$40 sps:$4 sm:$0xff]  }
 0x228   :  { %11403 = vmatpush1.bf16.msra.mxu1 %v18869_v26  ;;  %11363 = vmatprep.subr.bf16.mxu0 %v18874_v27  ;;  %v18929_v26 = vld [vmem:[%s28192_s1 + $0x28f8] ss:$40 sps:$4 sm:$0xff]   ;;  %v18934_v27 = vld [vmem:[%s28192_s1 + $0x244c] ss:$40 sps:$4 sm:$0xff]  }
 0x229   :  { %11404 = vmatprep.subr.bf16.mxu1 %v18877_v30  ;;  %v18937_v30 = vld [vmem:[%s28192_s1 + $0x294c] ss:$40 sps:$4 sm:$0xff]  }
 0x22b   :  { %11364 = vmatpush1.bf16.msra.mxu0 %v18872_v35  ;;  %v18932_v35 = vld [vmem:[%s28192_s1 + $0x2448] ss:$40 sps:$4 sm:$0xff]  }
 0x22c   :  { %11405 = vmatpush1.bf16.msra.mxu1 %v18875_v29  ;;  %11365 = vmatprep.subr.bf16.mxu0 %v18880_v31  ;;  %v18935_v29 = vld [vmem:[%s28192_s1 + $0x2948] ss:$40 sps:$4 sm:$0xff]   ;;  %v18940_v31 = vld [vmem:[%s28192_s1 + $0x249c] ss:$40 sps:$4 sm:$0xff]  }
 0x22d   :  { %11406 = vmatprep.subr.bf16.mxu1 %v18883_v32  ;;  %v18943_v32 = vld [vmem:[%s28192_s1 + $0x299c] ss:$40 sps:$4 sm:$0xff]  }
 0x22f   :  { %11366 = vmatpush1.bf16.msra.mxu0 %v18878_v34  ;;  %v18938_v34 = vld [vmem:[%s28192_s1 + $0x2498] ss:$40 sps:$4 sm:$0xff]  }
 0x230   :  { %11407 = vmatpush1.bf16.msra.mxu1 %v18881_v23  ;;  %11367 = vmatprep.subr.bf16.mxu0 %v18886_v44  ;;  %v18941_v23 = vld [vmem:[%s28192_s1 + $0x2998] ss:$40 sps:$4 sm:$0xff]   ;;  %v18946_v44 = vld [vmem:[%s28192_s1 + $0x24ec] ss:$40 sps:$4 sm:$0xff]  }
 0x231   :  { %11408 = vmatprep.subr.bf16.mxu1 %v18889_v22  ;;  %v18949_v22 = vld [vmem:[%s28192_s1 + $0x29ec] ss:$40 sps:$4 sm:$0xff]  }
 0x233   :  { %11368 = vmatpush1.bf16.msra.mxu0 %v18884_v45 }
 0x234   :  { %11409 = vmatpush1.bf16.msra.mxu1 %v18887_v46  ;;  %11369 = vmatprep.subr.bf16.mxu0 %v18892_v50  ;;  %v18944_v50 = vld [vmem:[%s28192_s1 + $0x24e8] ss:$40 sps:$4 sm:$0xff]  }
 0x235   :  { %11410 = vmatprep.subr.bf16.mxu1 %v18895_v52  ;;  %v18947_v52 = vld [vmem:[%s28192_s1 + $0x29e8] ss:$40 sps:$4 sm:$0xff]  }
 0x237   :  { %11370 = vmatpush1.bf16.msra.mxu0 %v18890_v61 }
 0x238   :  { %11411 = vmatpush1.bf16.msra.mxu1 %v18893_v53  ;;  %11371 = vmatprep.subr.bf16.mxu0 %v18898_v54 }
 0x239   :  { %11412 = vmatprep.subr.bf16.mxu1 %v18901_v55 }
 0x23b   :  { %11372 = vmatpush1.bf16.msra.mxu0 %v18896_v56 }
 0x23c   :  { %11413 = vmatpush1.bf16.msra.mxu1 %v18899_v57  ;;  %11373 = vmatprep.subr.bf16.mxu0 %v18904_v62 }
 0x23d   :  { %11414 = vmatprep.subr.bf16.mxu1 %v18907_v40 }
 0x23f   :  { %11374 = vmatpush1.bf16.msra.mxu0 %v18902_v41  ;;  %v18952_v41 = vld [vmem:[%s28192_s1 + $0x253c] ss:$40 sps:$4 sm:$0xff]  }
 0x240   :  { %11415 = vmatpush1.bf16.msra.mxu1 %v18905_v63  ;;  %11425 = vmatprep.subr.bf16.mxu0 %v18910_v2  ;;  %v18953_v63 = vld [vmem:[%s28192_s1 + $0x2a38] ss:$40 sps:$4 sm:$0xff]   ;;  %v18958_v2 = vld [vmem:[%s28192_s1 + $0x258c] ss:$40 sps:$4 sm:$0xff]  }
 0x241   :  { %11466 = vmatprep.subr.bf16.mxu1 %v18913_v3  ;;  %v18961_v3 = vld [vmem:[%s28192_s1 + $0x2a8c] ss:$40 sps:$4 sm:$0xff]  }
 0x242   :  { %11376 = vmatmul.mubr.bf16.vlgmr.msra.gmra.mrb[32].mxu0 %v21951_v39 }
 0x243   :  { %11417 = vmatmul.mubr.bf16.vlgmr.msra.gmra.mrb[32].mxu1 %v22168_v59  ;;  %11426 = vmatpush1.bf16.msra.mxu0 %v18908_v5  ;;  %v18956_v5 = vld [vmem:[%s28192_s1 + $0x2588] ss:$40 sps:$4 sm:$0xff]  }
 0x244   :  { %11467 = vmatpush1.bf16.msra.mxu1 %v18911_v8  ;;  %11427 = vmatprep.subr.bf16.mxu0 %v18916_v9  ;;  %v18959_v8 = vld [vmem:[%s28192_s1 + $0x2a88] ss:$40 sps:$4 sm:$0xff]   ;;  %v18964_v9 = vld [vmem:[%s28192_s1 + $0x25dc] ss:$40 sps:$4 sm:$0xff]  }
 0x245   :  { %11468 = vmatprep.subr.bf16.mxu1 %v18919_v12  ;;  %11457 = vmatprep.mubr.bf16.mxu0 %v21975_v43  ;;  %v18967_v12 = vld [vmem:[%s28192_s1 + $0x2adc] ss:$40 sps:$4 sm:$0xff]  }
 0x246   :  { %11498 = vmatprep.mubr.bf16.mxu1 %v22193_v0 }
 0x247   :  { %11428 = vmatpush1.bf16.msra.mxu0 %v18914_v18  ;;  %v18962_v18 = vld [vmem:[%s28192_s1 + $0x25d8] ss:$40 sps:$4 sm:$0xff]  }
 0x248   :  { %11469 = vmatpush1.bf16.msra.mxu1 %v18917_v11  ;;  %11429 = vmatprep.subr.bf16.mxu0 %v18922_v13  ;;  %v18965_v11 = vld [vmem:[%s28192_s1 + $0x2ad8] ss:$40 sps:$4 sm:$0xff]   ;;  %v18970_v13 = vld [vmem:[%s28192_s1 + $0x262c] ss:$40 sps:$4 sm:$0xff]  }
 0x249   :  { %11470 = vmatprep.subr.bf16.mxu1 %v18925_v14  ;;  %v18973_v14 = vld [vmem:[%s28192_s1 + $0x2b2c] ss:$40 sps:$4 sm:$0xff]  }
 0x24b   :  { %11430 = vmatpush1.bf16.msra.mxu0 %v18920_v20  ;;  %v18968_v20 = vld [vmem:[%s28192_s1 + $0x2628] ss:$40 sps:$4 sm:$0xff]  }
 0x24c   :  { %11471 = vmatpush1.bf16.msra.mxu1 %v18923_v15  ;;  %11431 = vmatprep.subr.bf16.mxu0 %v18928_v28  ;;  %v18971_v15 = vld [vmem:[%s28192_s1 + $0x2b28] ss:$40 sps:$4 sm:$0xff]   ;;  %v18976_v28 = vld [vmem:[%s28192_s1 + $0x267c] ss:$40 sps:$4 sm:$0xff]  }
 0x24d   :  { %11472 = vmatprep.subr.bf16.mxu1 %v18931_v19  ;;  %v18979_v19 = vld [vmem:[%s28192_s1 + $0x2b7c] ss:$40 sps:$4 sm:$0xff]  }
 0x24f   :  { %11432 = vmatpush1.bf16.msra.mxu0 %v18926_v21  ;;  %v18974_v21 = vld [vmem:[%s28192_s1 + $0x2678] ss:$40 sps:$4 sm:$0xff]  }
 0x250   :  { %11473 = vmatpush1.bf16.msra.mxu1 %v18929_v26  ;;  %11433 = vmatprep.subr.bf16.mxu0 %v18934_v27  ;;  %v18977_v26 = vld [vmem:[%s28192_s1 + $0x2b78] ss:$40 sps:$4 sm:$0xff]   ;;  %v18982_v27 = vld [vmem:[%s28192_s1 + $0x26cc] ss:$40 sps:$4 sm:$0xff]  }
 0x251   :  { %11474 = vmatprep.subr.bf16.mxu1 %v18937_v30  ;;  %v18985_v30 = vld [vmem:[%s28192_s1 + $0x2bcc] ss:$40 sps:$4 sm:$0xff]  }
 0x253   :  { %11434 = vmatpush1.bf16.msra.mxu0 %v18932_v35  ;;  %v18980_v35 = vld [vmem:[%s28192_s1 + $0x26c8] ss:$40 sps:$4 sm:$0xff]  }
 0x254   :  { %11475 = vmatpush1.bf16.msra.mxu1 %v18935_v29  ;;  %11435 = vmatprep.subr.bf16.mxu0 %v18940_v31  ;;  %v18983_v29 = vld [vmem:[%s28192_s1 + $0x2bc8] ss:$40 sps:$4 sm:$0xff]   ;;  %v18988_v31 = vld [vmem:[%s28192_s1 + $0x271c] ss:$40 sps:$4 sm:$0xff]  }
 0x255   :  { %11476 = vmatprep.subr.bf16.mxu1 %v18943_v32  ;;  %v11131_v45 = vpop.f32.mrb[20].mxu0  ;;  %v18991_v32 = vld [vmem:[%s28192_s1 + $0x2c1c] ss:$40 sps:$4 sm:$0xff]  }
 0x256   :  { %v23292_v46 = vpop.f32.mrb[20].mxu1  ;;  %v23301_v61 = vadd.f32 %v11131_v45, %v23098_v4  ;;  %v11133_v53 = vpop.f32.mrb[21].mxu0  ;;  %v18955_v4 = vld [vmem:[%s28192_s1 + $0x2a3c] ss:$40 sps:$4 sm:$0xff]   ;;  %v18992_v45 = vld [vmem:[%s28192_s1 + $0x2768] ss:$40 sps:$4 sm:$0xff]  }
 0x257   :  { %v23303_v54 = vpop.f32.mrb[21].mxu1  ;;  %v23306_v55 = vadd.f32 %v11133_v53, %v23106_v10  ;;  %v11135_v56 = vpop.f32.mrb[22].mxu0  ;;  %11436 = vmatpush1.bf16.msra.mxu0 %v18938_v34  ;;  %v18950_v10 = vld [vmem:[%s28192_s1 + $0x2538] ss:$40 sps:$4 sm:$0xff]   ;;  %v19003_v53 = vld [vmem:[%s28192_s1 + $0x2cbc] ss:$40 sps:$4 sm:$0xff]  }
 0x258   :  { %v11176_v57 = vpop.f32.mrb[22].mxu1  ;;  %11477 = vmatpush1.bf16.msra.mxu1 %v18941_v23  ;;  %v11136_v62 = vpop.f32.mrb[23].mxu0  ;;  %11437 = vmatprep.subr.bf16.mxu0 %v18946_v44  ;;  %v18986_v34 = vld [vmem:[%s28192_s1 + $0x2718] ss:$40 sps:$4 sm:$0xff]   ;;  %v18994_v44 = vld [vmem:[%s28192_s1 + $0x276c] ss:$40 sps:$4 sm:$0xff]  }
 0x259   :  { %v11177_v40 = vpop.f32.mrb[23].mxu1  ;;  %11478 = vmatprep.subr.bf16.mxu1 %v18949_v22  ;;  %v18989_v23 = vld [vmem:[%s28192_s1 + $0x2c18] ss:$40 sps:$4 sm:$0xff]   ;;  %v18997_v22 = vld [vmem:[%s28192_s1 + $0x2c6c] ss:$40 sps:$4 sm:$0xff]  }
 0x25a   :  { %v18998_v56 = vld [vmem:[%s28192_s1 + $0x27b8] ss:$40 sps:$4 sm:$0xff]   ;;  %v19006_v62 = vld [vmem:[%s28192_s1 + $0x2d0c] ss:$40 sps:$4 sm:$0xff]  }
 0x25b   :  { %11438 = vmatpush1.bf16.msra.mxu0 %v18944_v50  ;;  %v18995_v50 = vld [vmem:[%s28192_s1 + $0x2c68] ss:$40 sps:$4 sm:$0xff]   ;;  %v19001_v57 = vld [vmem:[%s28192_s1 + $0x2cb8] ss:$40 sps:$4 sm:$0xff]   ;;  %v19009_v40 = vld [vmem:[%s28192_s1 + $0x320c] ss:$40 sps:$4 sm:$0xff]  }
 0x25c   :  { %11479 = vmatpush1.bf16.msra.mxu1 %v18947_v52  ;;  %11439 = vmatprep.subr.bf16.mxu0 %v18952_v41  ;;  %v19000_v52 = vld [vmem:[%s28192_s1 + $0x27bc] ss:$40 sps:$4 sm:$0xff]   ;;  %v19004_v41 = vld [vmem:[%s28192_s1 + $0x2d08] ss:$40 sps:$4 sm:$0xff]  }
 0x25d   :  { %11480 = vmatprep.subr.bf16.mxu1 %v18955_v4  ;;  %v19007_v4 = vld [vmem:[%s28192_s1 + $0x3208] ss:$40 sps:$4 sm:$0xff]  }
 0x25f   :  { %11440 = vmatpush1.bf16.msra.mxu0 %v18950_v10  ;;  %v19012_v10 = vld [vmem:[%s28192_s1 + $0x2d5c] ss:$40 sps:$4 sm:$0xff]  }
 0x260   :  { %11481 = vmatpush1.bf16.msra.mxu1 %v18953_v63  ;;  %11441 = vmatprep.subr.bf16.mxu0 %v18958_v2  ;;  %v19015_v63 = vld [vmem:[%s28192_s1 + $0x325c] ss:$40 sps:$4 sm:$0xff]   ;;  %v19010_v2 = vld [vmem:[%s28192_s1 + $0x2d58] ss:$40 sps:$4 sm:$0xff]  }
 0x261   :  { %11482 = vmatprep.subr.bf16.mxu1 %v18961_v3  ;;  %v19013_v3 = vld [vmem:[%s28192_s1 + $0x3258] ss:$40 sps:$4 sm:$0xff]  }
 0x263   :  { %11442 = vmatpush1.bf16.msra.mxu0 %v18956_v5  ;;  %v19018_v5 = vld [vmem:[%s28192_s1 + $0x2dac] ss:$40 sps:$4 sm:$0xff]  }
 0x264   :  { %11483 = vmatpush1.bf16.msra.mxu1 %v18959_v8  ;;  %11443 = vmatprep.subr.bf16.mxu0 %v18964_v9  ;;  %v19021_v8 = vld [vmem:[%s28192_s1 + $0x32ac] ss:$40 sps:$4 sm:$0xff]   ;;  %v19016_v9 = vld [vmem:[%s28192_s1 + $0x2da8] ss:$40 sps:$4 sm:$0xff]  }
 0x265   :  { %11484 = vmatprep.subr.bf16.mxu1 %v18967_v12  ;;  %v19019_v12 = vld [vmem:[%s28192_s1 + $0x32a8] ss:$40 sps:$4 sm:$0xff]  }
 0x267   :  { %11444 = vmatpush1.bf16.msra.mxu0 %v18962_v18  ;;  %v19024_v18 = vld [vmem:[%s28192_s1 + $0x2dfc] ss:$40 sps:$4 sm:$0xff]  }
 0x268   :  { %11485 = vmatpush1.bf16.msra.mxu1 %v18965_v11  ;;  %11445 = vmatprep.subr.bf16.mxu0 %v18970_v13  ;;  %v19027_v11 = vld [vmem:[%s28192_s1 + $0x32fc] ss:$40 sps:$4 sm:$0xff]   ;;  %v19022_v13 = vld [vmem:[%s28192_s1 + $0x2df8] ss:$40 sps:$4 sm:$0xff]  }
 0x269   :  { %11486 = vmatprep.subr.bf16.mxu1 %v18973_v14  ;;  %v19025_v14 = vld [vmem:[%s28192_s1 + $0x32f8] ss:$40 sps:$4 sm:$0xff]  }
 0x26b   :  { %11446 = vmatpush1.bf16.msra.mxu0 %v18968_v20  ;;  %v19030_v20 = vld [vmem:[%s28192_s1 + $0x2e4c] ss:$40 sps:$4 sm:$0xff]  }
 0x26c   :  { %11487 = vmatpush1.bf16.msra.mxu1 %v18971_v15  ;;  %11447 = vmatprep.subr.bf16.mxu0 %v18976_v28  ;;  %v19033_v15 = vld [vmem:[%s28192_s1 + $0x334c] ss:$40 sps:$4 sm:$0xff]   ;;  %v19028_v28 = vld [vmem:[%s28192_s1 + $0x2e48] ss:$40 sps:$4 sm:$0xff]  }
 0x26d   :  { %11488 = vmatprep.subr.bf16.mxu1 %v18979_v19  ;;  %v19031_v19 = vld [vmem:[%s28192_s1 + $0x3348] ss:$40 sps:$4 sm:$0xff]  }
 0x26f   :  { %11448 = vmatpush1.bf16.msra.mxu0 %v18974_v21  ;;  %v19036_v21 = vld [vmem:[%s28192_s1 + $0x2e9c] ss:$40 sps:$4 sm:$0xff]  }
 0x270   :  { %11489 = vmatpush1.bf16.msra.mxu1 %v18977_v26  ;;  %11449 = vmatprep.subr.bf16.mxu0 %v18982_v27  ;;  %v19039_v26 = vld [vmem:[%s28192_s1 + $0x339c] ss:$40 sps:$4 sm:$0xff]   ;;  %v19034_v27 = vld [vmem:[%s28192_s1 + $0x2e98] ss:$40 sps:$4 sm:$0xff]  }
 0x271   :  { %11490 = vmatprep.subr.bf16.mxu1 %v18985_v30  ;;  %v19037_v30 = vld [vmem:[%s28192_s1 + $0x3398] ss:$40 sps:$4 sm:$0xff]  }
 0x273   :  { %11450 = vmatpush1.bf16.msra.mxu0 %v18980_v35  ;;  %v19042_v35 = vld [vmem:[%s28192_s1 + $0x2eec] ss:$40 sps:$4 sm:$0xff]  }
 0x274   :  { %11491 = vmatpush1.bf16.msra.mxu1 %v18983_v29  ;;  %11451 = vmatprep.subr.bf16.mxu0 %v18988_v31  ;;  %v19045_v29 = vld [vmem:[%s28192_s1 + $0x33ec] ss:$40 sps:$4 sm:$0xff]  }
 0x275   :  { %11492 = vmatprep.subr.bf16.mxu1 %v18991_v32 }
 0x277   :  { %11452 = vmatpush1.bf16.msra.mxu0 %v18986_v34  ;;  %v19040_v34 = vld [vmem:[%s28192_s1 + $0x2ee8] ss:$40 sps:$4 sm:$0xff]  }
 0x278   :  { %11493 = vmatpush1.bf16.msra.mxu1 %v18989_v23  ;;  %11453 = vmatprep.subr.bf16.mxu0 %v18994_v44  ;;  %v19043_v23 = vld [vmem:[%s28192_s1 + $0x33e8] ss:$40 sps:$4 sm:$0xff]  }
 0x279   :  { %11494 = vmatprep.subr.bf16.mxu1 %v18997_v22 }
 0x27b   :  { %11454 = vmatpush1.bf16.msra.mxu0 %v18992_v45 }
 0x27c   :  { %11495 = vmatpush1.bf16.msra.mxu1 %v18995_v50  ;;  %11455 = vmatprep.subr.bf16.mxu0 %v19000_v52 }
 0x27d   :  { %11496 = vmatprep.subr.bf16.mxu1 %v19003_v53 }
 0x27f   :  { %11456 = vmatpush1.bf16.msra.mxu0 %v18998_v56 }
 0x280   :  { %11497 = vmatpush1.bf16.msra.mxu1 %v19001_v57  ;;  %11507 = vmatprep.subr.bf16.mxu0 %v19006_v62 }
 0x281   :  { %11548 = vmatprep.subr.bf16.mxu1 %v19009_v40  ;;  %v19048_v40 = vld [vmem:[%s28192_s1 + $0x2f3c] ss:$40 sps:$4 sm:$0xff]  }
 0x282   :  { %11458 = vmatmul.mubr.bf16.vlgmr.msra.gmra.mrb[36].mxu0 %v22172_v60 }
 0x283   :  { %11499 = vmatmul.mubr.bf16.vlgmr.msra.gmra.mrb[36].mxu1 %v22400_v48  ;;  %11508 = vmatpush1.bf16.msra.mxu0 %v19004_v41 }
 0x284   :  { %11549 = vmatpush1.bf16.msra.mxu1 %v19007_v4  ;;  %11509 = vmatprep.subr.bf16.mxu0 %v19012_v10  ;;  %v19049_v4 = vld [vmem:[%s28192_s1 + $0x3438] ss:$40 sps:$4 sm:$0xff]   ;;  %v19054_v10 = vld [vmem:[%s28192_s1 + $0x2f8c] ss:$40 sps:$4 sm:$0xff]  }
 0x285   :  { %11550 = vmatprep.subr.bf16.mxu1 %v19015_v63  ;;  %11539 = vmatprep.mubr.bf16.mxu0 %v22197_v1  ;;  %v19057_v63 = vld [vmem:[%s28192_s1 + $0x348c] ss:$40 sps:$4 sm:$0xff]  }
 0x286   :  { %11580 = vmatprep.mubr.bf16.mxu1 %v22414_v58 }
 0x287   :  { %11510 = vmatpush1.bf16.msra.mxu0 %v19010_v2  ;;  %v19052_v2 = vld [vmem:[%s28192_s1 + $0x2f88] ss:$40 sps:$4 sm:$0xff]  }
 0x288   :  { %11551 = vmatpush1.bf16.msra.mxu1 %v19013_v3  ;;  %11511 = vmatprep.subr.bf16.mxu0 %v19018_v5  ;;  %v19055_v3 = vld [vmem:[%s28192_s1 + $0x3488] ss:$40 sps:$4 sm:$0xff]   ;;  %v19060_v5 = vld [vmem:[%s28192_s1 + $0x2fdc] ss:$40 sps:$4 sm:$0xff]  }
 0x289   :  { %11552 = vmatprep.subr.bf16.mxu1 %v19021_v8  ;;  %v19063_v8 = vld [vmem:[%s28192_s1 + $0x34dc] ss:$40 sps:$4 sm:$0xff]  }
 0x28b   :  { %11512 = vmatpush1.bf16.msra.mxu0 %v19016_v9  ;;  %v19058_v9 = vld [vmem:[%s28192_s1 + $0x2fd8] ss:$40 sps:$4 sm:$0xff]  }
 0x28c   :  { %11553 = vmatpush1.bf16.msra.mxu1 %v19019_v12  ;;  %11513 = vmatprep.subr.bf16.mxu0 %v19024_v18  ;;  %v19061_v12 = vld [vmem:[%s28192_s1 + $0x34d8] ss:$40 sps:$4 sm:$0xff]   ;;  %v19066_v18 = vld [vmem:[%s28192_s1 + $0x302c] ss:$40 sps:$4 sm:$0xff]  }
 0x28d   :  { %11554 = vmatprep.subr.bf16.mxu1 %v19027_v11  ;;  %v19069_v11 = vld [vmem:[%s28192_s1 + $0x352c] ss:$40 sps:$4 sm:$0xff]  }
 0x28f   :  { %11514 = vmatpush1.bf16.msra.mxu0 %v19022_v13  ;;  %v19064_v13 = vld [vmem:[%s28192_s1 + $0x3028] ss:$40 sps:$4 sm:$0xff]  }
 0x290   :  { %11555 = vmatpush1.bf16.msra.mxu1 %v19025_v14  ;;  %11515 = vmatprep.subr.bf16.mxu0 %v19030_v20  ;;  %v19067_v14 = vld [vmem:[%s28192_s1 + $0x3528] ss:$40 sps:$4 sm:$0xff]   ;;  %v19072_v20 = vld [vmem:[%s28192_s1 + $0x307c] ss:$40 sps:$4 sm:$0xff]  }
 0x291   :  { %11556 = vmatprep.subr.bf16.mxu1 %v19033_v15  ;;  %v19075_v15 = vld [vmem:[%s28192_s1 + $0x357c] ss:$40 sps:$4 sm:$0xff]  }
 0x293   :  { %11516 = vmatpush1.bf16.msra.mxu0 %v19028_v28  ;;  %v19070_v28 = vld [vmem:[%s28192_s1 + $0x3078] ss:$40 sps:$4 sm:$0xff]  }
 0x294   :  { %11557 = vmatpush1.bf16.msra.mxu1 %v19031_v19  ;;  %11517 = vmatprep.subr.bf16.mxu0 %v19036_v21  ;;  %v19073_v19 = vld [vmem:[%s28192_s1 + $0x3578] ss:$40 sps:$4 sm:$0xff]   ;;  %v19078_v21 = vld [vmem:[%s28192_s1 + $0x30cc] ss:$40 sps:$4 sm:$0xff]  }
 0x295   :  { %11558 = vmatprep.subr.bf16.mxu1 %v19039_v26  ;;  %v11213_v31 = vpop.f32.mrb[24].mxu0  ;;  %v19081_v26 = vld [vmem:[%s28192_s1 + $0x35cc] ss:$40 sps:$4 sm:$0xff]  }
 0x296   :  { %v11254_v32 = vpop.f32.mrb[24].mxu1  ;;  %v11214_v44 = vadd.f32 %v11213_v31, %v23292_v46  ;;  %v11215_v22 = vpop.f32.mrb[25].mxu0  ;;  %v19051_v46 = vld [vmem:[%s28192_s1 + $0x343c] ss:$40 sps:$4 sm:$0xff]   ;;  %v19082_v31 = vld [vmem:[%s28192_s1 + $0x3118] ss:$40 sps:$4 sm:$0xff]  }
 0x297   :  { %v11256_v45 = vpop.f32.mrb[25].mxu1  ;;  %v11216_v50 = vadd.f32 %v11215_v22, %v23303_v54  ;;  %v11217_v52 = vpop.f32.mrb[26].mxu0  ;;  %11518 = vmatpush1.bf16.msra.mxu0 %v19034_v27  ;;  %v19046_v54 = vld [vmem:[%s28192_s1 + $0x2f38] ss:$40 sps:$4 sm:$0xff]   ;;  %v19076_v27 = vld [vmem:[%s28192_s1 + $0x30c8] ss:$40 sps:$4 sm:$0xff]  }
 0x298   :  { %v11258_v53 = vpop.f32.mrb[26].mxu1  ;;  %11559 = vmatpush1.bf16.msra.mxu1 %v19037_v30  ;;  %v23506_v56 = vadd.f32 %v11254_v32, %v11214_v44  ;;  %v11218_v57 = vpop.f32.mrb[27].mxu0  ;;  %11519 = vmatprep.subr.bf16.mxu0 %v19042_v35  ;;  %v19079_v30 = vld [vmem:[%s28192_s1 + $0x35c8] ss:$40 sps:$4 sm:$0xff]   ;;  %v19084_v35 = vld [vmem:[%s28192_s1 + $0x311c] ss:$40 sps:$4 sm:$0xff]  }
 0x299   :  { %v11259_v62 = vpop.f32.mrb[27].mxu1  ;;  %11560 = vmatprep.subr.bf16.mxu1 %v19045_v29  ;;  %v23514_v41 = vadd.f32 %v11256_v45, %v11216_v50  ;;  %v19087_v29 = vld [vmem:[%s28192_s1 + $0x361c] ss:$40 sps:$4 sm:$0xff]   ;;  %v19085_v32 = vld [vmem:[%s28192_s1 + $0x3618] ss:$40 sps:$4 sm:$0xff]  }
 0x29a   :  { %v19088_v44 = vld [vmem:[%s28192_s1 + $0x3168] ss:$40 sps:$4 sm:$0xff]   ;;  %v19096_v45 = vld [vmem:[%s28192_s1 + $0x31bc] ss:$40 sps:$4 sm:$0xff]   ;;  %v19094_v52 = vld [vmem:[%s28192_s1 + $0x31b8] ss:$40 sps:$4 sm:$0xff]  }
 0x29b   :  { %11520 = vmatpush1.bf16.msra.mxu0 %v19040_v34  ;;  %v19090_v34 = vld [vmem:[%s28192_s1 + $0x316c] ss:$40 sps:$4 sm:$0xff]   ;;  %v19091_v22 = vld [vmem:[%s28192_s1 + $0x3668] ss:$40 sps:$4 sm:$0xff]   ;;  %v19099_v50 = vld [vmem:[%s28192_s1 + $0x36bc] ss:$40 sps:$4 sm:$0xff]  }
 0x29c   :  { %11561 = vmatpush1.bf16.msra.mxu1 %v19043_v23  ;;  %11521 = vmatprep.subr.bf16.mxu0 %v19048_v40  ;;  %v19093_v23 = vld [vmem:[%s28192_s1 + $0x366c] ss:$40 sps:$4 sm:$0xff]   ;;  %v19097_v53 = vld [vmem:[%s28192_s1 + $0x36b8] ss:$40 sps:$4 sm:$0xff]  }
 0x29d   :  { %11562 = vmatprep.subr.bf16.mxu1 %v19051_v46  ;;  %v19102_v57 = vld [vmem:[%s28192_s1 + $0x14] ss:$40 sps:$4 sm:$0xff]   ;;  %v19100_v40 = vld [vmem:[%s28192_s1 + $0x10] ss:$40 sps:$4 sm:$0xff]  }
 0x29e   :  { %v19105_v62 = vld [vmem:[%s28192_s1 + $0x514] ss:$40 sps:$4 sm:$0xff]   ;;  %v19103_v46 = vld [vmem:[%s28192_s1 + $0x510] ss:$40 sps:$4 sm:$0xff]  }
 0x29f   :  { %11522 = vmatpush1.bf16.msra.mxu0 %v19046_v54  ;;  %v19108_v54 = vld [vmem:[%s28192_s1 + $0x64] ss:$40 sps:$4 sm:$0xff]  }
 0x2a0   :  { %11563 = vmatpush1.bf16.msra.mxu1 %v19049_v4  ;;  %11523 = vmatprep.subr.bf16.mxu0 %v19054_v10  ;;  %v19111_v4 = vld [vmem:[%s28192_s1 + $0x564] ss:$40 sps:$4 sm:$0xff]   ;;  %v19106_v10 = vld [vmem:[%s28192_s1 + $0x60] ss:$40 sps:$4 sm:$0xff]  }
 0x2a1   :  { %11564 = vmatprep.subr.bf16.mxu1 %v19057_v63  ;;  %v19109_v63 = vld [vmem:[%s28192_s1 + $0x560] ss:$40 sps:$4 sm:$0xff]  }
 0x2a3   :  { %11524 = vmatpush1.bf16.msra.mxu0 %v19052_v2  ;;  %v19114_v2 = vld [vmem:[%s28192_s1 + $0xb4] ss:$40 sps:$4 sm:$0xff]  }
 0x2a4   :  { %11565 = vmatpush1.bf16.msra.mxu1 %v19055_v3  ;;  %11525 = vmatprep.subr.bf16.mxu0 %v19060_v5  ;;  %v19117_v3 = vld [vmem:[%s28192_s1 + $0x5b4] ss:$40 sps:$4 sm:$0xff]   ;;  %v19112_v5 = vld [vmem:[%s28192_s1 + $0xb0] ss:$40 sps:$4 sm:$0xff]  }
 0x2a5   :  { %11566 = vmatprep.subr.bf16.mxu1 %v19063_v8  ;;  %v19115_v8 = vld [vmem:[%s28192_s1 + $0x5b0] ss:$40 sps:$4 sm:$0xff]  }
 0x2a7   :  { %11526 = vmatpush1.bf16.msra.mxu0 %v19058_v9  ;;  %v19120_v9 = vld [vmem:[%s28192_s1 + $0x104] ss:$40 sps:$4 sm:$0xff]  }
 0x2a8   :  { %11567 = vmatpush1.bf16.msra.mxu1 %v19061_v12  ;;  %11527 = vmatprep.subr.bf16.mxu0 %v19066_v18  ;;  %v19123_v12 = vld [vmem:[%s28192_s1 + $0x604] ss:$40 sps:$4 sm:$0xff]   ;;  %v19118_v18 = vld [vmem:[%s28192_s1 + $0x100] ss:$40 sps:$4 sm:$0xff]  }
 0x2a9   :  { %11568 = vmatprep.subr.bf16.mxu1 %v19069_v11  ;;  %v19121_v11 = vld [vmem:[%s28192_s1 + $0x600] ss:$40 sps:$4 sm:$0xff]  }
 0x2ab   :  { %11528 = vmatpush1.bf16.msra.mxu0 %v19064_v13  ;;  %v19126_v13 = vld [vmem:[%s28192_s1 + $0x154] ss:$40 sps:$4 sm:$0xff]  }
 0x2ac   :  { %11569 = vmatpush1.bf16.msra.mxu1 %v19067_v14  ;;  %11529 = vmatprep.subr.bf16.mxu0 %v19072_v20  ;;  %v19129_v14 = vld [vmem:[%s28192_s1 + $0x654] ss:$40 sps:$4 sm:$0xff]   ;;  %v19124_v20 = vld [vmem:[%s28192_s1 + $0x150] ss:$40 sps:$4 sm:$0xff]  }
 0x2ad   :  { %11570 = vmatprep.subr.bf16.mxu1 %v19075_v15  ;;  %v19127_v15 = vld [vmem:[%s28192_s1 + $0x650] ss:$40 sps:$4 sm:$0xff]  }
 0x2af   :  { %11530 = vmatpush1.bf16.msra.mxu0 %v19070_v28  ;;  %v19132_v28 = vld [vmem:[%s28192_s1 + $0x1a4] ss:$40 sps:$4 sm:$0xff]  }
 0x2b0   :  { %11571 = vmatpush1.bf16.msra.mxu1 %v19073_v19  ;;  %11531 = vmatprep.subr.bf16.mxu0 %v19078_v21  ;;  %v19135_v19 = vld [vmem:[%s28192_s1 + $0x6a4] ss:$40 sps:$4 sm:$0xff]   ;;  %v19130_v21 = vld [vmem:[%s28192_s1 + $0x1a0] ss:$40 sps:$4 sm:$0xff]  }
 0x2b1   :  { %11572 = vmatprep.subr.bf16.mxu1 %v19081_v26  ;;  %v19133_v26 = vld [vmem:[%s28192_s1 + $0x6a0] ss:$40 sps:$4 sm:$0xff]  }
 0x2b3   :  { %11532 = vmatpush1.bf16.msra.mxu0 %v19076_v27  ;;  %v19138_v27 = vld [vmem:[%s28192_s1 + $0x1f4] ss:$40 sps:$4 sm:$0xff]  }
 0x2b4   :  { %11573 = vmatpush1.bf16.msra.mxu1 %v19079_v30  ;;  %11533 = vmatprep.subr.bf16.mxu0 %v19084_v35  ;;  %v19141_v30 = vld [vmem:[%s28192_s1 + $0x6f4] ss:$40 sps:$4 sm:$0xff]  }
 0x2b5   :  { %11574 = vmatprep.subr.bf16.mxu1 %v19087_v29 }
 0x2b7   :  { %11534 = vmatpush1.bf16.msra.mxu0 %v19082_v31  ;;  %v19136_v31 = vld [vmem:[%s28192_s1 + $0x1f0] ss:$40 sps:$4 sm:$0xff]  }
 0x2b8   :  { %11575 = vmatpush1.bf16.msra.mxu1 %v19085_v32  ;;  %11535 = vmatprep.subr.bf16.mxu0 %v19090_v34  ;;  %v19139_v32 = vld [vmem:[%s28192_s1 + $0x6f0] ss:$40 sps:$4 sm:$0xff]  }
 0x2b9   :  { %11576 = vmatprep.subr.bf16.mxu1 %v19093_v23 }
 0x2bb   :  { %11536 = vmatpush1.bf16.msra.mxu0 %v19088_v44 }
 0x2bc   :  { %11577 = vmatpush1.bf16.msra.mxu1 %v19091_v22  ;;  %11537 = vmatprep.subr.bf16.mxu0 %v19096_v45 }
 0x2bd   :  { %11578 = vmatprep.subr.bf16.mxu1 %v19099_v50 }
 0x2bf   :  { %11538 = vmatpush1.bf16.msra.mxu0 %v19094_v52 }
 0x2c0   :  { %11579 = vmatpush1.bf16.msra.mxu1 %v19097_v53  ;;  %11589 = vmatprep.subr.bf16.mxu0 %v19102_v57 }
 0x2c1   :  { %11630 = vmatprep.subr.bf16.mxu1 %v19105_v62  ;;  %v19144_v62 = vld [vmem:[%s28192_s1 + $0x244] ss:$40 sps:$4 sm:$0xff]  }
 0x2c2   :  { %11540 = vmatmul.mubr.bf16.vlgmr.msra.gmra.mrb[40].mxu0 %v22404_v49 }
 0x2c3   :  { %11581 = vmatmul.mubr.bf16.vlgmr.msra.gmra.mrb[40].mxu1 %v22614_v33  ;;  %11590 = vmatpush1.bf16.msra.mxu0 %v19100_v40 }
 0x2c4   :  { %11631 = vmatpush1.bf16.msra.mxu1 %v19103_v46  ;;  %11591 = vmatprep.subr.bf16.mxu0 %v19108_v54  ;;  %v19145_v46 = vld [vmem:[%s28192_s1 + $0x740] ss:$40 sps:$4 sm:$0xff]   ;;  %v19150_v54 = vld [vmem:[%s28192_s1 + $0x294] ss:$40 sps:$4 sm:$0xff]  }
 0x2c5   :  { %11632 = vmatprep.subr.bf16.mxu1 %v19111_v4  ;;  %11621 = vmatprep.mubr.bf16.mxu0 %v21430_v47  ;;  %v19153_v4 = vld [vmem:[%s28192_s1 + $0x794] ss:$40 sps:$4 sm:$0xff]  }
 0x2c6   :  { %11662 = vmatprep.mubr.bf16.mxu1 %v21441_v51 }
 0x2c7   :  { %11592 = vmatpush1.bf16.msra.mxu0 %v19106_v10  ;;  %v19148_v10 = vld [vmem:[%s28192_s1 + $0x290] ss:$40 sps:$4 sm:$0xff]  }
 0x2c8   :  { %11633 = vmatpush1.bf16.msra.mxu1 %v19109_v63  ;;  %11593 = vmatprep.subr.bf16.mxu0 %v19114_v2  ;;  %v19151_v63 = vld [vmem:[%s28192_s1 + $0x790] ss:$40 sps:$4 sm:$0xff]   ;;  %v19156_v2 = vld [vmem:[%s28192_s1 + $0x2e4] ss:$40 sps:$4 sm:$0xff]  }
 0x2c9   :  { %11634 = vmatprep.subr.bf16.mxu1 %v19117_v3  ;;  %v19159_v3 = vld [vmem:[%s28192_s1 + $0x7e4] ss:$40 sps:$4 sm:$0xff]  }
 0x2cb   :  { %11594 = vmatpush1.bf16.msra.mxu0 %v19112_v5  ;;  %v19154_v5 = vld [vmem:[%s28192_s1 + $0x2e0] ss:$40 sps:$4 sm:$0xff]  }
 0x2cc   :  { %11635 = vmatpush1.bf16.msra.mxu1 %v19115_v8  ;;  %11595 = vmatprep.subr.bf16.mxu0 %v19120_v9  ;;  %v19157_v8 = vld [vmem:[%s28192_s1 + $0x7e0] ss:$40 sps:$4 sm:$0xff]   ;;  %v19162_v9 = vld [vmem:[%s28192_s1 + $0x334] ss:$40 sps:$4 sm:$0xff]  }
 0x2cd   :  { %11636 = vmatprep.subr.bf16.mxu1 %v19123_v12  ;;  %v19165_v12 = vld [vmem:[%s28192_s1 + $0x834] ss:$40 sps:$4 sm:$0xff]  }
 0x2cf   :  { %11596 = vmatpush1.bf16.msra.mxu0 %v19118_v18  ;;  %v19160_v18 = vld [vmem:[%s28192_s1 + $0x330] ss:$40 sps:$4 sm:$0xff]  }
 0x2d0   :  { %11637 = vmatpush1.bf16.msra.mxu1 %v19121_v11  ;;  %11597 = vmatprep.subr.bf16.mxu0 %v19126_v13  ;;  %v19163_v11 = vld [vmem:[%s28192_s1 + $0x830] ss:$40 sps:$4 sm:$0xff]   ;;  %v19168_v13 = vld [vmem:[%s28192_s1 + $0x384] ss:$40 sps:$4 sm:$0xff]  }
 0x2d1   :  { %11638 = vmatprep.subr.bf16.mxu1 %v19129_v14  ;;  %v19171_v14 = vld [vmem:[%s28192_s1 + $0x884] ss:$40 sps:$4 sm:$0xff]  }
 0x2d3   :  { %11598 = vmatpush1.bf16.msra.mxu0 %v19124_v20  ;;  %v19166_v20 = vld [vmem:[%s28192_s1 + $0x380] ss:$40 sps:$4 sm:$0xff]  }
 0x2d4   :  { %11639 = vmatpush1.bf16.msra.mxu1 %v19127_v15  ;;  %11599 = vmatprep.subr.bf16.mxu0 %v19132_v28  ;;  %v19169_v15 = vld [vmem:[%s28192_s1 + $0x880] ss:$40 sps:$4 sm:$0xff]   ;;  %v19174_v28 = vld [vmem:[%s28192_s1 + $0x3d4] ss:$40 sps:$4 sm:$0xff]  }
 0x2d5   :  { %11640 = vmatprep.subr.bf16.mxu1 %v19135_v19  ;;  %v11295_v35 = vpop.f32.mrb[28].mxu0  ;;  %v19177_v19 = vld [vmem:[%s28192_s1 + $0x8d4] ss:$40 sps:$4 sm:$0xff]  }
 0x2d6   :  { %v11336_v29 = vpop.f32.mrb[28].mxu1  ;;  %v11296_v34 = vadd.f32 %v11295_v35, %v23506_v56  ;;  %v11297_v23 = vpop.f32.mrb[29].mxu0  ;;  %v19147_v56 = vld [vmem:[%s28192_s1 + $0x744] ss:$40 sps:$4 sm:$0xff]   ;;  %v19178_v35 = vld [vmem:[%s28192_s1 + $0x420] ss:$40 sps:$4 sm:$0xff]  }
 0x2d7   :  { %v11338_v44 = vpop.f32.mrb[29].mxu1  ;;  %v11298_v22 = vadd.f32 %v11297_v23, %v23514_v41  ;;  %v11299_v45 = vpop.f32.mrb[30].mxu0  ;;  %11600 = vmatpush1.bf16.msra.mxu0 %v19130_v21  ;;  %v19142_v41 = vld [vmem:[%s28192_s1 + $0x240] ss:$40 sps:$4 sm:$0xff]   ;;  %v19172_v21 = vld [vmem:[%s28192_s1 + $0x3d0] ss:$40 sps:$4 sm:$0xff]  }
 0x2d8   :  { %v11340_v50 = vpop.f32.mrb[30].mxu1  ;;  %11641 = vmatpush1.bf16.msra.mxu1 %v19133_v26  ;;  %v23708_v52 = vadd.f32 %v11336_v29, %v11296_v34  ;;  %v11300_v53 = vpop.f32.mrb[31].mxu0  ;;  %11601 = vmatprep.subr.bf16.mxu0 %v19138_v27  ;;  %v19175_v26 = vld [vmem:[%s28192_s1 + $0x8d0] ss:$40 sps:$4 sm:$0xff]   ;;  %v19180_v27 = vld [vmem:[%s28192_s1 + $0x424] ss:$40 sps:$4 sm:$0xff]  }
 0x2d9   :  { %v11341_v57 = vpop.f32.mrb[31].mxu1  ;;  %11642 = vmatprep.subr.bf16.mxu1 %v19141_v30  ;;  %v23716_v40 = vadd.f32 %v11338_v44, %v11298_v22  ;;  %v19183_v30 = vld [vmem:[%s28192_s1 + $0x924] ss:$40 sps:$4 sm:$0xff]   ;;  %v19181_v29 = vld [vmem:[%s28192_s1 + $0x920] ss:$40 sps:$4 sm:$0xff]  }
 0x2da   :  { %v19184_v34 = vld [vmem:[%s28192_s1 + $0x470] ss:$40 sps:$4 sm:$0xff]   ;;  %v19192_v44 = vld [vmem:[%s28192_s1 + $0x4c4] ss:$40 sps:$4 sm:$0xff]   ;;  %v19190_v45 = vld [vmem:[%s28192_s1 + $0x4c0] ss:$40 sps:$4 sm:$0xff]  }
 0x2db   :  { %11602 = vmatpush1.bf16.msra.mxu0 %v19136_v31  ;;  %v19186_v31 = vld [vmem:[%s28192_s1 + $0x474] ss:$40 sps:$4 sm:$0xff]   ;;  %v19187_v23 = vld [vmem:[%s28192_s1 + $0x970] ss:$40 sps:$4 sm:$0xff]   ;;  %v19195_v22 = vld [vmem:[%s28192_s1 + $0x9c4] ss:$40 sps:$4 sm:$0xff]  }
 0x2dc   :  { %11643 = vmatpush1.bf16.msra.mxu1 %v19139_v32  ;;  %11603 = vmatprep.subr.bf16.mxu0 %v19144_v62  ;;  %v19189_v32 = vld [vmem:[%s28192_s1 + $0x974] ss:$40 sps:$4 sm:$0xff]   ;;  %v19193_v50 = vld [vmem:[%s28192_s1 + $0x9c0] ss:$40 sps:$4 sm:$0xff]   ;;  %v19196_v62 = vld [vmem:[%s28192_s1 + $0xa10] ss:$40 sps:$4 sm:$0xff]  }
 0x2dd   :  { %11644 = vmatprep.subr.bf16.mxu1 %v19147_v56  ;;  %v19198_v53 = vld [vmem:[%s28192_s1 + $0xa14] ss:$40 sps:$4 sm:$0xff]   ;;  %v19199_v56 = vld [vmem:[%s28192_s1 + $0xf10] ss:$40 sps:$4 sm:$0xff]  }
 0x2de   :  { %v19201_v57 = vld [vmem:[%s28192_s1 + $0xf14] ss:$40 sps:$4 sm:$0xff]  }
 0x2df   :  { %11604 = vmatpush1.bf16.msra.mxu0 %v19142_v41  ;;  %v19204_v41 = vld [vmem:[%s28192_s1 + $0xa64] ss:$40 sps:$4 sm:$0xff]  }
 0x2e0   :  { %11645 = vmatpush1.bf16.msra.mxu1 %v19145_v46  ;;  %11605 = vmatprep.subr.bf16.mxu0 %v19150_v54  ;;  %v19207_v46 = vld [vmem:[%s28192_s1 + $0xf64] ss:$40 sps:$4 sm:$0xff]   ;;  %v19202_v54 = vld [vmem:[%s28192_s1 + $0xa60] ss:$40 sps:$4 sm:$0xff]  }
 0x2e1   :  { %11646 = vmatprep.subr.bf16.mxu1 %v19153_v4  ;;  %v19205_v4 = vld [vmem:[%s28192_s1 + $0xf60] ss:$40 sps:$4 sm:$0xff]  }
 0x2e3   :  { %11606 = vmatpush1.bf16.msra.mxu0 %v19148_v10  ;;  %v19210_v10 = vld [vmem:[%s28192_s1 + $0xab4] ss:$40 sps:$4 sm:$0xff]  }
 0x2e4   :  { %11647 = vmatpush1.bf16.msra.mxu1 %v19151_v63  ;;  %11607 = vmatprep.subr.bf16.mxu0 %v19156_v2  ;;  %v19213_v63 = vld [vmem:[%s28192_s1 + $0xfb4] ss:$40 sps:$4 sm:$0xff]   ;;  %v19208_v2 = vld [vmem:[%s28192_s1 + $0xab0] ss:$40 sps:$4 sm:$0xff]  }
 0x2e5   :  { %11648 = vmatprep.subr.bf16.mxu1 %v19159_v3  ;;  %v19211_v3 = vld [vmem:[%s28192_s1 + $0xfb0] ss:$40 sps:$4 sm:$0xff]  }
 0x2e7   :  { %11608 = vmatpush1.bf16.msra.mxu0 %v19154_v5  ;;  %v19216_v5 = vld [vmem:[%s28192_s1 + $0xb04] ss:$40 sps:$4 sm:$0xff]  }
 0x2e8   :  { %11649 = vmatpush1.bf16.msra.mxu1 %v19157_v8  ;;  %11609 = vmatprep.subr.bf16.mxu0 %v19162_v9  ;;  %v19219_v8 = vld [vmem:[%s28192_s1 + $0x1004] ss:$40 sps:$4 sm:$0xff]   ;;  %v19214_v9 = vld [vmem:[%s28192_s1 + $0xb00] ss:$40 sps:$4 sm:$0xff]  }
 0x2e9   :  { %11650 = vmatprep.subr.bf16.mxu1 %v19165_v12  ;;  %v19217_v12 = vld [vmem:[%s28192_s1 + $0x1000] ss:$40 sps:$4 sm:$0xff]  }
 0x2eb   :  { %11610 = vmatpush1.bf16.msra.mxu0 %v19160_v18  ;;  %v19222_v18 = vld [vmem:[%s28192_s1 + $0xb54] ss:$40 sps:$4 sm:$0xff]  }
 0x2ec   :  { %11651 = vmatpush1.bf16.msra.mxu1 %v19163_v11  ;;  %11611 = vmatprep.subr.bf16.mxu0 %v19168_v13  ;;  %v19225_v11 = vld [vmem:[%s28192_s1 + $0x1054] ss:$40 sps:$4 sm:$0xff]   ;;  %v19220_v13 = vld [vmem:[%s28192_s1 + $0xb50] ss:$40 sps:$4 sm:$0xff]  }
 0x2ed   :  { %11652 = vmatprep.subr.bf16.mxu1 %v19171_v14  ;;  %v19223_v14 = vld [vmem:[%s28192_s1 + $0x1050] ss:$40 sps:$4 sm:$0xff]  }
 0x2ef   :  { %11612 = vmatpush1.bf16.msra.mxu0 %v19166_v20  ;;  %v19228_v20 = vld [vmem:[%s28192_s1 + $0xba4] ss:$40 sps:$4 sm:$0xff]  }
 0x2f0   :  { %11653 = vmatpush1.bf16.msra.mxu1 %v19169_v15  ;;  %11613 = vmatprep.subr.bf16.mxu0 %v19174_v28  ;;  %v19231_v15 = vld [vmem:[%s28192_s1 + $0x10a4] ss:$40 sps:$4 sm:$0xff]   ;;  %v19226_v28 = vld [vmem:[%s28192_s1 + $0xba0] ss:$40 sps:$4 sm:$0xff]  }
 0x2f1   :  { %11654 = vmatprep.subr.bf16.mxu1 %v19177_v19  ;;  %v19229_v19 = vld [vmem:[%s28192_s1 + $0x10a0] ss:$40 sps:$4 sm:$0xff]  }
 0x2f3   :  { %11614 = vmatpush1.bf16.msra.mxu0 %v19172_v21  ;;  %v19234_v21 = vld [vmem:[%s28192_s1 + $0xbf4] ss:$40 sps:$4 sm:$0xff]  }
 0x2f4   :  { %11655 = vmatpush1.bf16.msra.mxu1 %v19175_v26  ;;  %11615 = vmatprep.subr.bf16.mxu0 %v19180_v27  ;;  %v19237_v26 = vld [vmem:[%s28192_s1 + $0x10f4] ss:$40 sps:$4 sm:$0xff]  }
 0x2f5   :  { %11656 = vmatprep.subr.bf16.mxu1 %v19183_v30 }
 0x2f7   :  { %11616 = vmatpush1.bf16.msra.mxu0 %v19178_v35  ;;  %v19232_v35 = vld [vmem:[%s28192_s1 + $0xbf0] ss:$40 sps:$4 sm:$0xff]  }
 0x2f8   :  { %11657 = vmatpush1.bf16.msra.mxu1 %v19181_v29  ;;  %11617 = vmatprep.subr.bf16.mxu0 %v19186_v31  ;;  %v19235_v29 = vld [vmem:[%s28192_s1 + $0x10f0] ss:$40 sps:$4 sm:$0xff]  }
 0x2f9   :  { %11658 = vmatprep.subr.bf16.mxu1 %v19189_v32 }
 0x2fb   :  { %11618 = vmatpush1.bf16.msra.mxu0 %v19184_v34 }
 0x2fc   :  { %11659 = vmatpush1.bf16.msra.mxu1 %v19187_v23  ;;  %11619 = vmatprep.subr.bf16.mxu0 %v19192_v44 }
 0x2fd   :  { %11660 = vmatprep.subr.bf16.mxu1 %v19195_v22 }
 0x2ff   :  { %11620 = vmatpush1.bf16.msra.mxu0 %v19190_v45 }
 0x300   :  { %11661 = vmatpush1.bf16.msra.mxu1 %v19193_v50  ;;  %11671 = vmatprep.subr.bf16.mxu0 %v19198_v53 }
 0x301   :  { %11712 = vmatprep.subr.bf16.mxu1 %v19201_v57  ;;  %v19240_v57 = vld [vmem:[%s28192_s1 + $0xc44] ss:$40 sps:$4 sm:$0xff]  }
 0x302   :  { %11622 = vmatmul.mubr.bf16.vlgmr.msra.gmra.mrb[44].mxu0 %v21499_v6 }
 0x303   :  { %11663 = vmatmul.mubr.bf16.vlgmr.msra.gmra.mrb[44].mxu1 %v21501_v7  ;;  %11672 = vmatpush1.bf16.msra.mxu0 %v19196_v62 }
 0x304   :  { %11713 = vmatpush1.bf16.msra.mxu1 %v19199_v56  ;;  %11673 = vmatprep.subr.bf16.mxu0 %v19204_v41  ;;  %v19241_v56 = vld [vmem:[%s28192_s1 + $0x1140] ss:$40 sps:$4 sm:$0xff]   ;;  %v19246_v41 = vld [vmem:[%s28192_s1 + $0xc94] ss:$40 sps:$4 sm:$0xff]  }
 0x305   :  { %11714 = vmatprep.subr.bf16.mxu1 %v19207_v46  ;;  %11703 = vmatprep.mubr.bf16.mxu0 %v21595_v36  ;;  %v19249_v46 = vld [vmem:[%s28192_s1 + $0x1194] ss:$40 sps:$4 sm:$0xff]  }
 0x306   :  { %11744 = vmatprep.mubr.bf16.mxu1 %v21599_v37 }
 0x307   :  { %11674 = vmatpush1.bf16.msra.mxu0 %v19202_v54  ;;  %v19244_v54 = vld [vmem:[%s28192_s1 + $0xc90] ss:$40 sps:$4 sm:$0xff]  }
 0x308   :  { %11715 = vmatpush1.bf16.msra.mxu1 %v19205_v4  ;;  %11675 = vmatprep.subr.bf16.mxu0 %v19210_v10  ;;  %v19247_v4 = vld [vmem:[%s28192_s1 + $0x1190] ss:$40 sps:$4 sm:$0xff]   ;;  %v19252_v10 = vld [vmem:[%s28192_s1 + $0xce4] ss:$40 sps:$4 sm:$0xff]  }
 0x309   :  { %11716 = vmatprep.subr.bf16.mxu1 %v19213_v63  ;;  %v19255_v63 = vld [vmem:[%s28192_s1 + $0x11e4] ss:$40 sps:$4 sm:$0xff]  }
 0x30b   :  { %11676 = vmatpush1.bf16.msra.mxu0 %v19208_v2  ;;  %v19250_v2 = vld [vmem:[%s28192_s1 + $0xce0] ss:$40 sps:$4 sm:$0xff]  }
 0x30c   :  { %11717 = vmatpush1.bf16.msra.mxu1 %v19211_v3  ;;  %11677 = vmatprep.subr.bf16.mxu0 %v19216_v5  ;;  %v19253_v3 = vld [vmem:[%s28192_s1 + $0x11e0] ss:$40 sps:$4 sm:$0xff]   ;;  %v19258_v5 = vld [vmem:[%s28192_s1 + $0xd34] ss:$40 sps:$4 sm:$0xff]  }
 0x30d   :  { %11718 = vmatprep.subr.bf16.mxu1 %v19219_v8  ;;  %v19261_v8 = vld [vmem:[%s28192_s1 + $0x1234] ss:$40 sps:$4 sm:$0xff]  }
 0x30f   :  { %11678 = vmatpush1.bf16.msra.mxu0 %v19214_v9  ;;  %v19256_v9 = vld [vmem:[%s28192_s1 + $0xd30] ss:$40 sps:$4 sm:$0xff]  }
 0x310   :  { %11719 = vmatpush1.bf16.msra.mxu1 %v19217_v12  ;;  %11679 = vmatprep.subr.bf16.mxu0 %v19222_v18  ;;  %v19259_v12 = vld [vmem:[%s28192_s1 + $0x1230] ss:$40 sps:$4 sm:$0xff]   ;;  %v19264_v18 = vld [vmem:[%s28192_s1 + $0xd84] ss:$40 sps:$4 sm:$0xff]  }
 0x311   :  { %11720 = vmatprep.subr.bf16.mxu1 %v19225_v11  ;;  %v19267_v11 = vld [vmem:[%s28192_s1 + $0x1284] ss:$40 sps:$4 sm:$0xff]  }
 0x313   :  { %11680 = vmatpush1.bf16.msra.mxu0 %v19220_v13  ;;  %v19262_v13 = vld [vmem:[%s28192_s1 + $0xd80] ss:$40 sps:$4 sm:$0xff]  }
 0x314   :  { %11721 = vmatpush1.bf16.msra.mxu1 %v19223_v14  ;;  %11681 = vmatprep.subr.bf16.mxu0 %v19228_v20  ;;  %v19265_v14 = vld [vmem:[%s28192_s1 + $0x1280] ss:$40 sps:$4 sm:$0xff]   ;;  %v19270_v20 = vld [vmem:[%s28192_s1 + $0xdd4] ss:$40 sps:$4 sm:$0xff]  }
 0x315   :  { %11722 = vmatprep.subr.bf16.mxu1 %v19231_v15  ;;  %v11377_v27 = vpop.f32.mrb[32].mxu0  ;;  %v19273_v15 = vld [vmem:[%s28192_s1 + $0x12d4] ss:$40 sps:$4 sm:$0xff]  }
 0x316   :  { %v11418_v30 = vpop.f32.mrb[32].mxu1  ;;  %v11378_v31 = vadd.f32 %v11377_v27, %v23708_v52  ;;  %v11379_v32 = vpop.f32.mrb[33].mxu0  ;;  %v19243_v52 = vld [vmem:[%s28192_s1 + $0x1144] ss:$40 sps:$4 sm:$0xff]   ;;  %v19274_v27 = vld [vmem:[%s28192_s1 + $0xe20] ss:$40 sps:$4 sm:$0xff]  }
 0x317   :  { %v11420_v34 = vpop.f32.mrb[33].mxu1  ;;  %v11380_v23 = vadd.f32 %v11379_v32, %v23716_v40  ;;  %v11381_v44 = vpop.f32.mrb[34].mxu0  ;;  %11682 = vmatpush1.bf16.msra.mxu0 %v19226_v28  ;;  %v19238_v40 = vld [vmem:[%s28192_s1 + $0xc40] ss:$40 sps:$4 sm:$0xff]   ;;  %v19268_v28 = vld [vmem:[%s28192_s1 + $0xdd0] ss:$40 sps:$4 sm:$0xff]  }
 0x318   :  { %v11422_v22 = vpop.f32.mrb[34].mxu1  ;;  %11723 = vmatpush1.bf16.msra.mxu1 %v19229_v19  ;;  %v23910_v45 = vadd.f32 %v11418_v30, %v11378_v31  ;;  %v11382_v50 = vpop.f32.mrb[35].mxu0  ;;  %11683 = vmatprep.subr.bf16.mxu0 %v19234_v21  ;;  %v19271_v19 = vld [vmem:[%s28192_s1 + $0x12d0] ss:$40 sps:$4 sm:$0xff]   ;;  %v19276_v21 = vld [vmem:[%s28192_s1 + $0xe24] ss:$40 sps:$4 sm:$0xff]  }
 0x319   :  { %v11423_v53 = vpop.f32.mrb[35].mxu1  ;;  %11724 = vmatprep.subr.bf16.mxu1 %v19237_v26  ;;  %v23918_v62 = vadd.f32 %v11420_v34, %v11380_v23  ;;  %v19279_v26 = vld [vmem:[%s28192_s1 + $0x1324] ss:$40 sps:$4 sm:$0xff]   ;;  %v19277_v30 = vld [vmem:[%s28192_s1 + $0x1320] ss:$40 sps:$4 sm:$0xff]  }
 0x31a   :  { %v19280_v31 = vld [vmem:[%s28192_s1 + $0xe70] ss:$40 sps:$4 sm:$0xff]   ;;  %v19288_v34 = vld [vmem:[%s28192_s1 + $0xec4] ss:$40 sps:$4 sm:$0xff]   ;;  %v19286_v44 = vld [vmem:[%s28192_s1 + $0xec0] ss:$40 sps:$4 sm:$0xff]  }
 0x31b   :  { %11684 = vmatpush1.bf16.msra.mxu0 %v19232_v35  ;;  %v19282_v35 = vld [vmem:[%s28192_s1 + $0xe74] ss:$40 sps:$4 sm:$0xff]   ;;  %v19283_v32 = vld [vmem:[%s28192_s1 + $0x1370] ss:$40 sps:$4 sm:$0xff]   ;;  %v19291_v23 = vld [vmem:[%s28192_s1 + $0x13c4] ss:$40 sps:$4 sm:$0xff]  }
 0x31c   :  { %11725 = vmatpush1.bf16.msra.mxu1 %v19235_v29  ;;  %11685 = vmatprep.subr.bf16.mxu0 %v19240_v57  ;;  %v19285_v29 = vld [vmem:[%s28192_s1 + $0x1374] ss:$40 sps:$4 sm:$0xff]   ;;  %v19289_v22 = vld [vmem:[%s28192_s1 + $0x13c0] ss:$40 sps:$4 sm:$0xff]   ;;  %v19292_v57 = vld [vmem:[%s28192_s1 + $0x1410] ss:$40 sps:$4 sm:$0xff]  }
 0x31d   :  { %11726 = vmatprep.subr.bf16.mxu1 %v19243_v52  ;;  %v19294_v50 = vld [vmem:[%s28192_s1 + $0x1414] ss:$40 sps:$4 sm:$0xff]   ;;  %v19295_v52 = vld [vmem:[%s28192_s1 + $0x1910] ss:$40 sps:$4 sm:$0xff]  }
 0x31e   :  { %v19297_v53 = vld [vmem:[%s28192_s1 + $0x1914] ss:$40 sps:$4 sm:$0xff]  }
 0x31f   :  { %11686 = vmatpush1.bf16.msra.mxu0 %v19238_v40  ;;  %v19300_v40 = vld [vmem:[%s28192_s1 + $0x1464] ss:$40 sps:$4 sm:$0xff]  }
 0x320   :  { %11727 = vmatpush1.bf16.msra.mxu1 %v19241_v56  ;;  %11687 = vmatprep.subr.bf16.mxu0 %v19246_v41  ;;  %v19303_v56 = vld [vmem:[%s28192_s1 + $0x1964] ss:$40 sps:$4 sm:$0xff]   ;;  %v19298_v41 = vld [vmem:[%s28192_s1 + $0x1460] ss:$40 sps:$4 sm:$0xff]  }
 0x321   :  { %11728 = vmatprep.subr.bf16.mxu1 %v19249_v46  ;;  %v19301_v46 = vld [vmem:[%s28192_s1 + $0x1960] ss:$40 sps:$4 sm:$0xff]  }
 0x323   :  { %11688 = vmatpush1.bf16.msra.mxu0 %v19244_v54  ;;  %v19306_v54 = vld [vmem:[%s28192_s1 + $0x14b4] ss:$40 sps:$4 sm:$0xff]  }
 0x324   :  { %11729 = vmatpush1.bf16.msra.mxu1 %v19247_v4  ;;  %11689 = vmatprep.subr.bf16.mxu0 %v19252_v10  ;;  %v19309_v4 = vld [vmem:[%s28192_s1 + $0x19b4] ss:$40 sps:$4 sm:$0xff]   ;;  %v19304_v10 = vld [vmem:[%s28192_s1 + $0x14b0] ss:$40 sps:$4 sm:$0xff]  }
 0x325   :  { %11730 = vmatprep.subr.bf16.mxu1 %v19255_v63  ;;  %v19307_v63 = vld [vmem:[%s28192_s1 + $0x19b0] ss:$40 sps:$4 sm:$0xff]  }
 0x327   :  { %11690 = vmatpush1.bf16.msra.mxu0 %v19250_v2  ;;  %v19312_v2 = vld [vmem:[%s28192_s1 + $0x1504] ss:$40 sps:$4 sm:$0xff]  }
 0x328   :  { %11731 = vmatpush1.bf16.msra.mxu1 %v19253_v3  ;;  %11691 = vmatprep.subr.bf16.mxu0 %v19258_v5  ;;  %v19315_v3 = vld [vmem:[%s28192_s1 + $0x1a04] ss:$40 sps:$4 sm:$0xff]   ;;  %v19310_v5 = vld [vmem:[%s28192_s1 + $0x1500] ss:$40 sps:$4 sm:$0xff]  }
 0x329   :  { %11732 = vmatprep.subr.bf16.mxu1 %v19261_v8  ;;  %v19313_v8 = vld [vmem:[%s28192_s1 + $0x1a00] ss:$40 sps:$4 sm:$0xff]  }
 0x32b   :  { %11692 = vmatpush1.bf16.msra.mxu0 %v19256_v9  ;;  %v19318_v9 = vld [vmem:[%s28192_s1 + $0x1554] ss:$40 sps:$4 sm:$0xff]  }
 0x32c   :  { %11733 = vmatpush1.bf16.msra.mxu1 %v19259_v12  ;;  %11693 = vmatprep.subr.bf16.mxu0 %v19264_v18  ;;  %v19321_v12 = vld [vmem:[%s28192_s1 + $0x1a54] ss:$40 sps:$4 sm:$0xff]   ;;  %v19316_v18 = vld [vmem:[%s28192_s1 + $0x1550] ss:$40 sps:$4 sm:$0xff]  }
 0x32d   :  { %11734 = vmatprep.subr.bf16.mxu1 %v19267_v11  ;;  %v19319_v11 = vld [vmem:[%s28192_s1 + $0x1a50] ss:$40 sps:$4 sm:$0xff]  }
 0x32f   :  { %11694 = vmatpush1.bf16.msra.mxu0 %v19262_v13  ;;  %v19324_v13 = vld [vmem:[%s28192_s1 + $0x15a4] ss:$40 sps:$4 sm:$0xff]  }
 0x330   :  { %11735 = vmatpush1.bf16.msra.mxu1 %v19265_v14  ;;  %11695 = vmatprep.subr.bf16.mxu0 %v19270_v20  ;;  %v19327_v14 = vld [vmem:[%s28192_s1 + $0x1aa4] ss:$40 sps:$4 sm:$0xff]   ;;  %v19322_v20 = vld [vmem:[%s28192_s1 + $0x15a0] ss:$40 sps:$4 sm:$0xff]  }
 0x331   :  { %11736 = vmatprep.subr.bf16.mxu1 %v19273_v15  ;;  %v19325_v15 = vld [vmem:[%s28192_s1 + $0x1aa0] ss:$40 sps:$4 sm:$0xff]  }
 0x333   :  { %11696 = vmatpush1.bf16.msra.mxu0 %v19268_v28  ;;  %v19330_v28 = vld [vmem:[%s28192_s1 + $0x15f4] ss:$40 sps:$4 sm:$0xff]  }
 0x334   :  { %11737 = vmatpush1.bf16.msra.mxu1 %v19271_v19  ;;  %11697 = vmatprep.subr.bf16.mxu0 %v19276_v21  ;;  %v19333_v19 = vld [vmem:[%s28192_s1 + $0x1af4] ss:$40 sps:$4 sm:$0xff]  }
 0x335   :  { %11738 = vmatprep.subr.bf16.mxu1 %v19279_v26 }
 0x337   :  { %11698 = vmatpush1.bf16.msra.mxu0 %v19274_v27  ;;  %v19328_v27 = vld [vmem:[%s28192_s1 + $0x15f0] ss:$40 sps:$4 sm:$0xff]  }
 0x338   :  { %11739 = vmatpush1.bf16.msra.mxu1 %v19277_v30  ;;  %11699 = vmatprep.subr.bf16.mxu0 %v19282_v35  ;;  %v19331_v30 = vld [vmem:[%s28192_s1 + $0x1af0] ss:$40 sps:$4 sm:$0xff]  }
 0x339   :  { %11740 = vmatprep.subr.bf16.mxu1 %v19285_v29 }
 0x33b   :  { %11700 = vmatpush1.bf16.msra.mxu0 %v19280_v31 }
 0x33c   :  { %11741 = vmatpush1.bf16.msra.mxu1 %v19283_v32  ;;  %11701 = vmatprep.subr.bf16.mxu0 %v19288_v34 }
 0x33d   :  { %11742 = vmatprep.subr.bf16.mxu1 %v19291_v23 }
 0x33f   :  { %11702 = vmatpush1.bf16.msra.mxu0 %v19286_v44 }
 0x340   :  { %11743 = vmatpush1.bf16.msra.mxu1 %v19289_v22  ;;  %11753 = vmatprep.subr.bf16.mxu0 %v19294_v50 }
 0x341   :  { %11794 = vmatprep.subr.bf16.mxu1 %v19297_v53  ;;  %v19336_v53 = vld [vmem:[%s28192_s1 + $0x1644] ss:$40 sps:$4 sm:$0xff]  }
 0x342   :  { %11704 = vmatmul.mubr.bf16.vlgmr.msra.gmra.mrb[48].mxu0 %v21719_v16 }
 0x343   :  { %11745 = vmatmul.mubr.bf16.vlgmr.msra.gmra.mrb[48].mxu1 %v21723_v17  ;;  %11754 = vmatpush1.bf16.msra.mxu0 %v19292_v57 }
 0x344   :  { %11795 = vmatpush1.bf16.msra.mxu1 %v19295_v52  ;;  %11755 = vmatprep.subr.bf16.mxu0 %v19300_v40  ;;  %v19337_v52 = vld [vmem:[%s28192_s1 + $0x1b40] ss:$40 sps:$4 sm:$0xff]   ;;  %v19342_v40 = vld [vmem:[%s28192_s1 + $0x1694] ss:$40 sps:$4 sm:$0xff]  }
 0x345   :  { %11796 = vmatprep.subr.bf16.mxu1 %v19303_v56  ;;  %11785 = vmatprep.mubr.bf16.mxu0 %v21749_v24  ;;  %v19345_v56 = vld [vmem:[%s28192_s1 + $0x1b94] ss:$40 sps:$4 sm:$0xff]  }
 0x346   :  { %11826 = vmatprep.mubr.bf16.mxu1 %v21753_v25 }
 0x347   :  { %11756 = vmatpush1.bf16.msra.mxu0 %v19298_v41  ;;  %v19340_v41 = vld [vmem:[%s28192_s1 + $0x1690] ss:$40 sps:$4 sm:$0xff]  }
 0x348   :  { %11797 = vmatpush1.bf16.msra.mxu1 %v19301_v46  ;;  %11757 = vmatprep.subr.bf16.mxu0 %v19306_v54  ;;  %v19343_v46 = vld [vmem:[%s28192_s1 + $0x1b90] ss:$40 sps:$4 sm:$0xff]   ;;  %v19348_v54 = vld [vmem:[%s28192_s1 + $0x16e4] ss:$40 sps:$4 sm:$0xff]  }
 0x349   :  { %11798 = vmatprep.subr.bf16.mxu1 %v19309_v4  ;;  %v19351_v4 = vld [vmem:[%s28192_s1 + $0x1be4] ss:$40 sps:$4 sm:$0xff]  }
 0x34b   :  { %11758 = vmatpush1.bf16.msra.mxu0 %v19304_v10  ;;  %v19346_v10 = vld [vmem:[%s28192_s1 + $0x16e0] ss:$40 sps:$4 sm:$0xff]  }
 0x34c   :  { %11799 = vmatpush1.bf16.msra.mxu1 %v19307_v63  ;;  %11759 = vmatprep.subr.bf16.mxu0 %v19312_v2  ;;  %v19349_v63 = vld [vmem:[%s28192_s1 + $0x1be0] ss:$40 sps:$4 sm:$0xff]   ;;  %v19354_v2 = vld [vmem:[%s28192_s1 + $0x1734] ss:$40 sps:$4 sm:$0xff]  }
 0x34d   :  { %11800 = vmatprep.subr.bf16.mxu1 %v19315_v3  ;;  %v19357_v3 = vld [vmem:[%s28192_s1 + $0x1c34] ss:$40 sps:$4 sm:$0xff]  }
 0x34f   :  { %11760 = vmatpush1.bf16.msra.mxu0 %v19310_v5  ;;  %v19352_v5 = vld [vmem:[%s28192_s1 + $0x1730] ss:$40 sps:$4 sm:$0xff]  }
 0x350   :  { %11801 = vmatpush1.bf16.msra.mxu1 %v19313_v8  ;;  %11761 = vmatprep.subr.bf16.mxu0 %v19318_v9  ;;  %v19355_v8 = vld [vmem:[%s28192_s1 + $0x1c30] ss:$40 sps:$4 sm:$0xff]   ;;  %v19360_v9 = vld [vmem:[%s28192_s1 + $0x1784] ss:$40 sps:$4 sm:$0xff]  }
 0x351   :  { %11802 = vmatprep.subr.bf16.mxu1 %v19321_v12  ;;  %v19363_v12 = vld [vmem:[%s28192_s1 + $0x1c84] ss:$40 sps:$4 sm:$0xff]  }
 0x353   :  { %11762 = vmatpush1.bf16.msra.mxu0 %v19316_v18  ;;  %v19358_v18 = vld [vmem:[%s28192_s1 + $0x1780] ss:$40 sps:$4 sm:$0xff]  }
 0x354   :  { %11803 = vmatpush1.bf16.msra.mxu1 %v19319_v11  ;;  %11763 = vmatprep.subr.bf16.mxu0 %v19324_v13  ;;  %v19361_v11 = vld [vmem:[%s28192_s1 + $0x1c80] ss:$40 sps:$4 sm:$0xff]   ;;  %v19366_v13 = vld [vmem:[%s28192_s1 + $0x17d4] ss:$40 sps:$4 sm:$0xff]  }
 0x355   :  { %11804 = vmatprep.subr.bf16.mxu1 %v19327_v14  ;;  %v11459_v21 = vpop.f32.mrb[36].mxu0  ;;  %v19369_v14 = vld [vmem:[%s28192_s1 + $0x1cd4] ss:$40 sps:$4 sm:$0xff]  }
 0x356   :  { %v11500_v26 = vpop.f32.mrb[36].mxu1  ;;  %v11460_v35 = vadd.f32 %v11459_v21, %v23910_v45  ;;  %v11461_v29 = vpop.f32.mrb[37].mxu0  ;;  %v19339_v45 = vld [vmem:[%s28192_s1 + $0x1b44] ss:$40 sps:$4 sm:$0xff]   ;;  %v19370_v21 = vld [vmem:[%s28192_s1 + $0x1820] ss:$40 sps:$4 sm:$0xff]  }
 0x357   :  { %v11502_v31 = vpop.f32.mrb[37].mxu1  ;;  %v11462_v32 = vadd.f32 %v11461_v29, %v23918_v62  ;;  %v11463_v34 = vpop.f32.mrb[38].mxu0  ;;  %11764 = vmatpush1.bf16.msra.mxu0 %v19322_v20  ;;  %v19334_v62 = vld [vmem:[%s28192_s1 + $0x1640] ss:$40 sps:$4 sm:$0xff]   ;;  %v19364_v20 = vld [vmem:[%s28192_s1 + $0x17d0] ss:$40 sps:$4 sm:$0xff]  }
 0x358   :  { %v11504_v23 = vpop.f32.mrb[38].mxu1  ;;  %11805 = vmatpush1.bf16.msra.mxu1 %v19325_v15  ;;  %v24112_v44 = vadd.f32 %v11500_v26, %v11460_v35  ;;  %v11464_v22 = vpop.f32.mrb[39].mxu0  ;;  %11765 = vmatprep.subr.bf16.mxu0 %v19330_v28  ;;  %v19367_v15 = vld [vmem:[%s28192_s1 + $0x1cd0] ss:$40 sps:$4 sm:$0xff]   ;;  %v19372_v28 = vld [vmem:[%s28192_s1 + $0x1824] ss:$40 sps:$4 sm:$0xff]  }
 0x359   :  { %v11505_v50 = vpop.f32.mrb[39].mxu1  ;;  %11806 = vmatprep.subr.bf16.mxu1 %v19333_v19  ;;  %v24120_v57 = vadd.f32 %v11502_v31, %v11462_v32  ;;  %v19375_v19 = vld [vmem:[%s28192_s1 + $0x1d24] ss:$40 sps:$4 sm:$0xff]   ;;  %v19373_v26 = vld [vmem:[%s28192_s1 + $0x1d20] ss:$40 sps:$4 sm:$0xff]  }
 0x35a   :  { %v19376_v35 = vld [vmem:[%s28192_s1 + $0x1870] ss:$40 sps:$4 sm:$0xff]   ;;  %v19384_v31 = vld [vmem:[%s28192_s1 + $0x18c4] ss:$40 sps:$4 sm:$0xff]   ;;  %v19382_v34 = vld [vmem:[%s28192_s1 + $0x18c0] ss:$40 sps:$4 sm:$0xff]  }
 0x35b   :  { %11766 = vmatpush1.bf16.msra.mxu0 %v19328_v27  ;;  %v19378_v27 = vld [vmem:[%s28192_s1 + $0x1874] ss:$40 sps:$4 sm:$0xff]   ;;  %v19379_v29 = vld [vmem:[%s28192_s1 + $0x1d70] ss:$40 sps:$4 sm:$0xff]   ;;  %v19387_v32 = vld [vmem:[%s28192_s1 + $0x1dc4] ss:$40 sps:$4 sm:$0xff]  }
 0x35c   :  { %11807 = vmatpush1.bf16.msra.mxu1 %v19331_v30  ;;  %11767 = vmatprep.subr.bf16.mxu0 %v19336_v53  ;;  %v19381_v30 = vld [vmem:[%s28192_s1 + $0x1d74] ss:$40 sps:$4 sm:$0xff]   ;;  %v19385_v23 = vld [vmem:[%s28192_s1 + $0x1dc0] ss:$40 sps:$4 sm:$0xff]   ;;  %v19388_v53 = vld [vmem:[%s28192_s1 + $0x1e10] ss:$40 sps:$4 sm:$0xff]  }
 0x35d   :  { %11808 = vmatprep.subr.bf16.mxu1 %v19339_v45  ;;  %v19390_v22 = vld [vmem:[%s28192_s1 + $0x1e14] ss:$40 sps:$4 sm:$0xff]   ;;  %v19391_v45 = vld [vmem:[%s28192_s1 + $0x2310] ss:$40 sps:$4 sm:$0xff]  }
 0x35e   :  { %v19393_v50 = vld [vmem:[%s28192_s1 + $0x2314] ss:$40 sps:$4 sm:$0xff]  }
 0x35f   :  { %11768 = vmatpush1.bf16.msra.mxu0 %v19334_v62  ;;  %v19396_v62 = vld [vmem:[%s28192_s1 + $0x1e64] ss:$40 sps:$4 sm:$0xff]  }
 0x360   :  { %11809 = vmatpush1.bf16.msra.mxu1 %v19337_v52  ;;  %11769 = vmatprep.subr.bf16.mxu0 %v19342_v40  ;;  %v19399_v52 = vld [vmem:[%s28192_s1 + $0x2364] ss:$40 sps:$4 sm:$0xff]   ;;  %v19394_v40 = vld [vmem:[%s28192_s1 + $0x1e60] ss:$40 sps:$4 sm:$0xff]  }
 0x361   :  { %11810 = vmatprep.subr.bf16.mxu1 %v19345_v56  ;;  %v19397_v56 = vld [vmem:[%s28192_s1 + $0x2360] ss:$40 sps:$4 sm:$0xff]  }
 0x363   :  { %11770 = vmatpush1.bf16.msra.mxu0 %v19340_v41  ;;  %v19402_v41 = vld [vmem:[%s28192_s1 + $0x1eb4] ss:$40 sps:$4 sm:$0xff]  }
 0x364   :  { %11811 = vmatpush1.bf16.msra.mxu1 %v19343_v46  ;;  %11771 = vmatprep.subr.bf16.mxu0 %v19348_v54  ;;  %v19405_v46 = vld [vmem:[%s28192_s1 + $0x23b4] ss:$40 sps:$4 sm:$0xff]   ;;  %v19400_v54 = vld [vmem:[%s28192_s1 + $0x1eb0] ss:$40 sps:$4 sm:$0xff]  }
 0x365   :  { %11812 = vmatprep.subr.bf16.mxu1 %v19351_v4  ;;  %v19403_v4 = vld [vmem:[%s28192_s1 + $0x23b0] ss:$40 sps:$4 sm:$0xff]  }
 0x367   :  { %11772 = vmatpush1.bf16.msra.mxu0 %v19346_v10  ;;  %v19408_v10 = vld [vmem:[%s28192_s1 + $0x1f04] ss:$40 sps:$4 sm:$0xff]  }
 0x368   :  { %11813 = vmatpush1.bf16.msra.mxu1 %v19349_v63  ;;  %11773 = vmatprep.subr.bf16.mxu0 %v19354_v2  ;;  %v19411_v63 = vld [vmem:[%s28192_s1 + $0x2404] ss:$40 sps:$4 sm:$0xff]   ;;  %v19406_v2 = vld [vmem:[%s28192_s1 + $0x1f00] ss:$40 sps:$4 sm:$0xff]  }
 0x369   :  { %11814 = vmatprep.subr.bf16.mxu1 %v19357_v3  ;;  %v19409_v3 = vld [vmem:[%s28192_s1 + $0x2400] ss:$40 sps:$4 sm:$0xff]  }
 0x36b   :  { %11774 = vmatpush1.bf16.msra.mxu0 %v19352_v5  ;;  %v19414_v5 = vld [vmem:[%s28192_s1 + $0x1f54] ss:$40 sps:$4 sm:$0xff]  }
 0x36c   :  { %11815 = vmatpush1.bf16.msra.mxu1 %v19355_v8  ;;  %11775 = vmatprep.subr.bf16.mxu0 %v19360_v9  ;;  %v19417_v8 = vld [vmem:[%s28192_s1 + $0x2454] ss:$40 sps:$4 sm:$0xff]   ;;  %v19412_v9 = vld [vmem:[%s28192_s1 + $0x1f50] ss:$40 sps:$4 sm:$0xff]  }
 0x36d   :  { %11816 = vmatprep.subr.bf16.mxu1 %v19363_v12  ;;  %v19415_v12 = vld [vmem:[%s28192_s1 + $0x2450] ss:$40 sps:$4 sm:$0xff]  }
 0x36f   :  { %11776 = vmatpush1.bf16.msra.mxu0 %v19358_v18  ;;  %v19420_v18 = vld [vmem:[%s28192_s1 + $0x1fa4] ss:$40 sps:$4 sm:$0xff]  }
 0x370   :  { %11817 = vmatpush1.bf16.msra.mxu1 %v19361_v11  ;;  %11777 = vmatprep.subr.bf16.mxu0 %v19366_v13  ;;  %v19423_v11 = vld [vmem:[%s28192_s1 + $0x24a4] ss:$40 sps:$4 sm:$0xff]   ;;  %v19418_v13 = vld [vmem:[%s28192_s1 + $0x1fa0] ss:$40 sps:$4 sm:$0xff]  }
 0x371   :  { %11818 = vmatprep.subr.bf16.mxu1 %v19369_v14  ;;  %v19421_v14 = vld [vmem:[%s28192_s1 + $0x24a0] ss:$40 sps:$4 sm:$0xff]  }
 0x373   :  { %11778 = vmatpush1.bf16.msra.mxu0 %v19364_v20  ;;  %v19426_v20 = vld [vmem:[%s28192_s1 + $0x1ff4] ss:$40 sps:$4 sm:$0xff]  }
 0x374   :  { %11819 = vmatpush1.bf16.msra.mxu1 %v19367_v15  ;;  %11779 = vmatprep.subr.bf16.mxu0 %v19372_v28  ;;  %v19429_v15 = vld [vmem:[%s28192_s1 + $0x24f4] ss:$40 sps:$4 sm:$0xff]  }
 0x375   :  { %11820 = vmatprep.subr.bf16.mxu1 %v19375_v19 }
 0x377   :  { %11780 = vmatpush1.bf16.msra.mxu0 %v19370_v21  ;;  %v19424_v21 = vld [vmem:[%s28192_s1 + $0x1ff0] ss:$40 sps:$4 sm:$0xff]  }
 0x378   :  { %11821 = vmatpush1.bf16.msra.mxu1 %v19373_v26  ;;  %11781 = vmatprep.subr.bf16.mxu0 %v19378_v27  ;;  %v19427_v26 = vld [vmem:[%s28192_s1 + $0x24f0] ss:$40 sps:$4 sm:$0xff]  }
 0x379   :  { %11822 = vmatprep.subr.bf16.mxu1 %v19381_v30 }
 0x37b   :  { %11782 = vmatpush1.bf16.msra.mxu0 %v19376_v35 }
 0x37c   :  { %11823 = vmatpush1.bf16.msra.mxu1 %v19379_v29  ;;  %11783 = vmatprep.subr.bf16.mxu0 %v19384_v31 }
 0x37d   :  { %11824 = vmatprep.subr.bf16.mxu1 %v19387_v32 }
 0x37f   :  { %11784 = vmatpush1.bf16.msra.mxu0 %v19382_v34 }
 0x380   :  { %11825 = vmatpush1.bf16.msra.mxu1 %v19385_v23  ;;  %11835 = vmatprep.subr.bf16.mxu0 %v19390_v22 }
 0x381   :  { %11876 = vmatprep.subr.bf16.mxu1 %v19393_v50  ;;  %v19432_v50 = vld [vmem:[%s28192_s1 + $0x2044] ss:$40 sps:$4 sm:$0xff]  }
 0x382   :  { %11786 = vmatmul.mubr.bf16.vlgmr.msra.gmra.mrb[52].mxu0 %v21947_v38 }
 0x383   :  { %11827 = vmatmul.mubr.bf16.vlgmr.msra.gmra.mrb[52].mxu1 %v21951_v39  ;;  %11836 = vmatpush1.bf16.msra.mxu0 %v19388_v53 }
 0x384   :  { %11877 = vmatpush1.bf16.msra.mxu1 %v19391_v45  ;;  %11837 = vmatprep.subr.bf16.mxu0 %v19396_v62  ;;  %v19433_v45 = vld [vmem:[%s28192_s1 + $0x2540] ss:$40 sps:$4 sm:$0xff]   ;;  %v19438_v62 = vld [vmem:[%s28192_s1 + $0x2094] ss:$40 sps:$4 sm:$0xff]  }
 0x385   :  { %11878 = vmatprep.subr.bf16.mxu1 %v19399_v52  ;;  %11867 = vmatprep.mubr.bf16.mxu0 %v21971_v42  ;;  %v19441_v52 = vld [vmem:[%s28192_s1 + $0x2594] ss:$40 sps:$4 sm:$0xff]  }
 0x386   :  { %11908 = vmatprep.mubr.bf16.mxu1 %v21975_v43 }
 0x387   :  { %11838 = vmatpush1.bf16.msra.mxu0 %v19394_v40  ;;  %v19436_v40 = vld [vmem:[%s28192_s1 + $0x2090] ss:$40 sps:$4 sm:$0xff]  }
 0x388   :  { %11879 = vmatpush1.bf16.msra.mxu1 %v19397_v56  ;;  %11839 = vmatprep.subr.bf16.mxu0 %v19402_v41  ;;  %v19439_v56 = vld [vmem:[%s28192_s1 + $0x2590] ss:$40 sps:$4 sm:$0xff]   ;;  %v19444_v41 = vld [vmem:[%s28192_s1 + $0x20e4] ss:$40 sps:$4 sm:$0xff]  }
 0x389   :  { %11880 = vmatprep.subr.bf16.mxu1 %v19405_v46  ;;  %v19447_v46 = vld [vmem:[%s28192_s1 + $0x25e4] ss:$40 sps:$4 sm:$0xff]  }
 0x38b   :  { %11840 = vmatpush1.bf16.msra.mxu0 %v19400_v54  ;;  %v19442_v54 = vld [vmem:[%s28192_s1 + $0x20e0] ss:$40 sps:$4 sm:$0xff]  }
 0x38c   :  { %11881 = vmatpush1.bf16.msra.mxu1 %v19403_v4  ;;  %11841 = vmatprep.subr.bf16.mxu0 %v19408_v10  ;;  %v19445_v4 = vld [vmem:[%s28192_s1 + $0x25e0] ss:$40 sps:$4 sm:$0xff]   ;;  %v19450_v10 = vld [vmem:[%s28192_s1 + $0x2134] ss:$40 sps:$4 sm:$0xff]  }
 0x38d   :  { %11882 = vmatprep.subr.bf16.mxu1 %v19411_v63  ;;  %v19453_v63 = vld [vmem:[%s28192_s1 + $0x2634] ss:$40 sps:$4 sm:$0xff]  }
 0x38f   :  { %11842 = vmatpush1.bf16.msra.mxu0 %v19406_v2  ;;  %v19448_v2 = vld [vmem:[%s28192_s1 + $0x2130] ss:$40 sps:$4 sm:$0xff]  }
 0x390   :  { %11883 = vmatpush1.bf16.msra.mxu1 %v19409_v3  ;;  %11843 = vmatprep.subr.bf16.mxu0 %v19414_v5  ;;  %v19451_v3 = vld [vmem:[%s28192_s1 + $0x2630] ss:$40 sps:$4 sm:$0xff]   ;;  %v19456_v5 = vld [vmem:[%s28192_s1 + $0x2184] ss:$40 sps:$4 sm:$0xff]  }
 0x391   :  { %11884 = vmatprep.subr.bf16.mxu1 %v19417_v8  ;;  %v19459_v8 = vld [vmem:[%s28192_s1 + $0x2684] ss:$40 sps:$4 sm:$0xff]  }
 0x393   :  { %11844 = vmatpush1.bf16.msra.mxu0 %v19412_v9  ;;  %v19454_v9 = vld [vmem:[%s28192_s1 + $0x2180] ss:$40 sps:$4 sm:$0xff]  }
 0x394   :  { %11885 = vmatpush1.bf16.msra.mxu1 %v19415_v12  ;;  %11845 = vmatprep.subr.bf16.mxu0 %v19420_v18  ;;  %v19457_v12 = vld [vmem:[%s28192_s1 + $0x2680] ss:$40 sps:$4 sm:$0xff]   ;;  %v19462_v18 = vld [vmem:[%s28192_s1 + $0x21d4] ss:$40 sps:$4 sm:$0xff]  }
 0x395   :  { %11886 = vmatprep.subr.bf16.mxu1 %v19423_v11  ;;  %v11541_v28 = vpop.f32.mrb[40].mxu0  ;;  %v19465_v11 = vld [vmem:[%s28192_s1 + $0x26d4] ss:$40 sps:$4 sm:$0xff]  }
 0x396   :  { %v11582_v19 = vpop.f32.mrb[40].mxu1  ;;  %v11542_v27 = vadd.f32 %v11541_v28, %v24112_v44  ;;  %v11543_v30 = vpop.f32.mrb[41].mxu0  ;;  %v19435_v44 = vld [vmem:[%s28192_s1 + $0x2544] ss:$40 sps:$4 sm:$0xff]   ;;  %v19466_v28 = vld [vmem:[%s28192_s1 + $0x2220] ss:$40 sps:$4 sm:$0xff]  }
 0x397   :  { %v11584_v35 = vpop.f32.mrb[41].mxu1  ;;  %v11544_v29 = vadd.f32 %v11543_v30, %v24120_v57  ;;  %v11545_v31 = vpop.f32.mrb[42].mxu0  ;;  %11846 = vmatpush1.bf16.msra.mxu0 %v19418_v13  ;;  %v19430_v57 = vld [vmem:[%s28192_s1 + $0x2040] ss:$40 sps:$4 sm:$0xff]   ;;  %v19460_v13 = vld [vmem:[%s28192_s1 + $0x21d0] ss:$40 sps:$4 sm:$0xff]  }
 0x398   :  { %v11586_v32 = vpop.f32.mrb[42].mxu1  ;;  %11887 = vmatpush1.bf16.msra.mxu1 %v19421_v14  ;;  %v24314_v34 = vadd.f32 %v11582_v19, %v11542_v27  ;;  %v11546_v23 = vpop.f32.mrb[43].mxu0  ;;  %11847 = vmatprep.subr.bf16.mxu0 %v19426_v20  ;;  %v19463_v14 = vld [vmem:[%s28192_s1 + $0x26d0] ss:$40 sps:$4 sm:$0xff]   ;;  %v19468_v20 = vld [vmem:[%s28192_s1 + $0x2224] ss:$40 sps:$4 sm:$0xff]  }
 0x399   :  { %v11587_v22 = vpop.f32.mrb[43].mxu1  ;;  %11888 = vmatprep.subr.bf16.mxu1 %v19429_v15  ;;  %v24322_v53 = vadd.f32 %v11584_v35, %v11544_v29  ;;  %v19471_v15 = vld [vmem:[%s28192_s1 + $0x2724] ss:$40 sps:$4 sm:$0xff]   ;;  %v19469_v19 = vld [vmem:[%s28192_s1 + $0x2720] ss:$40 sps:$4 sm:$0xff]  }
 0x39a   :  { %v19472_v27 = vld [vmem:[%s28192_s1 + $0x2270] ss:$40 sps:$4 sm:$0xff]   ;;  %v19480_v35 = vld [vmem:[%s28192_s1 + $0x22c4] ss:$40 sps:$4 sm:$0xff]   ;;  %v19478_v31 = vld [vmem:[%s28192_s1 + $0x22c0] ss:$40 sps:$4 sm:$0xff]  }
 0x39b   :  { %11848 = vmatpush1.bf16.msra.mxu0 %v19424_v21  ;;  %v19474_v21 = vld [vmem:[%s28192_s1 + $0x2274] ss:$40 sps:$4 sm:$0xff]   ;;  %v19475_v30 = vld [vmem:[%s28192_s1 + $0x2770] ss:$40 sps:$4 sm:$0xff]   ;;  %v19483_v29 = vld [vmem:[%s28192_s1 + $0x27c4] ss:$40 sps:$4 sm:$0xff]  }
 0x39c   :  { %11889 = vmatpush1.bf16.msra.mxu1 %v19427_v26  ;;  %11849 = vmatprep.subr.bf16.mxu0 %v19432_v50  ;;  %v19477_v26 = vld [vmem:[%s28192_s1 + $0x2774] ss:$40 sps:$4 sm:$0xff]   ;;  %v19481_v32 = vld [vmem:[%s28192_s1 + $0x27c0] ss:$40 sps:$4 sm:$0xff]   ;;  %v19484_v50 = vld [vmem:[%s28192_s1 + $0x2810] ss:$40 sps:$4 sm:$0xff]  }
 0x39d   :  { %11890 = vmatprep.subr.bf16.mxu1 %v19435_v44  ;;  %v19486_v23 = vld [vmem:[%s28192_s1 + $0x2814] ss:$40 sps:$4 sm:$0xff]   ;;  %v19487_v44 = vld [vmem:[%s28192_s1 + $0x2d10] ss:$40 sps:$4 sm:$0xff]  }
 0x39e   :  { %v19489_v22 = vld [vmem:[%s28192_s1 + $0x2d14] ss:$40 sps:$4 sm:$0xff]  }
 0x39f   :  { %11850 = vmatpush1.bf16.msra.mxu0 %v19430_v57  ;;  %v19492_v57 = vld [vmem:[%s28192_s1 + $0x2864] ss:$40 sps:$4 sm:$0xff]  }
 0x3a0   :  { %11891 = vmatpush1.bf16.msra.mxu1 %v19433_v45  ;;  %11851 = vmatprep.subr.bf16.mxu0 %v19438_v62  ;;  %v19495_v45 = vld [vmem:[%s28192_s1 + $0x2d64] ss:$40 sps:$4 sm:$0xff]   ;;  %v19490_v62 = vld [vmem:[%s28192_s1 + $0x2860] ss:$40 sps:$4 sm:$0xff]  }
 0x3a1   :  { %11892 = vmatprep.subr.bf16.mxu1 %v19441_v52  ;;  %v19493_v52 = vld [vmem:[%s28192_s1 + $0x2d60] ss:$40 sps:$4 sm:$0xff]  }
 0x3a3   :  { %11852 = vmatpush1.bf16.msra.mxu0 %v19436_v40  ;;  %v19498_v40 = vld [vmem:[%s28192_s1 + $0x28b4] ss:$40 sps:$4 sm:$0xff]  }
 0x3a4   :  { %11893 = vmatpush1.bf16.msra.mxu1 %v19439_v56  ;;  %11853 = vmatprep.subr.bf16.mxu0 %v19444_v41  ;;  %v19501_v56 = vld [vmem:[%s28192_s1 + $0x2db4] ss:$40 sps:$4 sm:$0xff]   ;;  %v19496_v41 = vld [vmem:[%s28192_s1 + $0x28b0] ss:$40 sps:$4 sm:$0xff]  }
 0x3a5   :  { %11894 = vmatprep.subr.bf16.mxu1 %v19447_v46  ;;  %v19499_v46 = vld [vmem:[%s28192_s1 + $0x2db0] ss:$40 sps:$4 sm:$0xff]  }
 0x3a7   :  { %11854 = vmatpush1.bf16.msra.mxu0 %v19442_v54  ;;  %v19504_v54 = vld [vmem:[%s28192_s1 + $0x2904] ss:$40 sps:$4 sm:$0xff]  }
 0x3a8   :  { %11895 = vmatpush1.bf16.msra.mxu1 %v19445_v4  ;;  %11855 = vmatprep.subr.bf16.mxu0 %v19450_v10  ;;  %v19507_v4 = vld [vmem:[%s28192_s1 + $0x2e04] ss:$40 sps:$4 sm:$0xff]   ;;  %v19502_v10 = vld [vmem:[%s28192_s1 + $0x2900] ss:$40 sps:$4 sm:$0xff]  }
 0x3a9   :  { %11896 = vmatprep.subr.bf16.mxu1 %v19453_v63  ;;  %v19505_v63 = vld [vmem:[%s28192_s1 + $0x2e00] ss:$40 sps:$4 sm:$0xff]  }
 0x3ab   :  { %11856 = vmatpush1.bf16.msra.mxu0 %v19448_v2  ;;  %v19510_v2 = vld [vmem:[%s28192_s1 + $0x2954] ss:$40 sps:$4 sm:$0xff]  }
 0x3ac   :  { %11897 = vmatpush1.bf16.msra.mxu1 %v19451_v3  ;;  %11857 = vmatprep.subr.bf16.mxu0 %v19456_v5  ;;  %v19513_v3 = vld [vmem:[%s28192_s1 + $0x2e54] ss:$40 sps:$4 sm:$0xff]   ;;  %v19508_v5 = vld [vmem:[%s28192_s1 + $0x2950] ss:$40 sps:$4 sm:$0xff]  }
 0x3ad   :  { %11898 = vmatprep.subr.bf16.mxu1 %v19459_v8  ;;  %v19511_v8 = vld [vmem:[%s28192_s1 + $0x2e50] ss:$40 sps:$4 sm:$0xff]  }
 0x3af   :  { %11858 = vmatpush1.bf16.msra.mxu0 %v19454_v9  ;;  %v19516_v9 = vld [vmem:[%s28192_s1 + $0x29a4] ss:$40 sps:$4 sm:$0xff]  }
 0x3b0   :  { %11899 = vmatpush1.bf16.msra.mxu1 %v19457_v12  ;;  %11859 = vmatprep.subr.bf16.mxu0 %v19462_v18  ;;  %v19519_v12 = vld [vmem:[%s28192_s1 + $0x2ea4] ss:$40 sps:$4 sm:$0xff]   ;;  %v19514_v18 = vld [vmem:[%s28192_s1 + $0x29a0] ss:$40 sps:$4 sm:$0xff]  }
 0x3b1   :  { %11900 = vmatprep.subr.bf16.mxu1 %v19465_v11  ;;  %v19517_v11 = vld [vmem:[%s28192_s1 + $0x2ea0] ss:$40 sps:$4 sm:$0xff]  }
 0x3b3   :  { %11860 = vmatpush1.bf16.msra.mxu0 %v19460_v13  ;;  %v19522_v13 = vld [vmem:[%s28192_s1 + $0x29f4] ss:$40 sps:$4 sm:$0xff]  }
 0x3b4   :  { %11901 = vmatpush1.bf16.msra.mxu1 %v19463_v14  ;;  %11861 = vmatprep.subr.bf16.mxu0 %v19468_v20  ;;  %v19525_v14 = vld [vmem:[%s28192_s1 + $0x2ef4] ss:$40 sps:$4 sm:$0xff]  }
 0x3b5   :  { %11902 = vmatprep.subr.bf16.mxu1 %v19471_v15 }
 0x3b7   :  { %11862 = vmatpush1.bf16.msra.mxu0 %v19466_v28 }
 0x3b8   :  { %11903 = vmatpush1.bf16.msra.mxu1 %v19469_v19  ;;  %11863 = vmatprep.subr.bf16.mxu0 %v19474_v21 }
 0x3b9   :  { %11904 = vmatprep.subr.bf16.mxu1 %v19477_v26 }
 0x3bb   :  { %11864 = vmatpush1.bf16.msra.mxu0 %v19472_v27 }
 0x3bc   :  { %11905 = vmatpush1.bf16.msra.mxu1 %v19475_v30  ;;  %11865 = vmatprep.subr.bf16.mxu0 %v19480_v35  ;;  %v19520_v35 = vld [vmem:[%s28192_s1 + $0x29f0] ss:$40 sps:$4 sm:$0xff]  }
 0x3bd   :  { %11906 = vmatprep.subr.bf16.mxu1 %v19483_v29  ;;  %v19523_v29 = vld [vmem:[%s28192_s1 + $0x2ef0] ss:$40 sps:$4 sm:$0xff]  }
 0x3bf   :  { %11866 = vmatpush1.bf16.msra.mxu0 %v19478_v31 }
 0x3c0   :  { %11907 = vmatpush1.bf16.msra.mxu1 %v19481_v32  ;;  %11917 = vmatprep.subr.bf16.mxu0 %v19486_v23  ;;  %v19528_v23 = vld [vmem:[%s28192_s1 + $0x2a44] ss:$40 sps:$4 sm:$0xff]  }
 0x3c1   :  { %11958 = vmatprep.subr.bf16.mxu1 %v19489_v22  ;;  %v19531_v22 = vld [vmem:[%s28192_s1 + $0x2f44] ss:$40 sps:$4 sm:$0xff]  }
 0x3c2   :  { %11868 = vmatmul.mubr.bf16.vlgmr.msra.gmra.mrb[56].mxu0 %v22168_v59 }
 0x3c3   :  { %11909 = vmatmul.mubr.bf16.vlgmr.msra.gmra.mrb[56].mxu1 %v22172_v60  ;;  %11918 = vmatpush1.bf16.msra.mxu0 %v19484_v50  ;;  %v19526_v50 = vld [vmem:[%s28192_s1 + $0x2a40] ss:$40 sps:$4 sm:$0xff]  }
 0x3c4   :  { %11959 = vmatpush1.bf16.msra.mxu1 %v19487_v44  ;;  %11919 = vmatprep.subr.bf16.mxu0 %v19492_v57  ;;  %v19529_v44 = vld [vmem:[%s28192_s1 + $0x2f40] ss:$40 sps:$4 sm:$0xff]   ;;  %v19534_v57 = vld [vmem:[%s28192_s1 + $0x2a94] ss:$40 sps:$4 sm:$0xff]  }
 0x3c5   :  { %11960 = vmatprep.subr.bf16.mxu1 %v19495_v45  ;;  %11949 = vmatprep.mubr.bf16.mxu0 %v22193_v0  ;;  %v19537_v45 = vld [vmem:[%s28192_s1 + $0x2f94] ss:$40 sps:$4 sm:$0xff]  }
 0x3c6   :  { %11990 = vmatprep.mubr.bf16.mxu1 %v22197_v1 }
 0x3c7   :  { %11920 = vmatpush1.bf16.msra.mxu0 %v19490_v62  ;;  %v19532_v62 = vld [vmem:[%s28192_s1 + $0x2a90] ss:$40 sps:$4 sm:$0xff]  }
 0x3c8   :  { %11961 = vmatpush1.bf16.msra.mxu1 %v19493_v52  ;;  %11921 = vmatprep.subr.bf16.mxu0 %v19498_v40  ;;  %v19535_v52 = vld [vmem:[%s28192_s1 + $0x2f90] ss:$40 sps:$4 sm:$0xff]   ;;  %v19540_v40 = vld [vmem:[%s28192_s1 + $0x2ae4] ss:$40 sps:$4 sm:$0xff]  }
 0x3c9   :  { %11962 = vmatprep.subr.bf16.mxu1 %v19501_v56  ;;  %v19543_v56 = vld [vmem:[%s28192_s1 + $0x2fe4] ss:$40 sps:$4 sm:$0xff]  }
 0x3cb   :  { %11922 = vmatpush1.bf16.msra.mxu0 %v19496_v41  ;;  %v19538_v41 = vld [vmem:[%s28192_s1 + $0x2ae0] ss:$40 sps:$4 sm:$0xff]  }
 0x3cc   :  { %11963 = vmatpush1.bf16.msra.mxu1 %v19499_v46  ;;  %11923 = vmatprep.subr.bf16.mxu0 %v19504_v54  ;;  %v19541_v46 = vld [vmem:[%s28192_s1 + $0x2fe0] ss:$40 sps:$4 sm:$0xff]   ;;  %v19546_v54 = vld [vmem:[%s28192_s1 + $0x2b34] ss:$40 sps:$4 sm:$0xff]  }
 0x3cd   :  { %11964 = vmatprep.subr.bf16.mxu1 %v19507_v4  ;;  %v19549_v4 = vld [vmem:[%s28192_s1 + $0x3034] ss:$40 sps:$4 sm:$0xff]  }
 0x3cf   :  { %11924 = vmatpush1.bf16.msra.mxu0 %v19502_v10  ;;  %v19544_v10 = vld [vmem:[%s28192_s1 + $0x2b30] ss:$40 sps:$4 sm:$0xff]  }
 0x3d0   :  { %11965 = vmatpush1.bf16.msra.mxu1 %v19505_v63  ;;  %11925 = vmatprep.subr.bf16.mxu0 %v19510_v2  ;;  %v19547_v63 = vld [vmem:[%s28192_s1 + $0x3030] ss:$40 sps:$4 sm:$0xff]   ;;  %v19552_v2 = vld [vmem:[%s28192_s1 + $0x2b84] ss:$40 sps:$4 sm:$0xff]  }
 0x3d1   :  { %11966 = vmatprep.subr.bf16.mxu1 %v19513_v3  ;;  %v19555_v3 = vld [vmem:[%s28192_s1 + $0x3084] ss:$40 sps:$4 sm:$0xff]  }
 0x3d3   :  { %11926 = vmatpush1.bf16.msra.mxu0 %v19508_v5  ;;  %v19550_v5 = vld [vmem:[%s28192_s1 + $0x2b80] ss:$40 sps:$4 sm:$0xff]  }
 0x3d4   :  { %11967 = vmatpush1.bf16.msra.mxu1 %v19511_v8  ;;  %11927 = vmatprep.subr.bf16.mxu0 %v19516_v9  ;;  %v19553_v8 = vld [vmem:[%s28192_s1 + $0x3080] ss:$40 sps:$4 sm:$0xff]   ;;  %v19558_v9 = vld [vmem:[%s28192_s1 + $0x2bd4] ss:$40 sps:$4 sm:$0xff]  }
 0x3d5   :  { %11968 = vmatprep.subr.bf16.mxu1 %v19519_v12  ;;  %v11623_v20 = vpop.f32.mrb[44].mxu0  ;;  %v19561_v12 = vld [vmem:[%s28192_s1 + $0x30d4] ss:$40 sps:$4 sm:$0xff]  }
 0x3d6   :  { %v11664_v15 = vpop.f32.mrb[44].mxu1  ;;  %v11625_v19 = vpop.f32.mrb[45].mxu0 }
 0x3d7   :  { %v24508_v28 = vadd.f32 %v11664_v15, %v11623_v20  ;;  %v11666_v21 = vpop.f32.mrb[45].mxu1  ;;  %v11627_v27 = vpop.f32.mrb[46].mxu0  ;;  %11928 = vmatpush1.bf16.msra.mxu0 %v19514_v18  ;;  %v19556_v18 = vld [vmem:[%s28192_s1 + $0x2bd0] ss:$40 sps:$4 sm:$0xff]   ;;  %v19562_v20 = vld [vmem:[%s28192_s1 + $0x2c20] ss:$40 sps:$4 sm:$0xff]  }
 0x3d8   :  { %v24510_v26 = vadd.f32 %v11666_v21, %v11625_v19  ;;  %v11668_v30 = vpop.f32.mrb[46].mxu1  ;;  %11969 = vmatpush1.bf16.msra.mxu1 %v19517_v11  ;;  %v11628_v31 = vpop.f32.mrb[47].mxu0  ;;  %11929 = vmatprep.subr.bf16.mxu0 %v19522_v13  ;;  %v19559_v11 = vld [vmem:[%s28192_s1 + $0x30d0] ss:$40 sps:$4 sm:$0xff]   ;;  %v19564_v13 = vld [vmem:[%s28192_s1 + $0x2c24] ss:$40 sps:$4 sm:$0xff]  }
 0x3d9   :  { %v11669_v32 = vpop.f32.mrb[47].mxu1  ;;  %11970 = vmatprep.subr.bf16.mxu1 %v19525_v14  ;;  %v19567_v14 = vld [vmem:[%s28192_s1 + $0x3124] ss:$40 sps:$4 sm:$0xff]   ;;  %v19565_v15 = vld [vmem:[%s28192_s1 + $0x3120] ss:$40 sps:$4 sm:$0xff]  }
 0x3da   :  { %v19570_v19 = vld [vmem:[%s28192_s1 + $0x2c74] ss:$40 sps:$4 sm:$0xff]   ;;  %v19568_v27 = vld [vmem:[%s28192_s1 + $0x2c70] ss:$40 sps:$4 sm:$0xff]   ;;  %v19574_v31 = vld [vmem:[%s28192_s1 + $0x2cc0] ss:$40 sps:$4 sm:$0xff]  }
 0x3db   :  { %11930 = vmatpush1.bf16.msra.mxu0 %v19520_v35  ;;  %v19573_v21 = vld [vmem:[%s28192_s1 + $0x3174] ss:$40 sps:$4 sm:$0xff]   ;;  %v19571_v30 = vld [vmem:[%s28192_s1 + $0x3170] ss:$40 sps:$4 sm:$0xff]   ;;  %v19576_v35 = vld [vmem:[%s28192_s1 + $0x2cc4] ss:$40 sps:$4 sm:$0xff]  }
 0x3dc   :  { %11971 = vmatpush1.bf16.msra.mxu1 %v19523_v29  ;;  %11931 = vmatprep.subr.bf16.mxu0 %v19528_v23  ;;  %v19579_v29 = vld [vmem:[%s28192_s1 + $0x31c4] ss:$40 sps:$4 sm:$0xff]   ;;  %v19577_v32 = vld [vmem:[%s28192_s1 + $0x31c0] ss:$40 sps:$4 sm:$0xff]   ;;  %v19582_v23 = vld [vmem:[%s28192_s1 + $0x3214] ss:$40 sps:$4 sm:$0xff]  }
 0x3dd   :  { %11972 = vmatprep.subr.bf16.mxu1 %v19531_v22  ;;  %v19585_v22 = vld [vmem:[%s28192_s1 + $0x1c] ss:$40 sps:$4 sm:$0xff]  }
 0x3df   :  { %11932 = vmatpush1.bf16.msra.mxu0 %v19526_v50  ;;  %v19580_v50 = vld [vmem:[%s28192_s1 + $0x3210] ss:$40 sps:$4 sm:$0xff]  }
 0x3e0   :  { %11973 = vmatpush1.bf16.msra.mxu1 %v19529_v44  ;;  %11933 = vmatprep.subr.bf16.mxu0 %v19534_v57  ;;  %v19583_v44 = vld [vmem:[%s28192_s1 + $0x18] ss:$40 sps:$4 sm:$0xff]   ;;  %v19588_v57 = vld [vmem:[%s28192_s1 + $0x3264] ss:$40 sps:$4 sm:$0xff]  }
 0x3e1   :  { %11974 = vmatprep.subr.bf16.mxu1 %v19537_v45  ;;  %v19591_v45 = vld [vmem:[%s28192_s1 + $0x6c] ss:$40 sps:$4 sm:$0xff]  }
 0x3e3   :  { %11934 = vmatpush1.bf16.msra.mxu0 %v19532_v62  ;;  %v19586_v62 = vld [vmem:[%s28192_s1 + $0x3260] ss:$40 sps:$4 sm:$0xff]  }
 0x3e4   :  { %11975 = vmatpush1.bf16.msra.mxu1 %v19535_v52  ;;  %11935 = vmatprep.subr.bf16.mxu0 %v19540_v40  ;;  %v19589_v52 = vld [vmem:[%s28192_s1 + $0x68] ss:$40 sps:$4 sm:$0xff]   ;;  %v19594_v40 = vld [vmem:[%s28192_s1 + $0x32b4] ss:$40 sps:$4 sm:$0xff]  }
 0x3e5   :  { %11976 = vmatprep.subr.bf16.mxu1 %v19543_v56  ;;  %v19597_v56 = vld [vmem:[%s28192_s1 + $0xbc] ss:$40 sps:$4 sm:$0xff]  }
 0x3e7   :  { %11936 = vmatpush1.bf16.msra.mxu0 %v19538_v41  ;;  %v19592_v41 = vld [vmem:[%s28192_s1 + $0x32b0] ss:$40 sps:$4 sm:$0xff]  }
 0x3e8   :  { %11977 = vmatpush1.bf16.msra.mxu1 %v19541_v46  ;;  %11937 = vmatprep.subr.bf16.mxu0 %v19546_v54  ;;  %v19595_v46 = vld [vmem:[%s28192_s1 + $0xb8] ss:$40 sps:$4 sm:$0xff]   ;;  %v19600_v54 = vld [vmem:[%s28192_s1 + $0x3304] ss:$40 sps:$4 sm:$0xff]  }
 0x3e9   :  { %11978 = vmatprep.subr.bf16.mxu1 %v19549_v4  ;;  %v19603_v4 = vld [vmem:[%s28192_s1 + $0x10c] ss:$40 sps:$4 sm:$0xff]  }
 0x3eb   :  { %11938 = vmatpush1.bf16.msra.mxu0 %v19544_v10  ;;  %v19598_v10 = vld [vmem:[%s28192_s1 + $0x3300] ss:$40 sps:$4 sm:$0xff]  }
 0x3ec   :  { %11979 = vmatpush1.bf16.msra.mxu1 %v19547_v63  ;;  %11939 = vmatprep.subr.bf16.mxu0 %v19552_v2  ;;  %v19601_v63 = vld [vmem:[%s28192_s1 + $0x108] ss:$40 sps:$4 sm:$0xff]   ;;  %v19606_v2 = vld [vmem:[%s28192_s1 + $0x3354] ss:$40 sps:$4 sm:$0xff]  }
 0x3ed   :  { %11980 = vmatprep.subr.bf16.mxu1 %v19555_v3  ;;  %v19609_v3 = vld [vmem:[%s28192_s1 + $0x15c] ss:$40 sps:$4 sm:$0xff]  }
 0x3ef   :  { %11940 = vmatpush1.bf16.msra.mxu0 %v19550_v5  ;;  %v19604_v5 = vld [vmem:[%s28192_s1 + $0x3350] ss:$40 sps:$4 sm:$0xff]  }
 0x3f0   :  { %11981 = vmatpush1.bf16.msra.mxu1 %v19553_v8  ;;  %11941 = vmatprep.subr.bf16.mxu0 %v19558_v9  ;;  %v19607_v8 = vld [vmem:[%s28192_s1 + $0x158] ss:$40 sps:$4 sm:$0xff]   ;;  %v19612_v9 = vld [vmem:[%s28192_s1 + $0x33a4] ss:$40 sps:$4 sm:$0xff]  }
 0x3f1   :  { %11982 = vmatprep.subr.bf16.mxu1 %v19561_v12  ;;  %v19615_v12 = vld [vmem:[%s28192_s1 + $0x1ac] ss:$40 sps:$4 sm:$0xff]  }
 0x3f3   :  { %11942 = vmatpush1.bf16.msra.mxu0 %v19556_v18  ;;  %v19610_v18 = vld [vmem:[%s28192_s1 + $0x33a0] ss:$40 sps:$4 sm:$0xff]  }
 0x3f4   :  { %11983 = vmatpush1.bf16.msra.mxu1 %v19559_v11  ;;  %11943 = vmatprep.subr.bf16.mxu0 %v19564_v13  ;;  %v19613_v11 = vld [vmem:[%s28192_s1 + $0x1a8] ss:$40 sps:$4 sm:$0xff]   ;;  %v19618_v13 = vld [vmem:[%s28192_s1 + $0x33f4] ss:$40 sps:$4 sm:$0xff]  }
 0x3f5   :  { %11984 = vmatprep.subr.bf16.mxu1 %v19567_v14  ;;  %v19621_v14 = vld [vmem:[%s28192_s1 + $0x1fc] ss:$40 sps:$4 sm:$0xff]  }
 0x3f7   :  { %11944 = vmatpush1.bf16.msra.mxu0 %v19562_v20 }
 0x3f8   :  { %11985 = vmatpush1.bf16.msra.mxu1 %v19565_v15  ;;  %11945 = vmatprep.subr.bf16.mxu0 %v19570_v19 }
 0x3f9   :  { %11986 = vmatprep.subr.bf16.mxu1 %v19573_v21 }
 0x3fb   :  { %11946 = vmatpush1.bf16.msra.mxu0 %v19568_v27 }
 0x3fc   :  { %11987 = vmatpush1.bf16.msra.mxu1 %v19571_v30  ;;  %11947 = vmatprep.subr.bf16.mxu0 %v19576_v35 }
 0x3fd   :  { %11988 = vmatprep.subr.bf16.mxu1 %v19579_v29 }
 0x3ff   :  { %11948 = vmatpush1.bf16.msra.mxu0 %v19574_v31  ;;  %v19616_v31 = vld [vmem:[%s28192_s1 + $0x33f0] ss:$40 sps:$4 sm:$0xff]  }
 0x400   :  { %11989 = vmatpush1.bf16.msra.mxu1 %v19577_v32  ;;  %11999 = vmatprep.subr.bf16.mxu0 %v19582_v23  ;;  %v19619_v32 = vld [vmem:[%s28192_s1 + $0x1f8] ss:$40 sps:$4 sm:$0xff]  }
 0x401   :  { %12040 = vmatprep.subr.bf16.mxu1 %v19585_v22 }
 0x402   :  { %11950 = vmatmul.mubr.bf16.vlgmr.msra.gmra.mrb[60].mxu0 %v22400_v48 }
 0x403   :  { %11991 = vmatmul.mubr.bf16.vlgmr.msra.gmra.mrb[60].mxu1 %v22404_v49  ;;  %12000 = vmatpush1.bf16.msra.mxu0 %v19580_v50  ;;  %v19627_v50 = vld [vmem:[%s28192_s1 + $0x24c] ss:$40 sps:$4 sm:$0xff]  }
 0x404   :  { %12041 = vmatpush1.bf16.msra.mxu1 %v19583_v44  ;;  %12001 = vmatprep.subr.bf16.mxu0 %v19588_v57  ;;  %v19622_v57 = vld [vmem:[%s28192_s1 + $0x3440] ss:$40 sps:$4 sm:$0xff]  }
 0x405   :  { %12042 = vmatprep.subr.bf16.mxu1 %v19591_v45  ;;  %12031 = vmatprep.mubr.bf16.mxu0 %v22414_v58  ;;  %v19625_v45 = vld [vmem:[%s28192_s1 + $0x248] ss:$40 sps:$4 sm:$0xff]  }
 0x406   :  { %12072 = vmatprep.mubr.bf16.mxu1 %v21430_v47 }
 0x407   :  { %12002 = vmatpush1.bf16.msra.mxu0 %v19586_v62  ;;  %v19630_v62 = vld [vmem:[%s28192_s1 + $0x3494] ss:$40 sps:$4 sm:$0xff]  }
 0x408   :  { %12043 = vmatpush1.bf16.msra.mxu1 %v19589_v52  ;;  %12003 = vmatprep.subr.bf16.mxu0 %v19594_v40  ;;  %v19633_v52 = vld [vmem:[%s28192_s1 + $0x29c] ss:$40 sps:$4 sm:$0xff]   ;;  %v19628_v40 = vld [vmem:[%s28192_s1 + $0x3490] ss:$40 sps:$4 sm:$0xff]  }
 0x409   :  { %12044 = vmatprep.subr.bf16.mxu1 %v19597_v56  ;;  %v19631_v56 = vld [vmem:[%s28192_s1 + $0x298] ss:$40 sps:$4 sm:$0xff]  }
 0x40b   :  { %12004 = vmatpush1.bf16.msra.mxu0 %v19592_v41  ;;  %v19636_v41 = vld [vmem:[%s28192_s1 + $0x34e4] ss:$40 sps:$4 sm:$0xff]  }
 0x40c   :  { %12045 = vmatpush1.bf16.msra.mxu1 %v19595_v46  ;;  %12005 = vmatprep.subr.bf16.mxu0 %v19600_v54  ;;  %v19639_v46 = vld [vmem:[%s28192_s1 + $0x2ec] ss:$40 sps:$4 sm:$0xff]   ;;  %v19634_v54 = vld [vmem:[%s28192_s1 + $0x34e0] ss:$40 sps:$4 sm:$0xff]  }
 0x40d   :  { %12046 = vmatprep.subr.bf16.mxu1 %v19603_v4  ;;  %v19637_v4 = vld [vmem:[%s28192_s1 + $0x2e8] ss:$40 sps:$4 sm:$0xff]  }
 0x40f   :  { %12006 = vmatpush1.bf16.msra.mxu0 %v19598_v10  ;;  %v19642_v10 = vld [vmem:[%s28192_s1 + $0x3534] ss:$40 sps:$4 sm:$0xff]  }
 0x410   :  { %12047 = vmatpush1.bf16.msra.mxu1 %v19601_v63  ;;  %12007 = vmatprep.subr.bf16.mxu0 %v19606_v2  ;;  %v19645_v63 = vld [vmem:[%s28192_s1 + $0x33c] ss:$40 sps:$4 sm:$0xff]   ;;  %v19640_v2 = vld [vmem:[%s28192_s1 + $0x3530] ss:$40 sps:$4 sm:$0xff]  }
 0x411   :  { %12048 = vmatprep.subr.bf16.mxu1 %v19609_v3  ;;  %v19643_v3 = vld [vmem:[%s28192_s1 + $0x338] ss:$40 sps:$4 sm:$0xff]  }
 0x413   :  { %12008 = vmatpush1.bf16.msra.mxu0 %v19604_v5  ;;  %v19648_v5 = vld [vmem:[%s28192_s1 + $0x3584] ss:$40 sps:$4 sm:$0xff]  }
 0x414   :  { %12049 = vmatpush1.bf16.msra.mxu1 %v19607_v8  ;;  %12009 = vmatprep.subr.bf16.mxu0 %v19612_v9  ;;  %v19651_v8 = vld [vmem:[%s28192_s1 + $0x38c] ss:$40 sps:$4 sm:$0xff]   ;;  %v19646_v9 = vld [vmem:[%s28192_s1 + $0x3580] ss:$40 sps:$4 sm:$0xff]  }
 0x415   :  { %12050 = vmatprep.subr.bf16.mxu1 %v19615_v12  ;;  %v11705_v20 = vpop.f32.mrb[48].mxu0  ;;  %v19649_v12 = vld [vmem:[%s28192_s1 + $0x388] ss:$40 sps:$4 sm:$0xff]  }
 0x416   :  { %v11746_v15 = vpop.f32.mrb[48].mxu1  ;;  %v11706_v19 = vadd.f32 %v11705_v20, %v24508_v28  ;;  %v11707_v21 = vpop.f32.mrb[49].mxu0  ;;  %v19660_v20 = vld [vmem:[%s28192_s1 + $0x3624] ss:$40 sps:$4 sm:$0xff]  }
 0x417   :  { %v11748_v27 = vpop.f32.mrb[49].mxu1  ;;  %v11708_v30 = vadd.f32 %v11707_v21, %v24510_v26  ;;  %v11709_v35 = vpop.f32.mrb[50].mxu0  ;;  %12010 = vmatpush1.bf16.msra.mxu0 %v19610_v18  ;;  %v19624_v26 = vld [vmem:[%s28192_s1 + $0x3444] ss:$40 sps:$4 sm:$0xff]   ;;  %v19654_v18 = vld [vmem:[%s28192_s1 + $0x35d4] ss:$40 sps:$4 sm:$0xff]  }
 0x418   :  { %v11750_v29 = vpop.f32.mrb[50].mxu1  ;;  %12051 = vmatpush1.bf16.msra.mxu1 %v19613_v11  ;;  %v24716_v23 = vadd.f32 %v11746_v15, %v11706_v19  ;;  %v11710_v22 = vpop.f32.mrb[51].mxu0  ;;  %12011 = vmatprep.subr.bf16.mxu0 %v19618_v13  ;;  %v19657_v11 = vld [vmem:[%s28192_s1 + $0x3dc] ss:$40 sps:$4 sm:$0xff]   ;;  %v19652_v13 = vld [vmem:[%s28192_s1 + $0x35d0] ss:$40 sps:$4 sm:$0xff]  }
 0x419   :  { %v11751_v28 = vpop.f32.mrb[51].mxu1  ;;  %12052 = vmatprep.subr.bf16.mxu1 %v19621_v14  ;;  %v24724_v44 = vadd.f32 %v11748_v27, %v11708_v30  ;;  %v19655_v14 = vld [vmem:[%s28192_s1 + $0x3d8] ss:$40 sps:$4 sm:$0xff]   ;;  %v19663_v15 = vld [vmem:[%s28192_s1 + $0x42c] ss:$40 sps:$4 sm:$0xff]  }
 0x41a   :  { %v19658_v19 = vld [vmem:[%s28192_s1 + $0x3620] ss:$40 sps:$4 sm:$0xff]   ;;  %v19666_v27 = vld [vmem:[%s28192_s1 + $0x3674] ss:$40 sps:$4 sm:$0xff]   ;;  %v19664_v35 = vld [vmem:[%s28192_s1 + $0x3670] ss:$40 sps:$4 sm:$0xff]  }
 0x41b   :  { %12012 = vmatpush1.bf16.msra.mxu0 %v19616_v31  ;;  %v19661_v21 = vld [vmem:[%s28192_s1 + $0x428] ss:$40 sps:$4 sm:$0xff]   ;;  %v19669_v30 = vld [vmem:[%s28192_s1 + $0x47c] ss:$40 sps:$4 sm:$0xff]   ;;  %v19667_v29 = vld [vmem:[%s28192_s1 + $0x478] ss:$40 sps:$4 sm:$0xff]  }
 0x41c   :  { %12053 = vmatpush1.bf16.msra.mxu1 %v19619_v32  ;;  %12013 = vmatprep.subr.bf16.mxu0 %v19624_v26  ;;  %v19672_v31 = vld [vmem:[%s28192_s1 + $0x36c4] ss:$40 sps:$4 sm:$0xff]   ;;  %v19670_v22 = vld [vmem:[%s28192_s1 + $0x36c0] ss:$40 sps:$4 sm:$0xff]  }
 0x41d   :  { %12054 = vmatprep.subr.bf16.mxu1 %v19627_v50  ;;  %v19675_v32 = vld [vmem:[%s28192_s1 + $0x4cc] ss:$40 sps:$4 sm:$0xff]   ;;  %v19673_v28 = vld [vmem:[%s28192_s1 + $0x4c8] ss:$40 sps:$4 sm:$0xff]   ;;  %v19678_v26 = vld [vmem:[%s28192_s1 + $0x51c] ss:$40 sps:$4 sm:$0xff]  }
 0x41e   :  { %v19681_v50 = vld [vmem:[%s28192_s1 + $0xa1c] ss:$40 sps:$4 sm:$0xff]  }
 0x41f   :  { %12014 = vmatpush1.bf16.msra.mxu0 %v19622_v57  ;;  %v19676_v57 = vld [vmem:[%s28192_s1 + $0x518] ss:$40 sps:$4 sm:$0xff]  }
 0x420   :  { %12055 = vmatpush1.bf16.msra.mxu1 %v19625_v45  ;;  %12015 = vmatprep.subr.bf16.mxu0 %v19630_v62  ;;  %v19679_v45 = vld [vmem:[%s28192_s1 + $0xa18] ss:$40 sps:$4 sm:$0xff]   ;;  %v19684_v62 = vld [vmem:[%s28192_s1 + $0x56c] ss:$40 sps:$4 sm:$0xff]  }
 0x421   :  { %12056 = vmatprep.subr.bf16.mxu1 %v19633_v52  ;;  %v19687_v52 = vld [vmem:[%s28192_s1 + $0xa6c] ss:$40 sps:$4 sm:$0xff]  }
 0x423   :  { %12016 = vmatpush1.bf16.msra.mxu0 %v19628_v40  ;;  %v19682_v40 = vld [vmem:[%s28192_s1 + $0x568] ss:$40 sps:$4 sm:$0xff]  }
 0x424   :  { %12057 = vmatpush1.bf16.msra.mxu1 %v19631_v56  ;;  %12017 = vmatprep.subr.bf16.mxu0 %v19636_v41  ;;  %v19685_v56 = vld [vmem:[%s28192_s1 + $0xa68] ss:$40 sps:$4 sm:$0xff]   ;;  %v19690_v41 = vld [vmem:[%s28192_s1 + $0x5bc] ss:$40 sps:$4 sm:$0xff]  }
 0x425   :  { %12058 = vmatprep.subr.bf16.mxu1 %v19639_v46  ;;  %v19693_v46 = vld [vmem:[%s28192_s1 + $0xabc] ss:$40 sps:$4 sm:$0xff]  }
 0x427   :  { %12018 = vmatpush1.bf16.msra.mxu0 %v19634_v54  ;;  %v19688_v54 = vld [vmem:[%s28192_s1 + $0x5b8] ss:$40 sps:$4 sm:$0xff]  }
 0x428   :  { %12059 = vmatpush1.bf16.msra.mxu1 %v19637_v4  ;;  %12019 = vmatprep.subr.bf16.mxu0 %v19642_v10  ;;  %v19691_v4 = vld [vmem:[%s28192_s1 + $0xab8] ss:$40 sps:$4 sm:$0xff]   ;;  %v19696_v10 = vld [vmem:[%s28192_s1 + $0x60c] ss:$40 sps:$4 sm:$0xff]  }
 0x429   :  { %12060 = vmatprep.subr.bf16.mxu1 %v19645_v63  ;;  %v19699_v63 = vld [vmem:[%s28192_s1 + $0xb0c] ss:$40 sps:$4 sm:$0xff]  }
 0x42b   :  { %12020 = vmatpush1.bf16.msra.mxu0 %v19640_v2  ;;  %v19694_v2 = vld [vmem:[%s28192_s1 + $0x608] ss:$40 sps:$4 sm:$0xff]  }
 0x42c   :  { %12061 = vmatpush1.bf16.msra.mxu1 %v19643_v3  ;;  %12021 = vmatprep.subr.bf16.mxu0 %v19648_v5  ;;  %v19697_v3 = vld [vmem:[%s28192_s1 + $0xb08] ss:$40 sps:$4 sm:$0xff]   ;;  %v19702_v5 = vld [vmem:[%s28192_s1 + $0x65c] ss:$40 sps:$4 sm:$0xff]  }
 0x42d   :  { %12062 = vmatprep.subr.bf16.mxu1 %v19651_v8  ;;  %v19705_v8 = vld [vmem:[%s28192_s1 + $0xb5c] ss:$40 sps:$4 sm:$0xff]  }
 0x42f   :  { %12022 = vmatpush1.bf16.msra.mxu0 %v19646_v9  ;;  %v19700_v9 = vld [vmem:[%s28192_s1 + $0x658] ss:$40 sps:$4 sm:$0xff]  }
 0x430   :  { %12063 = vmatpush1.bf16.msra.mxu1 %v19649_v12  ;;  %12023 = vmatprep.subr.bf16.mxu0 %v19654_v18  ;;  %v19703_v12 = vld [vmem:[%s28192_s1 + $0xb58] ss:$40 sps:$4 sm:$0xff]   ;;  %v19708_v18 = vld [vmem:[%s28192_s1 + $0x6ac] ss:$40 sps:$4 sm:$0xff]  }
 0x431   :  { %12064 = vmatprep.subr.bf16.mxu1 %v19657_v11  ;;  %v19711_v11 = vld [vmem:[%s28192_s1 + $0xbac] ss:$40 sps:$4 sm:$0xff]  }
 0x433   :  { %12024 = vmatpush1.bf16.msra.mxu0 %v19652_v13  ;;  %v19706_v13 = vld [vmem:[%s28192_s1 + $0x6a8] ss:$40 sps:$4 sm:$0xff]  }
 0x434   :  { %12065 = vmatpush1.bf16.msra.mxu1 %v19655_v14  ;;  %12025 = vmatprep.subr.bf16.mxu0 %v19660_v20  ;;  %v19709_v14 = vld [vmem:[%s28192_s1 + $0xba8] ss:$40 sps:$4 sm:$0xff]   ;;  %v19714_v20 = vld [vmem:[%s28192_s1 + $0x6fc] ss:$40 sps:$4 sm:$0xff]  }
 0x435   :  { %12066 = vmatprep.subr.bf16.mxu1 %v19663_v15  ;;  %v19717_v15 = vld [vmem:[%s28192_s1 + $0xbfc] ss:$40 sps:$4 sm:$0xff]  }
 0x437   :  { %12026 = vmatpush1.bf16.msra.mxu0 %v19658_v19 }
 0x438   :  { %12067 = vmatpush1.bf16.msra.mxu1 %v19661_v21  ;;  %12027 = vmatprep.subr.bf16.mxu0 %v19666_v27 }
 0x439   :  { %12068 = vmatprep.subr.bf16.mxu1 %v19669_v30 }
 0x43b   :  { %12028 = vmatpush1.bf16.msra.mxu0 %v19664_v35 }
 0x43c   :  { %12069 = vmatpush1.bf16.msra.mxu1 %v19667_v29  ;;  %12029 = vmatprep.subr.bf16.mxu0 %v19672_v31 }
 0x43d   :  { %12070 = vmatprep.subr.bf16.mxu1 %v19675_v32 }
 0x43f   :  { %12030 = vmatpush1.bf16.msra.mxu0 %v19670_v22  ;;  %v19712_v22 = vld [vmem:[%s28192_s1 + $0x6f8] ss:$40 sps:$4 sm:$0xff]  }
 0x440   :  { %12071 = vmatpush1.bf16.msra.mxu1 %v19673_v28  ;;  %12081 = vmatprep.subr.bf16.mxu0 %v19678_v26  ;;  %v19715_v28 = vld [vmem:[%s28192_s1 + $0xbf8] ss:$40 sps:$4 sm:$0xff]  }
 0x441   :  { %12122 = vmatprep.subr.bf16.mxu1 %v19681_v50 }
 0x442   :  { %12032 = vmatmul.mubr.bf16.vlgmr.msra.gmra.mrb[64].mxu0 %v22614_v33 }
 0x443   :  { %12073 = vmatmul.mubr.bf16.vlgmr.msra.gmra.mrb[64].mxu1 %v21499_v6  ;;  %12082 = vmatpush1.bf16.msra.mxu0 %v19676_v57  ;;  %v19723_v57 = vld [vmem:[%s28192_s1 + $0xc4c] ss:$40 sps:$4 sm:$0xff]  }
 0x444   :  { %12123 = vmatpush1.bf16.msra.mxu1 %v19679_v45  ;;  %12083 = vmatprep.subr.bf16.mxu0 %v19684_v62  ;;  %v19718_v62 = vld [vmem:[%s28192_s1 + $0x748] ss:$40 sps:$4 sm:$0xff]  }
 0x445   :  { %12124 = vmatprep.subr.bf16.mxu1 %v19687_v52  ;;  %12113 = vmatprep.mubr.bf16.mxu0 %v21441_v51  ;;  %v19721_v52 = vld [vmem:[%s28192_s1 + $0xc48] ss:$40 sps:$4 sm:$0xff]  }
 0x446   :  { %12154 = vmatprep.mubr.bf16.mxu1 %v21595_v36 }
 0x447   :  { %12084 = vmatpush1.bf16.msra.mxu0 %v19682_v40  ;;  %v19726_v40 = vld [vmem:[%s28192_s1 + $0x79c] ss:$40 sps:$4 sm:$0xff]  }
 0x448   :  { %12125 = vmatpush1.bf16.msra.mxu1 %v19685_v56  ;;  %12085 = vmatprep.subr.bf16.mxu0 %v19690_v41  ;;  %v19729_v56 = vld [vmem:[%s28192_s1 + $0xc9c] ss:$40 sps:$4 sm:$0xff]   ;;  %v19724_v41 = vld [vmem:[%s28192_s1 + $0x798] ss:$40 sps:$4 sm:$0xff]  }
 0x449   :  { %12126 = vmatprep.subr.bf16.mxu1 %v19693_v46  ;;  %v19727_v46 = vld [vmem:[%s28192_s1 + $0xc98] ss:$40 sps:$4 sm:$0xff]  }
 0x44b   :  { %12086 = vmatpush1.bf16.msra.mxu0 %v19688_v54  ;;  %v19732_v54 = vld [vmem:[%s28192_s1 + $0x7ec] ss:$40 sps:$4 sm:$0xff]  }
 0x44c   :  { %12127 = vmatpush1.bf16.msra.mxu1 %v19691_v4  ;;  %12087 = vmatprep.subr.bf16.mxu0 %v19696_v10  ;;  %v19735_v4 = vld [vmem:[%s28192_s1 + $0xcec] ss:$40 sps:$4 sm:$0xff]   ;;  %v19730_v10 = vld [vmem:[%s28192_s1 + $0x7e8] ss:$40 sps:$4 sm:$0xff]  }
 0x44d   :  { %12128 = vmatprep.subr.bf16.mxu1 %v19699_v63  ;;  %v19733_v63 = vld [vmem:[%s28192_s1 + $0xce8] ss:$40 sps:$4 sm:$0xff]  }
 0x44f   :  { %12088 = vmatpush1.bf16.msra.mxu0 %v19694_v2  ;;  %v19738_v2 = vld [vmem:[%s28192_s1 + $0x83c] ss:$40 sps:$4 sm:$0xff]  }
 0x450   :  { %12129 = vmatpush1.bf16.msra.mxu1 %v19697_v3  ;;  %12089 = vmatprep.subr.bf16.mxu0 %v19702_v5  ;;  %v19741_v3 = vld [vmem:[%s28192_s1 + $0xd3c] ss:$40 sps:$4 sm:$0xff]   ;;  %v19736_v5 = vld [vmem:[%s28192_s1 + $0x838] ss:$40 sps:$4 sm:$0xff]  }
 0x451   :  { %12130 = vmatprep.subr.bf16.mxu1 %v19705_v8  ;;  %v19739_v8 = vld [vmem:[%s28192_s1 + $0xd38] ss:$40 sps:$4 sm:$0xff]  }
 0x453   :  { %12090 = vmatpush1.bf16.msra.mxu0 %v19700_v9  ;;  %v19744_v9 = vld [vmem:[%s28192_s1 + $0x88c] ss:$40 sps:$4 sm:$0xff]  }
 0x454   :  { %12131 = vmatpush1.bf16.msra.mxu1 %v19703_v12  ;;  %12091 = vmatprep.subr.bf16.mxu0 %v19708_v18  ;;  %v19747_v12 = vld [vmem:[%s28192_s1 + $0xd8c] ss:$40 sps:$4 sm:$0xff]   ;;  %v19742_v18 = vld [vmem:[%s28192_s1 + $0x888] ss:$40 sps:$4 sm:$0xff]  }
 0x455   :  { %12132 = vmatprep.subr.bf16.mxu1 %v19711_v11  ;;  %v11787_v19 = vpop.f32.mrb[52].mxu0  ;;  %v19745_v11 = vld [vmem:[%s28192_s1 + $0xd88] ss:$40 sps:$4 sm:$0xff]  }
 0x456   :  { %v11828_v21 = vpop.f32.mrb[52].mxu1  ;;  %v11788_v27 = vadd.f32 %v11787_v19, %v24716_v23  ;;  %v11789_v30 = vpop.f32.mrb[53].mxu0  ;;  %v19756_v19 = vld [vmem:[%s28192_s1 + $0x92c] ss:$40 sps:$4 sm:$0xff]  }
 0x457   :  { %v11830_v35 = vpop.f32.mrb[53].mxu1  ;;  %v11790_v29 = vadd.f32 %v11789_v30, %v24724_v44  ;;  %v11791_v31 = vpop.f32.mrb[54].mxu0  ;;  %12092 = vmatpush1.bf16.msra.mxu0 %v19706_v13  ;;  %v19720_v44 = vld [vmem:[%s28192_s1 + $0x74c] ss:$40 sps:$4 sm:$0xff]   ;;  %v19750_v13 = vld [vmem:[%s28192_s1 + $0x8dc] ss:$40 sps:$4 sm:$0xff]  }
 0x458   :  { %v11832_v32 = vpop.f32.mrb[54].mxu1  ;;  %12133 = vmatpush1.bf16.msra.mxu1 %v19709_v14  ;;  %v24918_v26 = vadd.f32 %v11828_v21, %v11788_v27  ;;  %v11792_v50 = vpop.f32.mrb[55].mxu0  ;;  %12093 = vmatprep.subr.bf16.mxu0 %v19714_v20  ;;  %v19753_v14 = vld [vmem:[%s28192_s1 + $0xddc] ss:$40 sps:$4 sm:$0xff]   ;;  %v19748_v20 = vld [vmem:[%s28192_s1 + $0x8d8] ss:$40 sps:$4 sm:$0xff]  }
 0x459   :  { %v11833_v23 = vpop.f32.mrb[55].mxu1  ;;  %12134 = vmatprep.subr.bf16.mxu1 %v19717_v15  ;;  %v24926_v45 = vadd.f32 %v11830_v35, %v11790_v29  ;;  %v19751_v15 = vld [vmem:[%s28192_s1 + $0xdd8] ss:$40 sps:$4 sm:$0xff]   ;;  %v19759_v21 = vld [vmem:[%s28192_s1 + $0xe2c] ss:$40 sps:$4 sm:$0xff]  }
 0x45a   :  { %v19754_v27 = vld [vmem:[%s28192_s1 + $0x928] ss:$40 sps:$4 sm:$0xff]   ;;  %v19762_v35 = vld [vmem:[%s28192_s1 + $0x97c] ss:$40 sps:$4 sm:$0xff]   ;;  %v19760_v31 = vld [vmem:[%s28192_s1 + $0x978] ss:$40 sps:$4 sm:$0xff]  }
 0x45b   :  { %12094 = vmatpush1.bf16.msra.mxu0 %v19712_v22  ;;  %v19757_v30 = vld [vmem:[%s28192_s1 + $0xe28] ss:$40 sps:$4 sm:$0xff]   ;;  %v19765_v29 = vld [vmem:[%s28192_s1 + $0xe7c] ss:$40 sps:$4 sm:$0xff]   ;;  %v19763_v32 = vld [vmem:[%s28192_s1 + $0xe78] ss:$40 sps:$4 sm:$0xff]  }
 0x45c   :  { %12135 = vmatpush1.bf16.msra.mxu1 %v19715_v28  ;;  %12095 = vmatprep.subr.bf16.mxu0 %v19720_v44  ;;  %v19768_v22 = vld [vmem:[%s28192_s1 + $0x9cc] ss:$40 sps:$4 sm:$0xff]   ;;  %v19766_v50 = vld [vmem:[%s28192_s1 + $0x9c8] ss:$40 sps:$4 sm:$0xff]   ;;  %v19774_v44 = vld [vmem:[%s28192_s1 + $0xf1c] ss:$40 sps:$4 sm:$0xff]  }
 0x45d   :  { %12136 = vmatprep.subr.bf16.mxu1 %v19723_v57  ;;  %v19771_v28 = vld [vmem:[%s28192_s1 + $0xecc] ss:$40 sps:$4 sm:$0xff]   ;;  %v19769_v23 = vld [vmem:[%s28192_s1 + $0xec8] ss:$40 sps:$4 sm:$0xff]   ;;  %v19777_v57 = vld [vmem:[%s28192_s1 + $0x141c] ss:$40 sps:$4 sm:$0xff]  }
 0x45f   :  { %12096 = vmatpush1.bf16.msra.mxu0 %v19718_v62  ;;  %v19772_v62 = vld [vmem:[%s28192_s1 + $0xf18] ss:$40 sps:$4 sm:$0xff]  }
 0x460   :  { %12137 = vmatpush1.bf16.msra.mxu1 %v19721_v52  ;;  %12097 = vmatprep.subr.bf16.mxu0 %v19726_v40  ;;  %v19775_v52 = vld [vmem:[%s28192_s1 + $0x1418] ss:$40 sps:$4 sm:$0xff]   ;;  %v19780_v40 = vld [vmem:[%s28192_s1 + $0xf6c] ss:$40 sps:$4 sm:$0xff]  }
 0x461   :  { %12138 = vmatprep.subr.bf16.mxu1 %v19729_v56  ;;  %v19783_v56 = vld [vmem:[%s28192_s1 + $0x146c] ss:$40 sps:$4 sm:$0xff]  }
 0x463   :  { %12098 = vmatpush1.bf16.msra.mxu0 %v19724_v41  ;;  %v19778_v41 = vld [vmem:[%s28192_s1 + $0xf68] ss:$40 sps:$4 sm:$0xff]  }
 0x464   :  { %12139 = vmatpush1.bf16.msra.mxu1 %v19727_v46  ;;  %12099 = vmatprep.subr.bf16.mxu0 %v19732_v54  ;;  %v19781_v46 = vld [vmem:[%s28192_s1 + $0x1468] ss:$40 sps:$4 sm:$0xff]   ;;  %v19786_v54 = vld [vmem:[%s28192_s1 + $0xfbc] ss:$40 sps:$4 sm:$0xff]  }
 0x465   :  { %12140 = vmatprep.subr.bf16.mxu1 %v19735_v4  ;;  %v19789_v4 = vld [vmem:[%s28192_s1 + $0x14bc] ss:$40 sps:$4 sm:$0xff]  }
 0x467   :  { %12100 = vmatpush1.bf16.msra.mxu0 %v19730_v10  ;;  %v19784_v10 = vld [vmem:[%s28192_s1 + $0xfb8] ss:$40 sps:$4 sm:$0xff]  }
 0x468   :  { %12141 = vmatpush1.bf16.msra.mxu1 %v19733_v63  ;;  %12101 = vmatprep.subr.bf16.mxu0 %v19738_v2  ;;  %v19787_v63 = vld [vmem:[%s28192_s1 + $0x14b8] ss:$40 sps:$4 sm:$0xff]   ;;  %v19792_v2 = vld [vmem:[%s28192_s1 + $0x100c] ss:$40 sps:$4 sm:$0xff]  }
 0x469   :  { %12142 = vmatprep.subr.bf16.mxu1 %v19741_v3  ;;  %v19795_v3 = vld [vmem:[%s28192_s1 + $0x150c] ss:$40 sps:$4 sm:$0xff]  }
 0x46b   :  { %12102 = vmatpush1.bf16.msra.mxu0 %v19736_v5  ;;  %v19790_v5 = vld [vmem:[%s28192_s1 + $0x1008] ss:$40 sps:$4 sm:$0xff]  }
 0x46c   :  { %12143 = vmatpush1.bf16.msra.mxu1 %v19739_v8  ;;  %12103 = vmatprep.subr.bf16.mxu0 %v19744_v9  ;;  %v19793_v8 = vld [vmem:[%s28192_s1 + $0x1508] ss:$40 sps:$4 sm:$0xff]   ;;  %v19798_v9 = vld [vmem:[%s28192_s1 + $0x105c] ss:$40 sps:$4 sm:$0xff]  }
 0x46d   :  { %12144 = vmatprep.subr.bf16.mxu1 %v19747_v12  ;;  %v19801_v12 = vld [vmem:[%s28192_s1 + $0x155c] ss:$40 sps:$4 sm:$0xff]  }
 0x46f   :  { %12104 = vmatpush1.bf16.msra.mxu0 %v19742_v18  ;;  %v19796_v18 = vld [vmem:[%s28192_s1 + $0x1058] ss:$40 sps:$4 sm:$0xff]  }
 0x470   :  { %12145 = vmatpush1.bf16.msra.mxu1 %v19745_v11  ;;  %12105 = vmatprep.subr.bf16.mxu0 %v19750_v13  ;;  %v19799_v11 = vld [vmem:[%s28192_s1 + $0x1558] ss:$40 sps:$4 sm:$0xff]   ;;  %v19804_v13 = vld [vmem:[%s28192_s1 + $0x10ac] ss:$40 sps:$4 sm:$0xff]  }
 0x471   :  { %12146 = vmatprep.subr.bf16.mxu1 %v19753_v14  ;;  %v19807_v14 = vld [vmem:[%s28192_s1 + $0x15ac] ss:$40 sps:$4 sm:$0xff]  }
 0x473   :  { %12106 = vmatpush1.bf16.msra.mxu0 %v19748_v20  ;;  %v19802_v20 = vld [vmem:[%s28192_s1 + $0x10a8] ss:$40 sps:$4 sm:$0xff]  }
 0x474   :  { %12147 = vmatpush1.bf16.msra.mxu1 %v19751_v15  ;;  %12107 = vmatprep.subr.bf16.mxu0 %v19756_v19  ;;  %v19805_v15 = vld [vmem:[%s28192_s1 + $0x15a8] ss:$40 sps:$4 sm:$0xff]   ;;  %v19810_v19 = vld [vmem:[%s28192_s1 + $0x10fc] ss:$40 sps:$4 sm:$0xff]  }
 0x475   :  { %12148 = vmatprep.subr.bf16.mxu1 %v19759_v21  ;;  %v19813_v21 = vld [vmem:[%s28192_s1 + $0x15fc] ss:$40 sps:$4 sm:$0xff]  }
 0x477   :  { %12108 = vmatpush1.bf16.msra.mxu0 %v19754_v27 }
 0x478   :  { %12149 = vmatpush1.bf16.msra.mxu1 %v19757_v30  ;;  %12109 = vmatprep.subr.bf16.mxu0 %v19762_v35 }
 0x479   :  { %12150 = vmatprep.subr.bf16.mxu1 %v19765_v29 }
 0x47b   :  { %12110 = vmatpush1.bf16.msra.mxu0 %v19760_v31 }
 0x47c   :  { %12151 = vmatpush1.bf16.msra.mxu1 %v19763_v32  ;;  %12111 = vmatprep.subr.bf16.mxu0 %v19768_v22 }
 0x47d   :  { %12152 = vmatprep.subr.bf16.mxu1 %v19771_v28 }
 0x47f   :  { %12112 = vmatpush1.bf16.msra.mxu0 %v19766_v50  ;;  %v19808_v50 = vld [vmem:[%s28192_s1 + $0x10f8] ss:$40 sps:$4 sm:$0xff]  }
 0x480   :  { %12153 = vmatpush1.bf16.msra.mxu1 %v19769_v23  ;;  %12163 = vmatprep.subr.bf16.mxu0 %v19774_v44  ;;  %v19811_v23 = vld [vmem:[%s28192_s1 + $0x15f8] ss:$40 sps:$4 sm:$0xff]  }
 0x481   :  { %12204 = vmatprep.subr.bf16.mxu1 %v19777_v57 }
 0x482   :  { %12114 = vmatmul.mubr.bf16.vlgmr.msra.gmra.mrb[68].mxu0 %v21501_v7 }
 0x483   :  { %12155 = vmatmul.mubr.bf16.vlgmr.msra.gmra.mrb[68].mxu1 %v21719_v16  ;;  %12164 = vmatpush1.bf16.msra.mxu0 %v19772_v62  ;;  %v19819_v62 = vld [vmem:[%s28192_s1 + $0x164c] ss:$40 sps:$4 sm:$0xff]  }
 0x484   :  { %12205 = vmatpush1.bf16.msra.mxu1 %v19775_v52  ;;  %12165 = vmatprep.subr.bf16.mxu0 %v19780_v40  ;;  %v19814_v40 = vld [vmem:[%s28192_s1 + $0x1148] ss:$40 sps:$4 sm:$0xff]  }
 0x485   :  { %12206 = vmatprep.subr.bf16.mxu1 %v19783_v56  ;;  %12195 = vmatprep.mubr.bf16.mxu0 %v21599_v37  ;;  %v19817_v56 = vld [vmem:[%s28192_s1 + $0x1648] ss:$40 sps:$4 sm:$0xff]  }
 0x486   :  { %12236 = vmatprep.mubr.bf16.mxu1 %v21749_v24 }
 0x487   :  { %12166 = vmatpush1.bf16.msra.mxu0 %v19778_v41  ;;  %v19822_v41 = vld [vmem:[%s28192_s1 + $0x119c] ss:$40 sps:$4 sm:$0xff]  }
 0x488   :  { %12207 = vmatpush1.bf16.msra.mxu1 %v19781_v46  ;;  %12167 = vmatprep.subr.bf16.mxu0 %v19786_v54  ;;  %v19825_v46 = vld [vmem:[%s28192_s1 + $0x169c] ss:$40 sps:$4 sm:$0xff]   ;;  %v19820_v54 = vld [vmem:[%s28192_s1 + $0x1198] ss:$40 sps:$4 sm:$0xff]  }
 0x489   :  { %12208 = vmatprep.subr.bf16.mxu1 %v19789_v4  ;;  %v19823_v4 = vld [vmem:[%s28192_s1 + $0x1698] ss:$40 sps:$4 sm:$0xff]  }
 0x48b   :  { %12168 = vmatpush1.bf16.msra.mxu0 %v19784_v10  ;;  %v19828_v10 = vld [vmem:[%s28192_s1 + $0x11ec] ss:$40 sps:$4 sm:$0xff]  }
 0x48c   :  { %12209 = vmatpush1.bf16.msra.mxu1 %v19787_v63  ;;  %12169 = vmatprep.subr.bf16.mxu0 %v19792_v2  ;;  %v19831_v63 = vld [vmem:[%s28192_s1 + $0x16ec] ss:$40 sps:$4 sm:$0xff]   ;;  %v19826_v2 = vld [vmem:[%s28192_s1 + $0x11e8] ss:$40 sps:$4 sm:$0xff]  }
 0x48d   :  { %12210 = vmatprep.subr.bf16.mxu1 %v19795_v3  ;;  %v19829_v3 = vld [vmem:[%s28192_s1 + $0x16e8] ss:$40 sps:$4 sm:$0xff]  }
 0x48f   :  { %12170 = vmatpush1.bf16.msra.mxu0 %v19790_v5  ;;  %v19834_v5 = vld [vmem:[%s28192_s1 + $0x123c] ss:$40 sps:$4 sm:$0xff]  }
 0x490   :  { %12211 = vmatpush1.bf16.msra.mxu1 %v19793_v8  ;;  %12171 = vmatprep.subr.bf16.mxu0 %v19798_v9  ;;  %v19837_v8 = vld [vmem:[%s28192_s1 + $0x173c] ss:$40 sps:$4 sm:$0xff]   ;;  %v19832_v9 = vld [vmem:[%s28192_s1 + $0x1238] ss:$40 sps:$4 sm:$0xff]  }
 0x491   :  { %12212 = vmatprep.subr.bf16.mxu1 %v19801_v12  ;;  %v19835_v12 = vld [vmem:[%s28192_s1 + $0x1738] ss:$40 sps:$4 sm:$0xff]  }
 0x493   :  { %12172 = vmatpush1.bf16.msra.mxu0 %v19796_v18  ;;  %v19840_v18 = vld [vmem:[%s28192_s1 + $0x128c] ss:$40 sps:$4 sm:$0xff]  }
 0x494   :  { %12213 = vmatpush1.bf16.msra.mxu1 %v19799_v11  ;;  %12173 = vmatprep.subr.bf16.mxu0 %v19804_v13  ;;  %v19843_v11 = vld [vmem:[%s28192_s1 + $0x178c] ss:$40 sps:$4 sm:$0xff]   ;;  %v19838_v13 = vld [vmem:[%s28192_s1 + $0x1288] ss:$40 sps:$4 sm:$0xff]  }
 0x495   :  { %12214 = vmatprep.subr.bf16.mxu1 %v19807_v14  ;;  %v11869_v27 = vpop.f32.mrb[56].mxu0  ;;  %v19841_v14 = vld [vmem:[%s28192_s1 + $0x1788] ss:$40 sps:$4 sm:$0xff]  }
 0x496   :  { %v11910_v30 = vpop.f32.mrb[56].mxu1  ;;  %v11870_v35 = vadd.f32 %v11869_v27, %v24918_v26  ;;  %v11871_v29 = vpop.f32.mrb[57].mxu0  ;;  %v19852_v27 = vld [vmem:[%s28192_s1 + $0x132c] ss:$40 sps:$4 sm:$0xff]  }
 0x497   :  { %v11912_v31 = vpop.f32.mrb[57].mxu1  ;;  %v11872_v32 = vadd.f32 %v11871_v29, %v24926_v45  ;;  %v11873_v22 = vpop.f32.mrb[58].mxu0  ;;  %12174 = vmatpush1.bf16.msra.mxu0 %v19802_v20  ;;  %v19816_v45 = vld [vmem:[%s28192_s1 + $0x114c] ss:$40 sps:$4 sm:$0xff]   ;;  %v19846_v20 = vld [vmem:[%s28192_s1 + $0x12dc] ss:$40 sps:$4 sm:$0xff]  }
 0x498   :  { %v11914_v28 = vpop.f32.mrb[58].mxu1  ;;  %12215 = vmatpush1.bf16.msra.mxu1 %v19805_v15  ;;  %v25120_v44 = vadd.f32 %v11910_v30, %v11870_v35  ;;  %v11874_v57 = vpop.f32.mrb[59].mxu0  ;;  %12175 = vmatprep.subr.bf16.mxu0 %v19810_v19  ;;  %v19849_v15 = vld [vmem:[%s28192_s1 + $0x17dc] ss:$40 sps:$4 sm:$0xff]   ;;  %v19844_v19 = vld [vmem:[%s28192_s1 + $0x12d8] ss:$40 sps:$4 sm:$0xff]  }
 0x499   :  { %v11915_v26 = vpop.f32.mrb[59].mxu1  ;;  %12216 = vmatprep.subr.bf16.mxu1 %v19813_v21  ;;  %v25128_v52 = vadd.f32 %v11912_v31, %v11872_v32  ;;  %v19847_v21 = vld [vmem:[%s28192_s1 + $0x17d8] ss:$40 sps:$4 sm:$0xff]   ;;  %v19855_v30 = vld [vmem:[%s28192_s1 + $0x182c] ss:$40 sps:$4 sm:$0xff]  }
 0x49a   :  { %v19850_v35 = vld [vmem:[%s28192_s1 + $0x1328] ss:$40 sps:$4 sm:$0xff]   ;;  %v19858_v31 = vld [vmem:[%s28192_s1 + $0x137c] ss:$40 sps:$4 sm:$0xff]   ;;  %v19856_v22 = vld [vmem:[%s28192_s1 + $0x1378] ss:$40 sps:$4 sm:$0xff]  }
 0x49b   :  { %12176 = vmatpush1.bf16.msra.mxu0 %v19808_v50  ;;  %v19853_v29 = vld [vmem:[%s28192_s1 + $0x1828] ss:$40 sps:$4 sm:$0xff]   ;;  %v19861_v32 = vld [vmem:[%s28192_s1 + $0x187c] ss:$40 sps:$4 sm:$0xff]   ;;  %v19859_v28 = vld [vmem:[%s28192_s1 + $0x1878] ss:$40 sps:$4 sm:$0xff]  }
 0x49c   :  { %12217 = vmatpush1.bf16.msra.mxu1 %v19811_v23  ;;  %12177 = vmatprep.subr.bf16.mxu0 %v19816_v45  ;;  %v19864_v50 = vld [vmem:[%s28192_s1 + $0x13cc] ss:$40 sps:$4 sm:$0xff]   ;;  %v19862_v57 = vld [vmem:[%s28192_s1 + $0x13c8] ss:$40 sps:$4 sm:$0xff]   ;;  %v19870_v45 = vld [vmem:[%s28192_s1 + $0x191c] ss:$40 sps:$4 sm:$0xff]  }
 0x49d   :  { %12218 = vmatprep.subr.bf16.mxu1 %v19819_v62  ;;  %v19867_v23 = vld [vmem:[%s28192_s1 + $0x18cc] ss:$40 sps:$4 sm:$0xff]   ;;  %v19865_v26 = vld [vmem:[%s28192_s1 + $0x18c8] ss:$40 sps:$4 sm:$0xff]   ;;  %v19873_v62 = vld [vmem:[%s28192_s1 + $0x1e1c] ss:$40 sps:$4 sm:$0xff]  }
 0x49f   :  { %12178 = vmatpush1.bf16.msra.mxu0 %v19814_v40  ;;  %v19868_v40 = vld [vmem:[%s28192_s1 + $0x1918] ss:$40 sps:$4 sm:$0xff]  }
 0x4a0   :  { %12219 = vmatpush1.bf16.msra.mxu1 %v19817_v56  ;;  %12179 = vmatprep.subr.bf16.mxu0 %v19822_v41  ;;  %v19871_v56 = vld [vmem:[%s28192_s1 + $0x1e18] ss:$40 sps:$4 sm:$0xff]   ;;  %v19876_v41 = vld [vmem:[%s28192_s1 + $0x196c] ss:$40 sps:$4 sm:$0xff]  }
 0x4a1   :  { %12220 = vmatprep.subr.bf16.mxu1 %v19825_v46  ;;  %v19879_v46 = vld [vmem:[%s28192_s1 + $0x1e6c] ss:$40 sps:$4 sm:$0xff]  }
 0x4a3   :  { %12180 = vmatpush1.bf16.msra.mxu0 %v19820_v54  ;;  %v19874_v54 = vld [vmem:[%s28192_s1 + $0x1968] ss:$40 sps:$4 sm:$0xff]  }
 0x4a4   :  { %12221 = vmatpush1.bf16.msra.mxu1 %v19823_v4  ;;  %12181 = vmatprep.subr.bf16.mxu0 %v19828_v10  ;;  %v19877_v4 = vld [vmem:[%s28192_s1 + $0x1e68] ss:$40 sps:$4 sm:$0xff]   ;;  %v19882_v10 = vld [vmem:[%s28192_s1 + $0x19bc] ss:$40 sps:$4 sm:$0xff]  }
 0x4a5   :  { %12222 = vmatprep.subr.bf16.mxu1 %v19831_v63  ;;  %v19885_v63 = vld [vmem:[%s28192_s1 + $0x1ebc] ss:$40 sps:$4 sm:$0xff]  }
 0x4a7   :  { %12182 = vmatpush1.bf16.msra.mxu0 %v19826_v2  ;;  %v19880_v2 = vld [vmem:[%s28192_s1 + $0x19b8] ss:$40 sps:$4 sm:$0xff]  }
 0x4a8   :  { %12223 = vmatpush1.bf16.msra.mxu1 %v19829_v3  ;;  %12183 = vmatprep.subr.bf16.mxu0 %v19834_v5  ;;  %v19883_v3 = vld [vmem:[%s28192_s1 + $0x1eb8] ss:$40 sps:$4 sm:$0xff]   ;;  %v19888_v5 = vld [vmem:[%s28192_s1 + $0x1a0c] ss:$40 sps:$4 sm:$0xff]  }
 0x4a9   :  { %12224 = vmatprep.subr.bf16.mxu1 %v19837_v8  ;;  %v19891_v8 = vld [vmem:[%s28192_s1 + $0x1f0c] ss:$40 sps:$4 sm:$0xff]  }
 0x4ab   :  { %12184 = vmatpush1.bf16.msra.mxu0 %v19832_v9  ;;  %v19886_v9 = vld [vmem:[%s28192_s1 + $0x1a08] ss:$40 sps:$4 sm:$0xff]  }
 0x4ac   :  { %12225 = vmatpush1.bf16.msra.mxu1 %v19835_v12  ;;  %12185 = vmatprep.subr.bf16.mxu0 %v19840_v18  ;;  %v19889_v12 = vld [vmem:[%s28192_s1 + $0x1f08] ss:$40 sps:$4 sm:$0xff]   ;;  %v19894_v18 = vld [vmem:[%s28192_s1 + $0x1a5c] ss:$40 sps:$4 sm:$0xff]  }
 0x4ad   :  { %12226 = vmatprep.subr.bf16.mxu1 %v19843_v11  ;;  %v19897_v11 = vld [vmem:[%s28192_s1 + $0x1f5c] ss:$40 sps:$4 sm:$0xff]  }
 0x4af   :  { %12186 = vmatpush1.bf16.msra.mxu0 %v19838_v13  ;;  %v19892_v13 = vld [vmem:[%s28192_s1 + $0x1a58] ss:$40 sps:$4 sm:$0xff]  }
 0x4b0   :  { %12227 = vmatpush1.bf16.msra.mxu1 %v19841_v14  ;;  %12187 = vmatprep.subr.bf16.mxu0 %v19846_v20  ;;  %v19895_v14 = vld [vmem:[%s28192_s1 + $0x1f58] ss:$40 sps:$4 sm:$0xff]   ;;  %v19900_v20 = vld [vmem:[%s28192_s1 + $0x1aac] ss:$40 sps:$4 sm:$0xff]  }
 0x4b1   :  { %12228 = vmatprep.subr.bf16.mxu1 %v19849_v15  ;;  %v19903_v15 = vld [vmem:[%s28192_s1 + $0x1fac] ss:$40 sps:$4 sm:$0xff]  }
 0x4b3   :  { %12188 = vmatpush1.bf16.msra.mxu0 %v19844_v19  ;;  %v19898_v19 = vld [vmem:[%s28192_s1 + $0x1aa8] ss:$40 sps:$4 sm:$0xff]  }
 0x4b4   :  { %12229 = vmatpush1.bf16.msra.mxu1 %v19847_v21  ;;  %12189 = vmatprep.subr.bf16.mxu0 %v19852_v27  ;;  %v19901_v21 = vld [vmem:[%s28192_s1 + $0x1fa8] ss:$40 sps:$4 sm:$0xff]   ;;  %v19906_v27 = vld [vmem:[%s28192_s1 + $0x1afc] ss:$40 sps:$4 sm:$0xff]  }
 0x4b5   :  { %12230 = vmatprep.subr.bf16.mxu1 %v19855_v30  ;;  %v19909_v30 = vld [vmem:[%s28192_s1 + $0x1ffc] ss:$40 sps:$4 sm:$0xff]  }
 0x4b7   :  { %12190 = vmatpush1.bf16.msra.mxu0 %v19850_v35 }
 0x4b8   :  { %12231 = vmatpush1.bf16.msra.mxu1 %v19853_v29  ;;  %12191 = vmatprep.subr.bf16.mxu0 %v19858_v31 }
 0x4b9   :  { %12232 = vmatprep.subr.bf16.mxu1 %v19861_v32 }
 0x4bb   :  { %12192 = vmatpush1.bf16.msra.mxu0 %v19856_v22 }
 0x4bc   :  { %12233 = vmatpush1.bf16.msra.mxu1 %v19859_v28  ;;  %12193 = vmatprep.subr.bf16.mxu0 %v19864_v50 }
 0x4bd   :  { %12234 = vmatprep.subr.bf16.mxu1 %v19867_v23 }
 0x4bf   :  { %12194 = vmatpush1.bf16.msra.mxu0 %v19862_v57  ;;  %v19904_v57 = vld [vmem:[%s28192_s1 + $0x1af8] ss:$40 sps:$4 sm:$0xff]  }
 0x4c0   :  { %12235 = vmatpush1.bf16.msra.mxu1 %v19865_v26  ;;  %12245 = vmatprep.subr.bf16.mxu0 %v19870_v45  ;;  %v19907_v26 = vld [vmem:[%s28192_s1 + $0x1ff8] ss:$40 sps:$4 sm:$0xff]  }
 0x4c1   :  { %12286 = vmatprep.subr.bf16.mxu1 %v19873_v62 }
 0x4c2   :  { %12196 = vmatmul.mubr.bf16.vlgmr.msra.gmra.mrb[72].mxu0 %v21723_v17 }
 0x4c3   :  { %12237 = vmatmul.mubr.bf16.vlgmr.msra.gmra.mrb[72].mxu1 %v21947_v38  ;;  %12246 = vmatpush1.bf16.msra.mxu0 %v19868_v40  ;;  %v19915_v40 = vld [vmem:[%s28192_s1 + $0x204c] ss:$40 sps:$4 sm:$0xff]  }
 0x4c4   :  { %12287 = vmatpush1.bf16.msra.mxu1 %v19871_v56  ;;  %12247 = vmatprep.subr.bf16.mxu0 %v19876_v41  ;;  %v19910_v41 = vld [vmem:[%s28192_s1 + $0x1b48] ss:$40 sps:$4 sm:$0xff]  }
 0x4c5   :  { %12288 = vmatprep.subr.bf16.mxu1 %v19879_v46  ;;  %12277 = vmatprep.mubr.bf16.mxu0 %v21753_v25  ;;  %v19913_v46 = vld [vmem:[%s28192_s1 + $0x2048] ss:$40 sps:$4 sm:$0xff]  }
 0x4c6   :  { %12318 = vmatprep.mubr.bf16.mxu1 %v21971_v42 }
 0x4c7   :  { %12248 = vmatpush1.bf16.msra.mxu0 %v19874_v54  ;;  %v19918_v54 = vld [vmem:[%s28192_s1 + $0x1b9c] ss:$40 sps:$4 sm:$0xff]  }
 0x4c8   :  { %12289 = vmatpush1.bf16.msra.mxu1 %v19877_v4  ;;  %12249 = vmatprep.subr.bf16.mxu0 %v19882_v10  ;;  %v19921_v4 = vld [vmem:[%s28192_s1 + $0x209c] ss:$40 sps:$4 sm:$0xff]   ;;  %v19916_v10 = vld [vmem:[%s28192_s1 + $0x1b98] ss:$40 sps:$4 sm:$0xff]  }
 0x4c9   :  { %12290 = vmatprep.subr.bf16.mxu1 %v19885_v63  ;;  %v19919_v63 = vld [vmem:[%s28192_s1 + $0x2098] ss:$40 sps:$4 sm:$0xff]  }
 0x4cb   :  { %12250 = vmatpush1.bf16.msra.mxu0 %v19880_v2  ;;  %v19924_v2 = vld [vmem:[%s28192_s1 + $0x1bec] ss:$40 sps:$4 sm:$0xff]  }
 0x4cc   :  { %12291 = vmatpush1.bf16.msra.mxu1 %v19883_v3  ;;  %12251 = vmatprep.subr.bf16.mxu0 %v19888_v5  ;;  %v19927_v3 = vld [vmem:[%s28192_s1 + $0x20ec] ss:$40 sps:$4 sm:$0xff]   ;;  %v19922_v5 = vld [vmem:[%s28192_s1 + $0x1be8] ss:$40 sps:$4 sm:$0xff]  }
 0x4cd   :  { %12292 = vmatprep.subr.bf16.mxu1 %v19891_v8  ;;  %v19925_v8 = vld [vmem:[%s28192_s1 + $0x20e8] ss:$40 sps:$4 sm:$0xff]  }
 0x4cf   :  { %12252 = vmatpush1.bf16.msra.mxu0 %v19886_v9  ;;  %v19930_v9 = vld [vmem:[%s28192_s1 + $0x1c3c] ss:$40 sps:$4 sm:$0xff]  }
 0x4d0   :  { %12293 = vmatpush1.bf16.msra.mxu1 %v19889_v12  ;;  %12253 = vmatprep.subr.bf16.mxu0 %v19894_v18  ;;  %v19933_v12 = vld [vmem:[%s28192_s1 + $0x213c] ss:$40 sps:$4 sm:$0xff]   ;;  %v19928_v18 = vld [vmem:[%s28192_s1 + $0x1c38] ss:$40 sps:$4 sm:$0xff]  }
 0x4d1   :  { %12294 = vmatprep.subr.bf16.mxu1 %v19897_v11  ;;  %v19931_v11 = vld [vmem:[%s28192_s1 + $0x2138] ss:$40 sps:$4 sm:$0xff]  }
 0x4d3   :  { %12254 = vmatpush1.bf16.msra.mxu0 %v19892_v13  ;;  %v19936_v13 = vld [vmem:[%s28192_s1 + $0x1c8c] ss:$40 sps:$4 sm:$0xff]  }
 0x4d4   :  { %12295 = vmatpush1.bf16.msra.mxu1 %v19895_v14  ;;  %12255 = vmatprep.subr.bf16.mxu0 %v19900_v20  ;;  %v19939_v14 = vld [vmem:[%s28192_s1 + $0x218c] ss:$40 sps:$4 sm:$0xff]   ;;  %v19934_v20 = vld [vmem:[%s28192_s1 + $0x1c88] ss:$40 sps:$4 sm:$0xff]  }
 0x4d5   :  { %12296 = vmatprep.subr.bf16.mxu1 %v19903_v15  ;;  %v11951_v35 = vpop.f32.mrb[60].mxu0  ;;  %v19937_v15 = vld [vmem:[%s28192_s1 + $0x2188] ss:$40 sps:$4 sm:$0xff]  }
 0x4d6   :  { %v11992_v29 = vpop.f32.mrb[60].mxu1  ;;  %v11952_v31 = vadd.f32 %v11951_v35, %v25120_v44  ;;  %v11953_v32 = vpop.f32.mrb[61].mxu0  ;;  %v19948_v35 = vld [vmem:[%s28192_s1 + $0x1d2c] ss:$40 sps:$4 sm:$0xff]  }
 0x4d7   :  { %v11994_v22 = vpop.f32.mrb[61].mxu1  ;;  %v11954_v28 = vadd.f32 %v11953_v32, %v25128_v52  ;;  %v11955_v50 = vpop.f32.mrb[62].mxu0  ;;  %12256 = vmatpush1.bf16.msra.mxu0 %v19898_v19  ;;  %v19912_v52 = vld [vmem:[%s28192_s1 + $0x1b4c] ss:$40 sps:$4 sm:$0xff]   ;;  %v19942_v19 = vld [vmem:[%s28192_s1 + $0x1cdc] ss:$40 sps:$4 sm:$0xff]  }
 0x4d8   :  { %v11996_v23 = vpop.f32.mrb[62].mxu1  ;;  %12297 = vmatpush1.bf16.msra.mxu1 %v19901_v21  ;;  %v25322_v45 = vadd.f32 %v11992_v29, %v11952_v31  ;;  %v11956_v62 = vpop.f32.mrb[63].mxu0  ;;  %12257 = vmatprep.subr.bf16.mxu0 %v19906_v27  ;;  %v19945_v21 = vld [vmem:[%s28192_s1 + $0x21dc] ss:$40 sps:$4 sm:$0xff]   ;;  %v19940_v27 = vld [vmem:[%s28192_s1 + $0x1cd8] ss:$40 sps:$4 sm:$0xff]  }
 0x4d9   :  { %v11997_v44 = vpop.f32.mrb[63].mxu1  ;;  %12298 = vmatprep.subr.bf16.mxu1 %v19909_v30  ;;  %v25330_v56 = vadd.f32 %v11994_v22, %v11954_v28  ;;  %v19943_v30 = vld [vmem:[%s28192_s1 + $0x21d8] ss:$40 sps:$4 sm:$0xff]   ;;  %v19951_v29 = vld [vmem:[%s28192_s1 + $0x222c] ss:$40 sps:$4 sm:$0xff]  }
 0x4da   :  { %v19946_v31 = vld [vmem:[%s28192_s1 + $0x1d28] ss:$40 sps:$4 sm:$0xff]   ;;  %v19954_v22 = vld [vmem:[%s28192_s1 + $0x1d7c] ss:$40 sps:$4 sm:$0xff]   ;;  %v19952_v50 = vld [vmem:[%s28192_s1 + $0x1d78] ss:$40 sps:$4 sm:$0xff]  }
 0x4db   :  { %12258 = vmatpush1.bf16.msra.mxu0 %v19904_v57  ;;  %v19949_v32 = vld [vmem:[%s28192_s1 + $0x2228] ss:$40 sps:$4 sm:$0xff]   ;;  %v19957_v28 = vld [vmem:[%s28192_s1 + $0x227c] ss:$40 sps:$4 sm:$0xff]   ;;  %v19955_v23 = vld [vmem:[%s28192_s1 + $0x2278] ss:$40 sps:$4 sm:$0xff]  }
 0x4dc   :  { %12299 = vmatpush1.bf16.msra.mxu1 %v19907_v26  ;;  %12259 = vmatprep.subr.bf16.mxu0 %v19912_v52  ;;  %v19960_v57 = vld [vmem:[%s28192_s1 + $0x1dcc] ss:$40 sps:$4 sm:$0xff]   ;;  %v19958_v62 = vld [vmem:[%s28192_s1 + $0x1dc8] ss:$40 sps:$4 sm:$0xff]   ;;  %v19966_v52 = vld [vmem:[%s28192_s1 + $0x231c] ss:$40 sps:$4 sm:$0xff]  }
 0x4dd   :  { %12300 = vmatprep.subr.bf16.mxu1 %v19915_v40  ;;  %v19963_v26 = vld [vmem:[%s28192_s1 + $0x22cc] ss:$40 sps:$4 sm:$0xff]   ;;  %v19961_v44 = vld [vmem:[%s28192_s1 + $0x22c8] ss:$40 sps:$4 sm:$0xff]   ;;  %v19969_v40 = vld [vmem:[%s28192_s1 + $0x281c] ss:$40 sps:$4 sm:$0xff]  }
 0x4df   :  { %12260 = vmatpush1.bf16.msra.mxu0 %v19910_v41  ;;  %v19964_v41 = vld [vmem:[%s28192_s1 + $0x2318] ss:$40 sps:$4 sm:$0xff]  }
 0x4e0   :  { %12301 = vmatpush1.bf16.msra.mxu1 %v19913_v46  ;;  %12261 = vmatprep.subr.bf16.mxu0 %v19918_v54  ;;  %v19967_v46 = vld [vmem:[%s28192_s1 + $0x2818] ss:$40 sps:$4 sm:$0xff]   ;;  %v19972_v54 = vld [vmem:[%s28192_s1 + $0x236c] ss:$40 sps:$4 sm:$0xff]  }
 0x4e1   :  { %12302 = vmatprep.subr.bf16.mxu1 %v19921_v4  ;;  %v19975_v4 = vld [vmem:[%s28192_s1 + $0x286c] ss:$40 sps:$4 sm:$0xff]  }
 0x4e3   :  { %12262 = vmatpush1.bf16.msra.mxu0 %v19916_v10  ;;  %v19970_v10 = vld [vmem:[%s28192_s1 + $0x2368] ss:$40 sps:$4 sm:$0xff]  }
 0x4e4   :  { %12303 = vmatpush1.bf16.msra.mxu1 %v19919_v63  ;;  %12263 = vmatprep.subr.bf16.mxu0 %v19924_v2  ;;  %v19973_v63 = vld [vmem:[%s28192_s1 + $0x2868] ss:$40 sps:$4 sm:$0xff]   ;;  %v19978_v2 = vld [vmem:[%s28192_s1 + $0x23bc] ss:$40 sps:$4 sm:$0xff]  }
 0x4e5   :  { %12304 = vmatprep.subr.bf16.mxu1 %v19927_v3  ;;  %v19981_v3 = vld [vmem:[%s28192_s1 + $0x28bc] ss:$40 sps:$4 sm:$0xff]  }
 0x4e7   :  { %12264 = vmatpush1.bf16.msra.mxu0 %v19922_v5  ;;  %v19976_v5 = vld [vmem:[%s28192_s1 + $0x23b8] ss:$40 sps:$4 sm:$0xff]  }
 0x4e8   :  { %12305 = vmatpush1.bf16.msra.mxu1 %v19925_v8  ;;  %12265 = vmatprep.subr.bf16.mxu0 %v19930_v9  ;;  %v19979_v8 = vld [vmem:[%s28192_s1 + $0x28b8] ss:$40 sps:$4 sm:$0xff]   ;;  %v19984_v9 = vld [vmem:[%s28192_s1 + $0x240c] ss:$40 sps:$4 sm:$0xff]  }
 0x4e9   :  { %12306 = vmatprep.subr.bf16.mxu1 %v19933_v12  ;;  %v19987_v12 = vld [vmem:[%s28192_s1 + $0x290c] ss:$40 sps:$4 sm:$0xff]  }
 0x4eb   :  { %12266 = vmatpush1.bf16.msra.mxu0 %v19928_v18  ;;  %v19982_v18 = vld [vmem:[%s28192_s1 + $0x2408] ss:$40 sps:$4 sm:$0xff]  }
 0x4ec   :  { %12307 = vmatpush1.bf16.msra.mxu1 %v19931_v11  ;;  %12267 = vmatprep.subr.bf16.mxu0 %v19936_v13  ;;  %v19985_v11 = vld [vmem:[%s28192_s1 + $0x2908] ss:$40 sps:$4 sm:$0xff]   ;;  %v19990_v13 = vld [vmem:[%s28192_s1 + $0x245c] ss:$40 sps:$4 sm:$0xff]  }
 0x4ed   :  { %12308 = vmatprep.subr.bf16.mxu1 %v19939_v14  ;;  %v19993_v14 = vld [vmem:[%s28192_s1 + $0x295c] ss:$40 sps:$4 sm:$0xff]  }
 0x4ef   :  { %12268 = vmatpush1.bf16.msra.mxu0 %v19934_v20  ;;  %v19988_v20 = vld [vmem:[%s28192_s1 + $0x2458] ss:$40 sps:$4 sm:$0xff]  }
 0x4f0   :  { %12309 = vmatpush1.bf16.msra.mxu1 %v19937_v15  ;;  %12269 = vmatprep.subr.bf16.mxu0 %v19942_v19  ;;  %v19991_v15 = vld [vmem:[%s28192_s1 + $0x2958] ss:$40 sps:$4 sm:$0xff]   ;;  %v19996_v19 = vld [vmem:[%s28192_s1 + $0x24ac] ss:$40 sps:$4 sm:$0xff]  }
 0x4f1   :  { %12310 = vmatprep.subr.bf16.mxu1 %v19945_v21  ;;  %v19999_v21 = vld [vmem:[%s28192_s1 + $0x29ac] ss:$40 sps:$4 sm:$0xff]  }
 0x4f3   :  { %12270 = vmatpush1.bf16.msra.mxu0 %v19940_v27  ;;  %v19994_v27 = vld [vmem:[%s28192_s1 + $0x24a8] ss:$40 sps:$4 sm:$0xff]  }
 0x4f4   :  { %12311 = vmatpush1.bf16.msra.mxu1 %v19943_v30  ;;  %12271 = vmatprep.subr.bf16.mxu0 %v19948_v35  ;;  %v19997_v30 = vld [vmem:[%s28192_s1 + $0x29a8] ss:$40 sps:$4 sm:$0xff]   ;;  %v20002_v35 = vld [vmem:[%s28192_s1 + $0x24fc] ss:$40 sps:$4 sm:$0xff]  }
 0x4f5   :  { %12312 = vmatprep.subr.bf16.mxu1 %v19951_v29  ;;  %v20005_v29 = vld [vmem:[%s28192_s1 + $0x29fc] ss:$40 sps:$4 sm:$0xff]  }
 0x4f7   :  { %12272 = vmatpush1.bf16.msra.mxu0 %v19946_v31 }
 0x4f8   :  { %12313 = vmatpush1.bf16.msra.mxu1 %v19949_v32  ;;  %12273 = vmatprep.subr.bf16.mxu0 %v19954_v22 }
 0x4f9   :  { %12314 = vmatprep.subr.bf16.mxu1 %v19957_v28 }
 0x4fb   :  { %12274 = vmatpush1.bf16.msra.mxu0 %v19952_v50 }
 0x4fc   :  { %12315 = vmatpush1.bf16.msra.mxu1 %v19955_v23  ;;  %12275 = vmatprep.subr.bf16.mxu0 %v19960_v57 }
 0x4fd   :  { %12316 = vmatprep.subr.bf16.mxu1 %v19963_v26 }
 0x4ff   :  { %12276 = vmatpush1.bf16.msra.mxu0 %v19958_v62  ;;  %v20000_v62 = vld [vmem:[%s28192_s1 + $0x24f8] ss:$40 sps:$4 sm:$0xff]  }
 0x500   :  { %12317 = vmatpush1.bf16.msra.mxu1 %v19961_v44  ;;  %12327 = vmatprep.subr.bf16.mxu0 %v19966_v52  ;;  %v20003_v44 = vld [vmem:[%s28192_s1 + $0x29f8] ss:$40 sps:$4 sm:$0xff]  }
 0x501   :  { %12368 = vmatprep.subr.bf16.mxu1 %v19969_v40  ;;  %v20011_v40 = vld [vmem:[%s28192_s1 + $0x2a4c] ss:$40 sps:$4 sm:$0xff]  }
 0x502   :  { %12278 = vmatmul.mubr.bf16.vlgmr.msra.gmra.mrb[76].mxu0 %v21951_v39 }
 0x503   :  { %12319 = vmatmul.mubr.bf16.vlgmr.msra.gmra.mrb[76].mxu1 %v22168_v59  ;;  %12328 = vmatpush1.bf16.msra.mxu0 %v19964_v41  ;;  %v20006_v41 = vld [vmem:[%s28192_s1 + $0x2548] ss:$40 sps:$4 sm:$0xff]  }
 0x504   :  { %12369 = vmatpush1.bf16.msra.mxu1 %v19967_v46  ;;  %12329 = vmatprep.subr.bf16.mxu0 %v19972_v54  ;;  %v20009_v46 = vld [vmem:[%s28192_s1 + $0x2a48] ss:$40 sps:$4 sm:$0xff]   ;;  %v20014_v54 = vld [vmem:[%s28192_s1 + $0x259c] ss:$40 sps:$4 sm:$0xff]  }
 0x505   :  { %12370 = vmatprep.subr.bf16.mxu1 %v19975_v4  ;;  %12359 = vmatprep.mubr.bf16.mxu0 %v21975_v43  ;;  %v20017_v4 = vld [vmem:[%s28192_s1 + $0x2a9c] ss:$40 sps:$4 sm:$0xff]  }
 0x506   :  { %12400 = vmatprep.mubr.bf16.mxu1 %v22193_v0 }
 0x507   :  { %12330 = vmatpush1.bf16.msra.mxu0 %v19970_v10  ;;  %v20012_v10 = vld [vmem:[%s28192_s1 + $0x2598] ss:$40 sps:$4 sm:$0xff]  }
 0x508   :  { %12371 = vmatpush1.bf16.msra.mxu1 %v19973_v63  ;;  %12331 = vmatprep.subr.bf16.mxu0 %v19978_v2  ;;  %v20015_v63 = vld [vmem:[%s28192_s1 + $0x2a98] ss:$40 sps:$4 sm:$0xff]   ;;  %v20020_v2 = vld [vmem:[%s28192_s1 + $0x25ec] ss:$40 sps:$4 sm:$0xff]  }
 0x509   :  { %12372 = vmatprep.subr.bf16.mxu1 %v19981_v3  ;;  %v20023_v3 = vld [vmem:[%s28192_s1 + $0x2aec] ss:$40 sps:$4 sm:$0xff]  }
 0x50b   :  { %12332 = vmatpush1.bf16.msra.mxu0 %v19976_v5  ;;  %v20018_v5 = vld [vmem:[%s28192_s1 + $0x25e8] ss:$40 sps:$4 sm:$0xff]  }
 0x50c   :  { %12373 = vmatpush1.bf16.msra.mxu1 %v19979_v8  ;;  %12333 = vmatprep.subr.bf16.mxu0 %v19984_v9  ;;  %v20021_v8 = vld [vmem:[%s28192_s1 + $0x2ae8] ss:$40 sps:$4 sm:$0xff]   ;;  %v20026_v9 = vld [vmem:[%s28192_s1 + $0x263c] ss:$40 sps:$4 sm:$0xff]  }
 0x50d   :  { %12374 = vmatprep.subr.bf16.mxu1 %v19987_v12  ;;  %v20029_v12 = vld [vmem:[%s28192_s1 + $0x2b3c] ss:$40 sps:$4 sm:$0xff]  }
 0x50f   :  { %12334 = vmatpush1.bf16.msra.mxu0 %v19982_v18  ;;  %v20024_v18 = vld [vmem:[%s28192_s1 + $0x2638] ss:$40 sps:$4 sm:$0xff]  }
 0x510   :  { %12375 = vmatpush1.bf16.msra.mxu1 %v19985_v11  ;;  %12335 = vmatprep.subr.bf16.mxu0 %v19990_v13  ;;  %v20027_v11 = vld [vmem:[%s28192_s1 + $0x2b38] ss:$40 sps:$4 sm:$0xff]   ;;  %v20032_v13 = vld [vmem:[%s28192_s1 + $0x268c] ss:$40 sps:$4 sm:$0xff]  }
 0x511   :  { %12376 = vmatprep.subr.bf16.mxu1 %v19993_v14  ;;  %v20035_v14 = vld [vmem:[%s28192_s1 + $0x2b8c] ss:$40 sps:$4 sm:$0xff]  }
 0x513   :  { %12336 = vmatpush1.bf16.msra.mxu0 %v19988_v20  ;;  %v20030_v20 = vld [vmem:[%s28192_s1 + $0x2688] ss:$40 sps:$4 sm:$0xff]  }
 0x514   :  { %12377 = vmatpush1.bf16.msra.mxu1 %v19991_v15  ;;  %12337 = vmatprep.subr.bf16.mxu0 %v19996_v19  ;;  %v20033_v15 = vld [vmem:[%s28192_s1 + $0x2b88] ss:$40 sps:$4 sm:$0xff]   ;;  %v20038_v19 = vld [vmem:[%s28192_s1 + $0x26dc] ss:$40 sps:$4 sm:$0xff]  }
 0x515   :  { %12378 = vmatprep.subr.bf16.mxu1 %v19999_v21  ;;  %v12033_v31 = vpop.f32.mrb[64].mxu0  ;;  %v20041_v21 = vld [vmem:[%s28192_s1 + $0x2bdc] ss:$40 sps:$4 sm:$0xff]  }
 0x516   :  { %v25516_v32 = vpop.f32.mrb[64].mxu1  ;;  %v25519_v22 = vadd.f32 %v12033_v31, %v25322_v45  ;;  %v12035_v28 = vpop.f32.mrb[65].mxu0  ;;  %v20042_v31 = vld [vmem:[%s28192_s1 + $0x2728] ss:$40 sps:$4 sm:$0xff]  }
 0x517   :  { %v25521_v50 = vpop.f32.mrb[65].mxu1  ;;  %v25524_v23 = vadd.f32 %v12035_v28, %v25330_v56  ;;  %v12037_v57 = vpop.f32.mrb[66].mxu0  ;;  %12338 = vmatpush1.bf16.msra.mxu0 %v19994_v27  ;;  %v20008_v56 = vld [vmem:[%s28192_s1 + $0x254c] ss:$40 sps:$4 sm:$0xff]   ;;  %v20036_v27 = vld [vmem:[%s28192_s1 + $0x26d8] ss:$40 sps:$4 sm:$0xff]  }
 0x518   :  { %v12078_v26 = vpop.f32.mrb[66].mxu1  ;;  %12379 = vmatpush1.bf16.msra.mxu1 %v19997_v30  ;;  %v12038_v45 = vpop.f32.mrb[67].mxu0  ;;  %12339 = vmatprep.subr.bf16.mxu0 %v20002_v35  ;;  %v20039_v30 = vld [vmem:[%s28192_s1 + $0x2bd8] ss:$40 sps:$4 sm:$0xff]   ;;  %v20044_v35 = vld [vmem:[%s28192_s1 + $0x272c] ss:$40 sps:$4 sm:$0xff]  }
 0x519   :  { %v12079_v52 = vpop.f32.mrb[67].mxu1  ;;  %12380 = vmatprep.subr.bf16.mxu1 %v20005_v29  ;;  %v20047_v29 = vld [vmem:[%s28192_s1 + $0x2c2c] ss:$40 sps:$4 sm:$0xff]   ;;  %v20045_v28 = vld [vmem:[%s28192_s1 + $0x2c28] ss:$40 sps:$4 sm:$0xff]  }
 0x51a   :  { %v20050_v57 = vld [vmem:[%s28192_s1 + $0x277c] ss:$40 sps:$4 sm:$0xff]   ;;  %v20056_v45 = vld [vmem:[%s28192_s1 + $0x27cc] ss:$40 sps:$4 sm:$0xff]  }
 0x51b   :  { %12340 = vmatpush1.bf16.msra.mxu0 %v20000_v62  ;;  %v20053_v26 = vld [vmem:[%s28192_s1 + $0x2c7c] ss:$40 sps:$4 sm:$0xff]   ;;  %v20048_v62 = vld [vmem:[%s28192_s1 + $0x2778] ss:$40 sps:$4 sm:$0xff]   ;;  %v20059_v52 = vld [vmem:[%s28192_s1 + $0x2ccc] ss:$40 sps:$4 sm:$0xff]  }
 0x51c   :  { %12381 = vmatpush1.bf16.msra.mxu1 %v20003_v44  ;;  %12341 = vmatprep.subr.bf16.mxu0 %v20008_v56  ;;  %v20051_v44 = vld [vmem:[%s28192_s1 + $0x2c78] ss:$40 sps:$4 sm:$0xff]   ;;  %v20054_v56 = vld [vmem:[%s28192_s1 + $0x27c8] ss:$40 sps:$4 sm:$0xff]  }
 0x51d   :  { %12382 = vmatprep.subr.bf16.mxu1 %v20011_v40  ;;  %v20057_v40 = vld [vmem:[%s28192_s1 + $0x2cc8] ss:$40 sps:$4 sm:$0xff]  }
 0x51f   :  { %12342 = vmatpush1.bf16.msra.mxu0 %v20006_v41  ;;  %v20062_v41 = vld [vmem:[%s28192_s1 + $0x2d1c] ss:$40 sps:$4 sm:$0xff]  }
 0x520   :  { %12383 = vmatpush1.bf16.msra.mxu1 %v20009_v46  ;;  %12343 = vmatprep.subr.bf16.mxu0 %v20014_v54  ;;  %v20065_v46 = vld [vmem:[%s28192_s1 + $0x321c] ss:$40 sps:$4 sm:$0xff]   ;;  %v20060_v54 = vld [vmem:[%s28192_s1 + $0x2d18] ss:$40 sps:$4 sm:$0xff]  }
 0x521   :  { %12384 = vmatprep.subr.bf16.mxu1 %v20017_v4  ;;  %v20063_v4 = vld [vmem:[%s28192_s1 + $0x3218] ss:$40 sps:$4 sm:$0xff]  }
 0x523   :  { %12344 = vmatpush1.bf16.msra.mxu0 %v20012_v10  ;;  %v20068_v10 = vld [vmem:[%s28192_s1 + $0x2d6c] ss:$40 sps:$4 sm:$0xff]  }
 0x524   :  { %12385 = vmatpush1.bf16.msra.mxu1 %v20015_v63  ;;  %12345 = vmatprep.subr.bf16.mxu0 %v20020_v2  ;;  %v20071_v63 = vld [vmem:[%s28192_s1 + $0x326c] ss:$40 sps:$4 sm:$0xff]   ;;  %v20066_v2 = vld [vmem:[%s28192_s1 + $0x2d68] ss:$40 sps:$4 sm:$0xff]  }
 0x525   :  { %12386 = vmatprep.subr.bf16.mxu1 %v20023_v3  ;;  %v20069_v3 = vld [vmem:[%s28192_s1 + $0x3268] ss:$40 sps:$4 sm:$0xff]  }
 0x527   :  { %12346 = vmatpush1.bf16.msra.mxu0 %v20018_v5  ;;  %v20074_v5 = vld [vmem:[%s28192_s1 + $0x2dbc] ss:$40 sps:$4 sm:$0xff]  }
 0x528   :  { %12387 = vmatpush1.bf16.msra.mxu1 %v20021_v8  ;;  %12347 = vmatprep.subr.bf16.mxu0 %v20026_v9  ;;  %v20077_v8 = vld [vmem:[%s28192_s1 + $0x32bc] ss:$40 sps:$4 sm:$0xff]   ;;  %v20072_v9 = vld [vmem:[%s28192_s1 + $0x2db8] ss:$40 sps:$4 sm:$0xff]  }
 0x529   :  { %12388 = vmatprep.subr.bf16.mxu1 %v20029_v12  ;;  %v20075_v12 = vld [vmem:[%s28192_s1 + $0x32b8] ss:$40 sps:$4 sm:$0xff]  }
 0x52b   :  { %12348 = vmatpush1.bf16.msra.mxu0 %v20024_v18  ;;  %v20080_v18 = vld [vmem:[%s28192_s1 + $0x2e0c] ss:$40 sps:$4 sm:$0xff]  }
 0x52c   :  { %12389 = vmatpush1.bf16.msra.mxu1 %v20027_v11  ;;  %12349 = vmatprep.subr.bf16.mxu0 %v20032_v13  ;;  %v20083_v11 = vld [vmem:[%s28192_s1 + $0x330c] ss:$40 sps:$4 sm:$0xff]   ;;  %v20078_v13 = vld [vmem:[%s28192_s1 + $0x2e08] ss:$40 sps:$4 sm:$0xff]  }
 0x52d   :  { %12390 = vmatprep.subr.bf16.mxu1 %v20035_v14  ;;  %v20081_v14 = vld [vmem:[%s28192_s1 + $0x3308] ss:$40 sps:$4 sm:$0xff]  }
 0x52f   :  { %12350 = vmatpush1.bf16.msra.mxu0 %v20030_v20  ;;  %v20086_v20 = vld [vmem:[%s28192_s1 + $0x2e5c] ss:$40 sps:$4 sm:$0xff]  }
 0x530   :  { %12391 = vmatpush1.bf16.msra.mxu1 %v20033_v15  ;;  %12351 = vmatprep.subr.bf16.mxu0 %v20038_v19  ;;  %v20089_v15 = vld [vmem:[%s28192_s1 + $0x335c] ss:$40 sps:$4 sm:$0xff]   ;;  %v20084_v19 = vld [vmem:[%s28192_s1 + $0x2e58] ss:$40 sps:$4 sm:$0xff]  }
 0x531   :  { %12392 = vmatprep.subr.bf16.mxu1 %v20041_v21  ;;  %v20087_v21 = vld [vmem:[%s28192_s1 + $0x3358] ss:$40 sps:$4 sm:$0xff]  }
 0x533   :  { %12352 = vmatpush1.bf16.msra.mxu0 %v20036_v27  ;;  %v20092_v27 = vld [vmem:[%s28192_s1 + $0x2eac] ss:$40 sps:$4 sm:$0xff]  }
 0x534   :  { %12393 = vmatpush1.bf16.msra.mxu1 %v20039_v30  ;;  %12353 = vmatprep.subr.bf16.mxu0 %v20044_v35  ;;  %v20095_v30 = vld [vmem:[%s28192_s1 + $0x33ac] ss:$40 sps:$4 sm:$0xff]   ;;  %v20090_v35 = vld [vmem:[%s28192_s1 + $0x2ea8] ss:$40 sps:$4 sm:$0xff]  }
 0x535   :  { %12394 = vmatprep.subr.bf16.mxu1 %v20047_v29  ;;  %v20093_v29 = vld [vmem:[%s28192_s1 + $0x33a8] ss:$40 sps:$4 sm:$0xff]  }
 0x537   :  { %12354 = vmatpush1.bf16.msra.mxu0 %v20042_v31  ;;  %v20098_v31 = vld [vmem:[%s28192_s1 + $0x2efc] ss:$40 sps:$4 sm:$0xff]  }
 0x538   :  { %12395 = vmatpush1.bf16.msra.mxu1 %v20045_v28  ;;  %12355 = vmatprep.subr.bf16.mxu0 %v20050_v57  ;;  %v20101_v28 = vld [vmem:[%s28192_s1 + $0x33fc] ss:$40 sps:$4 sm:$0xff]  }
 0x539   :  { %12396 = vmatprep.subr.bf16.mxu1 %v20053_v26 }
 0x53b   :  { %12356 = vmatpush1.bf16.msra.mxu0 %v20048_v62 }
 0x53c   :  { %12397 = vmatpush1.bf16.msra.mxu1 %v20051_v44  ;;  %12357 = vmatprep.subr.bf16.mxu0 %v20056_v45 }
 0x53d   :  { %12398 = vmatprep.subr.bf16.mxu1 %v20059_v52 }
 0x53f   :  { %12358 = vmatpush1.bf16.msra.mxu0 %v20054_v56 }
 0x540   :  { %12399 = vmatpush1.bf16.msra.mxu1 %v20057_v40  ;;  %12409 = vmatprep.subr.bf16.mxu0 %v20062_v41  ;;  %v20096_v41 = vld [vmem:[%s28192_s1 + $0x2ef8] ss:$40 sps:$4 sm:$0xff]  }
 0x541   :  { %12450 = vmatprep.subr.bf16.mxu1 %v20065_v46  ;;  %v20099_v46 = vld [vmem:[%s28192_s1 + $0x33f8] ss:$40 sps:$4 sm:$0xff]  }
 0x542   :  { %12360 = vmatmul.mubr.bf16.vlgmr.msra.gmra.mrb[80].mxu0 %v22172_v60 }
 0x543   :  { %12401 = vmatmul.mubr.bf16.vlgmr.msra.gmra.mrb[80].mxu1 %v22400_v48  ;;  %12410 = vmatpush1.bf16.msra.mxu0 %v20060_v54 }
 0x544   :  { %12451 = vmatpush1.bf16.msra.mxu1 %v20063_v4  ;;  %12411 = vmatprep.subr.bf16.mxu0 %v20068_v10  ;;  %v20107_v10 = vld [vmem:[%s28192_s1 + $0x344c] ss:$40 sps:$4 sm:$0xff]  }
 0x545   :  { %12452 = vmatprep.subr.bf16.mxu1 %v20071_v63  ;;  %12441 = vmatprep.mubr.bf16.mxu0 %v22197_v1 }
 0x546   :  { %12482 = vmatprep.mubr.bf16.mxu1 %v22414_v58 }
 0x547   :  { %12412 = vmatpush1.bf16.msra.mxu0 %v20066_v2  ;;  %v20102_v2 = vld [vmem:[%s28192_s1 + $0x2f48] ss:$40 sps:$4 sm:$0xff]  }
 0x548   :  { %12453 = vmatpush1.bf16.msra.mxu1 %v20069_v3  ;;  %12413 = vmatprep.subr.bf16.mxu0 %v20074_v5  ;;  %v20105_v3 = vld [vmem:[%s28192_s1 + $0x3448] ss:$40 sps:$4 sm:$0xff]   ;;  %v20110_v5 = vld [vmem:[%s28192_s1 + $0x2f9c] ss:$40 sps:$4 sm:$0xff]  }
 0x549   :  { %12454 = vmatprep.subr.bf16.mxu1 %v20077_v8  ;;  %v20113_v8 = vld [vmem:[%s28192_s1 + $0x349c] ss:$40 sps:$4 sm:$0xff]  }
 0x54b   :  { %12414 = vmatpush1.bf16.msra.mxu0 %v20072_v9  ;;  %v20108_v9 = vld [vmem:[%s28192_s1 + $0x2f98] ss:$40 sps:$4 sm:$0xff]  }
 0x54c   :  { %12455 = vmatpush1.bf16.msra.mxu1 %v20075_v12  ;;  %12415 = vmatprep.subr.bf16.mxu0 %v20080_v18  ;;  %v20111_v12 = vld [vmem:[%s28192_s1 + $0x3498] ss:$40 sps:$4 sm:$0xff]   ;;  %v20116_v18 = vld [vmem:[%s28192_s1 + $0x2fec] ss:$40 sps:$4 sm:$0xff]  }
 0x54d   :  { %12456 = vmatprep.subr.bf16.mxu1 %v20083_v11  ;;  %v20119_v11 = vld [vmem:[%s28192_s1 + $0x34ec] ss:$40 sps:$4 sm:$0xff]  }
 0x54f   :  { %12416 = vmatpush1.bf16.msra.mxu0 %v20078_v13  ;;  %v20114_v13 = vld [vmem:[%s28192_s1 + $0x2fe8] ss:$40 sps:$4 sm:$0xff]  }
 0x550   :  { %12457 = vmatpush1.bf16.msra.mxu1 %v20081_v14  ;;  %12417 = vmatprep.subr.bf16.mxu0 %v20086_v20  ;;  %v20117_v14 = vld [vmem:[%s28192_s1 + $0x34e8] ss:$40 sps:$4 sm:$0xff]   ;;  %v20122_v20 = vld [vmem:[%s28192_s1 + $0x303c] ss:$40 sps:$4 sm:$0xff]  }
 0x551   :  { %12458 = vmatprep.subr.bf16.mxu1 %v20089_v15  ;;  %v20125_v15 = vld [vmem:[%s28192_s1 + $0x353c] ss:$40 sps:$4 sm:$0xff]  }
 0x553   :  { %12418 = vmatpush1.bf16.msra.mxu0 %v20084_v19  ;;  %v20120_v19 = vld [vmem:[%s28192_s1 + $0x3038] ss:$40 sps:$4 sm:$0xff]  }
 0x554   :  { %12459 = vmatpush1.bf16.msra.mxu1 %v20087_v21  ;;  %12419 = vmatprep.subr.bf16.mxu0 %v20092_v27  ;;  %v20123_v21 = vld [vmem:[%s28192_s1 + $0x3538] ss:$40 sps:$4 sm:$0xff]   ;;  %v20128_v27 = vld [vmem:[%s28192_s1 + $0x308c] ss:$40 sps:$4 sm:$0xff]  }
 0x555   :  { %12460 = vmatprep.subr.bf16.mxu1 %v20095_v30  ;;  %v12115_v57 = vpop.f32.mrb[68].mxu0  ;;  %v20131_v30 = vld [vmem:[%s28192_s1 + $0x358c] ss:$40 sps:$4 sm:$0xff]  }
 0x556   :  { %v12156_v26 = vpop.f32.mrb[68].mxu1  ;;  %v12116_v62 = vadd.f32 %v12115_v57, %v25516_v32  ;;  %v12117_v44 = vpop.f32.mrb[69].mxu0  ;;  %v20132_v57 = vld [vmem:[%s28192_s1 + $0x30d8] ss:$40 sps:$4 sm:$0xff]  }
 0x557   :  { %v12158_v45 = vpop.f32.mrb[69].mxu1  ;;  %v12118_v52 = vadd.f32 %v12117_v44, %v25521_v50  ;;  %v12119_v56 = vpop.f32.mrb[70].mxu0  ;;  %12420 = vmatpush1.bf16.msra.mxu0 %v20090_v35  ;;  %v20104_v50 = vld [vmem:[%s28192_s1 + $0x2f4c] ss:$40 sps:$4 sm:$0xff]   ;;  %v20126_v35 = vld [vmem:[%s28192_s1 + $0x3088] ss:$40 sps:$4 sm:$0xff]  }
 0x558   :  { %v12160_v40 = vpop.f32.mrb[70].mxu1  ;;  %12461 = vmatpush1.bf16.msra.mxu1 %v20093_v29  ;;  %v25730_v54 = vadd.f32 %v12156_v26, %v12116_v62  ;;  %v12120_v4 = vpop.f32.mrb[71].mxu0  ;;  %12421 = vmatprep.subr.bf16.mxu0 %v20098_v31  ;;  %v20129_v29 = vld [vmem:[%s28192_s1 + $0x3588] ss:$40 sps:$4 sm:$0xff]   ;;  %v20134_v31 = vld [vmem:[%s28192_s1 + $0x30dc] ss:$40 sps:$4 sm:$0xff]  }
 0x559   :  { %v12161_v32 = vpop.f32.mrb[71].mxu1  ;;  %12462 = vmatprep.subr.bf16.mxu1 %v20101_v28  ;;  %v25738_v63 = vadd.f32 %v12158_v45, %v12118_v52  ;;  %v20137_v28 = vld [vmem:[%s28192_s1 + $0x35dc] ss:$40 sps:$4 sm:$0xff]   ;;  %v20135_v26 = vld [vmem:[%s28192_s1 + $0x35d8] ss:$40 sps:$4 sm:$0xff]  }
 0x55a   :  { %v20140_v62 = vld [vmem:[%s28192_s1 + $0x312c] ss:$40 sps:$4 sm:$0xff]   ;;  %v20138_v45 = vld [vmem:[%s28192_s1 + $0x3128] ss:$40 sps:$4 sm:$0xff]   ;;  %v20146_v56 = vld [vmem:[%s28192_s1 + $0x317c] ss:$40 sps:$4 sm:$0xff]  }
 0x55b   :  { %12422 = vmatpush1.bf16.msra.mxu0 %v20096_v41  ;;  %v20143_v44 = vld [vmem:[%s28192_s1 + $0x362c] ss:$40 sps:$4 sm:$0xff]   ;;  %v20141_v52 = vld [vmem:[%s28192_s1 + $0x3628] ss:$40 sps:$4 sm:$0xff]   ;;  %v20149_v40 = vld [vmem:[%s28192_s1 + $0x367c] ss:$40 sps:$4 sm:$0xff]  }
 0x55c   :  { %12463 = vmatpush1.bf16.msra.mxu1 %v20099_v46  ;;  %12423 = vmatprep.subr.bf16.mxu0 %v20104_v50  ;;  %v20144_v41 = vld [vmem:[%s28192_s1 + $0x3178] ss:$40 sps:$4 sm:$0xff]   ;;  %v20152_v4 = vld [vmem:[%s28192_s1 + $0x31cc] ss:$40 sps:$4 sm:$0xff]   ;;  %v20150_v50 = vld [vmem:[%s28192_s1 + $0x31c8] ss:$40 sps:$4 sm:$0xff]  }
 0x55d   :  { %12464 = vmatprep.subr.bf16.mxu1 %v20107_v10  ;;  %v20147_v46 = vld [vmem:[%s28192_s1 + $0x3678] ss:$40 sps:$4 sm:$0xff]   ;;  %v20155_v32 = vld [vmem:[%s28192_s1 + $0x36cc] ss:$40 sps:$4 sm:$0xff]   ;;  %v20153_v10 = vld [vmem:[%s28192_s1 + $0x36c8] ss:$40 sps:$4 sm:$0xff]  }
 0x55f   :  { %12424 = vmatpush1.bf16.msra.mxu0 %v20102_v2  ;;  %v20158_v2 = vld [vmem:[%s28192_s1 + $0x24] ss:$40 sps:$4 sm:$0xff]  }
 0x560   :  { %12465 = vmatpush1.bf16.msra.mxu1 %v20105_v3  ;;  %12425 = vmatprep.subr.bf16.mxu0 %v20110_v5  ;;  %v20161_v3 = vld [vmem:[%s28192_s1 + $0x524] ss:$40 sps:$4 sm:$0xff]   ;;  %v20156_v5 = vld [vmem:[%s28192_s1 + $0x20] ss:$40 sps:$4 sm:$0xff]  }
 0x561   :  { %12466 = vmatprep.subr.bf16.mxu1 %v20113_v8  ;;  %v20159_v8 = vld [vmem:[%s28192_s1 + $0x520] ss:$40 sps:$4 sm:$0xff]  }
 0x563   :  { %12426 = vmatpush1.bf16.msra.mxu0 %v20108_v9  ;;  %v20164_v9 = vld [vmem:[%s28192_s1 + $0x74] ss:$40 sps:$4 sm:$0xff]  }
 0x564   :  { %12467 = vmatpush1.bf16.msra.mxu1 %v20111_v12  ;;  %12427 = vmatprep.subr.bf16.mxu0 %v20116_v18  ;;  %v20167_v12 = vld [vmem:[%s28192_s1 + $0x574] ss:$40 sps:$4 sm:$0xff]   ;;  %v20162_v18 = vld [vmem:[%s28192_s1 + $0x70] ss:$40 sps:$4 sm:$0xff]  }
 0x565   :  { %12468 = vmatprep.subr.bf16.mxu1 %v20119_v11  ;;  %v20165_v11 = vld [vmem:[%s28192_s1 + $0x570] ss:$40 sps:$4 sm:$0xff]  }
 0x567   :  { %12428 = vmatpush1.bf16.msra.mxu0 %v20114_v13  ;;  %v20170_v13 = vld [vmem:[%s28192_s1 + $0xc4] ss:$40 sps:$4 sm:$0xff]  }
 0x568   :  { %12469 = vmatpush1.bf16.msra.mxu1 %v20117_v14  ;;  %12429 = vmatprep.subr.bf16.mxu0 %v20122_v20  ;;  %v20173_v14 = vld [vmem:[%s28192_s1 + $0x5c4] ss:$40 sps:$4 sm:$0xff]   ;;  %v20168_v20 = vld [vmem:[%s28192_s1 + $0xc0] ss:$40 sps:$4 sm:$0xff]  }
 0x569   :  { %12470 = vmatprep.subr.bf16.mxu1 %v20125_v15  ;;  %v20171_v15 = vld [vmem:[%s28192_s1 + $0x5c0] ss:$40 sps:$4 sm:$0xff]  }
 0x56b   :  { %12430 = vmatpush1.bf16.msra.mxu0 %v20120_v19  ;;  %v20176_v19 = vld [vmem:[%s28192_s1 + $0x114] ss:$40 sps:$4 sm:$0xff]  }
 0x56c   :  { %12471 = vmatpush1.bf16.msra.mxu1 %v20123_v21  ;;  %12431 = vmatprep.subr.bf16.mxu0 %v20128_v27  ;;  %v20177_v21 = vld [vmem:[%s28192_s1 + $0x610] ss:$40 sps:$4 sm:$0xff]   ;;  %v20182_v27 = vld [vmem:[%s28192_s1 + $0x164] ss:$40 sps:$4 sm:$0xff]  }
 0x56d   :  { %12472 = vmatprep.subr.bf16.mxu1 %v20131_v30  ;;  %v20185_v30 = vld [vmem:[%s28192_s1 + $0x664] ss:$40 sps:$4 sm:$0xff]  }
 0x56f   :  { %12432 = vmatpush1.bf16.msra.mxu0 %v20126_v35  ;;  %v20180_v35 = vld [vmem:[%s28192_s1 + $0x160] ss:$40 sps:$4 sm:$0xff]  }
 0x570   :  { %12473 = vmatpush1.bf16.msra.mxu1 %v20129_v29  ;;  %12433 = vmatprep.subr.bf16.mxu0 %v20134_v31  ;;  %v20183_v29 = vld [vmem:[%s28192_s1 + $0x660] ss:$40 sps:$4 sm:$0xff]   ;;  %v20188_v31 = vld [vmem:[%s28192_s1 + $0x1b4] ss:$40 sps:$4 sm:$0xff]  }
 0x571   :  { %12474 = vmatprep.subr.bf16.mxu1 %v20137_v28  ;;  %v20191_v28 = vld [vmem:[%s28192_s1 + $0x6b4] ss:$40 sps:$4 sm:$0xff]  }
 0x573   :  { %12434 = vmatpush1.bf16.msra.mxu0 %v20132_v57  ;;  %v20186_v57 = vld [vmem:[%s28192_s1 + $0x1b0] ss:$40 sps:$4 sm:$0xff]  }
 0x574   :  { %12475 = vmatpush1.bf16.msra.mxu1 %v20135_v26  ;;  %12435 = vmatprep.subr.bf16.mxu0 %v20140_v62  ;;  %v20189_v26 = vld [vmem:[%s28192_s1 + $0x6b0] ss:$40 sps:$4 sm:$0xff]   ;;  %v20194_v62 = vld [vmem:[%s28192_s1 + $0x204] ss:$40 sps:$4 sm:$0xff]  }
 0x575   :  { %12476 = vmatprep.subr.bf16.mxu1 %v20143_v44  ;;  %v20197_v44 = vld [vmem:[%s28192_s1 + $0x704] ss:$40 sps:$4 sm:$0xff]  }
 0x577   :  { %12436 = vmatpush1.bf16.msra.mxu0 %v20138_v45 }
 0x578   :  { %12477 = vmatpush1.bf16.msra.mxu1 %v20141_v52  ;;  %12437 = vmatprep.subr.bf16.mxu0 %v20146_v56 }
 0x579   :  { %12478 = vmatprep.subr.bf16.mxu1 %v20149_v40 }
 0x57b   :  { %12438 = vmatpush1.bf16.msra.mxu0 %v20144_v41 }
 0x57c   :  { %12479 = vmatpush1.bf16.msra.mxu1 %v20147_v46  ;;  %12439 = vmatprep.subr.bf16.mxu0 %v20152_v4 }
 0x57d   :  { %12480 = vmatprep.subr.bf16.mxu1 %v20155_v32 }
 0x57f   :  { %12440 = vmatpush1.bf16.msra.mxu0 %v20150_v50  ;;  %v20192_v50 = vld [vmem:[%s28192_s1 + $0x200] ss:$40 sps:$4 sm:$0xff]  }
 0x580   :  { %12481 = vmatpush1.bf16.msra.mxu1 %v20153_v10  ;;  %12491 = vmatprep.subr.bf16.mxu0 %v20158_v2  ;;  %v20195_v10 = vld [vmem:[%s28192_s1 + $0x700] ss:$40 sps:$4 sm:$0xff]  }
 0x581   :  { %12532 = vmatprep.subr.bf16.mxu1 %v20161_v3 }
 0x582   :  { %12442 = vmatmul.mubr.bf16.vlgmr.msra.gmra.mrb[84].mxu0 %v22404_v49 }
 0x583   :  { %12483 = vmatmul.mubr.bf16.vlgmr.msra.gmra.mrb[84].mxu1 %v22614_v33  ;;  %12492 = vmatpush1.bf16.msra.mxu0 %v20156_v5  ;;  %v20203_v5 = vld [vmem:[%s28192_s1 + $0x754] ss:$40 sps:$4 sm:$0xff]  }
 0x584   :  { %12533 = vmatpush1.bf16.msra.mxu1 %v20159_v8  ;;  %12493 = vmatprep.subr.bf16.mxu0 %v20164_v9  ;;  %v20198_v9 = vld [vmem:[%s28192_s1 + $0x250] ss:$40 sps:$4 sm:$0xff]  }
 0x585   :  { %12534 = vmatprep.subr.bf16.mxu1 %v20167_v12  ;;  %12523 = vmatprep.mubr.bf16.mxu0 %v21430_v47  ;;  %v20179_v47 = vld [vmem:[%s28192_s1 + $0x614] ss:$40 sps:$4 sm:$0xff]   ;;  %v20201_v12 = vld [vmem:[%s28192_s1 + $0x750] ss:$40 sps:$4 sm:$0xff]  }
 0x586   :  { %12564 = vmatprep.mubr.bf16.mxu1 %v21441_v51  ;;  %v20174_v51 = vld [vmem:[%s28192_s1 + $0x110] ss:$40 sps:$4 sm:$0xff]  }
 0x587   :  { %12494 = vmatpush1.bf16.msra.mxu0 %v20162_v18  ;;  %v20206_v18 = vld [vmem:[%s28192_s1 + $0x2a4] ss:$40 sps:$4 sm:$0xff]  }
 0x588   :  { %12535 = vmatpush1.bf16.msra.mxu1 %v20165_v11  ;;  %12495 = vmatprep.subr.bf16.mxu0 %v20170_v13  ;;  %v20209_v11 = vld [vmem:[%s28192_s1 + $0x7a4] ss:$40 sps:$4 sm:$0xff]   ;;  %v20204_v13 = vld [vmem:[%s28192_s1 + $0x2a0] ss:$40 sps:$4 sm:$0xff]  }
 0x589   :  { %12536 = vmatprep.subr.bf16.mxu1 %v20173_v14  ;;  %v20207_v14 = vld [vmem:[%s28192_s1 + $0x7a0] ss:$40 sps:$4 sm:$0xff]  }
 0x58b   :  { %12496 = vmatpush1.bf16.msra.mxu0 %v20168_v20  ;;  %v20212_v20 = vld [vmem:[%s28192_s1 + $0x2f4] ss:$40 sps:$4 sm:$0xff]  }
 0x58c   :  { %12537 = vmatpush1.bf16.msra.mxu1 %v20171_v15  ;;  %12497 = vmatprep.subr.bf16.mxu0 %v20176_v19  ;;  %v20215_v15 = vld [vmem:[%s28192_s1 + $0x7f4] ss:$40 sps:$4 sm:$0xff]   ;;  %v20210_v19 = vld [vmem:[%s28192_s1 + $0x2f0] ss:$40 sps:$4 sm:$0xff]  }
 0x58d   :  { %12538 = vmatprep.subr.bf16.mxu1 %v20179_v47  ;;  %v20213_v47 = vld [vmem:[%s28192_s1 + $0x7f0] ss:$40 sps:$4 sm:$0xff]  }
 0x58f   :  { %12498 = vmatpush1.bf16.msra.mxu0 %v20174_v51  ;;  %v20218_v51 = vld [vmem:[%s28192_s1 + $0x344] ss:$40 sps:$4 sm:$0xff]  }
 0x590   :  { %12539 = vmatpush1.bf16.msra.mxu1 %v20177_v21  ;;  %12499 = vmatprep.subr.bf16.mxu0 %v20182_v27  ;;  %v20221_v21 = vld [vmem:[%s28192_s1 + $0x844] ss:$40 sps:$4 sm:$0xff]   ;;  %v20216_v27 = vld [vmem:[%s28192_s1 + $0x340] ss:$40 sps:$4 sm:$0xff]  }
 0x591   :  { %12540 = vmatprep.subr.bf16.mxu1 %v20185_v30  ;;  %v20219_v30 = vld [vmem:[%s28192_s1 + $0x840] ss:$40 sps:$4 sm:$0xff]  }
 0x593   :  { %12500 = vmatpush1.bf16.msra.mxu0 %v20180_v35  ;;  %v20224_v35 = vld [vmem:[%s28192_s1 + $0x394] ss:$40 sps:$4 sm:$0xff]  }
 0x594   :  { %12541 = vmatpush1.bf16.msra.mxu1 %v20183_v29  ;;  %12501 = vmatprep.subr.bf16.mxu0 %v20188_v31  ;;  %v20227_v29 = vld [vmem:[%s28192_s1 + $0x894] ss:$40 sps:$4 sm:$0xff]   ;;  %v20222_v31 = vld [vmem:[%s28192_s1 + $0x390] ss:$40 sps:$4 sm:$0xff]  }
 0x595   :  { %12542 = vmatprep.subr.bf16.mxu1 %v20191_v28  ;;  %v12197_v45 = vpop.f32.mrb[72].mxu0  ;;  %v20225_v28 = vld [vmem:[%s28192_s1 + $0x890] ss:$40 sps:$4 sm:$0xff]  }
 0x596   :  { %v12238_v52 = vpop.f32.mrb[72].mxu1  ;;  %v12198_v56 = vadd.f32 %v12197_v45, %v25730_v54  ;;  %v12199_v40 = vpop.f32.mrb[73].mxu0  ;;  %v20236_v45 = vld [vmem:[%s28192_s1 + $0x434] ss:$40 sps:$4 sm:$0xff]  }
 0x597   :  { %v12240_v41 = vpop.f32.mrb[73].mxu1  ;;  %v12200_v46 = vadd.f32 %v12199_v40, %v25738_v63  ;;  %v12201_v4 = vpop.f32.mrb[74].mxu0  ;;  %12502 = vmatpush1.bf16.msra.mxu0 %v20186_v57  ;;  %v20200_v63 = vld [vmem:[%s28192_s1 + $0x254] ss:$40 sps:$4 sm:$0xff]   ;;  %v20230_v57 = vld [vmem:[%s28192_s1 + $0x3e4] ss:$40 sps:$4 sm:$0xff]  }
 0x598   :  { %v12242_v32 = vpop.f32.mrb[74].mxu1  ;;  %12543 = vmatpush1.bf16.msra.mxu1 %v20189_v26  ;;  %v25932_v2 = vadd.f32 %v12238_v52, %v12198_v56  ;;  %v12202_v3 = vpop.f32.mrb[75].mxu0  ;;  %12503 = vmatprep.subr.bf16.mxu0 %v20194_v62  ;;  %v20233_v26 = vld [vmem:[%s28192_s1 + $0x8e4] ss:$40 sps:$4 sm:$0xff]   ;;  %v20228_v62 = vld [vmem:[%s28192_s1 + $0x3e0] ss:$40 sps:$4 sm:$0xff]  }
 0x599   :  { %v12243_v54 = vpop.f32.mrb[75].mxu1  ;;  %12544 = vmatprep.subr.bf16.mxu1 %v20197_v44  ;;  %v25940_v8 = vadd.f32 %v12240_v41, %v12200_v46  ;;  %v20231_v44 = vld [vmem:[%s28192_s1 + $0x8e0] ss:$40 sps:$4 sm:$0xff]   ;;  %v20239_v52 = vld [vmem:[%s28192_s1 + $0x934] ss:$40 sps:$4 sm:$0xff]  }
 0x59a   :  { %v20234_v56 = vld [vmem:[%s28192_s1 + $0x430] ss:$40 sps:$4 sm:$0xff]   ;;  %v20242_v41 = vld [vmem:[%s28192_s1 + $0x484] ss:$40 sps:$4 sm:$0xff]   ;;  %v20240_v4 = vld [vmem:[%s28192_s1 + $0x480] ss:$40 sps:$4 sm:$0xff]  }
 0x59b   :  { %12504 = vmatpush1.bf16.msra.mxu0 %v20192_v50  ;;  %v20237_v40 = vld [vmem:[%s28192_s1 + $0x930] ss:$40 sps:$4 sm:$0xff]   ;;  %v20245_v46 = vld [vmem:[%s28192_s1 + $0x984] ss:$40 sps:$4 sm:$0xff]   ;;  %v20243_v32 = vld [vmem:[%s28192_s1 + $0x980] ss:$40 sps:$4 sm:$0xff]  }
 0x59c   :  { %12545 = vmatpush1.bf16.msra.mxu1 %v20195_v10  ;;  %12505 = vmatprep.subr.bf16.mxu0 %v20200_v63  ;;  %v20248_v50 = vld [vmem:[%s28192_s1 + $0x4d4] ss:$40 sps:$4 sm:$0xff]   ;;  %v20246_v3 = vld [vmem:[%s28192_s1 + $0x4d0] ss:$40 sps:$4 sm:$0xff]   ;;  %v20254_v63 = vld [vmem:[%s28192_s1 + $0xa24] ss:$40 sps:$4 sm:$0xff]  }
 0x59d   :  { %12546 = vmatprep.subr.bf16.mxu1 %v20203_v5  ;;  %v20251_v10 = vld [vmem:[%s28192_s1 + $0x9d4] ss:$40 sps:$4 sm:$0xff]   ;;  %v20249_v54 = vld [vmem:[%s28192_s1 + $0x9d0] ss:$40 sps:$4 sm:$0xff]   ;;  %v20257_v5 = vld [vmem:[%s28192_s1 + $0xf24] ss:$40 sps:$4 sm:$0xff]  }
 0x59f   :  { %12506 = vmatpush1.bf16.msra.mxu0 %v20198_v9  ;;  %v20252_v9 = vld [vmem:[%s28192_s1 + $0xa20] ss:$40 sps:$4 sm:$0xff]  }
 0x5a0   :  { %12547 = vmatpush1.bf16.msra.mxu1 %v20201_v12  ;;  %12507 = vmatprep.subr.bf16.mxu0 %v20206_v18  ;;  %v20255_v12 = vld [vmem:[%s28192_s1 + $0xf20] ss:$40 sps:$4 sm:$0xff]   ;;  %v20260_v18 = vld [vmem:[%s28192_s1 + $0xa74] ss:$40 sps:$4 sm:$0xff]  }
 0x5a1   :  { %12548 = vmatprep.subr.bf16.mxu1 %v20209_v11  ;;  %v20263_v11 = vld [vmem:[%s28192_s1 + $0xf74] ss:$40 sps:$4 sm:$0xff]  }
 0x5a3   :  { %12508 = vmatpush1.bf16.msra.mxu0 %v20204_v13  ;;  %v20258_v13 = vld [vmem:[%s28192_s1 + $0xa70] ss:$40 sps:$4 sm:$0xff]  }
 0x5a4   :  { %12549 = vmatpush1.bf16.msra.mxu1 %v20207_v14  ;;  %12509 = vmatprep.subr.bf16.mxu0 %v20212_v20  ;;  %v20261_v14 = vld [vmem:[%s28192_s1 + $0xf70] ss:$40 sps:$4 sm:$0xff]   ;;  %v20266_v20 = vld [vmem:[%s28192_s1 + $0xac4] ss:$40 sps:$4 sm:$0xff]  }
 0x5a5   :  { %12550 = vmatprep.subr.bf16.mxu1 %v20215_v15  ;;  %v20267_v15 = vld [vmem:[%s28192_s1 + $0xfc0] ss:$40 sps:$4 sm:$0xff]  }
 0x5a7   :  { %12510 = vmatpush1.bf16.msra.mxu0 %v20210_v19  ;;  %v20272_v19 = vld [vmem:[%s28192_s1 + $0xb14] ss:$40 sps:$4 sm:$0xff]  }
 0x5a8   :  { %12551 = vmatpush1.bf16.msra.mxu1 %v20213_v47  ;;  %12511 = vmatprep.subr.bf16.mxu0 %v20218_v51  ;;  %v20273_v47 = vld [vmem:[%s28192_s1 + $0x1010] ss:$40 sps:$4 sm:$0xff]   ;;  %v20278_v51 = vld [vmem:[%s28192_s1 + $0xb64] ss:$40 sps:$4 sm:$0xff]  }
 0x5a9   :  { %12552 = vmatprep.subr.bf16.mxu1 %v20221_v21  ;;  %v20281_v21 = vld [vmem:[%s28192_s1 + $0x1064] ss:$40 sps:$4 sm:$0xff]  }
 0x5ab   :  { %12512 = vmatpush1.bf16.msra.mxu0 %v20216_v27  ;;  %v20276_v27 = vld [vmem:[%s28192_s1 + $0xb60] ss:$40 sps:$4 sm:$0xff]  }
 0x5ac   :  { %12553 = vmatpush1.bf16.msra.mxu1 %v20219_v30  ;;  %12513 = vmatprep.subr.bf16.mxu0 %v20224_v35  ;;  %v20279_v30 = vld [vmem:[%s28192_s1 + $0x1060] ss:$40 sps:$4 sm:$0xff]   ;;  %v20284_v35 = vld [vmem:[%s28192_s1 + $0xbb4] ss:$40 sps:$4 sm:$0xff]  }
 0x5ad   :  { %12554 = vmatprep.subr.bf16.mxu1 %v20227_v29  ;;  %v20287_v29 = vld [vmem:[%s28192_s1 + $0x10b4] ss:$40 sps:$4 sm:$0xff]  }
 0x5af   :  { %12514 = vmatpush1.bf16.msra.mxu0 %v20222_v31  ;;  %v20282_v31 = vld [vmem:[%s28192_s1 + $0xbb0] ss:$40 sps:$4 sm:$0xff]  }
 0x5b0   :  { %12555 = vmatpush1.bf16.msra.mxu1 %v20225_v28  ;;  %12515 = vmatprep.subr.bf16.mxu0 %v20230_v57  ;;  %v20285_v28 = vld [vmem:[%s28192_s1 + $0x10b0] ss:$40 sps:$4 sm:$0xff]   ;;  %v20290_v57 = vld [vmem:[%s28192_s1 + $0xc04] ss:$40 sps:$4 sm:$0xff]  }
 0x5b1   :  { %12556 = vmatprep.subr.bf16.mxu1 %v20233_v26  ;;  %v20293_v26 = vld [vmem:[%s28192_s1 + $0x1104] ss:$40 sps:$4 sm:$0xff]  }
 0x5b3   :  { %12516 = vmatpush1.bf16.msra.mxu0 %v20228_v62 }
 0x5b4   :  { %12557 = vmatpush1.bf16.msra.mxu1 %v20231_v44  ;;  %12517 = vmatprep.subr.bf16.mxu0 %v20236_v45 }
 0x5b5   :  { %12558 = vmatprep.subr.bf16.mxu1 %v20239_v52 }
 0x5b7   :  { %12518 = vmatpush1.bf16.msra.mxu0 %v20234_v56 }
 0x5b8   :  { %12559 = vmatpush1.bf16.msra.mxu1 %v20237_v40  ;;  %12519 = vmatprep.subr.bf16.mxu0 %v20242_v41 }
 0x5b9   :  { %12560 = vmatprep.subr.bf16.mxu1 %v20245_v46 }
 0x5bb   :  { %12520 = vmatpush1.bf16.msra.mxu0 %v20240_v4  ;;  %v20288_v4 = vld [vmem:[%s28192_s1 + $0xc00] ss:$40 sps:$4 sm:$0xff]  }
 0x5bc   :  { %12561 = vmatpush1.bf16.msra.mxu1 %v20243_v32  ;;  %12521 = vmatprep.subr.bf16.mxu0 %v20248_v50  ;;  %v20291_v32 = vld [vmem:[%s28192_s1 + $0x1100] ss:$40 sps:$4 sm:$0xff]  }
 0x5bd   :  { %12562 = vmatprep.subr.bf16.mxu1 %v20251_v10 }
 0x5bf   :  { %12522 = vmatpush1.bf16.msra.mxu0 %v20246_v3  ;;  %v20299_v3 = vld [vmem:[%s28192_s1 + $0x1154] ss:$40 sps:$4 sm:$0xff]  }
 0x5c0   :  { %12563 = vmatpush1.bf16.msra.mxu1 %v20249_v54  ;;  %12573 = vmatprep.subr.bf16.mxu0 %v20254_v63  ;;  %v20294_v63 = vld [vmem:[%s28192_s1 + $0xc50] ss:$40 sps:$4 sm:$0xff]  }
 0x5c1   :  { %12614 = vmatprep.subr.bf16.mxu1 %v20257_v5  ;;  %v20297_v5 = vld [vmem:[%s28192_s1 + $0x1150] ss:$40 sps:$4 sm:$0xff]  }
 0x5c2   :  { %12524 = vmatmul.mubr.bf16.vlgmr.msra.gmra.mrb[88].mxu0 %v21499_v6  ;;  %v20269_v6 = vld [vmem:[%s28192_s1 + $0xfc4] ss:$40 sps:$4 sm:$0xff]  }
 0x5c3   :  { %12565 = vmatmul.mubr.bf16.vlgmr.msra.gmra.mrb[88].mxu1 %v21501_v7  ;;  %12574 = vmatpush1.bf16.msra.mxu0 %v20252_v9  ;;  %v20264_v7 = vld [vmem:[%s28192_s1 + $0xac0] ss:$40 sps:$4 sm:$0xff]   ;;  %v20302_v9 = vld [vmem:[%s28192_s1 + $0xca4] ss:$40 sps:$4 sm:$0xff]  }
 0x5c4   :  { %12615 = vmatpush1.bf16.msra.mxu1 %v20255_v12  ;;  %12575 = vmatprep.subr.bf16.mxu0 %v20260_v18  ;;  %v20305_v12 = vld [vmem:[%s28192_s1 + $0x11a4] ss:$40 sps:$4 sm:$0xff]   ;;  %v20300_v18 = vld [vmem:[%s28192_s1 + $0xca0] ss:$40 sps:$4 sm:$0xff]  }
 0x5c5   :  { %12616 = vmatprep.subr.bf16.mxu1 %v20263_v11  ;;  %12605 = vmatprep.mubr.bf16.mxu0 %v21595_v36  ;;  %v20275_v36 = vld [vmem:[%s28192_s1 + $0x1014] ss:$40 sps:$4 sm:$0xff]   ;;  %v20303_v11 = vld [vmem:[%s28192_s1 + $0x11a0] ss:$40 sps:$4 sm:$0xff]  }
 0x5c6   :  { %12646 = vmatprep.mubr.bf16.mxu1 %v21599_v37  ;;  %v20270_v37 = vld [vmem:[%s28192_s1 + $0xb10] ss:$40 sps:$4 sm:$0xff]  }
 0x5c7   :  { %12576 = vmatpush1.bf16.msra.mxu0 %v20258_v13  ;;  %v20308_v13 = vld [vmem:[%s28192_s1 + $0xcf4] ss:$40 sps:$4 sm:$0xff]  }
 0x5c8   :  { %12617 = vmatpush1.bf16.msra.mxu1 %v20261_v14  ;;  %12577 = vmatprep.subr.bf16.mxu0 %v20266_v20  ;;  %v20311_v14 = vld [vmem:[%s28192_s1 + $0x11f4] ss:$40 sps:$4 sm:$0xff]   ;;  %v20306_v20 = vld [vmem:[%s28192_s1 + $0xcf0] ss:$40 sps:$4 sm:$0xff]  }
 0x5c9   :  { %12618 = vmatprep.subr.bf16.mxu1 %v20269_v6  ;;  %v20309_v6 = vld [vmem:[%s28192_s1 + $0x11f0] ss:$40 sps:$4 sm:$0xff]  }
 0x5cb   :  { %12578 = vmatpush1.bf16.msra.mxu0 %v20264_v7  ;;  %v20314_v7 = vld [vmem:[%s28192_s1 + $0xd44] ss:$40 sps:$4 sm:$0xff]  }
 0x5cc   :  { %12619 = vmatpush1.bf16.msra.mxu1 %v20267_v15  ;;  %12579 = vmatprep.subr.bf16.mxu0 %v20272_v19  ;;  %v20317_v15 = vld [vmem:[%s28192_s1 + $0x1244] ss:$40 sps:$4 sm:$0xff]   ;;  %v20312_v19 = vld [vmem:[%s28192_s1 + $0xd40] ss:$40 sps:$4 sm:$0xff]  }
 0x5cd   :  { %12620 = vmatprep.subr.bf16.mxu1 %v20275_v36  ;;  %v20315_v36 = vld [vmem:[%s28192_s1 + $0x1240] ss:$40 sps:$4 sm:$0xff]  }
 0x5cf   :  { %12580 = vmatpush1.bf16.msra.mxu0 %v20270_v37  ;;  %v20320_v37 = vld [vmem:[%s28192_s1 + $0xd94] ss:$40 sps:$4 sm:$0xff]  }
 0x5d0   :  { %12621 = vmatpush1.bf16.msra.mxu1 %v20273_v47  ;;  %12581 = vmatprep.subr.bf16.mxu0 %v20278_v51  ;;  %v20323_v47 = vld [vmem:[%s28192_s1 + $0x1294] ss:$40 sps:$4 sm:$0xff]   ;;  %v20318_v51 = vld [vmem:[%s28192_s1 + $0xd90] ss:$40 sps:$4 sm:$0xff]  }
 0x5d1   :  { %12622 = vmatprep.subr.bf16.mxu1 %v20281_v21  ;;  %v20321_v21 = vld [vmem:[%s28192_s1 + $0x1290] ss:$40 sps:$4 sm:$0xff]  }
 0x5d3   :  { %12582 = vmatpush1.bf16.msra.mxu0 %v20276_v27  ;;  %v20326_v27 = vld [vmem:[%s28192_s1 + $0xde4] ss:$40 sps:$4 sm:$0xff]  }
 0x5d4   :  { %12623 = vmatpush1.bf16.msra.mxu1 %v20279_v30  ;;  %12583 = vmatprep.subr.bf16.mxu0 %v20284_v35  ;;  %v20329_v30 = vld [vmem:[%s28192_s1 + $0x12e4] ss:$40 sps:$4 sm:$0xff]   ;;  %v20324_v35 = vld [vmem:[%s28192_s1 + $0xde0] ss:$40 sps:$4 sm:$0xff]  }
 0x5d5   :  { %12624 = vmatprep.subr.bf16.mxu1 %v20287_v29  ;;  %v12279_v62 = vpop.f32.mrb[76].mxu0  ;;  %v20327_v29 = vld [vmem:[%s28192_s1 + $0x12e0] ss:$40 sps:$4 sm:$0xff]  }
 0x5d6   :  { %v12320_v44 = vpop.f32.mrb[76].mxu1  ;;  %v12280_v45 = vadd.f32 %v12279_v62, %v25932_v2  ;;  %v12281_v52 = vpop.f32.mrb[77].mxu0  ;;  %v20338_v62 = vld [vmem:[%s28192_s1 + $0xe84] ss:$40 sps:$4 sm:$0xff]  }
 0x5d7   :  { %v12322_v56 = vpop.f32.mrb[77].mxu1  ;;  %v12282_v40 = vadd.f32 %v12281_v52, %v25940_v8  ;;  %v12283_v41 = vpop.f32.mrb[78].mxu0  ;;  %12584 = vmatpush1.bf16.msra.mxu0 %v20282_v31  ;;  %v20296_v8 = vld [vmem:[%s28192_s1 + $0xc54] ss:$40 sps:$4 sm:$0xff]   ;;  %v20339_v52 = vld [vmem:[%s28192_s1 + $0x1380] ss:$40 sps:$4 sm:$0xff]  }
 0x5d8   :  { %v12324_v46 = vpop.f32.mrb[78].mxu1  ;;  %12625 = vmatpush1.bf16.msra.mxu1 %v20285_v28  ;;  %v26134_v50 = vadd.f32 %v12320_v44, %v12280_v45  ;;  %v12284_v10 = vpop.f32.mrb[79].mxu0  ;;  %12585 = vmatprep.subr.bf16.mxu0 %v20290_v57  ;;  %v20332_v31 = vld [vmem:[%s28192_s1 + $0xe34] ss:$40 sps:$4 sm:$0xff]   ;;  %v20330_v57 = vld [vmem:[%s28192_s1 + $0xe30] ss:$40 sps:$4 sm:$0xff]  }
 0x5d9   :  { %v12325_v2 = vpop.f32.mrb[79].mxu1  ;;  %12626 = vmatprep.subr.bf16.mxu1 %v20293_v26  ;;  %v26142_v54 = vadd.f32 %v12322_v56, %v12282_v40  ;;  %v20335_v28 = vld [vmem:[%s28192_s1 + $0x1334] ss:$40 sps:$4 sm:$0xff]   ;;  %v20333_v26 = vld [vmem:[%s28192_s1 + $0x1330] ss:$40 sps:$4 sm:$0xff]  }
 0x5da   :  { %v20341_v44 = vld [vmem:[%s28192_s1 + $0x1384] ss:$40 sps:$4 sm:$0xff]   ;;  %v20336_v45 = vld [vmem:[%s28192_s1 + $0xe80] ss:$40 sps:$4 sm:$0xff]   ;;  %v20344_v56 = vld [vmem:[%s28192_s1 + $0xed4] ss:$40 sps:$4 sm:$0xff]  }
 0x5db   :  { %12586 = vmatpush1.bf16.msra.mxu0 %v20288_v4  ;;  %v20347_v40 = vld [vmem:[%s28192_s1 + $0x13d4] ss:$40 sps:$4 sm:$0xff]   ;;  %v20342_v41 = vld [vmem:[%s28192_s1 + $0xed0] ss:$40 sps:$4 sm:$0xff]   ;;  %v20350_v4 = vld [vmem:[%s28192_s1 + $0x1424] ss:$40 sps:$4 sm:$0xff]  }
 0x5dc   :  { %12627 = vmatpush1.bf16.msra.mxu1 %v20291_v32  ;;  %12587 = vmatprep.subr.bf16.mxu0 %v20296_v8  ;;  %v20345_v46 = vld [vmem:[%s28192_s1 + $0x13d0] ss:$40 sps:$4 sm:$0xff]   ;;  %v20353_v32 = vld [vmem:[%s28192_s1 + $0x1924] ss:$40 sps:$4 sm:$0xff]   ;;  %v20348_v10 = vld [vmem:[%s28192_s1 + $0x1420] ss:$40 sps:$4 sm:$0xff]  }
 0x5dd   :  { %12628 = vmatprep.subr.bf16.mxu1 %v20299_v3  ;;  %v20351_v2 = vld [vmem:[%s28192_s1 + $0x1920] ss:$40 sps:$4 sm:$0xff]   ;;  %v20356_v8 = vld [vmem:[%s28192_s1 + $0x1474] ss:$40 sps:$4 sm:$0xff]  }
 0x5de   :  { %v20359_v3 = vld [vmem:[%s28192_s1 + $0x1974] ss:$40 sps:$4 sm:$0xff]  }
 0x5df   :  { %12588 = vmatpush1.bf16.msra.mxu0 %v20294_v63  ;;  %v20354_v63 = vld [vmem:[%s28192_s1 + $0x1470] ss:$40 sps:$4 sm:$0xff]  }
 0x5e0   :  { %12629 = vmatpush1.bf16.msra.mxu1 %v20297_v5  ;;  %12589 = vmatprep.subr.bf16.mxu0 %v20302_v9  ;;  %v20357_v5 = vld [vmem:[%s28192_s1 + $0x1970] ss:$40 sps:$4 sm:$0xff]   ;;  %v20362_v9 = vld [vmem:[%s28192_s1 + $0x14c4] ss:$40 sps:$4 sm:$0xff]  }
 0x5e1   :  { %12630 = vmatprep.subr.bf16.mxu1 %v20305_v12  ;;  %v20363_v12 = vld [vmem:[%s28192_s1 + $0x19c0] ss:$40 sps:$4 sm:$0xff]  }
 0x5e3   :  { %12590 = vmatpush1.bf16.msra.mxu0 %v20300_v18  ;;  %v20368_v18 = vld [vmem:[%s28192_s1 + $0x1514] ss:$40 sps:$4 sm:$0xff]  }
 0x5e4   :  { %12631 = vmatpush1.bf16.msra.mxu1 %v20303_v11  ;;  %12591 = vmatprep.subr.bf16.mxu0 %v20308_v13  ;;  %v20369_v11 = vld [vmem:[%s28192_s1 + $0x1a10] ss:$40 sps:$4 sm:$0xff]   ;;  %v20374_v13 = vld [vmem:[%s28192_s1 + $0x1564] ss:$40 sps:$4 sm:$0xff]  }
 0x5e5   :  { %12632 = vmatprep.subr.bf16.mxu1 %v20311_v14  ;;  %v20377_v14 = vld [vmem:[%s28192_s1 + $0x1a64] ss:$40 sps:$4 sm:$0xff]  }
 0x5e7   :  { %12592 = vmatpush1.bf16.msra.mxu0 %v20306_v20  ;;  %v20372_v20 = vld [vmem:[%s28192_s1 + $0x1560] ss:$40 sps:$4 sm:$0xff]  }
 0x5e8   :  { %12633 = vmatpush1.bf16.msra.mxu1 %v20309_v6  ;;  %12593 = vmatprep.subr.bf16.mxu0 %v20314_v7  ;;  %v20375_v6 = vld [vmem:[%s28192_s1 + $0x1a60] ss:$40 sps:$4 sm:$0xff]   ;;  %v20380_v7 = vld [vmem:[%s28192_s1 + $0x15b4] ss:$40 sps:$4 sm:$0xff]  }
 0x5e9   :  { %12634 = vmatprep.subr.bf16.mxu1 %v20317_v15  ;;  %v20383_v15 = vld [vmem:[%s28192_s1 + $0x1ab4] ss:$40 sps:$4 sm:$0xff]  }
 0x5eb   :  { %12594 = vmatpush1.bf16.msra.mxu0 %v20312_v19  ;;  %v20378_v19 = vld [vmem:[%s28192_s1 + $0x15b0] ss:$40 sps:$4 sm:$0xff]  }
 0x5ec   :  { %12635 = vmatpush1.bf16.msra.mxu1 %v20315_v36  ;;  %12595 = vmatprep.subr.bf16.mxu0 %v20320_v37  ;;  %v20381_v36 = vld [vmem:[%s28192_s1 + $0x1ab0] ss:$40 sps:$4 sm:$0xff]   ;;  %v20386_v37 = vld [vmem:[%s28192_s1 + $0x1604] ss:$40 sps:$4 sm:$0xff]  }
 0x5ed   :  { %12636 = vmatprep.subr.bf16.mxu1 %v20323_v47  ;;  %v20389_v47 = vld [vmem:[%s28192_s1 + $0x1b04] ss:$40 sps:$4 sm:$0xff]  }
 0x5ef   :  { %12596 = vmatpush1.bf16.msra.mxu0 %v20318_v51 }
 0x5f0   :  { %12637 = vmatpush1.bf16.msra.mxu1 %v20321_v21  ;;  %12597 = vmatprep.subr.bf16.mxu0 %v20326_v27 }
 0x5f1   :  { %12638 = vmatprep.subr.bf16.mxu1 %v20329_v30 }
 0x5f3   :  { %12598 = vmatpush1.bf16.msra.mxu0 %v20324_v35 }
 0x5f4   :  { %12639 = vmatpush1.bf16.msra.mxu1 %v20327_v29  ;;  %12599 = vmatprep.subr.bf16.mxu0 %v20332_v31 }
 0x5f5   :  { %12640 = vmatprep.subr.bf16.mxu1 %v20335_v28 }
 0x5f7   :  { %12600 = vmatpush1.bf16.msra.mxu0 %v20330_v57  ;;  %v20384_v57 = vld [vmem:[%s28192_s1 + $0x1600] ss:$40 sps:$4 sm:$0xff]  }
 0x5f8   :  { %12641 = vmatpush1.bf16.msra.mxu1 %v20333_v26  ;;  %12601 = vmatprep.subr.bf16.mxu0 %v20338_v62  ;;  %v20387_v26 = vld [vmem:[%s28192_s1 + $0x1b00] ss:$40 sps:$4 sm:$0xff]  }
 0x5f9   :  { %12642 = vmatprep.subr.bf16.mxu1 %v20341_v44 }
 0x5fb   :  { %12602 = vmatpush1.bf16.msra.mxu0 %v20336_v45  ;;  %v20395_v45 = vld [vmem:[%s28192_s1 + $0x1b54] ss:$40 sps:$4 sm:$0xff]  }
 0x5fc   :  { %12643 = vmatpush1.bf16.msra.mxu1 %v20339_v52  ;;  %12603 = vmatprep.subr.bf16.mxu0 %v20344_v56  ;;  %v20390_v56 = vld [vmem:[%s28192_s1 + $0x1650] ss:$40 sps:$4 sm:$0xff]  }
 0x5fd   :  { %12644 = vmatprep.subr.bf16.mxu1 %v20347_v40  ;;  %v20393_v40 = vld [vmem:[%s28192_s1 + $0x1b50] ss:$40 sps:$4 sm:$0xff]  }
 0x5ff   :  { %12604 = vmatpush1.bf16.msra.mxu0 %v20342_v41  ;;  %v20398_v41 = vld [vmem:[%s28192_s1 + $0x16a4] ss:$40 sps:$4 sm:$0xff]  }
 0x600   :  { %12645 = vmatpush1.bf16.msra.mxu1 %v20345_v46  ;;  %12655 = vmatprep.subr.bf16.mxu0 %v20350_v4  ;;  %v20401_v46 = vld [vmem:[%s28192_s1 + $0x1ba4] ss:$40 sps:$4 sm:$0xff]   ;;  %v20396_v4 = vld [vmem:[%s28192_s1 + $0x16a0] ss:$40 sps:$4 sm:$0xff]  }
 0x601   :  { %12696 = vmatprep.subr.bf16.mxu1 %v20353_v32  ;;  %v20399_v32 = vld [vmem:[%s28192_s1 + $0x1ba0] ss:$40 sps:$4 sm:$0xff]  }
 0x602   :  { %12606 = vmatmul.mubr.bf16.vlgmr.msra.gmra.mrb[92].mxu0 %v21719_v16  ;;  %v20365_v16 = vld [vmem:[%s28192_s1 + $0x19c4] ss:$40 sps:$4 sm:$0xff]  }
 0x603   :  { %12647 = vmatmul.mubr.bf16.vlgmr.msra.gmra.mrb[92].mxu1 %v21723_v17  ;;  %12656 = vmatpush1.bf16.msra.mxu0 %v20348_v10  ;;  %v20360_v17 = vld [vmem:[%s28192_s1 + $0x14c0] ss:$40 sps:$4 sm:$0xff]   ;;  %v20404_v10 = vld [vmem:[%s28192_s1 + $0x16f4] ss:$40 sps:$4 sm:$0xff]  }
 0x604   :  { %12697 = vmatpush1.bf16.msra.mxu1 %v20351_v2  ;;  %12657 = vmatprep.subr.bf16.mxu0 %v20356_v8  ;;  %v20407_v2 = vld [vmem:[%s28192_s1 + $0x1bf4] ss:$40 sps:$4 sm:$0xff]   ;;  %v20402_v8 = vld [vmem:[%s28192_s1 + $0x16f0] ss:$40 sps:$4 sm:$0xff]  }
 0x605   :  { %12698 = vmatprep.subr.bf16.mxu1 %v20359_v3  ;;  %12687 = vmatprep.mubr.bf16.mxu0 %v21749_v24  ;;  %v20371_v24 = vld [vmem:[%s28192_s1 + $0x1a14] ss:$40 sps:$4 sm:$0xff]   ;;  %v20405_v3 = vld [vmem:[%s28192_s1 + $0x1bf0] ss:$40 sps:$4 sm:$0xff]  }
 0x606   :  { %12728 = vmatprep.mubr.bf16.mxu1 %v21753_v25  ;;  %v20366_v25 = vld [vmem:[%s28192_s1 + $0x1510] ss:$40 sps:$4 sm:$0xff]  }
 0x607   :  { %12658 = vmatpush1.bf16.msra.mxu0 %v20354_v63  ;;  %v20410_v63 = vld [vmem:[%s28192_s1 + $0x1744] ss:$40 sps:$4 sm:$0xff]  }
 0x608   :  { %12699 = vmatpush1.bf16.msra.mxu1 %v20357_v5  ;;  %12659 = vmatprep.subr.bf16.mxu0 %v20362_v9  ;;  %v20413_v5 = vld [vmem:[%s28192_s1 + $0x1c44] ss:$40 sps:$4 sm:$0xff]   ;;  %v20408_v9 = vld [vmem:[%s28192_s1 + $0x1740] ss:$40 sps:$4 sm:$0xff]  }
 0x609   :  { %12700 = vmatprep.subr.bf16.mxu1 %v20365_v16  ;;  %v20411_v16 = vld [vmem:[%s28192_s1 + $0x1c40] ss:$40 sps:$4 sm:$0xff]  }
 0x60b   :  { %12660 = vmatpush1.bf16.msra.mxu0 %v20360_v17  ;;  %v20416_v17 = vld [vmem:[%s28192_s1 + $0x1794] ss:$40 sps:$4 sm:$0xff]  }
 0x60c   :  { %12701 = vmatpush1.bf16.msra.mxu1 %v20363_v12  ;;  %12661 = vmatprep.subr.bf16.mxu0 %v20368_v18  ;;  %v20419_v12 = vld [vmem:[%s28192_s1 + $0x1c94] ss:$40 sps:$4 sm:$0xff]   ;;  %v20414_v18 = vld [vmem:[%s28192_s1 + $0x1790] ss:$40 sps:$4 sm:$0xff]  }
 0x60d   :  { %12702 = vmatprep.subr.bf16.mxu1 %v20371_v24  ;;  %v20417_v24 = vld [vmem:[%s28192_s1 + $0x1c90] ss:$40 sps:$4 sm:$0xff]  }
 0x60f   :  { %12662 = vmatpush1.bf16.msra.mxu0 %v20366_v25  ;;  %v20422_v25 = vld [vmem:[%s28192_s1 + $0x17e4] ss:$40 sps:$4 sm:$0xff]  }
 0x610   :  { %12703 = vmatpush1.bf16.msra.mxu1 %v20369_v11  ;;  %12663 = vmatprep.subr.bf16.mxu0 %v20374_v13  ;;  %v20425_v11 = vld [vmem:[%s28192_s1 + $0x1ce4] ss:$40 sps:$4 sm:$0xff]   ;;  %v20420_v13 = vld [vmem:[%s28192_s1 + $0x17e0] ss:$40 sps:$4 sm:$0xff]  }
 0x611   :  { %12704 = vmatprep.subr.bf16.mxu1 %v20377_v14  ;;  %v20423_v14 = vld [vmem:[%s28192_s1 + $0x1ce0] ss:$40 sps:$4 sm:$0xff]  }
 0x613   :  { %12664 = vmatpush1.bf16.msra.mxu0 %v20372_v20  ;;  %v20428_v20 = vld [vmem:[%s28192_s1 + $0x1834] ss:$40 sps:$4 sm:$0xff]  }
 0x614   :  { %12705 = vmatpush1.bf16.msra.mxu1 %v20375_v6  ;;  %12665 = vmatprep.subr.bf16.mxu0 %v20380_v7  ;;  %v20431_v6 = vld [vmem:[%s28192_s1 + $0x1d34] ss:$40 sps:$4 sm:$0xff]   ;;  %v20426_v7 = vld [vmem:[%s28192_s1 + $0x1830] ss:$40 sps:$4 sm:$0xff]  }
 0x615   :  { %12706 = vmatprep.subr.bf16.mxu1 %v20383_v15  ;;  %v12361_v51 = vpop.f32.mrb[80].mxu0  ;;  %v20429_v15 = vld [vmem:[%s28192_s1 + $0x1d30] ss:$40 sps:$4 sm:$0xff]  }
 0x616   :  { %v12402_v21 = vpop.f32.mrb[80].mxu1  ;;  %v12362_v27 = vadd.f32 %v12361_v51, %v26134_v50  ;;  %v12363_v30 = vpop.f32.mrb[81].mxu0  ;;  %v20440_v51 = vld [vmem:[%s28192_s1 + $0x18d4] ss:$40 sps:$4 sm:$0xff]  }
 0x617   :  { %v12404_v35 = vpop.f32.mrb[81].mxu1  ;;  %v12364_v29 = vadd.f32 %v12363_v30, %v26142_v54  ;;  %v12365_v31 = vpop.f32.mrb[82].mxu0  ;;  %12666 = vmatpush1.bf16.msra.mxu0 %v20378_v19  ;;  %v20392_v54 = vld [vmem:[%s28192_s1 + $0x1654] ss:$40 sps:$4 sm:$0xff]   ;;  %v20434_v19 = vld [vmem:[%s28192_s1 + $0x1884] ss:$40 sps:$4 sm:$0xff]  }
 0x618   :  { %v12406_v28 = vpop.f32.mrb[82].mxu1  ;;  %12707 = vmatpush1.bf16.msra.mxu1 %v20381_v36  ;;  %v26336_v62 = vadd.f32 %v12402_v21, %v12362_v27  ;;  %v12366_v44 = vpop.f32.mrb[83].mxu0  ;;  %12667 = vmatprep.subr.bf16.mxu0 %v20386_v37  ;;  %v20437_v36 = vld [vmem:[%s28192_s1 + $0x1d84] ss:$40 sps:$4 sm:$0xff]   ;;  %v20432_v37 = vld [vmem:[%s28192_s1 + $0x1880] ss:$40 sps:$4 sm:$0xff]  }
 0x619   :  { %v12407_v50 = vpop.f32.mrb[83].mxu1  ;;  %12708 = vmatprep.subr.bf16.mxu1 %v20389_v47  ;;  %v26344_v52 = vadd.f32 %v12404_v35, %v12364_v29  ;;  %v20435_v47 = vld [vmem:[%s28192_s1 + $0x1d80] ss:$40 sps:$4 sm:$0xff]   ;;  %v20443_v21 = vld [vmem:[%s28192_s1 + $0x1dd4] ss:$40 sps:$4 sm:$0xff]  }
 0x61a   :  { %v20438_v27 = vld [vmem:[%s28192_s1 + $0x18d0] ss:$40 sps:$4 sm:$0xff]   ;;  %v20446_v35 = vld [vmem:[%s28192_s1 + $0x1e24] ss:$40 sps:$4 sm:$0xff]   ;;  %v20444_v31 = vld [vmem:[%s28192_s1 + $0x1e20] ss:$40 sps:$4 sm:$0xff]  }
 0x61b   :  { %12668 = vmatpush1.bf16.msra.mxu0 %v20384_v57  ;;  %v20441_v30 = vld [vmem:[%s28192_s1 + $0x1dd0] ss:$40 sps:$4 sm:$0xff]   ;;  %v20449_v29 = vld [vmem:[%s28192_s1 + $0x2324] ss:$40 sps:$4 sm:$0xff]   ;;  %v20447_v28 = vld [vmem:[%s28192_s1 + $0x2320] ss:$40 sps:$4 sm:$0xff]  }
 0x61c   :  { %12709 = vmatpush1.bf16.msra.mxu1 %v20387_v26  ;;  %12669 = vmatprep.subr.bf16.mxu0 %v20392_v54  ;;  %v20452_v57 = vld [vmem:[%s28192_s1 + $0x1e74] ss:$40 sps:$4 sm:$0xff]   ;;  %v20450_v44 = vld [vmem:[%s28192_s1 + $0x1e70] ss:$40 sps:$4 sm:$0xff]   ;;  %v20458_v54 = vld [vmem:[%s28192_s1 + $0x1ec4] ss:$40 sps:$4 sm:$0xff]  }
 0x61d   :  { %12710 = vmatprep.subr.bf16.mxu1 %v20395_v45  ;;  %v20455_v26 = vld [vmem:[%s28192_s1 + $0x2374] ss:$40 sps:$4 sm:$0xff]   ;;  %v20453_v50 = vld [vmem:[%s28192_s1 + $0x2370] ss:$40 sps:$4 sm:$0xff]   ;;  %v20461_v45 = vld [vmem:[%s28192_s1 + $0x23c4] ss:$40 sps:$4 sm:$0xff]  }
 0x61f   :  { %12670 = vmatpush1.bf16.msra.mxu0 %v20390_v56  ;;  %v20464_v56 = vld [vmem:[%s28192_s1 + $0x1f14] ss:$40 sps:$4 sm:$0xff]  }
 0x620   :  { %12711 = vmatpush1.bf16.msra.mxu1 %v20393_v40  ;;  %12671 = vmatprep.subr.bf16.mxu0 %v20398_v41  ;;  %v20465_v40 = vld [vmem:[%s28192_s1 + $0x2410] ss:$40 sps:$4 sm:$0xff]   ;;  %v20470_v41 = vld [vmem:[%s28192_s1 + $0x1f64] ss:$40 sps:$4 sm:$0xff]  }
 0x621   :  { %12712 = vmatprep.subr.bf16.mxu1 %v20401_v46  ;;  %v20473_v46 = vld [vmem:[%s28192_s1 + $0x2464] ss:$40 sps:$4 sm:$0xff]  }
 0x623   :  { %12672 = vmatpush1.bf16.msra.mxu0 %v20396_v4  ;;  %v20468_v4 = vld [vmem:[%s28192_s1 + $0x1f60] ss:$40 sps:$4 sm:$0xff]  }
 0x624   :  { %12713 = vmatpush1.bf16.msra.mxu1 %v20399_v32  ;;  %12673 = vmatprep.subr.bf16.mxu0 %v20404_v10  ;;  %v20471_v32 = vld [vmem:[%s28192_s1 + $0x2460] ss:$40 sps:$4 sm:$0xff]   ;;  %v20476_v10 = vld [vmem:[%s28192_s1 + $0x1fb4] ss:$40 sps:$4 sm:$0xff]  }
 0x625   :  { %12714 = vmatprep.subr.bf16.mxu1 %v20407_v2  ;;  %v20479_v2 = vld [vmem:[%s28192_s1 + $0x24b4] ss:$40 sps:$4 sm:$0xff]  }
 0x627   :  { %12674 = vmatpush1.bf16.msra.mxu0 %v20402_v8  ;;  %v20474_v8 = vld [vmem:[%s28192_s1 + $0x1fb0] ss:$40 sps:$4 sm:$0xff]  }
 0x628   :  { %12715 = vmatpush1.bf16.msra.mxu1 %v20405_v3  ;;  %12675 = vmatprep.subr.bf16.mxu0 %v20410_v63  ;;  %v20477_v3 = vld [vmem:[%s28192_s1 + $0x24b0] ss:$40 sps:$4 sm:$0xff]   ;;  %v20482_v63 = vld [vmem:[%s28192_s1 + $0x2004] ss:$40 sps:$4 sm:$0xff]  }
 0x629   :  { %12716 = vmatprep.subr.bf16.mxu1 %v20413_v5  ;;  %v20485_v5 = vld [vmem:[%s28192_s1 + $0x2504] ss:$40 sps:$4 sm:$0xff]  }
 0x62b   :  { %12676 = vmatpush1.bf16.msra.mxu0 %v20408_v9 }
 0x62c   :  { %12717 = vmatpush1.bf16.msra.mxu1 %v20411_v16  ;;  %12677 = vmatprep.subr.bf16.mxu0 %v20416_v17  ;;  %v20480_v17 = vld [vmem:[%s28192_s1 + $0x2000] ss:$40 sps:$4 sm:$0xff]  }
 0x62d   :  { %12718 = vmatprep.subr.bf16.mxu1 %v20419_v12  ;;  %v20483_v12 = vld [vmem:[%s28192_s1 + $0x2500] ss:$40 sps:$4 sm:$0xff]  }
 0x62f   :  { %12678 = vmatpush1.bf16.msra.mxu0 %v20414_v18 }
 0x630   :  { %12719 = vmatpush1.bf16.msra.mxu1 %v20417_v24  ;;  %12679 = vmatprep.subr.bf16.mxu0 %v20422_v25 }
 0x631   :  { %12720 = vmatprep.subr.bf16.mxu1 %v20425_v11  ;;  %v20488_v11 = vld [vmem:[%s28192_s1 + $0x2054] ss:$40 sps:$4 sm:$0xff]  }
 0x633   :  { %12680 = vmatpush1.bf16.msra.mxu0 %v20420_v13  ;;  %v20491_v13 = vld [vmem:[%s28192_s1 + $0x2554] ss:$40 sps:$4 sm:$0xff]  }
 0x634   :  { %12721 = vmatpush1.bf16.msra.mxu1 %v20423_v14  ;;  %12681 = vmatprep.subr.bf16.mxu0 %v20428_v20 }
 0x635   :  { %12722 = vmatprep.subr.bf16.mxu1 %v20431_v6 }
 0x637   :  { %12682 = vmatpush1.bf16.msra.mxu0 %v20426_v7 }
 0x638   :  { %12723 = vmatpush1.bf16.msra.mxu1 %v20429_v15  ;;  %12683 = vmatprep.subr.bf16.mxu0 %v20434_v19 }
 0x639   :  { %12724 = vmatprep.subr.bf16.mxu1 %v20437_v36  ;;  %v20486_v36 = vld [vmem:[%s28192_s1 + $0x2050] ss:$40 sps:$4 sm:$0xff]  }
 0x63b   :  { %12684 = vmatpush1.bf16.msra.mxu0 %v20432_v37  ;;  %v20494_v37 = vld [vmem:[%s28192_s1 + $0x20a4] ss:$40 sps:$4 sm:$0xff]  }
 0x63c   :  { %12725 = vmatpush1.bf16.msra.mxu1 %v20435_v47  ;;  %12685 = vmatprep.subr.bf16.mxu0 %v20440_v51  ;;  %v20497_v47 = vld [vmem:[%s28192_s1 + $0x25a4] ss:$40 sps:$4 sm:$0xff]   ;;  %v20492_v51 = vld [vmem:[%s28192_s1 + $0x20a0] ss:$40 sps:$4 sm:$0xff]  }
 0x63d   :  { %12726 = vmatprep.subr.bf16.mxu1 %v20443_v21  ;;  %v20495_v21 = vld [vmem:[%s28192_s1 + $0x25a0] ss:$40 sps:$4 sm:$0xff]  }
 0x63f   :  { %12686 = vmatpush1.bf16.msra.mxu0 %v20438_v27  ;;  %v20500_v27 = vld [vmem:[%s28192_s1 + $0x20f4] ss:$40 sps:$4 sm:$0xff]  }
 0x640   :  { %12727 = vmatpush1.bf16.msra.mxu1 %v20441_v30  ;;  %12737 = vmatprep.subr.bf16.mxu0 %v20446_v35  ;;  %v20503_v30 = vld [vmem:[%s28192_s1 + $0x25f4] ss:$40 sps:$4 sm:$0xff]   ;;  %v20498_v35 = vld [vmem:[%s28192_s1 + $0x20f0] ss:$40 sps:$4 sm:$0xff]  }
 0x641   :  { %12778 = vmatprep.subr.bf16.mxu1 %v20449_v29  ;;  %v20501_v29 = vld [vmem:[%s28192_s1 + $0x25f0] ss:$40 sps:$4 sm:$0xff]  }
 0x642   :  { %12688 = vmatmul.mubr.bf16.vlgmr.msra.gmra.mrb[96].mxu0 %v21947_v38  ;;  %v20456_v38 = vld [vmem:[%s28192_s1 + $0x1ec0] ss:$40 sps:$4 sm:$0xff]  }
 0x643   :  { %12729 = vmatmul.mubr.bf16.vlgmr.msra.gmra.mrb[96].mxu1 %v21951_v39  ;;  %12738 = vmatpush1.bf16.msra.mxu0 %v20444_v31  ;;  %v20459_v39 = vld [vmem:[%s28192_s1 + $0x23c0] ss:$40 sps:$4 sm:$0xff]   ;;  %v20506_v31 = vld [vmem:[%s28192_s1 + $0x2144] ss:$40 sps:$4 sm:$0xff]  }
 0x644   :  { %12779 = vmatpush1.bf16.msra.mxu1 %v20447_v28  ;;  %12739 = vmatprep.subr.bf16.mxu0 %v20452_v57  ;;  %v20509_v28 = vld [vmem:[%s28192_s1 + $0x2644] ss:$40 sps:$4 sm:$0xff]   ;;  %v20504_v57 = vld [vmem:[%s28192_s1 + $0x2140] ss:$40 sps:$4 sm:$0xff]  }
 0x645   :  { %12780 = vmatprep.subr.bf16.mxu1 %v20455_v26  ;;  %12769 = vmatprep.mubr.bf16.mxu0 %v21971_v42  ;;  %v20467_v42 = vld [vmem:[%s28192_s1 + $0x2414] ss:$40 sps:$4 sm:$0xff]   ;;  %v20507_v26 = vld [vmem:[%s28192_s1 + $0x2640] ss:$40 sps:$4 sm:$0xff]  }
 0x646   :  { %12810 = vmatprep.mubr.bf16.mxu1 %v21975_v43  ;;  %v20462_v43 = vld [vmem:[%s28192_s1 + $0x1f10] ss:$40 sps:$4 sm:$0xff]  }
 0x647   :  { %12740 = vmatpush1.bf16.msra.mxu0 %v20450_v44  ;;  %v20512_v44 = vld [vmem:[%s28192_s1 + $0x2194] ss:$40 sps:$4 sm:$0xff]  }
 0x648   :  { %12781 = vmatpush1.bf16.msra.mxu1 %v20453_v50  ;;  %12741 = vmatprep.subr.bf16.mxu0 %v20458_v54  ;;  %v20515_v50 = vld [vmem:[%s28192_s1 + $0x2694] ss:$40 sps:$4 sm:$0xff]   ;;  %v20510_v54 = vld [vmem:[%s28192_s1 + $0x2190] ss:$40 sps:$4 sm:$0xff]  }
 0x649   :  { %12782 = vmatprep.subr.bf16.mxu1 %v20461_v45  ;;  %v20513_v45 = vld [vmem:[%s28192_s1 + $0x2690] ss:$40 sps:$4 sm:$0xff]  }
 0x64b   :  { %12742 = vmatpush1.bf16.msra.mxu0 %v20456_v38  ;;  %v20518_v38 = vld [vmem:[%s28192_s1 + $0x21e4] ss:$40 sps:$4 sm:$0xff]  }
 0x64c   :  { %12783 = vmatpush1.bf16.msra.mxu1 %v20459_v39  ;;  %12743 = vmatprep.subr.bf16.mxu0 %v20464_v56  ;;  %v20521_v39 = vld [vmem:[%s28192_s1 + $0x26e4] ss:$40 sps:$4 sm:$0xff]   ;;  %v20516_v56 = vld [vmem:[%s28192_s1 + $0x21e0] ss:$40 sps:$4 sm:$0xff]  }
 0x64d   :  { %12784 = vmatprep.subr.bf16.mxu1 %v20467_v42  ;;  %v20519_v42 = vld [vmem:[%s28192_s1 + $0x26e0] ss:$40 sps:$4 sm:$0xff]  }
 0x64f   :  { %12744 = vmatpush1.bf16.msra.mxu0 %v20462_v43  ;;  %v20524_v43 = vld [vmem:[%s28192_s1 + $0x2234] ss:$40 sps:$4 sm:$0xff]  }
 0x650   :  { %12785 = vmatpush1.bf16.msra.mxu1 %v20465_v40  ;;  %12745 = vmatprep.subr.bf16.mxu0 %v20470_v41  ;;  %v20527_v40 = vld [vmem:[%s28192_s1 + $0x2734] ss:$40 sps:$4 sm:$0xff]   ;;  %v20522_v41 = vld [vmem:[%s28192_s1 + $0x2230] ss:$40 sps:$4 sm:$0xff]  }
 0x651   :  { %12786 = vmatprep.subr.bf16.mxu1 %v20473_v46  ;;  %v20525_v46 = vld [vmem:[%s28192_s1 + $0x2730] ss:$40 sps:$4 sm:$0xff]  }
 0x653   :  { %12746 = vmatpush1.bf16.msra.mxu0 %v20468_v4  ;;  %v20530_v4 = vld [vmem:[%s28192_s1 + $0x2284] ss:$40 sps:$4 sm:$0xff]  }
 0x654   :  { %12787 = vmatpush1.bf16.msra.mxu1 %v20471_v32  ;;  %12747 = vmatprep.subr.bf16.mxu0 %v20476_v10  ;;  %v20533_v32 = vld [vmem:[%s28192_s1 + $0x2784] ss:$40 sps:$4 sm:$0xff]   ;;  %v20528_v10 = vld [vmem:[%s28192_s1 + $0x2280] ss:$40 sps:$4 sm:$0xff]  }
 0x655   :  { %12788 = vmatprep.subr.bf16.mxu1 %v20479_v2  ;;  %v12443_v9 = vpop.f32.mrb[84].mxu0  ;;  %v20531_v2 = vld [vmem:[%s28192_s1 + $0x2780] ss:$40 sps:$4 sm:$0xff]  }
 0x656   :  { %v12484_v16 = vpop.f32.mrb[84].mxu1  ;;  %v12444_v18 = vadd.f32 %v12443_v9, %v26336_v62  ;;  %v12445_v24 = vpop.f32.mrb[85].mxu0  ;;  %v20542_v9 = vld [vmem:[%s28192_s1 + $0x2824] ss:$40 sps:$4 sm:$0xff]  }
 0x657   :  { %v12486_v25 = vpop.f32.mrb[85].mxu1  ;;  %v12446_v14 = vadd.f32 %v12445_v24, %v26344_v52  ;;  %v12447_v20 = vpop.f32.mrb[86].mxu0  ;;  %12748 = vmatpush1.bf16.msra.mxu0 %v20474_v8  ;;  %v20489_v52 = vld [vmem:[%s28192_s1 + $0x2550] ss:$40 sps:$4 sm:$0xff]   ;;  %v20536_v8 = vld [vmem:[%s28192_s1 + $0x22d4] ss:$40 sps:$4 sm:$0xff]  }
 0x658   :  { %v12488_v6 = vpop.f32.mrb[86].mxu1  ;;  %12789 = vmatpush1.bf16.msra.mxu1 %v20477_v3  ;;  %v26544_v7 = vadd.f32 %v12484_v16, %v12444_v18  ;;  %v12448_v15 = vpop.f32.mrb[87].mxu0  ;;  %12749 = vmatprep.subr.bf16.mxu0 %v20482_v63  ;;  %v20539_v3 = vld [vmem:[%s28192_s1 + $0x27d4] ss:$40 sps:$4 sm:$0xff]   ;;  %v20534_v63 = vld [vmem:[%s28192_s1 + $0x22d0] ss:$40 sps:$4 sm:$0xff]  }
 0x659   :  { %v12489_v62 = vpop.f32.mrb[87].mxu1  ;;  %12790 = vmatprep.subr.bf16.mxu1 %v20485_v5  ;;  %v26546_v19 = vadd.f32 %v12486_v25, %v12446_v14  ;;  %v20537_v5 = vld [vmem:[%s28192_s1 + $0x27d0] ss:$40 sps:$4 sm:$0xff]   ;;  %v20545_v16 = vld [vmem:[%s28192_s1 + $0x2d24] ss:$40 sps:$4 sm:$0xff]  }
 0x65a   :  { %v20548_v18 = vld [vmem:[%s28192_s1 + $0x2874] ss:$40 sps:$4 sm:$0xff]   ;;  %v20546_v25 = vld [vmem:[%s28192_s1 + $0x2870] ss:$40 sps:$4 sm:$0xff]   ;;  %v20555_v14 = vld [vmem:[%s28192_s1 + $0x2dc0] ss:$40 sps:$4 sm:$0xff]  }
 0x65b   :  { %12750 = vmatpush1.bf16.msra.mxu0 %v20480_v17  ;;  %v20540_v17 = vld [vmem:[%s28192_s1 + $0x2820] ss:$40 sps:$4 sm:$0xff]   ;;  %v20551_v24 = vld [vmem:[%s28192_s1 + $0x2d74] ss:$40 sps:$4 sm:$0xff]   ;;  %v20558_v15 = vld [vmem:[%s28192_s1 + $0x2910] ss:$40 sps:$4 sm:$0xff]  }
 0x65c   :  { %12791 = vmatpush1.bf16.msra.mxu1 %v20483_v12  ;;  %12751 = vmatprep.subr.bf16.mxu0 %v20488_v11  ;;  %v20543_v12 = vld [vmem:[%s28192_s1 + $0x2d20] ss:$40 sps:$4 sm:$0xff]   ;;  %v20549_v11 = vld [vmem:[%s28192_s1 + $0x2d70] ss:$40 sps:$4 sm:$0xff]   ;;  %v20560_v20 = vld [vmem:[%s28192_s1 + $0x2914] ss:$40 sps:$4 sm:$0xff]  }
 0x65d   :  { %12792 = vmatprep.subr.bf16.mxu1 %v20491_v13  ;;  %v20554_v13 = vld [vmem:[%s28192_s1 + $0x28c4] ss:$40 sps:$4 sm:$0xff]   ;;  %v20563_v6 = vld [vmem:[%s28192_s1 + $0x2e14] ss:$40 sps:$4 sm:$0xff]  }
 0x65e   :  { %v20569_v62 = vld [vmem:[%s28192_s1 + $0x2e64] ss:$40 sps:$4 sm:$0xff]  }
 0x65f   :  { %12752 = vmatpush1.bf16.msra.mxu0 %v20486_v36  ;;  %v20564_v36 = vld [vmem:[%s28192_s1 + $0x2960] ss:$40 sps:$4 sm:$0xff]  }
 0x660   :  { %12793 = vmatpush1.bf16.msra.mxu1 %v20489_v52  ;;  %12753 = vmatprep.subr.bf16.mxu0 %v20494_v37  ;;  %v20567_v52 = vld [vmem:[%s28192_s1 + $0x2e60] ss:$40 sps:$4 sm:$0xff]   ;;  %v20572_v37 = vld [vmem:[%s28192_s1 + $0x29b4] ss:$40 sps:$4 sm:$0xff]  }
 0x661   :  { %12794 = vmatprep.subr.bf16.mxu1 %v20497_v47  ;;  %v20575_v47 = vld [vmem:[%s28192_s1 + $0x2eb4] ss:$40 sps:$4 sm:$0xff]  }
 0x663   :  { %12754 = vmatpush1.bf16.msra.mxu0 %v20492_v51  ;;  %v20570_v51 = vld [vmem:[%s28192_s1 + $0x29b0] ss:$40 sps:$4 sm:$0xff]  }
 0x664   :  { %12795 = vmatpush1.bf16.msra.mxu1 %v20495_v21  ;;  %12755 = vmatprep.subr.bf16.mxu0 %v20500_v27  ;;  %v20573_v21 = vld [vmem:[%s28192_s1 + $0x2eb0] ss:$40 sps:$4 sm:$0xff]   ;;  %v20578_v27 = vld [vmem:[%s28192_s1 + $0x2a04] ss:$40 sps:$4 sm:$0xff]  }
 0x665   :  { %12796 = vmatprep.subr.bf16.mxu1 %v20503_v30  ;;  %v20581_v30 = vld [vmem:[%s28192_s1 + $0x2f04] ss:$40 sps:$4 sm:$0xff]  }
 0x667   :  { %12756 = vmatpush1.bf16.msra.mxu0 %v20498_v35 }
 0x668   :  { %12797 = vmatpush1.bf16.msra.mxu1 %v20501_v29  ;;  %12757 = vmatprep.subr.bf16.mxu0 %v20506_v31  ;;  %v20576_v31 = vld [vmem:[%s28192_s1 + $0x2a00] ss:$40 sps:$4 sm:$0xff]  }
 0x669   :  { %12798 = vmatprep.subr.bf16.mxu1 %v20509_v28  ;;  %v20579_v28 = vld [vmem:[%s28192_s1 + $0x2f00] ss:$40 sps:$4 sm:$0xff]  }
 0x66b   :  { %12758 = vmatpush1.bf16.msra.mxu0 %v20504_v57 }
 0x66c   :  { %12799 = vmatpush1.bf16.msra.mxu1 %v20507_v26  ;;  %12759 = vmatprep.subr.bf16.mxu0 %v20512_v44 }
 0x66d   :  { %12800 = vmatprep.subr.bf16.mxu1 %v20515_v50  ;;  %v20584_v50 = vld [vmem:[%s28192_s1 + $0x2a54] ss:$40 sps:$4 sm:$0xff]  }
 0x66f   :  { %12760 = vmatpush1.bf16.msra.mxu0 %v20510_v54  ;;  %v20587_v54 = vld [vmem:[%s28192_s1 + $0x2f54] ss:$40 sps:$4 sm:$0xff]  }
 0x670   :  { %12801 = vmatpush1.bf16.msra.mxu1 %v20513_v45  ;;  %12761 = vmatprep.subr.bf16.mxu0 %v20518_v38 }
 0x671   :  { %12802 = vmatprep.subr.bf16.mxu1 %v20521_v39 }
 0x673   :  { %12762 = vmatpush1.bf16.msra.mxu0 %v20516_v56 }
 0x674   :  { %12803 = vmatpush1.bf16.msra.mxu1 %v20519_v42  ;;  %12763 = vmatprep.subr.bf16.mxu0 %v20524_v43  ;;  %v20582_v43 = vld [vmem:[%s28192_s1 + $0x2a50] ss:$40 sps:$4 sm:$0xff]  }
 0x675   :  { %12804 = vmatprep.subr.bf16.mxu1 %v20527_v40  ;;  %v20585_v40 = vld [vmem:[%s28192_s1 + $0x2f50] ss:$40 sps:$4 sm:$0xff]  }
 0x677   :  { %12764 = vmatpush1.bf16.msra.mxu0 %v20522_v41  ;;  %v20590_v41 = vld [vmem:[%s28192_s1 + $0x2aa4] ss:$40 sps:$4 sm:$0xff]  }
 0x678   :  { %12805 = vmatpush1.bf16.msra.mxu1 %v20525_v46  ;;  %12765 = vmatprep.subr.bf16.mxu0 %v20530_v4  ;;  %v20593_v46 = vld [vmem:[%s28192_s1 + $0x2fa4] ss:$40 sps:$4 sm:$0xff]   ;;  %v20588_v4 = vld [vmem:[%s28192_s1 + $0x2aa0] ss:$40 sps:$4 sm:$0xff]  }
 0x679   :  { %12806 = vmatprep.subr.bf16.mxu1 %v20533_v32  ;;  %v20591_v32 = vld [vmem:[%s28192_s1 + $0x2fa0] ss:$40 sps:$4 sm:$0xff]  }
 0x67b   :  { %12766 = vmatpush1.bf16.msra.mxu0 %v20528_v10  ;;  %v20596_v10 = vld [vmem:[%s28192_s1 + $0x2af4] ss:$40 sps:$4 sm:$0xff]  }
 0x67c   :  { %12807 = vmatpush1.bf16.msra.mxu1 %v20531_v2  ;;  %12767 = vmatprep.subr.bf16.mxu0 %v20536_v8  ;;  %v20599_v2 = vld [vmem:[%s28192_s1 + $0x2ff4] ss:$40 sps:$4 sm:$0xff]   ;;  %v20594_v8 = vld [vmem:[%s28192_s1 + $0x2af0] ss:$40 sps:$4 sm:$0xff]  }
 0x67d   :  { %12808 = vmatprep.subr.bf16.mxu1 %v20539_v3  ;;  %v20597_v3 = vld [vmem:[%s28192_s1 + $0x2ff0] ss:$40 sps:$4 sm:$0xff]  }
 0x67f   :  { %12768 = vmatpush1.bf16.msra.mxu0 %v20534_v63  ;;  %v20602_v63 = vld [vmem:[%s28192_s1 + $0x2b44] ss:$40 sps:$4 sm:$0xff]  }
 0x680   :  { %12809 = vmatpush1.bf16.msra.mxu1 %v20537_v5  ;;  %12819 = vmatprep.subr.bf16.mxu0 %v20542_v9  ;;  %v20605_v5 = vld [vmem:[%s28192_s1 + $0x3044] ss:$40 sps:$4 sm:$0xff]   ;;  %v20600_v9 = vld [vmem:[%s28192_s1 + $0x2b40] ss:$40 sps:$4 sm:$0xff]  }
 0x681   :  { %12860 = vmatprep.subr.bf16.mxu1 %v20545_v16  ;;  %v20603_v16 = vld [vmem:[%s28192_s1 + $0x3040] ss:$40 sps:$4 sm:$0xff]  }
 0x682   :  { %12770 = vmatmul.mubr.bf16.vlgmr.msra.gmra.mrb[100].mxu0 %v22168_v59  ;;  %v20557_v59 = vld [vmem:[%s28192_s1 + $0x2dc4] ss:$40 sps:$4 sm:$0xff]  }
 0x683   :  { %12811 = vmatmul.mubr.bf16.vlgmr.msra.gmra.mrb[100].mxu1 %v22172_v60  ;;  %12820 = vmatpush1.bf16.msra.mxu0 %v20540_v17  ;;  %v20552_v60 = vld [vmem:[%s28192_s1 + $0x28c0] ss:$40 sps:$4 sm:$0xff]   ;;  %v20608_v17 = vld [vmem:[%s28192_s1 + $0x2b94] ss:$40 sps:$4 sm:$0xff]  }
 0x684   :  { %12861 = vmatpush1.bf16.msra.mxu1 %v20543_v12  ;;  %12821 = vmatprep.subr.bf16.mxu0 %v20548_v18  ;;  %v20611_v12 = vld [vmem:[%s28192_s1 + $0x3094] ss:$40 sps:$4 sm:$0xff]   ;;  %v20606_v18 = vld [vmem:[%s28192_s1 + $0x2b90] ss:$40 sps:$4 sm:$0xff]  }
 0x685   :  { %12862 = vmatprep.subr.bf16.mxu1 %v20551_v24  ;;  %12851 = vmatprep.mubr.bf16.mxu0 %v22193_v0  ;;  %v20561_v0 = vld [vmem:[%s28192_s1 + $0x2e10] ss:$40 sps:$4 sm:$0xff]  }
 0x686   :  { %12892 = vmatprep.mubr.bf16.mxu1 %v22197_v1  ;;  %v20566_v1 = vld [vmem:[%s28192_s1 + $0x2964] ss:$40 sps:$4 sm:$0xff]   ;;  %v20609_v24 = vld [vmem:[%s28192_s1 + $0x3090] ss:$40 sps:$4 sm:$0xff]  }
 0x687   :  { %12822 = vmatpush1.bf16.msra.mxu0 %v20546_v25  ;;  %v12944_v25 = vlaneseq }
 0x688   :  { %12863 = vmatpush1.bf16.msra.mxu1 %v20549_v11  ;;  %12823 = vmatprep.subr.bf16.mxu0 %v20554_v13  ;;  %v20614_v11 = vld [vmem:[%s28192_s1 + $0x2be4] ss:$40 sps:$4 sm:$0xff]  }
 0x689   :  { %12864 = vmatprep.subr.bf16.mxu1 %v20557_v59  ;;  %v20617_v13 = vld [vmem:[%s28192_s1 + $0x30e4] ss:$40 sps:$4 sm:$0xff]   ;;  %v20612_v59 = vld [vmem:[%s28192_s1 + $0x2be0] ss:$40 sps:$4 sm:$0xff]  }
 0x68b   :  { %12824 = vmatpush1.bf16.msra.mxu0 %v20552_v60  ;;  %v20615_v60 = vld [vmem:[%s28192_s1 + $0x30e0] ss:$40 sps:$4 sm:$0xff]  }
 0x68c   :  { %12865 = vmatpush1.bf16.msra.mxu1 %v20555_v14  ;;  %12825 = vmatprep.subr.bf16.mxu0 %v20560_v20  ;;  %v26814_v14 = vshrl.u32 %v12944_v25, 7  ;;  %v20620_v20 = vld [vmem:[%s28192_s1 + $0x2c34] ss:$40 sps:$4 sm:$0xff]  }
 0x68d   :  { %12866 = vmatprep.subr.bf16.mxu1 %v20563_v6  ;;  %v20623_v6 = vld [vmem:[%s28192_s1 + $0x3134] ss:$40 sps:$4 sm:$0xff]  }
 0x68f   :  { %12826 = vmatpush1.bf16.msra.mxu0 %v20558_v15  ;;  %v26825_v15 = vld [vmem:[%s28195_s2] sm:$0xff] }
 0x690   :  { %12867 = vmatpush1.bf16.msra.mxu1 %v20561_v0  ;;  %12827 = vmatprep.subr.bf16.mxu0 %v20566_v1  ;;  %v20618_v0 = vld [vmem:[%s28192_s1 + $0x2c30] ss:$40 sps:$4 sm:$0xff]  }
 0x691   :  { %12868 = vmatprep.subr.bf16.mxu1 %v20569_v62  ;;  %v20621_v1 = vld [vmem:[%s28192_s1 + $0x3130] ss:$40 sps:$4 sm:$0xff]   ;;  %v26834_v62 = vsub.s32 1, %v26814_v14 }
 0x693   :  { %12828 = vmatpush1.bf16.msra.mxu0 %v20564_v36  ;;  %v20626_v36 = vld [vmem:[%s28192_s1 + $0x2c84] ss:$40 sps:$4 sm:$0xff]  }
 0x694   :  { %12869 = vmatpush1.bf16.msra.mxu1 %v20567_v52  ;;  %12829 = vmatprep.subr.bf16.mxu0 %v20572_v37  ;;  %v20629_v52 = vld [vmem:[%s28192_s1 + $0x3184] ss:$40 sps:$4 sm:$0xff]   ;;  %v20624_v37 = vld [vmem:[%s28192_s1 + $0x2c80] ss:$40 sps:$4 sm:$0xff]  }
 0x695   :  { %12870 = vmatprep.subr.bf16.mxu1 %v20575_v47  ;;  %v12525_v35 = vpop.f32.mrb[88].mxu0  ;;  %v20627_v47 = vld [vmem:[%s28192_s1 + $0x3180] ss:$40 sps:$4 sm:$0xff]  }
 0x696   :  { %v12566_v29 = vpop.f32.mrb[88].mxu1  ;;  %v12527_v26 = vpop.f32.mrb[89].mxu0 }
 0x697   :  { %v26738_v57 = vadd.f32 %v12566_v29, %v12525_v35  ;;  %v12568_v44 = vpop.f32.mrb[89].mxu1  ;;  %v12529_v38 = vpop.f32.mrb[90].mxu0  ;;  %12830 = vmatpush1.bf16.msra.mxu0 %v20570_v51  ;;  %v12951_v51 = vrot.slane %v26825_v15, %v26834_v62  ;;  %v20633_v35 = vld [vmem:[%s28192_s1 + $0x31d0] ss:$40 sps:$4 sm:$0xff]  }
 0x698   :  { %v26746_v45 = vadd.f32 %v12568_v44, %v12527_v26  ;;  %v12570_v39 = vpop.f32.mrb[90].mxu1  ;;  %12871 = vmatpush1.bf16.msra.mxu1 %v20573_v21  ;;  %v12530_v56 = vpop.f32.mrb[91].mxu0  ;;  %12831 = vmatprep.subr.bf16.mxu0 %v20578_v27  ;;  %v20632_v21 = vld [vmem:[%s28192_s1 + $0x2cd4] ss:$40 sps:$4 sm:$0xff]   ;;  %v20636_v26 = vld [vmem:[%s28192_s1 + $0x3220] ss:$40 sps:$4 sm:$0xff]  }
 0x699   :  { %v12571_v42 = vpop.f32.mrb[91].mxu1  ;;  %12872 = vmatprep.subr.bf16.mxu1 %v20581_v30  ;;  %v20635_v27 = vld [vmem:[%s28192_s1 + $0x31d4] ss:$40 sps:$4 sm:$0xff]   ;;  %v20630_v30 = vld [vmem:[%s28192_s1 + $0x2cd0] ss:$40 sps:$4 sm:$0xff]   ;;  %v12985_v29 = vadd.f32 %v12951_v51, %v23306_v55 }
 0x69a   :  { %v20639_v55 = vld [vmem:[%s28194_s3] ss:$16 sps:$4 sm:$0xff]   ;;  %v20650_v42 = vld [vmem:[%s28192_s1 + $0x32c4] ss:$40 sps:$4 sm:$0xff]  }
 0x69b   :  { %12832 = vmatpush1.bf16.msra.mxu0 %v20576_v31  ;;  %v20638_v31 = vld [vmem:[%s28192_s1 + $0x3224] ss:$40 sps:$4 sm:$0xff]   ;;  %v12993_v44 = vmax.f32 %v12985_v29, 0.0  ;;  %v20642_v39 = vld [vmem:[%s28192_s1 + $0x3270] ss:$40 sps:$4 sm:$0xff]  }
 0x69c   :  { %12873 = vmatpush1.bf16.msra.mxu1 %v20579_v28  ;;  %12833 = vmatprep.subr.bf16.mxu0 %v20584_v50  ;;  %v20641_v28 = vld [vmem:[%s28194_s3 + $0x4] ss:$16 sps:$4 sm:$0xff]   ;;  %v20645_v56 = vld [vmem:[%s28194_s3 + $0x20] ss:$16 sps:$4 sm:$0xff]  }
 0x69d   :  { %12874 = vmatprep.subr.bf16.mxu1 %v20587_v54  ;;  %v20644_v50 = vld [vmem:[%s28192_s1 + $0x3274] ss:$40 sps:$4 sm:$0xff]   ;;  %v26881_v38 = vpack.c.bf16 %v12993_v44, %v12993_v44  ;;  %v20690_v29 = vld [vmem:[%s28192_s1 + $0x34f0] ss:$40 sps:$4 sm:$0xff]  }
 0x69e   :  { %v20647_v54 = vld [vmem:[%s28194_s3 + $0x24] ss:$16 sps:$4 sm:$0xff]   ;;  %v20699_v44 = vld [vmem:[%s28194_s3 + $0x140] ss:$16 sps:$4 sm:$0xff]  }
 0x69f   :  { %12834 = vmatpush1.bf16.msra.mxu0 %v20582_v43  ;;  %v20651_v43 = vld [vmem:[%s28194_s3 + $0x40] ss:$16 sps:$4 sm:$0xff]   ;;  %v20689_v51 = vld [vmem:[%s28194_s3 + $0x104] ss:$16 sps:$4 sm:$0xff]  }
 0x6a0   :  { %12875 = vmatpush1.bf16.msra.mxu1 %v20585_v40  ;;  %12835 = vmatprep.subr.bf16.mxu0 %v20590_v41  ;;  %v20656_v40 = vld [vmem:[%s28192_s1 + $0x3314] ss:$40 sps:$4 sm:$0xff]   ;;  %v20654_v41 = vld [vmem:[%s28192_s1 + $0x3310] ss:$40 sps:$4 sm:$0xff]  }
 0x6a1   :  { %12876 = vmatprep.subr.bf16.mxu1 %v20593_v46  ;;  %v20657_v46 = vld [vmem:[%s28194_s3 + $0x60] ss:$16 sps:$4 sm:$0xff]  }
 0x6a3   :  { %12836 = vmatpush1.bf16.msra.mxu0 %v20588_v4  ;;  %v20662_v4 = vld [vmem:[%s28192_s1 + $0x3364] ss:$40 sps:$4 sm:$0xff]  }
 0x6a4   :  { %12877 = vmatpush1.bf16.msra.mxu1 %v20591_v32  ;;  %12837 = vmatprep.subr.bf16.mxu0 %v20596_v10  ;;  %v20665_v32 = vld [vmem:[%s28194_s3 + $0x84] ss:$16 sps:$4 sm:$0xff]   ;;  %v20660_v10 = vld [vmem:[%s28192_s1 + $0x3360] ss:$40 sps:$4 sm:$0xff]  }
 0x6a5   :  { %12878 = vmatprep.subr.bf16.mxu1 %v20599_v2  ;;  %v20663_v2 = vld [vmem:[%s28194_s3 + $0x80] ss:$16 sps:$4 sm:$0xff]  }
 0x6a7   :  { %12838 = vmatpush1.bf16.msra.mxu0 %v20594_v8  ;;  %v20668_v8 = vld [vmem:[%s28192_s1 + $0x33b4] ss:$40 sps:$4 sm:$0xff]  }
 0x6a8   :  { %12879 = vmatpush1.bf16.msra.mxu1 %v20597_v3  ;;  %12839 = vmatprep.subr.bf16.mxu0 %v20602_v63  ;;  %v20671_v3 = vld [vmem:[%s28194_s3 + $0xa4] ss:$16 sps:$4 sm:$0xff]   ;;  %v20666_v63 = vld [vmem:[%s28192_s1 + $0x33b0] ss:$40 sps:$4 sm:$0xff]  }
 0x6a9   :  { %12880 = vmatprep.subr.bf16.mxu1 %v20605_v5  ;;  %v20669_v5 = vld [vmem:[%s28194_s3 + $0xa0] ss:$16 sps:$4 sm:$0xff]  }
 0x6ab   :  { %12840 = vmatpush1.bf16.msra.mxu0 %v20600_v9  ;;  %v20674_v9 = vld [vmem:[%s28192_s1 + $0x3404] ss:$40 sps:$4 sm:$0xff]  }
 0x6ac   :  { %12881 = vmatpush1.bf16.msra.mxu1 %v20603_v16  ;;  %12841 = vmatprep.subr.bf16.mxu0 %v20608_v17  ;;  %v20677_v16 = vld [vmem:[%s28194_s3 + $0xc4] ss:$16 sps:$4 sm:$0xff]  }
 0x6ad   :  { %12882 = vmatprep.subr.bf16.mxu1 %v20611_v12 }
 0x6af   :  { %12842 = vmatpush1.bf16.msra.mxu0 %v20606_v18 }
 0x6b0   :  { %12883 = vmatpush1.bf16.msra.mxu1 %v20609_v24  ;;  %12843 = vmatprep.subr.bf16.mxu0 %v20614_v11 }
 0x6b1   :  { %12884 = vmatprep.subr.bf16.mxu1 %v20617_v13 }
 0x6b3   :  { %12844 = vmatpush1.bf16.msra.mxu0 %v20612_v59 }
 0x6b4   :  { %12885 = vmatpush1.bf16.msra.mxu1 %v20615_v60  ;;  %12845 = vmatprep.subr.bf16.mxu0 %v20620_v20  ;;  %v20672_v60 = vld [vmem:[%s28192_s1 + $0x3400] ss:$40 sps:$4 sm:$0xff]  }
 0x6b5   :  { %12886 = vmatprep.subr.bf16.mxu1 %v20623_v6  ;;  %v20675_v20 = vld [vmem:[%s28194_s3 + $0xc0] ss:$16 sps:$4 sm:$0xff]  }
 0x6b7   :  { %12846 = vmatpush1.bf16.msra.mxu0 %v20618_v0 }
 0x6b8   :  { %12887 = vmatpush1.bf16.msra.mxu1 %v20621_v1  ;;  %12847 = vmatprep.subr.bf16.mxu0 %v20626_v36  ;;  %v20683_v1 = vld [vmem:[%s28194_s3 + $0xe4] ss:$16 sps:$4 sm:$0xff]  }
 0x6b9   :  { %12888 = vmatprep.subr.bf16.mxu1 %v20629_v52  ;;  %v20678_v52 = vld [vmem:[%s28192_s1 + $0x3450] ss:$40 sps:$4 sm:$0xff]  }
 0x6bb   :  { %12848 = vmatpush1.bf16.msra.mxu0 %v20624_v37  ;;  %v20681_v37 = vld [vmem:[%s28194_s3 + $0xe0] ss:$16 sps:$4 sm:$0xff]  }
 0x6bc   :  { %12889 = vmatpush1.bf16.msra.mxu1 %v20627_v47  ;;  %12849 = vmatprep.subr.bf16.mxu0 %v20632_v21  ;;  %v20686_v47 = vld [vmem:[%s28192_s1 + $0x34a4] ss:$40 sps:$4 sm:$0xff]   ;;  %v20684_v21 = vld [vmem:[%s28192_s1 + $0x34a0] ss:$40 sps:$4 sm:$0xff]  }
 0x6bd   :  { %12890 = vmatprep.subr.bf16.mxu1 %v20635_v27  ;;  %v20687_v27 = vld [vmem:[%s28194_s3 + $0x100] ss:$16 sps:$4 sm:$0xff]  }
 0x6bf   :  { %12850 = vmatpush1.bf16.msra.mxu0 %v20630_v30  ;;  %v20692_v30 = vld [vmem:[%s28192_s1 + $0x34f4] ss:$40 sps:$4 sm:$0xff]  }
 0x6c0   :  { %12891 = vmatpush1.bf16.msra.mxu1 %v20633_v35  ;;  %12901 = vmatprep.subr.bf16.mxu0 %v20638_v31  ;;  %v20695_v35 = vld [vmem:[%s28194_s3 + $0x124] ss:$16 sps:$4 sm:$0xff]   ;;  %v20693_v31 = vld [vmem:[%s28194_s3 + $0x120] ss:$16 sps:$4 sm:$0xff]  }
 0x6c1   :  { %14566 = vmatprep.subr.bf16.mxu1 %v20641_v28  ;;  %v20698_v28 = vld [vmem:[%s28192_s1 + $0x3544] ss:$40 sps:$4 sm:$0xff]  }
 0x6c2   :  { %12852 = vmatmul.mubr.bf16.vlgmr.msra.gmra.mrb[104].mxu0 %v22400_v48  ;;  %v20653_v48 = vld [vmem:[%s28194_s3 + $0x44] ss:$16 sps:$4 sm:$0xff]  }
 0x6c3   :  { %12893 = vmatmul.mubr.bf16.vlgmr.msra.gmra.mrb[104].mxu1 %v22404_v49  ;;  %12902 = vmatpush1.bf16.msra.mxu0 %v20636_v26  ;;  %v20648_v49 = vld [vmem:[%s28192_s1 + $0x32c0] ss:$40 sps:$4 sm:$0xff]   ;;  %v20701_v26 = vld [vmem:[%s28194_s3 + $0x144] ss:$16 sps:$4 sm:$0xff]  }
 0x6c4   :  { %14567 = vmatpush1.bf16.msra.mxu1 %v20639_v55  ;;  %14598 = vmatprep.mubr.bf16.mxu1 %v26881_v38  ;;  %v20696_v55 = vld [vmem:[%s28192_s1 + $0x3540] ss:$40 sps:$4 sm:$0xff]  }
 0x6c5   :  { %12903 = vmatprep.subr.bf16.mxu0 %v20644_v50  ;;  %14568 = vmatprep.subr.bf16.mxu1 %v20647_v54  ;;  %v20704_v50 = vld [vmem:[%s28192_s1 + $0x3594] ss:$40 sps:$4 sm:$0xff]  }
 0x6c6   :  { %12933 = vmatprep.mubr.bf16.mxu0 %v22414_v58  ;;  %v20659_v58 = vld [vmem:[%s28194_s3 + $0x64] ss:$16 sps:$4 sm:$0xff]  }
 0x6c7   :  { %12904 = vmatpush1.bf16.msra.mxu0 %v20642_v39  ;;  %v20707_v54 = vld [vmem:[%s28194_s3 + $0x164] ss:$16 sps:$4 sm:$0xff]   ;;  %v20702_v39 = vld [vmem:[%s28192_s1 + $0x3590] ss:$40 sps:$4 sm:$0xff]  }
 0x6c8   :  { %14569 = vmatpush1.bf16.msra.mxu1 %v20645_v56  ;;  %12905 = vmatprep.subr.bf16.mxu0 %v20650_v42  ;;  %v20705_v56 = vld [vmem:[%s28194_s3 + $0x160] ss:$16 sps:$4 sm:$0xff]   ;;  %v20710_v42 = vld [vmem:[%s28192_s1 + $0x35e4] ss:$40 sps:$4 sm:$0xff]  }
 0x6c9   :  { %14570 = vmatprep.subr.bf16.mxu1 %v20653_v48  ;;  %v20713_v48 = vld [vmem:[%s28194_s3 + $0x184] ss:$16 sps:$4 sm:$0xff]  }
 0x6cb   :  { %12906 = vmatpush1.bf16.msra.mxu0 %v20648_v49  ;;  %v20708_v49 = vld [vmem:[%s28192_s1 + $0x35e0] ss:$40 sps:$4 sm:$0xff]  }
 0x6cc   :  { %14571 = vmatpush1.bf16.msra.mxu1 %v20651_v43  ;;  %12907 = vmatprep.subr.bf16.mxu0 %v20656_v40  ;;  %v20711_v43 = vld [vmem:[%s28194_s3 + $0x180] ss:$16 sps:$4 sm:$0xff]   ;;  %v27032_v40 = vsub.s32 0, %v26814_v14 }
 0x6cd   :  { %14572 = vmatprep.subr.bf16.mxu1 %v20659_v58  ;;  %v20716_v58 = vld [vmem:[%s28192_s1 + $0x3634] ss:$40 sps:$4 sm:$0xff]  }
 0x6cf   :  { %12908 = vmatpush1.bf16.msra.mxu0 %v20654_v41  ;;  %v20719_v41 = vld [vmem:[%s28194_s3 + $0x1a4] ss:$16 sps:$4 sm:$0xff]  }
 0x6d0   :  { %14573 = vmatpush1.bf16.msra.mxu1 %v20657_v46  ;;  %12909 = vmatprep.subr.bf16.mxu0 %v20662_v4  ;;  %v12958_v46 = vsub.s32 3, %v26814_v14  ;;  %v20714_v4 = vld [vmem:[%s28192_s1 + $0x3630] ss:$40 sps:$4 sm:$0xff]  }
 0x6d1   :  { %14574 = vmatprep.subr.bf16.mxu1 %v20665_v32  ;;  %v20717_v32 = vld [vmem:[%s28194_s3 + $0x1a0] ss:$16 sps:$4 sm:$0xff]  }
 0x6d3   :  { %12910 = vmatpush1.bf16.msra.mxu0 %v20660_v10  ;;  %v12947_v10 = vrot.slane %v26825_v15, %v27032_v40 }
 0x6d4   :  { %14575 = vmatpush1.bf16.msra.mxu1 %v20663_v2  ;;  %12911 = vmatprep.subr.bf16.mxu0 %v20668_v8  ;;  %v20722_v2 = vld [vmem:[%s28192_s1 + $0x3684] ss:$40 sps:$4 sm:$0xff]  }
 0x6d5   :  { %14576 = vmatprep.subr.bf16.mxu1 %v20671_v3  ;;  %v12607_v17 = vpop.f32.mrb[92].mxu0  ;;  %v20725_v8 = vld [vmem:[%s28194_s3 + $0x1c4] ss:$16 sps:$4 sm:$0xff]   ;;  %v12959_v3 = vrot.slane %v26825_v15, %v12958_v46 }
 0x6d6   :  { %v12648_v12 = vpop.f32.mrb[92].mxu1  ;;  %v12608_v18 = vadd.f32 %v12607_v17, %v26738_v57  ;;  %v12609_v24 = vpop.f32.mrb[93].mxu0  ;;  %v20731_v17 = vld [vmem:[%s28194_s3 + $0x1e4] ss:$16 sps:$4 sm:$0xff]  }
 0x6d7   :  { %v12650_v25 = vpop.f32.mrb[93].mxu1  ;;  %v12610_v11 = vadd.f32 %v12609_v24, %v26746_v45  ;;  %v12611_v13 = vpop.f32.mrb[94].mxu0  ;;  %12912 = vmatpush1.bf16.msra.mxu0 %v20666_v63  ;;  %v20680_v45 = vld [vmem:[%s28192_s1 + $0x3454] ss:$40 sps:$4 sm:$0xff]   ;;  %v20720_v63 = vld [vmem:[%s28192_s1 + $0x3680] ss:$40 sps:$4 sm:$0xff]  }
 0x6d8   :  { %v12652_v59 = vpop.f32.mrb[94].mxu1  ;;  %14577 = vmatpush1.bf16.msra.mxu1 %v20669_v5  ;;  %v26955_v6 = vadd.f32 %v12648_v12, %v12608_v18  ;;  %v12612_v0 = vpop.f32.mrb[95].mxu0  ;;  %12913 = vmatprep.subr.bf16.mxu0 %v20674_v9  ;;  %v20723_v5 = vld [vmem:[%s28194_s3 + $0x1c0] ss:$16 sps:$4 sm:$0xff]   ;;  %v12984_v9 = vadd.f32 %v12947_v10, %v23301_v61  ;;  %v12987_v12 = vadd.f32 %v12959_v3, %v24322_v53  ;;  %v20737_v53 = vld [vmem:[%s28194_s3 + $0xc] ss:$16 sps:$4 sm:$0xff]  }
 0x6d9   :  { %v12653_v57 = vpop.f32.mrb[95].mxu1  ;;  %14578 = vmatprep.subr.bf16.mxu1 %v20677_v16  ;;  %v26963_v36 = vadd.f32 %v12650_v25, %v12610_v11  ;;  %v20728_v16 = vld [vmem:[%s28192_s1 + $0x36d4] ss:$40 sps:$4 sm:$0xff]   ;;  %v20726_v18 = vld [vmem:[%s28192_s1 + $0x36d0] ss:$40 sps:$4 sm:$0xff]  }
 0x6da   :  { %v20729_v61 = vld [vmem:[%s28194_s3 + $0x1e0] ss:$16 sps:$4 sm:$0xff]   ;;  %v12992_v24 = vmax.f32 %v12984_v9, 0.0  ;;  %v20734_v25 = vld [vmem:[%s28194_s3 + $0x204] ss:$16 sps:$4 sm:$0xff]   ;;  %v12995_v11 = vmax.f32 %v12987_v12, 0.0 }
 0x6db   :  { %12914 = vmatpush1.bf16.msra.mxu0 %v20672_v60  ;;  %v20732_v13 = vld [vmem:[%s28194_s3 + $0x200] ss:$16 sps:$4 sm:$0xff]   ;;  %v20735_v60 = vld [vmem:[%s28194_s3 + $0x8] ss:$16 sps:$4 sm:$0xff]   ;;  %v20740_v0 = vld [vmem:[%s28194_s3 + $0x224] ss:$16 sps:$4 sm:$0xff]  }
 0x6dc   :  { %14579 = vmatpush1.bf16.msra.mxu1 %v20675_v20  ;;  %12915 = vmatprep.subr.bf16.mxu0 %v20680_v45  ;;  %v27087_v59 = vpack.c.bf16 %v12992_v24, %v12992_v24  ;;  %v27092_v20 = vpack.c.bf16 %v12995_v11, %v12995_v11  ;;  %v20743_v57 = vld [vmem:[%s28194_s3 + $0x2c] ss:$16 sps:$4 sm:$0xff]   ;;  %v20738_v45 = vld [vmem:[%s28194_s3 + $0x220] ss:$16 sps:$4 sm:$0xff]   ;;  %v20782_v9 = vld [vmem:[%s28194_s3 + $0x304] ss:$16 sps:$4 sm:$0xff]  }
 0x6dd   :  { %14580 = vmatprep.subr.bf16.mxu1 %v20683_v1  ;;  %v20741_v1 = vld [vmem:[%s28194_s3 + $0x28] ss:$16 sps:$4 sm:$0xff]   ;;  %v20779_v3 = vld [vmem:[%s28194_s3 + $0xec] ss:$16 sps:$4 sm:$0xff]   ;;  %v20786_v24 = vld [vmem:[%s28194_s3 + $0x320] ss:$16 sps:$4 sm:$0xff]  }
 0x6de   :  { %v20783_v12 = vld [vmem:[%s28194_s3 + $0x108] ss:$16 sps:$4 sm:$0xff]   ;;  %v20797_v11 = vld [vmem:[%s28194_s3 + $0x14c] ss:$16 sps:$4 sm:$0xff]  }
 0x6df   :  { %12916 = vmatpush1.bf16.msra.mxu0 %v20678_v52  ;;  %v20749_v52 = vld [vmem:[%s28194_s3 + $0x4c] ss:$16 sps:$4 sm:$0xff]  }
 0x6e0   :  { %14581 = vmatpush1.bf16.msra.mxu1 %v20681_v37  ;;  %12917 = vmatprep.subr.bf16.mxu0 %v20686_v47  ;;  %v20744_v37 = vld [vmem:[%s28194_s3 + $0x240] ss:$16 sps:$4 sm:$0xff]   ;;  %v20752_v47 = vld [vmem:[%s28194_s3 + $0x264] ss:$16 sps:$4 sm:$0xff]  }
 0x6e1   :  { %14582 = vmatprep.subr.bf16.mxu1 %v20689_v51  ;;  %v20755_v51 = vld [vmem:[%s28194_s3 + $0x6c] ss:$16 sps:$4 sm:$0xff]  }
 0x6e3   :  { %12918 = vmatpush1.bf16.msra.mxu0 %v20684_v21  ;;  %v20750_v21 = vld [vmem:[%s28194_s3 + $0x260] ss:$16 sps:$4 sm:$0xff]  }
 0x6e4   :  { %14583 = vmatpush1.bf16.msra.mxu1 %v20687_v27  ;;  %12919 = vmatprep.subr.bf16.mxu0 %v20692_v30  ;;  %v20753_v27 = vld [vmem:[%s28194_s3 + $0x68] ss:$16 sps:$4 sm:$0xff]   ;;  %v20758_v30 = vld [vmem:[%s28194_s3 + $0x284] ss:$16 sps:$4 sm:$0xff]  }
 0x6e5   :  { %14584 = vmatprep.subr.bf16.mxu1 %v20695_v35  ;;  %v20761_v35 = vld [vmem:[%s28194_s3 + $0x8c] ss:$16 sps:$4 sm:$0xff]  }
 0x6e7   :  { %12920 = vmatpush1.bf16.msra.mxu0 %v20690_v29  ;;  %v20756_v29 = vld [vmem:[%s28194_s3 + $0x280] ss:$16 sps:$4 sm:$0xff]  }
 0x6e8   :  { %14585 = vmatpush1.bf16.msra.mxu1 %v20693_v31  ;;  %12921 = vmatprep.subr.bf16.mxu0 %v20698_v28  ;;  %v20759_v31 = vld [vmem:[%s28194_s3 + $0x88] ss:$16 sps:$4 sm:$0xff]   ;;  %v20764_v28 = vld [vmem:[%s28194_s3 + $0x2a4] ss:$16 sps:$4 sm:$0xff]  }
 0x6e9   :  { %14586 = vmatprep.subr.bf16.mxu1 %v20701_v26  ;;  %v20767_v26 = vld [vmem:[%s28194_s3 + $0xac] ss:$16 sps:$4 sm:$0xff]  }
 0x6eb   :  { %12922 = vmatpush1.bf16.msra.mxu0 %v20696_v55  ;;  %v20762_v55 = vld [vmem:[%s28194_s3 + $0x2a0] ss:$16 sps:$4 sm:$0xff]  }
 0x6ec   :  { %14587 = vmatpush1.bf16.msra.mxu1 %v20699_v44  ;;  %12923 = vmatprep.subr.bf16.mxu0 %v20704_v50  ;;  %v20765_v44 = vld [vmem:[%s28194_s3 + $0xa8] ss:$16 sps:$4 sm:$0xff]   ;;  %v20770_v50 = vld [vmem:[%s28194_s3 + $0x2c4] ss:$16 sps:$4 sm:$0xff]  }
 0x6ed   :  { %14588 = vmatprep.subr.bf16.mxu1 %v20707_v54 }
 0x6ef   :  { %12924 = vmatpush1.bf16.msra.mxu0 %v20702_v39 }
 0x6f0   :  { %14589 = vmatpush1.bf16.msra.mxu1 %v20705_v56  ;;  %12925 = vmatprep.subr.bf16.mxu0 %v20710_v42  ;;  %v20773_v56 = vld [vmem:[%s28194_s3 + $0xcc] ss:$16 sps:$4 sm:$0xff]  }
 0x6f1   :  { %14590 = vmatprep.subr.bf16.mxu1 %v20713_v48 }
 0x6f3   :  { %12926 = vmatpush1.bf16.msra.mxu0 %v20708_v49 }
 0x6f4   :  { %14591 = vmatpush1.bf16.msra.mxu1 %v20711_v43  ;;  %12927 = vmatprep.subr.bf16.mxu0 %v20716_v58 }
 0x6f5   :  { %14592 = vmatprep.subr.bf16.mxu1 %v20719_v41 }
 0x6f7   :  { %12928 = vmatpush1.bf16.msra.mxu0 %v20714_v4  ;;  %v20768_v4 = vld [vmem:[%s28194_s3 + $0x2c0] ss:$16 sps:$4 sm:$0xff]  }
 0x6f8   :  { %14593 = vmatpush1.bf16.msra.mxu1 %v20717_v32  ;;  %12929 = vmatprep.subr.bf16.mxu0 %v20722_v2 }
 0x6f9   :  { %14594 = vmatprep.subr.bf16.mxu1 %v20725_v8 }
 0x6fb   :  { %12930 = vmatpush1.bf16.msra.mxu0 %v20720_v63  ;;  %v20774_v63 = vld [vmem:[%s28194_s3 + $0x2e0] ss:$16 sps:$4 sm:$0xff]  }
 0x6fc   :  { %14595 = vmatpush1.bf16.msra.mxu1 %v20723_v5  ;;  %12931 = vmatprep.subr.bf16.mxu0 %v20728_v16  ;;  %v20777_v5 = vld [vmem:[%s28194_s3 + $0xe8] ss:$16 sps:$4 sm:$0xff]   ;;  %v20785_v16 = vld [vmem:[%s28194_s3 + $0x10c] ss:$16 sps:$4 sm:$0xff]  }
 0x6fd   :  { %14596 = vmatprep.subr.bf16.mxu1 %v20731_v17  ;;  %v20780_v17 = vld [vmem:[%s28194_s3 + $0x300] ss:$16 sps:$4 sm:$0xff]  }
 0x6ff   :  { %12932 = vmatpush1.bf16.msra.mxu0 %v20726_v18  ;;  %v20788_v18 = vld [vmem:[%s28194_s3 + $0x324] ss:$16 sps:$4 sm:$0xff]  }
 0x700   :  { %14597 = vmatpush1.bf16.msra.mxu1 %v20729_v61  ;;  %14730 = vmatprep.subr.bf16.mxu0 %v20737_v53  ;;  %v20791_v61 = vld [vmem:[%s28194_s3 + $0x12c] ss:$16 sps:$4 sm:$0xff]   ;;  %v20794_v53 = vld [vmem:[%s28194_s3 + $0x344] ss:$16 sps:$4 sm:$0xff]  }
 0x701   :  { %14607 = vmatprep.subr.bf16.mxu1 %v20734_v25  ;;  %v20789_v25 = vld [vmem:[%s28194_s3 + $0x128] ss:$16 sps:$4 sm:$0xff]  }
 0x702   :  { %12934 = vmatmul.mubr.bf16.vlgmr.msra.gmra.mrb[108].mxu0 %v22614_v33  ;;  %v20746_v33 = vld [vmem:[%s28194_s3 + $0x244] ss:$16 sps:$4 sm:$0xff]  }
 0x703   :  { %14599 = vmatmul.mubr.bf16.vlgmr.msra.gmra.mrb[108].mxu1 %v27087_v59  ;;  %14731 = vmatpush1.bf16.msra.mxu0 %v20735_v60  ;;  %v20795_v60 = vld [vmem:[%s28194_s3 + $0x148] ss:$16 sps:$4 sm:$0xff]  }
 0x704   :  { %14608 = vmatpush1.bf16.msra.mxu1 %v20732_v13  ;;  %14639 = vmatprep.mubr.bf16.mxu1 %v27092_v20  ;;  %v20792_v13 = vld [vmem:[%s28194_s3 + $0x340] ss:$16 sps:$4 sm:$0xff]  }
 0x705   :  { %14762 = vmatprep.mubr.bf16.mxu0 %v26881_v38  ;;  %14609 = vmatprep.subr.bf16.mxu1 %v20740_v0  ;;  %v20747_v38 = vld [vmem:[%s28194_s3 + $0x48] ss:$16 sps:$4 sm:$0xff]   ;;  %v20800_v0 = vld [vmem:[%s28194_s3 + $0x364] ss:$16 sps:$4 sm:$0xff]  }
 0x706   :  { %14732 = vmatprep.subr.bf16.mxu0 %v20743_v57  ;;  %v20803_v57 = vld [vmem:[%s28194_s3 + $0x16c] ss:$16 sps:$4 sm:$0xff]  }
 0x707   :  { %14733 = vmatpush1.bf16.msra.mxu0 %v20741_v1  ;;  %v20801_v1 = vld [vmem:[%s28194_s3 + $0x168] ss:$16 sps:$4 sm:$0xff]  }
 0x708   :  { %14610 = vmatpush1.bf16.msra.mxu1 %v20738_v45  ;;  %14734 = vmatprep.subr.bf16.mxu0 %v20749_v52  ;;  %v20798_v45 = vld [vmem:[%s28194_s3 + $0x360] ss:$16 sps:$4 sm:$0xff]   ;;  %v20809_v52 = vld [vmem:[%s28194_s3 + $0x18c] ss:$16 sps:$4 sm:$0xff]  }
 0x709   :  { %14611 = vmatprep.subr.bf16.mxu1 %v20746_v33  ;;  %v20806_v33 = vld [vmem:[%s28194_s3 + $0x384] ss:$16 sps:$4 sm:$0xff]  }
 0x70b   :  { %14735 = vmatpush1.bf16.msra.mxu0 %v20747_v38  ;;  %v12954_v38 = vsub.s32 2, %v26814_v14 }
 0x70c   :  { %14612 = vmatpush1.bf16.msra.mxu1 %v20744_v37  ;;  %14736 = vmatprep.subr.bf16.mxu0 %v20755_v51  ;;  %v20804_v37 = vld [vmem:[%s28194_s3 + $0x380] ss:$16 sps:$4 sm:$0xff]   ;;  %v20812_v51 = vld [vmem:[%s28194_s3 + $0x3a4] ss:$16 sps:$4 sm:$0xff]  }
 0x70d   :  { %14613 = vmatprep.subr.bf16.mxu1 %v20752_v47  ;;  %v20807_v47 = vld [vmem:[%s28194_s3 + $0x188] ss:$16 sps:$4 sm:$0xff]  }
 0x70f   :  { %14737 = vmatpush1.bf16.msra.mxu0 %v20753_v27  ;;  %v12966_v27 = vsub.s32 5, %v26814_v14 }
 0x710   :  { %14614 = vmatpush1.bf16.msra.mxu1 %v20750_v21  ;;  %14738 = vmatprep.subr.bf16.mxu0 %v20761_v35  ;;  %v20815_v21 = vld [vmem:[%s28194_s3 + $0x1ac] ss:$16 sps:$4 sm:$0xff]   ;;  %v12955_v35 = vrot.slane %v26825_v15, %v12954_v38 }
 0x711   :  { %14615 = vmatprep.subr.bf16.mxu1 %v20758_v30  ;;  %v20810_v30 = vld [vmem:[%s28194_s3 + $0x3a0] ss:$16 sps:$4 sm:$0xff]  }
 0x713   :  { %14739 = vmatpush1.bf16.msra.mxu0 %v20759_v31  ;;  %v20818_v31 = vld [vmem:[%s28194_s3 + $0x3c4] ss:$16 sps:$4 sm:$0xff]  }
 0x714   :  { %14616 = vmatpush1.bf16.msra.mxu1 %v20756_v29  ;;  %14740 = vmatprep.subr.bf16.mxu0 %v20767_v26  ;;  %v20813_v29 = vld [vmem:[%s28194_s3 + $0x1a8] ss:$16 sps:$4 sm:$0xff]   ;;  %v12967_v26 = vrot.slane %v26825_v15, %v12966_v27  ;;  %v20864_v27 = vld [vmem:[%s28194_s3 + $0x4c0] ss:$16 sps:$4 sm:$0xff]  }
 0x715   :  { %14617 = vmatprep.subr.bf16.mxu1 %v20764_v28  ;;  %v12689_v54 = vpop.f32.mrb[96].mxu0  ;;  %v20821_v28 = vld [vmem:[%s28194_s3 + $0x1cc] ss:$16 sps:$4 sm:$0xff]  }
 0x716   :  { %v12730_v39 = vpop.f32.mrb[96].mxu1  ;;  %v12690_v42 = vadd.f32 %v12689_v54, %v26955_v6  ;;  %v12691_v48 = vpop.f32.mrb[97].mxu0  ;;  %v20771_v6 = vld [vmem:[%s28194_s3 + $0xc8] ss:$16 sps:$4 sm:$0xff]   ;;  %v20824_v54 = vld [vmem:[%s28194_s3 + $0x3e4] ss:$16 sps:$4 sm:$0xff]  }
 0x717   :  { %v12732_v49 = vpop.f32.mrb[97].mxu1  ;;  %v12692_v43 = vadd.f32 %v12691_v48, %v26963_v36  ;;  %v12693_v58 = vpop.f32.mrb[98].mxu0  ;;  %14741 = vmatpush1.bf16.msra.mxu0 %v20765_v44  ;;  %v20776_v36 = vld [vmem:[%s28194_s3 + $0x2e4] ss:$16 sps:$4 sm:$0xff]   ;;  %v12986_v44 = vadd.f32 %v12955_v35, %v24314_v34  ;;  %v20822_v34 = vld [vmem:[%s28194_s3 + $0x3e0] ss:$16 sps:$4 sm:$0xff]  }
 0x718   :  { %v12734_v41 = vpop.f32.mrb[98].mxu1  ;;  %14618 = vmatpush1.bf16.msra.mxu1 %v20762_v55  ;;  %v27169_v32 = vadd.f32 %v12730_v39, %v12690_v42  ;;  %v12694_v10 = vpop.f32.mrb[99].mxu0  ;;  %14742 = vmatprep.subr.bf16.mxu0 %v20773_v56  ;;  %v20816_v55 = vld [vmem:[%s28194_s3 + $0x3c0] ss:$16 sps:$4 sm:$0xff]   ;;  %v20827_v39 = vld [vmem:[%s28194_s3 + $0x1ec] ss:$16 sps:$4 sm:$0xff]   ;;  %v12989_v56 = vadd.f32 %v12967_v26, %v25524_v23 }
 0x719   :  { %v12735_v2 = vpop.f32.mrb[99].mxu1  ;;  %14619 = vmatprep.subr.bf16.mxu1 %v20770_v50  ;;  %v27177_v8 = vadd.f32 %v12732_v49, %v12692_v43  ;;  %v20819_v50 = vld [vmem:[%s28194_s3 + $0x1c8] ss:$16 sps:$4 sm:$0xff]   ;;  %v12994_v42 = vmax.f32 %v12986_v44, 0.0  ;;  %v20830_v49 = vld [vmem:[%s28194_s3 + $0x404] ss:$16 sps:$4 sm:$0xff]  }
 0x71a   :  { %v20825_v48 = vld [vmem:[%s28194_s3 + $0x1e8] ss:$16 sps:$4 sm:$0xff]   ;;  %v20833_v23 = vld [vmem:[%s28194_s3 + $0x20c] ss:$16 sps:$4 sm:$0xff]   ;;  %v12997_v43 = vmax.f32 %v12989_v56, 0.0 }
 0x71b   :  { %14743 = vmatpush1.bf16.msra.mxu0 %v20771_v6  ;;  %v20828_v58 = vld [vmem:[%s28194_s3 + $0x400] ss:$16 sps:$4 sm:$0xff]   ;;  %v27301_v41 = vpack.c.bf16 %v12994_v42, %v12994_v42  ;;  %v20836_v10 = vld [vmem:[%s28194_s3 + $0x424] ss:$16 sps:$4 sm:$0xff]   ;;  %v20839_v6 = vld [vmem:[%s28194_s3 + $0x22c] ss:$16 sps:$4 sm:$0xff]  }
 0x71c   :  { %14620 = vmatpush1.bf16.msra.mxu1 %v20768_v4  ;;  %14744 = vmatprep.subr.bf16.mxu0 %v20779_v3  ;;  %v20831_v4 = vld [vmem:[%s28194_s3 + $0x208] ss:$16 sps:$4 sm:$0xff]   ;;  %v27309_v2 = vpack.c.bf16 %v12997_v43, %v12997_v43  ;;  %v20870_v26 = vld [vmem:[%s28194_s3 + $0x4e0] ss:$16 sps:$4 sm:$0xff]   ;;  %v20878_v44 = vld [vmem:[%s28194_s3 + $0x504] ss:$16 sps:$4 sm:$0xff]  }
 0x71d   :  { %14621 = vmatprep.subr.bf16.mxu1 %v20776_v36  ;;  %v20834_v36 = vld [vmem:[%s28194_s3 + $0x420] ss:$16 sps:$4 sm:$0xff]   ;;  %v20837_v3 = vld [vmem:[%s28194_s3 + $0x228] ss:$16 sps:$4 sm:$0xff]   ;;  %v20884_v56 = vld [vmem:[%s28194_s3 + $0x524] ss:$16 sps:$4 sm:$0xff]  }
 0x71e   :  { %v20882_v42 = vld [vmem:[%s28194_s3 + $0x520] ss:$16 sps:$4 sm:$0xff]  }
 0x71f   :  { %14745 = vmatpush1.bf16.msra.mxu0 %v20777_v5  ;;  %v20840_v5 = vld [vmem:[%s28194_s3 + $0x440] ss:$16 sps:$4 sm:$0xff]  }
 0x720   :  { %14622 = vmatpush1.bf16.msra.mxu1 %v20774_v63  ;;  %14746 = vmatprep.subr.bf16.mxu0 %v20785_v16  ;;  %v20842_v63 = vld [vmem:[%s28194_s3 + $0x444] ss:$16 sps:$4 sm:$0xff]   ;;  %v20851_v16 = vld [vmem:[%s28194_s3 + $0x26c] ss:$16 sps:$4 sm:$0xff]   ;;  %v20888_v43 = vld [vmem:[%s28194_s3 + $0x540] ss:$16 sps:$4 sm:$0xff]  }
 0x721   :  { %14623 = vmatprep.subr.bf16.mxu1 %v20782_v9  ;;  %v20843_v9 = vld [vmem:[%s28194_s3 + $0x248] ss:$16 sps:$4 sm:$0xff]  }
 0x723   :  { %14747 = vmatpush1.bf16.msra.mxu0 %v20783_v12  ;;  %v20849_v12 = vld [vmem:[%s28194_s3 + $0x268] ss:$16 sps:$4 sm:$0xff]  }
 0x724   :  { %14624 = vmatpush1.bf16.msra.mxu1 %v20780_v17  ;;  %14748 = vmatprep.subr.bf16.mxu0 %v20791_v61  ;;  %v20846_v17 = vld [vmem:[%s28194_s3 + $0x460] ss:$16 sps:$4 sm:$0xff]   ;;  %v20857_v61 = vld [vmem:[%s28194_s3 + $0x28c] ss:$16 sps:$4 sm:$0xff]  }
 0x725   :  { %14625 = vmatprep.subr.bf16.mxu1 %v20788_v18  ;;  %v20854_v18 = vld [vmem:[%s28194_s3 + $0x484] ss:$16 sps:$4 sm:$0xff]  }
 0x727   :  { %14749 = vmatpush1.bf16.msra.mxu0 %v20789_v25  ;;  %v20855_v25 = vld [vmem:[%s28194_s3 + $0x288] ss:$16 sps:$4 sm:$0xff]  }
 0x728   :  { %14626 = vmatpush1.bf16.msra.mxu1 %v20786_v24  ;;  %14750 = vmatprep.subr.bf16.mxu0 %v20797_v11  ;;  %v20852_v24 = vld [vmem:[%s28194_s3 + $0x480] ss:$16 sps:$4 sm:$0xff]   ;;  %v20863_v11 = vld [vmem:[%s28194_s3 + $0x2ac] ss:$16 sps:$4 sm:$0xff]  }
 0x729   :  { %14627 = vmatprep.subr.bf16.mxu1 %v20794_v53  ;;  %v20860_v53 = vld [vmem:[%s28194_s3 + $0x4a4] ss:$16 sps:$4 sm:$0xff]  }
 0x72b   :  { %14751 = vmatpush1.bf16.msra.mxu0 %v20795_v60  ;;  %v20861_v60 = vld [vmem:[%s28194_s3 + $0x2a8] ss:$16 sps:$4 sm:$0xff]  }
 0x72c   :  { %14628 = vmatpush1.bf16.msra.mxu1 %v20792_v13  ;;  %14752 = vmatprep.subr.bf16.mxu0 %v20803_v57  ;;  %v20858_v13 = vld [vmem:[%s28194_s3 + $0x4a0] ss:$16 sps:$4 sm:$0xff]  }
 0x72d   :  { %14629 = vmatprep.subr.bf16.mxu1 %v20800_v0  ;;  %v20866_v0 = vld [vmem:[%s28194_s3 + $0x4c4] ss:$16 sps:$4 sm:$0xff]  }
 0x72f   :  { %14753 = vmatpush1.bf16.msra.mxu0 %v20801_v1  ;;  %v20869_v1 = vld [vmem:[%s28194_s3 + $0x2cc] ss:$16 sps:$4 sm:$0xff]  }
 0x730   :  { %14630 = vmatpush1.bf16.msra.mxu1 %v20798_v45  ;;  %14754 = vmatprep.subr.bf16.mxu0 %v20809_v52 }
 0x731   :  { %14631 = vmatprep.subr.bf16.mxu1 %v20806_v33 }
 0x733   :  { %14755 = vmatpush1.bf16.msra.mxu0 %v20807_v47 }
 0x734   :  { %14632 = vmatpush1.bf16.msra.mxu1 %v20804_v37  ;;  %14756 = vmatprep.subr.bf16.mxu0 %v20815_v21 }
 0x735   :  { %14633 = vmatprep.subr.bf16.mxu1 %v20812_v51 }
 0x737   :  { %14757 = vmatpush1.bf16.msra.mxu0 %v20813_v29 }
 0x738   :  { %14634 = vmatpush1.bf16.msra.mxu1 %v20810_v30  ;;  %14758 = vmatprep.subr.bf16.mxu0 %v20821_v28  ;;  %v20875_v28 = vld [vmem:[%s28194_s3 + $0x2ec] ss:$16 sps:$4 sm:$0xff]  }
 0x739   :  { %14635 = vmatprep.subr.bf16.mxu1 %v20818_v31 }
 0x73b   :  { %14759 = vmatpush1.bf16.msra.mxu0 %v20819_v50  ;;  %v20881_v50 = vld [vmem:[%s28194_s3 + $0x30c] ss:$16 sps:$4 sm:$0xff]  }
 0x73c   :  { %14636 = vmatpush1.bf16.msra.mxu1 %v20816_v55  ;;  %14760 = vmatprep.subr.bf16.mxu0 %v20827_v39  ;;  %v20873_v55 = vld [vmem:[%s28194_s3 + $0x2e8] ss:$16 sps:$4 sm:$0xff]  }
 0x73d   :  { %14637 = vmatprep.subr.bf16.mxu1 %v20824_v54  ;;  %v20876_v54 = vld [vmem:[%s28194_s3 + $0x500] ss:$16 sps:$4 sm:$0xff]   ;;  %v20879_v39 = vld [vmem:[%s28194_s3 + $0x308] ss:$16 sps:$4 sm:$0xff]  }
 0x73f   :  { %14761 = vmatpush1.bf16.msra.mxu0 %v20825_v48  ;;  %v20885_v48 = vld [vmem:[%s28194_s3 + $0x328] ss:$16 sps:$4 sm:$0xff]  }
 0x740   :  { %14638 = vmatpush1.bf16.msra.mxu1 %v20822_v34  ;;  %14771 = vmatprep.subr.bf16.mxu0 %v20833_v23  ;;  %v20887_v34 = vld [vmem:[%s28194_s3 + $0x32c] ss:$16 sps:$4 sm:$0xff]  }
 0x741   :  { %14648 = vmatprep.subr.bf16.mxu1 %v20830_v49  ;;  %v20890_v49 = vld [vmem:[%s28194_s3 + $0x544] ss:$16 sps:$4 sm:$0xff]   ;;  %v20893_v23 = vld [vmem:[%s28194_s3 + $0x34c] ss:$16 sps:$4 sm:$0xff]  }
 0x742   :  { %14763 = vmatmul.mubr.bf16.vlgmr.msra.gmra.mrb[112].mxu0 %v27087_v59  ;;  %v20845_v59 = vld [vmem:[%s28194_s3 + $0x24c] ss:$16 sps:$4 sm:$0xff]  }
 0x743   :  { %14640 = vmatmul.mubr.bf16.vlgmr.msra.gmra.mrb[108].mxu1 %v27301_v41  ;;  %14772 = vmatpush1.bf16.msra.mxu0 %v20831_v4  ;;  %v20896_v4 = vld [vmem:[%s28194_s3 + $0x564] ss:$16 sps:$4 sm:$0xff]  }
 0x744   :  { %14649 = vmatpush1.bf16.msra.mxu1 %v20828_v58  ;;  %14680 = vmatprep.mubr.bf16.mxu1 %v27309_v2  ;;  %v20891_v58 = vld [vmem:[%s28194_s3 + $0x348] ss:$16 sps:$4 sm:$0xff]  }
 0x745   :  { %14803 = vmatprep.mubr.bf16.mxu0 %v27092_v20  ;;  %14650 = vmatprep.subr.bf16.mxu1 %v20836_v10  ;;  %v20848_v20 = vld [vmem:[%s28194_s3 + $0x464] ss:$16 sps:$4 sm:$0xff]   ;;  %v20899_v10 = vld [vmem:[%s28194_s3 + $0x36c] ss:$16 sps:$4 sm:$0xff]  }
 0x746   :  { %14773 = vmatprep.subr.bf16.mxu0 %v20839_v6  ;;  %v20894_v6 = vld [vmem:[%s28194_s3 + $0x560] ss:$16 sps:$4 sm:$0xff]  }
 0x747   :  { %14774 = vmatpush1.bf16.msra.mxu0 %v20837_v3  ;;  %v20902_v3 = vld [vmem:[%s28194_s3 + $0x584] ss:$16 sps:$4 sm:$0xff]  }
 0x748   :  { %14651 = vmatpush1.bf16.msra.mxu1 %v20834_v36  ;;  %14775 = vmatprep.subr.bf16.mxu0 %v20845_v59  ;;  %v20897_v36 = vld [vmem:[%s28194_s3 + $0x368] ss:$16 sps:$4 sm:$0xff]   ;;  %v20900_v59 = vld [vmem:[%s28194_s3 + $0x580] ss:$16 sps:$4 sm:$0xff]  }
 0x749   :  { %14652 = vmatprep.subr.bf16.mxu1 %v20842_v63  ;;  %v20905_v63 = vld [vmem:[%s28194_s3 + $0x38c] ss:$16 sps:$4 sm:$0xff]  }
 0x74b   :  { %14776 = vmatpush1.bf16.msra.mxu0 %v20843_v9  ;;  %v20903_v9 = vld [vmem:[%s28194_s3 + $0x388] ss:$16 sps:$4 sm:$0xff]  }
 0x74c   :  { %14653 = vmatpush1.bf16.msra.mxu1 %v20840_v5  ;;  %14777 = vmatprep.subr.bf16.mxu0 %v20851_v16  ;;  %v12962_v5 = vsub.s32 4, %v26814_v14  ;;  %v20911_v16 = vld [vmem:[%s28194_s3 + $0x3ac] ss:$16 sps:$4 sm:$0xff]  }
 0x74d   :  { %14654 = vmatprep.subr.bf16.mxu1 %v20848_v20  ;;  %v20908_v20 = vld [vmem:[%s28194_s3 + $0x5a4] ss:$16 sps:$4 sm:$0xff]  }
 0x74f   :  { %14778 = vmatpush1.bf16.msra.mxu0 %v20849_v12  ;;  %v20906_v12 = vld [vmem:[%s28194_s3 + $0x5a0] ss:$16 sps:$4 sm:$0xff]  }
 0x750   :  { %14655 = vmatpush1.bf16.msra.mxu1 %v20846_v17  ;;  %14779 = vmatprep.subr.bf16.mxu0 %v20857_v61  ;;  %v12974_v17 = vsub.s32 7, %v26814_v14  ;;  %v20909_v61 = vld [vmem:[%s28194_s3 + $0x3a8] ss:$16 sps:$4 sm:$0xff]  }
 0x751   :  { %14656 = vmatprep.subr.bf16.mxu1 %v20854_v18  ;;  %v12963_v18 = vrot.slane %v26825_v15, %v12962_v5  ;;  %v20968_v5 = vld [vmem:[%s28194_s3 + $0x6e4] ss:$16 sps:$4 sm:$0xff]  }
 0x753   :  { %14780 = vmatpush1.bf16.msra.mxu0 %v20855_v25  ;;  %v20917_v25 = vld [vmem:[%s28194_s3 + $0x3cc] ss:$16 sps:$4 sm:$0xff]  }
 0x754   :  { %14657 = vmatpush1.bf16.msra.mxu1 %v20852_v24  ;;  %14781 = vmatprep.subr.bf16.mxu0 %v20863_v11  ;;  %v20914_v24 = vld [vmem:[%s28194_s3 + $0x5c4] ss:$16 sps:$4 sm:$0xff]   ;;  %v20912_v11 = vld [vmem:[%s28194_s3 + $0x5c0] ss:$16 sps:$4 sm:$0xff]  }
 0x755   :  { %14658 = vmatprep.subr.bf16.mxu1 %v20860_v53  ;;  %v12771_v57 = vpop.f32.mrb[100].mxu0  ;;  %v12975_v53 = vrot.slane %v26825_v15, %v12974_v17  ;;  %v20923_v15 = vld [vmem:[%s28194_s3 + $0x3ec] ss:$16 sps:$4 sm:$0xff]  }
 0x756   :  { %v12812_v45 = vpop.f32.mrb[100].mxu1  ;;  %v12772_v33 = vadd.f32 %v12771_v57, %v27169_v32  ;;  %v12773_v52 = vpop.f32.mrb[101].mxu0  ;;  %v20867_v32 = vld [vmem:[%s28194_s3 + $0x2c8] ss:$16 sps:$4 sm:$0xff]   ;;  %v20971_v17 = vld [vmem:[%s28194_s3 + $0x4ec] ss:$16 sps:$4 sm:$0xff]  }
 0x757   :  { %v12814_v37 = vpop.f32.mrb[101].mxu1  ;;  %v12774_v47 = vadd.f32 %v12773_v52, %v27177_v8  ;;  %v12775_v51 = vpop.f32.mrb[102].mxu0  ;;  %14782 = vmatpush1.bf16.msra.mxu0 %v20861_v60  ;;  %v20872_v8 = vld [vmem:[%s28194_s3 + $0x4e4] ss:$16 sps:$4 sm:$0xff]   ;;  %v20915_v60 = vld [vmem:[%s28194_s3 + $0x3c8] ss:$16 sps:$4 sm:$0xff]   ;;  %v12991_v57 = vadd.f32 %v12975_v53, %v26546_v19 }
 0x758   :  { %v12816_v21 = vpop.f32.mrb[102].mxu1  ;;  %14659 = vmatpush1.bf16.msra.mxu1 %v20858_v13  ;;  %v27383_v30 = vadd.f32 %v12812_v45, %v12772_v33  ;;  %v12776_v35 = vpop.f32.mrb[103].mxu0  ;;  %14783 = vmatprep.subr.bf16.mxu0 %v20869_v1  ;;  %v12988_v13 = vadd.f32 %v12963_v18, %v25519_v22  ;;  %v20918_v22 = vld [vmem:[%s28194_s3 + $0x5e0] ss:$16 sps:$4 sm:$0xff]   ;;  %v20921_v1 = vld [vmem:[%s28194_s3 + $0x3e8] ss:$16 sps:$4 sm:$0xff]  }
 0x759   :  { %v12817_v29 = vpop.f32.mrb[103].mxu1  ;;  %14660 = vmatprep.subr.bf16.mxu1 %v20866_v0  ;;  %v27391_v31 = vadd.f32 %v12814_v37, %v12774_v47  ;;  %v20920_v0 = vld [vmem:[%s28194_s3 + $0x5e4] ss:$16 sps:$4 sm:$0xff]   ;;  %v20929_v19 = vld [vmem:[%s28194_s3 + $0x40c] ss:$16 sps:$4 sm:$0xff]   ;;  %v12999_v52 = vmax.f32 %v12991_v57, 0.0 }
 0x75a   :  { %v12996_v45 = vmax.f32 %v12988_v13, 0.0  ;;  %v20926_v33 = vld [vmem:[%s28194_s3 + $0x604] ss:$16 sps:$4 sm:$0xff]   ;;  %v20924_v37 = vld [vmem:[%s28194_s3 + $0x600] ss:$16 sps:$4 sm:$0xff]  }
 0x75b   :  { %14784 = vmatpush1.bf16.msra.mxu0 %v20867_v32  ;;  %v20927_v51 = vld [vmem:[%s28194_s3 + $0x408] ss:$16 sps:$4 sm:$0xff]   ;;  %v20932_v21 = vld [vmem:[%s28194_s3 + $0x624] ss:$16 sps:$4 sm:$0xff]   ;;  %v20935_v35 = vld [vmem:[%s28194_s3 + $0x42c] ss:$16 sps:$4 sm:$0xff]  }
 0x75c   :  { %14661 = vmatpush1.bf16.msra.mxu1 %v20864_v27  ;;  %14785 = vmatprep.subr.bf16.mxu0 %v20875_v28  ;;  %v27513_v47 = vpack.c.bf16 %v12996_v45, %v12996_v45  ;;  %v27521_v27 = vpack.c.bf16 %v12999_v52, %v12999_v52  ;;  %v20930_v29 = vld [vmem:[%s28194_s3 + $0x620] ss:$16 sps:$4 sm:$0xff]   ;;  %v20933_v32 = vld [vmem:[%s28194_s3 + $0x428] ss:$16 sps:$4 sm:$0xff]   ;;  %v20977_v53 = vld [vmem:[%s28194_s3 + $0x50c] ss:$16 sps:$4 sm:$0xff]  }
 0x75d   :  { %14662 = vmatprep.subr.bf16.mxu1 %v20872_v8  ;;  %v20938_v8 = vld [vmem:[%s28194_s3 + $0x644] ss:$16 sps:$4 sm:$0xff]   ;;  %v20936_v28 = vld [vmem:[%s28194_s3 + $0x640] ss:$16 sps:$4 sm:$0xff]   ;;  %v20975_v13 = vld [vmem:[%s28194_s3 + $0x508] ss:$16 sps:$4 sm:$0xff]  }
 0x75e   :  { %v20981_v57 = vld [vmem:[%s28194_s3 + $0x528] ss:$16 sps:$4 sm:$0xff]   ;;  %v20989_v45 = vld [vmem:[%s28194_s3 + $0x54c] ss:$16 sps:$4 sm:$0xff]  }
 0x75f   :  { %14786 = vmatpush1.bf16.msra.mxu0 %v20873_v55  ;;  %v20947_v55 = vld [vmem:[%s28194_s3 + $0x46c] ss:$16 sps:$4 sm:$0xff]  }
 0x760   :  { %14663 = vmatpush1.bf16.msra.mxu1 %v20870_v26  ;;  %14787 = vmatprep.subr.bf16.mxu0 %v20881_v50  ;;  %v20939_v26 = vld [vmem:[%s28194_s3 + $0x448] ss:$16 sps:$4 sm:$0xff]   ;;  %v20995_v52 = vld [vmem:[%s28194_s3 + $0x56c] ss:$16 sps:$4 sm:$0xff]  }
 0x761   :  { %14664 = vmatprep.subr.bf16.mxu1 %v20878_v44  ;;  %v20942_v44 = vld [vmem:[%s28194_s3 + $0x660] ss:$16 sps:$4 sm:$0xff]   ;;  %v20945_v50 = vld [vmem:[%s28194_s3 + $0x468] ss:$16 sps:$4 sm:$0xff]  }
 0x763   :  { %14788 = vmatpush1.bf16.msra.mxu0 %v20879_v39  ;;  %v20953_v39 = vld [vmem:[%s28194_s3 + $0x48c] ss:$16 sps:$4 sm:$0xff]  }
 0x764   :  { %14665 = vmatpush1.bf16.msra.mxu1 %v20876_v54  ;;  %14789 = vmatprep.subr.bf16.mxu0 %v20887_v34  ;;  %v20950_v54 = vld [vmem:[%s28194_s3 + $0x684] ss:$16 sps:$4 sm:$0xff]   ;;  %v20951_v34 = vld [vmem:[%s28194_s3 + $0x488] ss:$16 sps:$4 sm:$0xff]  }
 0x765   :  { %14666 = vmatprep.subr.bf16.mxu1 %v20884_v56  ;;  %v20948_v56 = vld [vmem:[%s28194_s3 + $0x680] ss:$16 sps:$4 sm:$0xff]  }
 0x767   :  { %14790 = vmatpush1.bf16.msra.mxu0 %v20885_v48  ;;  %v20959_v48 = vld [vmem:[%s28194_s3 + $0x4ac] ss:$16 sps:$4 sm:$0xff]  }
 0x768   :  { %14667 = vmatpush1.bf16.msra.mxu1 %v20882_v42  ;;  %14791 = vmatprep.subr.bf16.mxu0 %v20893_v23  ;;  %v20956_v42 = vld [vmem:[%s28194_s3 + $0x6a4] ss:$16 sps:$4 sm:$0xff]   ;;  %v20957_v23 = vld [vmem:[%s28194_s3 + $0x4a8] ss:$16 sps:$4 sm:$0xff]  }
 0x769   :  { %14668 = vmatprep.subr.bf16.mxu1 %v20890_v49  ;;  %v20954_v49 = vld [vmem:[%s28194_s3 + $0x6a0] ss:$16 sps:$4 sm:$0xff]  }
 0x76b   :  { %14792 = vmatpush1.bf16.msra.mxu0 %v20891_v58 }
 0x76c   :  { %14669 = vmatpush1.bf16.msra.mxu1 %v20888_v43  ;;  %14793 = vmatprep.subr.bf16.mxu0 %v20899_v10  ;;  %v20962_v43 = vld [vmem:[%s28194_s3 + $0x6c4] ss:$16 sps:$4 sm:$0xff]   ;;  %v20960_v10 = vld [vmem:[%s28194_s3 + $0x6c0] ss:$16 sps:$4 sm:$0xff]  }
 0x76d   :  { %14670 = vmatprep.subr.bf16.mxu1 %v20896_v4 }
 0x76f   :  { %14794 = vmatpush1.bf16.msra.mxu0 %v20897_v36 }
 0x770   :  { %14671 = vmatpush1.bf16.msra.mxu1 %v20894_v6  ;;  %14795 = vmatprep.subr.bf16.mxu0 %v20905_v63  ;;  %v20965_v6 = vld [vmem:[%s28194_s3 + $0x4cc] ss:$16 sps:$4 sm:$0xff]  }
 0x771   :  { %14672 = vmatprep.subr.bf16.mxu1 %v20902_v3 }
 0x773   :  { %14796 = vmatpush1.bf16.msra.mxu0 %v20903_v9 }
 0x774   :  { %14673 = vmatpush1.bf16.msra.mxu1 %v20900_v59  ;;  %14797 = vmatprep.subr.bf16.mxu0 %v20911_v16  ;;  %v20963_v59 = vld [vmem:[%s28194_s3 + $0x4c8] ss:$16 sps:$4 sm:$0xff]  }
 0x775   :  { %14674 = vmatprep.subr.bf16.mxu1 %v20908_v20 }
 0x777   :  { %14798 = vmatpush1.bf16.msra.mxu0 %v20909_v61 }
 0x778   :  { %14675 = vmatpush1.bf16.msra.mxu1 %v20906_v12  ;;  %14799 = vmatprep.subr.bf16.mxu0 %v20917_v25  ;;  %v20974_v25 = vld [vmem:[%s28194_s3 + $0x704] ss:$16 sps:$4 sm:$0xff]  }
 0x779   :  { %14676 = vmatprep.subr.bf16.mxu1 %v20914_v24  ;;  %v20969_v24 = vld [vmem:[%s28194_s3 + $0x4e8] ss:$16 sps:$4 sm:$0xff]  }
 0x77b   :  { %14800 = vmatpush1.bf16.msra.mxu0 %v20915_v60  ;;  %v20980_v60 = vld [vmem:[%s28194_s3 + $0x724] ss:$16 sps:$4 sm:$0xff]  }
 0x77c   :  { %14677 = vmatpush1.bf16.msra.mxu1 %v20912_v11  ;;  %14801 = vmatprep.subr.bf16.mxu0 %v20923_v15  ;;  %v20972_v11 = vld [vmem:[%s28194_s3 + $0x700] ss:$16 sps:$4 sm:$0xff]  }
 0x77d   :  { %14678 = vmatprep.subr.bf16.mxu1 %v20920_v0  ;;  %v20983_v0 = vld [vmem:[%s28194_s3 + $0x52c] ss:$16 sps:$4 sm:$0xff]   ;;  %v20978_v15 = vld [vmem:[%s28194_s3 + $0x720] ss:$16 sps:$4 sm:$0xff]  }
 0x77f   :  { %14802 = vmatpush1.bf16.msra.mxu0 %v20921_v1  ;;  %v20984_v1 = vld [vmem:[%s28194_s3 + $0x740] ss:$16 sps:$4 sm:$0xff]  }
 0x780   :  { %14679 = vmatpush1.bf16.msra.mxu1 %v20918_v22  ;;  %14812 = vmatprep.subr.bf16.mxu0 %v20929_v19  ;;  %v20986_v22 = vld [vmem:[%s28194_s3 + $0x744] ss:$16 sps:$4 sm:$0xff]  }
 0x781   :  { %14689 = vmatprep.subr.bf16.mxu1 %v20926_v33  ;;  %v20987_v33 = vld [vmem:[%s28194_s3 + $0x548] ss:$16 sps:$4 sm:$0xff]   ;;  %v20992_v19 = vld [vmem:[%s28194_s3 + $0x764] ss:$16 sps:$4 sm:$0xff]  }
 0x782   :  { %14804 = vmatmul.mubr.bf16.vlgmr.msra.gmra.mrb[112].mxu0 %v27301_v41  ;;  %v20941_v41 = vld [vmem:[%s28194_s3 + $0x44c] ss:$16 sps:$4 sm:$0xff]  }
 0x783   :  { %14681 = vmatmul.mubr.bf16.vlgmr.msra.gmra.mrb[108].mxu1 %v27513_v47  ;;  %14813 = vmatpush1.bf16.msra.mxu0 %v20927_v51  ;;  %v20993_v51 = vld [vmem:[%s28194_s3 + $0x568] ss:$16 sps:$4 sm:$0xff]  }
 0x784   :  { %14690 = vmatpush1.bf16.msra.mxu1 %v20924_v37  ;;  %14721 = vmatprep.mubr.bf16.mxu1 %v27521_v27  ;;  %v20990_v37 = vld [vmem:[%s28194_s3 + $0x760] ss:$16 sps:$4 sm:$0xff]  }
 0x785   :  { %14844 = vmatprep.mubr.bf16.mxu0 %v27309_v2  ;;  %14691 = vmatprep.subr.bf16.mxu1 %v20932_v21  ;;  %v20944_v2 = vld [vmem:[%s28194_s3 + $0x664] ss:$16 sps:$4 sm:$0xff]  }
 0x786   :  { %14814 = vmatprep.subr.bf16.mxu0 %v20935_v35  ;;  %v20998_v21 = vld [vmem:[%s28194_s3 + $0x784] ss:$16 sps:$4 sm:$0xff]   ;;  %v21001_v35 = vld [vmem:[%s28194_s3 + $0x58c] ss:$16 sps:$4 sm:$0xff]  }
 0x787   :  { %14815 = vmatpush1.bf16.msra.mxu0 %v20933_v32  ;;  %v12970_v32 = vsub.s32 6, %v26814_v14 }
 0x788   :  { %14692 = vmatpush1.bf16.msra.mxu1 %v20930_v29  ;;  %14816 = vmatprep.subr.bf16.mxu0 %v20941_v41  ;;  %v20996_v29 = vld [vmem:[%s28194_s3 + $0x780] ss:$16 sps:$4 sm:$0xff]   ;;  %v21004_v41 = vld [vmem:[%s28194_s3 + $0x7a4] ss:$16 sps:$4 sm:$0xff]  }
 0x789   :  { %14693 = vmatprep.subr.bf16.mxu1 %v20938_v8  ;;  %v20999_v8 = vld [vmem:[%s28194_s3 + $0x588] ss:$16 sps:$4 sm:$0xff]  }
 0x78b   :  { %14817 = vmatpush1.bf16.msra.mxu0 %v20939_v26  ;;  %v21002_v26 = vld [vmem:[%s28194_s3 + $0x7a0] ss:$16 sps:$4 sm:$0xff]  }
 0x78c   :  { %14694 = vmatpush1.bf16.msra.mxu1 %v20936_v28  ;;  %14818 = vmatprep.subr.bf16.mxu0 %v20947_v55  ;;  %v21007_v28 = vld [vmem:[%s28194_s3 + $0x5ac] ss:$16 sps:$4 sm:$0xff]  }
 0x78d   :  { %14695 = vmatprep.subr.bf16.mxu1 %v20944_v2  ;;  %v21228_v2 = vld [vmem:[%s28195_s2] sm:$0xff] }
 0x78e   :  { %v12971_v55 = vrot.slane %v21228_v2, %v12970_v32  ;;  %v21092_v32 = vld [vmem:[%s28196_s5 + $0x80] ss:$8 sps:$4 sm:$0xff]  }
 0x78f   :  { %14819 = vmatpush1.bf16.msra.mxu0 %v20945_v50  ;;  %v21010_v50 = vld [vmem:[%s28194_s3 + $0x7c4] ss:$16 sps:$4 sm:$0xff]   ;;  %v21047_v2 = vld [vmem:[%s28194_s3 + $0x728] ss:$16 sps:$4 sm:$0xff]  }
 0x790   :  { %14696 = vmatpush1.bf16.msra.mxu1 %v20942_v44  ;;  %14820 = vmatprep.subr.bf16.mxu0 %v20953_v39  ;;  %v21005_v44 = vld [vmem:[%s28194_s3 + $0x5a8] ss:$16 sps:$4 sm:$0xff]   ;;  %v21008_v39 = vld [vmem:[%s28194_s3 + $0x7c0] ss:$16 sps:$4 sm:$0xff]  }
 0x791   :  { %14697 = vmatprep.subr.bf16.mxu1 %v20950_v54  ;;  %v21013_v54 = vld [vmem:[%s28194_s3 + $0x5cc] ss:$16 sps:$4 sm:$0xff]  }
 0x793   :  { %14821 = vmatpush1.bf16.msra.mxu0 %v20951_v34  ;;  %v21011_v34 = vld [vmem:[%s28194_s3 + $0x5c8] ss:$16 sps:$4 sm:$0xff]  }
 0x794   :  { %14698 = vmatpush1.bf16.msra.mxu1 %v20948_v56  ;;  %14822 = vmatprep.subr.bf16.mxu0 %v20959_v48  ;;  %v12990_v56 = vadd.f32 %v12971_v55, %v26544_v7  ;;  %v21019_v48 = vld [vmem:[%s28194_s3 + $0x5ec] ss:$16 sps:$4 sm:$0xff]   ;;  %v21014_v7 = vld [vmem:[%s28194_s3 + $0x7e0] ss:$16 sps:$4 sm:$0xff]  }
 0x795   :  { %14699 = vmatprep.subr.bf16.mxu1 %v20956_v42  ;;  %v12853_v58 = vpop.f32.mrb[104].mxu0  ;;  %v21016_v42 = vld [vmem:[%s28194_s3 + $0x7e4] ss:$16 sps:$4 sm:$0xff]  }
 0x796   :  { %v12894_v4 = vpop.f32.mrb[104].mxu1  ;;  %v12854_v36 = vadd.f32 %v12853_v58, %v27383_v30  ;;  %v12855_v3 = vpop.f32.mrb[105].mxu0  ;;  %v21022_v58 = vld [vmem:[%s28194_s3 + $0x60c] ss:$16 sps:$4 sm:$0xff]  }
 0x797   :  { %v12896_v63 = vpop.f32.mrb[105].mxu1  ;;  %v12856_v9 = vadd.f32 %v12855_v3, %v27391_v31  ;;  %v12857_v20 = vpop.f32.mrb[106].mxu0  ;;  %14823 = vmatpush1.bf16.msra.mxu0 %v20957_v23  ;;  %v20966_v31 = vld [vmem:[%s28194_s3 + $0x6e0] ss:$16 sps:$4 sm:$0xff]   ;;  %v21017_v23 = vld [vmem:[%s28194_s3 + $0x5e8] ss:$16 sps:$4 sm:$0xff]  }
 0x798   :  { %v12898_v16 = vpop.f32.mrb[106].mxu1  ;;  %14700 = vmatpush1.bf16.msra.mxu1 %v20954_v49  ;;  %v27604_v30 = vadd.f32 %v12894_v4, %v12854_v36  ;;  %v12858_v12 = vpop.f32.mrb[107].mxu0  ;;  %14824 = vmatprep.subr.bf16.mxu0 %v20965_v6  ;;  %v12998_v49 = vmax.f32 %v12990_v56, 0.0  ;;  %v21068_v4 = vld [vmem:[%s28196_s5] ss:$8 sps:$4 sm:$0xff]  }
 0x799   :  { %v12899_v18 = vpop.f32.mrb[107].mxu1  ;;  %14701 = vmatprep.subr.bf16.mxu1 %v20962_v43  ;;  %v27606_v61 = vadd.f32 %v12896_v63, %v12856_v9  ;;  %v21070_v43 = vld [vmem:[%s28196_s5 + $0x4] ss:$8 sps:$4 sm:$0xff]   ;;  %v21020_v6 = vld [vmem:[%s28194_s3 + $0x608] ss:$16 sps:$4 sm:$0xff]  }
 0x79a   :  { %v21025_v36 = vld [vmem:[%s28194_s3 + $0x62c] ss:$16 sps:$4 sm:$0xff]   ;;  %v21071_v63 = vld [vmem:[%s28196_s5 + $0x10] ss:$8 sps:$4 sm:$0xff]   ;;  %v21074_v9 = vld [vmem:[%s28196_s5 + $0x20] ss:$8 sps:$4 sm:$0xff]  }
 0x79b   :  { %14825 = vmatpush1.bf16.msra.mxu0 %v20963_v59  ;;  %v21073_v3 = vld [vmem:[%s28196_s5 + $0x14] ss:$8 sps:$4 sm:$0xff]   ;;  %v21023_v59 = vld [vmem:[%s28194_s3 + $0x628] ss:$16 sps:$4 sm:$0xff]   ;;  %v21082_v18 = vld [vmem:[%s28196_s5 + $0x44] ss:$8 sps:$4 sm:$0xff]  }
 0x79c   :  { %14702 = vmatpush1.bf16.msra.mxu1 %v20960_v10  ;;  %14826 = vmatprep.subr.bf16.mxu0 %v20971_v17  ;;  %v27724_v10 = vpack.c.bf16 %v12998_v49, %v12998_v49  ;;  %v21079_v20 = vld [vmem:[%s28196_s5 + $0x34] ss:$8 sps:$4 sm:$0xff]   ;;  %v21077_v17 = vld [vmem:[%s28196_s5 + $0x30] ss:$8 sps:$4 sm:$0xff]   ;;  %v21100_v55 = vld [vmem:[%s28196_s5 + $0xa4] ss:$8 sps:$4 sm:$0xff]  }
 0x79d   :  { %14703 = vmatprep.subr.bf16.mxu1 %v20968_v5  ;;  %v21076_v5 = vld [vmem:[%s28196_s5 + $0x24] ss:$8 sps:$4 sm:$0xff]   ;;  %v21029_v12 = vld [vmem:[%s28194_s3 + $0x668] ss:$16 sps:$4 sm:$0xff]  }
 0x79e   :  { %v21031_v16 = vld [vmem:[%s28194_s3 + $0x66c] ss:$16 sps:$4 sm:$0xff]   ;;  %v21104_v49 = vld [vmem:[%s28196_s5 + $0xc0] ss:$8 sps:$4 sm:$0xff]  }
 0x79f   :  { %14827 = vmatpush1.bf16.msra.mxu0 %v20969_v24  ;;  %v21080_v24 = vld [vmem:[%s28196_s5 + $0x40] ss:$8 sps:$4 sm:$0xff]   ;;  %v21055_v56 = vld [vmem:[%s28194_s3 + $0x76c] ss:$16 sps:$4 sm:$0xff]  }
 0x7a0   :  { %14704 = vmatpush1.bf16.msra.mxu1 %v20966_v31  ;;  %14828 = vmatprep.subr.bf16.mxu0 %v20977_v53  ;;  %v21034_v31 = vld [vmem:[%s28194_s3 + $0x68c] ss:$16 sps:$4 sm:$0xff]  }
 0x7a1   :  { %14705 = vmatprep.subr.bf16.mxu1 %v20974_v25  ;;  %v21032_v25 = vld [vmem:[%s28194_s3 + $0x688] ss:$16 sps:$4 sm:$0xff]   ;;  %v21085_v53 = vld [vmem:[%s28196_s5 + $0x54] ss:$8 sps:$4 sm:$0xff]  }
 0x7a3   :  { %14829 = vmatpush1.bf16.msra.mxu0 %v20975_v13  ;;  %v21083_v13 = vld [vmem:[%s28196_s5 + $0x50] ss:$8 sps:$4 sm:$0xff]  }
 0x7a4   :  { %14706 = vmatpush1.bf16.msra.mxu1 %v20972_v11  ;;  %14830 = vmatprep.subr.bf16.mxu0 %v20983_v0  ;;  %v21037_v11 = vld [vmem:[%s28194_s3 + $0x6ac] ss:$16 sps:$4 sm:$0xff]  }
 0x7a5   :  { %14707 = vmatprep.subr.bf16.mxu1 %v20980_v60  ;;  %v21035_v60 = vld [vmem:[%s28194_s3 + $0x6a8] ss:$16 sps:$4 sm:$0xff]   ;;  %v21088_v0 = vld [vmem:[%s28196_s5 + $0x64] ss:$8 sps:$4 sm:$0xff]  }
 0x7a7   :  { %14831 = vmatpush1.bf16.msra.mxu0 %v20981_v57  ;;  %v21040_v57 = vld [vmem:[%s28194_s3 + $0x6cc] ss:$16 sps:$4 sm:$0xff]  }
 0x7a8   :  { %14708 = vmatpush1.bf16.msra.mxu1 %v20978_v15  ;;  %14832 = vmatprep.subr.bf16.mxu0 %v20989_v45 }
 0x7a9   :  { %14709 = vmatprep.subr.bf16.mxu1 %v20986_v22 }
 0x7ab   :  { %14833 = vmatpush1.bf16.msra.mxu0 %v20987_v33 }
 0x7ac   :  { %14710 = vmatpush1.bf16.msra.mxu1 %v20984_v1  ;;  %14834 = vmatprep.subr.bf16.mxu0 %v20995_v52 }
 0x7ad   :  { %14711 = vmatprep.subr.bf16.mxu1 %v20992_v19  ;;  %v21086_v19 = vld [vmem:[%s28196_s5 + $0x60] ss:$8 sps:$4 sm:$0xff]  }
 0x7af   :  { %14835 = vmatpush1.bf16.msra.mxu0 %v20993_v51  ;;  %v21089_v51 = vld [vmem:[%s28196_s5 + $0x70] ss:$8 sps:$4 sm:$0xff]  }
 0x7b0   :  { %14712 = vmatpush1.bf16.msra.mxu1 %v20990_v37  ;;  %14836 = vmatprep.subr.bf16.mxu0 %v21001_v35  ;;  %v21038_v37 = vld [vmem:[%s28194_s3 + $0x6c8] ss:$16 sps:$4 sm:$0xff]   ;;  %v21094_v35 = vld [vmem:[%s28196_s5 + $0x84] ss:$8 sps:$4 sm:$0xff]  }
 0x7b1   :  { %14713 = vmatprep.subr.bf16.mxu1 %v20998_v21  ;;  %v21041_v21 = vld [vmem:[%s28194_s3 + $0x6e8] ss:$16 sps:$4 sm:$0xff]  }
 0x7b3   :  { %14837 = vmatpush1.bf16.msra.mxu0 %v20999_v8  ;;  %v21044_v8 = vld [vmem:[%s28194_s3 + $0x708] ss:$16 sps:$4 sm:$0xff]  }
 0x7b4   :  { %14714 = vmatpush1.bf16.msra.mxu1 %v20996_v29  ;;  %14838 = vmatprep.subr.bf16.mxu0 %v21007_v28  ;;  %v21046_v29 = vld [vmem:[%s28194_s3 + $0x70c] ss:$16 sps:$4 sm:$0xff]  }
 0x7b5   :  { %14715 = vmatprep.subr.bf16.mxu1 %v21004_v41  ;;  %v21097_v41 = vld [vmem:[%s28196_s5 + $0x94] ss:$8 sps:$4 sm:$0xff]  }
 0x7b6   :  { %v21049_v28 = vld [vmem:[%s28194_s3 + $0x72c] ss:$16 sps:$4 sm:$0xff]  }
 0x7b7   :  { %14839 = vmatpush1.bf16.msra.mxu0 %v21005_v44  ;;  %v21052_v44 = vld [vmem:[%s28194_s3 + $0x74c] ss:$16 sps:$4 sm:$0xff]  }
 0x7b8   :  { %14716 = vmatpush1.bf16.msra.mxu1 %v21002_v26  ;;  %14840 = vmatprep.subr.bf16.mxu0 %v21013_v54  ;;  %v21095_v26 = vld [vmem:[%s28196_s5 + $0x90] ss:$8 sps:$4 sm:$0xff]  }
 0x7b9   :  { %14717 = vmatprep.subr.bf16.mxu1 %v21010_v50  ;;  %v21098_v50 = vld [vmem:[%s28196_s5 + $0xa0] ss:$8 sps:$4 sm:$0xff]  }
 0x7ba   :  { %v21050_v54 = vld [vmem:[%s28194_s3 + $0x748] ss:$16 sps:$4 sm:$0xff]  }
 0x7bb   :  { %14841 = vmatpush1.bf16.msra.mxu0 %v21011_v34  ;;  %v21101_v34 = vld [vmem:[%s28196_s5 + $0xb0] ss:$8 sps:$4 sm:$0xff]  }
 0x7bc   :  { %14718 = vmatpush1.bf16.msra.mxu1 %v21008_v39  ;;  %14842 = vmatprep.subr.bf16.mxu0 %v21019_v48  ;;  %v21103_v39 = vld [vmem:[%s28196_s5 + $0xb4] ss:$8 sps:$4 sm:$0xff]   ;;  %v21106_v48 = vld [vmem:[%s28196_s5 + $0xc4] ss:$8 sps:$4 sm:$0xff]  }
 0x7bd   :  { %14719 = vmatprep.subr.bf16.mxu1 %v21016_v42  ;;  %v21053_v42 = vld [vmem:[%s28194_s3 + $0x768] ss:$16 sps:$4 sm:$0xff]  }
 0x7bf   :  { %14843 = vmatpush1.bf16.msra.mxu0 %v21017_v23  ;;  %v21056_v23 = vld [vmem:[%s28194_s3 + $0x788] ss:$16 sps:$4 sm:$0xff]  }
 0x7c0   :  { %14720 = vmatpush1.bf16.msra.mxu1 %v21014_v7  ;;  %14853 = vmatprep.subr.bf16.mxu0 %v21022_v58  ;;  %v21058_v7 = vld [vmem:[%s28194_s3 + $0x78c] ss:$16 sps:$4 sm:$0xff]  }
 0x7c1   :  { %15298 = vmatprep.subr.bf16.mxu1 %v21070_v43  ;;  %v21109_v43 = vld [vmem:[%s28196_s5 + $0xd4] ss:$8 sps:$4 sm:$0xff]  }
 0x7c2   :  { %14845 = vmatmul.mubr.bf16.vlgmr.msra.gmra.mrb[112].mxu0 %v27513_v47  ;;  %v21028_v47 = vld [vmem:[%s28194_s3 + $0x64c] ss:$16 sps:$4 sm:$0xff]  }
 0x7c3   :  { %14722 = vmatmul.mubr.bf16.vlgmr.msra.gmra.mrb[108].mxu1 %v27724_v10  ;;  %14854 = vmatpush1.bf16.msra.mxu0 %v21020_v6  ;;  %v21061_v58 = vld [vmem:[%s28194_s3 + $0x7ac] ss:$16 sps:$4 sm:$0xff]   ;;  %v21059_v6 = vld [vmem:[%s28194_s3 + $0x7a8] ss:$16 sps:$4 sm:$0xff]  }
 0x7c4   :  { %15299 = vmatpush1.bf16.msra.mxu1 %v21068_v4  ;;  %14885 = vmatprep.mubr.bf16.mxu0 %v27521_v27  ;;  %v21026_v27 = vld [vmem:[%s28194_s3 + $0x648] ss:$16 sps:$4 sm:$0xff]  }
 0x7c5   :  { %14855 = vmatprep.subr.bf16.mxu0 %v21025_v36  ;;  %15300 = vmatprep.subr.bf16.mxu1 %v21073_v3  ;;  %v21107_v4 = vld [vmem:[%s28196_s5 + $0xd0] ss:$8 sps:$4 sm:$0xff]   ;;  %v21064_v36 = vld [vmem:[%s28194_s3 + $0x7cc] ss:$16 sps:$4 sm:$0xff]  }
 0x7c6   :  { %v21062_v3 = vld [vmem:[%s28194_s3 + $0x7c8] ss:$16 sps:$4 sm:$0xff]  }
 0x7c7   :  { %14856 = vmatpush1.bf16.msra.mxu0 %v21023_v59  ;;  %v21065_v59 = vld [vmem:[%s28194_s3 + $0x7e8] ss:$16 sps:$4 sm:$0xff]  }
 0x7c8   :  { %15301 = vmatpush1.bf16.msra.mxu1 %v21071_v63  ;;  %14857 = vmatprep.subr.bf16.mxu0 %v21028_v47  ;;  %v21067_v63 = vld [vmem:[%s28194_s3 + $0x7ec] ss:$16 sps:$4 sm:$0xff]   ;;  %v21110_v47 = vld [vmem:[%s28196_s5 + $0xe0] ss:$8 sps:$4 sm:$0xff]  }
 0x7c9   :  { %15302 = vmatprep.subr.bf16.mxu1 %v21076_v5  ;;  %v21112_v5 = vld [vmem:[%s28196_s5 + $0xe4] ss:$8 sps:$4 sm:$0xff]  }
 0x7cb   :  { %14858 = vmatpush1.bf16.msra.mxu0 %v21026_v27  ;;  %v21113_v27 = vld [vmem:[%s28196_s5 + $0xf0] ss:$8 sps:$4 sm:$0xff]  }
 0x7cc   :  { %15303 = vmatpush1.bf16.msra.mxu1 %v21074_v9  ;;  %14859 = vmatprep.subr.bf16.mxu0 %v21031_v16  ;;  %v21115_v9 = vld [vmem:[%s28196_s5 + $0xf4] ss:$8 sps:$4 sm:$0xff]   ;;  %v21166_v16 = vld [vmem:[%s28197_s7 + $0x4] ss:$8 sps:$4 sm:$0xff]  }
 0x7cd   :  { %15304 = vmatprep.subr.bf16.mxu1 %v21079_v20  ;;  %v21164_v20 = vld [vmem:[%s28197_s7] ss:$8 sps:$4 sm:$0xff]  }
 0x7cf   :  { %14860 = vmatpush1.bf16.msra.mxu0 %v21029_v12  ;;  %v21167_v12 = vld [vmem:[%s28197_s7 + $0x10] ss:$8 sps:$4 sm:$0xff]  }
 0x7d0   :  { %15305 = vmatpush1.bf16.msra.mxu1 %v21077_v17  ;;  %14861 = vmatprep.subr.bf16.mxu0 %v21034_v31  ;;  %v21169_v17 = vld [vmem:[%s28197_s7 + $0x14] ss:$8 sps:$4 sm:$0xff]   ;;  %v21170_v31 = vld [vmem:[%s28197_s7 + $0x20] ss:$8 sps:$4 sm:$0xff]  }
 0x7d1   :  { %15306 = vmatprep.subr.bf16.mxu1 %v21082_v18  ;;  %v21172_v18 = vld [vmem:[%s28197_s7 + $0x24] ss:$8 sps:$4 sm:$0xff]  }
 0x7d3   :  { %14862 = vmatpush1.bf16.msra.mxu0 %v21032_v25  ;;  %v21173_v25 = vld [vmem:[%s28197_s7 + $0x30] ss:$8 sps:$4 sm:$0xff]  }
 0x7d4   :  { %15307 = vmatpush1.bf16.msra.mxu1 %v21080_v24  ;;  %14863 = vmatprep.subr.bf16.mxu0 %v21037_v11  ;;  %v21175_v24 = vld [vmem:[%s28197_s7 + $0x34] ss:$8 sps:$4 sm:$0xff]   ;;  %v21176_v11 = vld [vmem:[%s28197_s7 + $0x40] ss:$8 sps:$4 sm:$0xff]  }
 0x7d5   :  { %15308 = vmatprep.subr.bf16.mxu1 %v21085_v53  ;;  %v12935_v15 = vpop.f32.mrb[108].mxu0  ;;  %v21178_v53 = vld [vmem:[%s28197_s7 + $0x44] ss:$8 sps:$4 sm:$0xff]  }
 0x7d6   :  { %v27799_v22 = vadd.f32 %v12935_v15, %v27604_v30  ;;  %v12937_v45 = vpop.f32.mrb[109].mxu0  ;;  %v21091_v30 = vld [vmem:[%s28196_s5 + $0x74] ss:$8 sps:$4 sm:$0xff]   ;;  %v21182_v15 = vld [vmem:[%s28197_s7 + $0x60] ss:$8 sps:$4 sm:$0xff]  }
 0x7d7   :  { %v27802_v1 = vadd.f32 %v12937_v45, %v27606_v61  ;;  %v12939_v33 = vpop.f32.mrb[110].mxu0  ;;  %14864 = vmatpush1.bf16.msra.mxu0 %v21035_v60  ;;  %v21043_v61 = vld [vmem:[%s28194_s3 + $0x6ec] ss:$16 sps:$4 sm:$0xff]   ;;  %v21179_v60 = vld [vmem:[%s28197_s7 + $0x50] ss:$8 sps:$4 sm:$0xff]  }
 0x7d8   :  { %15309 = vmatpush1.bf16.msra.mxu1 %v21083_v13  ;;  %v12940_v52 = vpop.f32.mrb[111].mxu0  ;;  %14865 = vmatprep.subr.bf16.mxu0 %v21040_v57  ;;  %v21181_v13 = vld [vmem:[%s28197_s7 + $0x54] ss:$8 sps:$4 sm:$0xff]   ;;  %v21185_v45 = vld [vmem:[%s28197_s7 + $0x70] ss:$8 sps:$4 sm:$0xff]  }
 0x7d9   :  { %15310 = vmatprep.subr.bf16.mxu1 %v21088_v0  ;;  %v21184_v0 = vld [vmem:[%s28197_s7 + $0x64] ss:$8 sps:$4 sm:$0xff]   ;;  %v21187_v57 = vld [vmem:[%s28197_s7 + $0x74] ss:$8 sps:$4 sm:$0xff]  }
 0x7da   :  { %v21190_v33 = vld [vmem:[%s28197_s7 + $0x84] ss:$8 sps:$4 sm:$0xff]   ;;  %v21193_v52 = vld [vmem:[%s28197_s7 + $0x94] ss:$8 sps:$4 sm:$0xff]  }
 0x7db   :  { %14866 = vmatpush1.bf16.msra.mxu0 %v21038_v37  ;;  %v21191_v37 = vld [vmem:[%s28197_s7 + $0x90] ss:$8 sps:$4 sm:$0xff]  }
 0x7dc   :  { %15311 = vmatpush1.bf16.msra.mxu1 %v21086_v19  ;;  %14867 = vmatprep.subr.bf16.mxu0 %v21043_v61  ;;  %v21188_v19 = vld [vmem:[%s28197_s7 + $0x80] ss:$8 sps:$4 sm:$0xff]  }
 0x7dd   :  { %15312 = vmatprep.subr.bf16.mxu1 %v21091_v30  ;;  %v21196_v30 = vld [vmem:[%s28197_s7 + $0xa4] ss:$8 sps:$4 sm:$0xff]   ;;  %v21194_v61 = vld [vmem:[%s28197_s7 + $0xa0] ss:$8 sps:$4 sm:$0xff]  }
 0x7df   :  { %14868 = vmatpush1.bf16.msra.mxu0 %v21041_v21  ;;  %v21197_v21 = vld [vmem:[%s28197_s7 + $0xb0] ss:$8 sps:$4 sm:$0xff]  }
 0x7e0   :  { %15313 = vmatpush1.bf16.msra.mxu1 %v21089_v51  ;;  %14869 = vmatprep.subr.bf16.mxu0 %v21046_v29  ;;  %v21199_v51 = vld [vmem:[%s28197_s7 + $0xb4] ss:$8 sps:$4 sm:$0xff]   ;;  %v28000_v29 = vld [vmem:[%s28198_s4] sm:$0xf] }
 0x7e1   :  { %15314 = vmatprep.subr.bf16.mxu1 %v21094_v35  ;;  %v21202_v35 = vld [vmem:[%s28197_s7 + $0xc4] ss:$8 sps:$4 sm:$0xff]  }
 0x7e3   :  { %14870 = vmatpush1.bf16.msra.mxu0 %v21044_v8  ;;  %v21205_v8 = vld [vmem:[%s28197_s7 + $0xd4] ss:$8 sps:$4 sm:$0xff]  }
 0x7e4   :  { %15315 = vmatpush1.bf16.msra.mxu1 %v21092_v32  ;;  %14871 = vmatprep.subr.bf16.mxu0 %v21049_v28  ;;  %v21200_v32 = vld [vmem:[%s28197_s7 + $0xc0] ss:$8 sps:$4 sm:$0xff]   ;;  %v13273_v28 = vrot.slane %v28000_v29, %v26834_v62 }
 0x7e5   :  { %15316 = vmatprep.subr.bf16.mxu1 %v21097_v41  ;;  %v13269_v41 = vrot.slane %v28000_v29, %v27032_v40 }
 0x7e7   :  { %14872 = vmatpush1.bf16.msra.mxu0 %v21047_v2 }
 0x7e8   :  { %15317 = vmatpush1.bf16.msra.mxu1 %v21095_v26  ;;  %14873 = vmatprep.subr.bf16.mxu0 %v21052_v44  ;;  %v21203_v26 = vld [vmem:[%s28197_s7 + $0xd0] ss:$8 sps:$4 sm:$0xff]  }
 0x7e9   :  { %15318 = vmatprep.subr.bf16.mxu1 %v21100_v55 }
 0x7eb   :  { %14874 = vmatpush1.bf16.msra.mxu0 %v21050_v54 }
 0x7ec   :  { %15319 = vmatpush1.bf16.msra.mxu1 %v21098_v50  ;;  %14875 = vmatprep.subr.bf16.mxu0 %v21055_v56 }
 0x7ed   :  { %15320 = vmatprep.subr.bf16.mxu1 %v21103_v39 }
 0x7ef   :  { %14876 = vmatpush1.bf16.msra.mxu0 %v21053_v42 }
 0x7f0   :  { %15321 = vmatpush1.bf16.msra.mxu1 %v21101_v34  ;;  %14877 = vmatprep.subr.bf16.mxu0 %v21058_v7 }
 0x7f1   :  { %15322 = vmatprep.subr.bf16.mxu1 %v21106_v48  ;;  %v21116_v48 = vld [vmem:[%s28196_s5 + $0x100] ss:$8 sps:$4 sm:$0xff]  }
 0x7f3   :  { %14878 = vmatpush1.bf16.msra.mxu0 %v21056_v23  ;;  %v21119_v23 = vld [vmem:[%s28196_s5 + $0x110] ss:$8 sps:$4 sm:$0xff]  }
 0x7f4   :  { %15323 = vmatpush1.bf16.msra.mxu1 %v21104_v49  ;;  %14879 = vmatprep.subr.bf16.mxu0 %v21061_v58  ;;  %v21121_v49 = vld [vmem:[%s28196_s5 + $0x114] ss:$8 sps:$4 sm:$0xff]   ;;  %v21122_v58 = vld [vmem:[%s28196_s5 + $0x120] ss:$8 sps:$4 sm:$0xff]  }
 0x7f5   :  { %15324 = vmatprep.subr.bf16.mxu1 %v21109_v43  ;;  %v21124_v43 = vld [vmem:[%s28196_s5 + $0x124] ss:$8 sps:$4 sm:$0xff]  }
 0x7f7   :  { %14880 = vmatpush1.bf16.msra.mxu0 %v21059_v6  ;;  %v21125_v6 = vld [vmem:[%s28196_s5 + $0x130] ss:$8 sps:$4 sm:$0xff]  }
 0x7f8   :  { %15325 = vmatpush1.bf16.msra.mxu1 %v21107_v4  ;;  %14881 = vmatprep.subr.bf16.mxu0 %v21064_v36  ;;  %v21127_v4 = vld [vmem:[%s28196_s5 + $0x134] ss:$8 sps:$4 sm:$0xff]   ;;  %v21130_v36 = vld [vmem:[%s28196_s5 + $0x144] ss:$8 sps:$4 sm:$0xff]  }
 0x7f9   :  { %15326 = vmatprep.subr.bf16.mxu1 %v21112_v5  ;;  %v21136_v5 = vld [vmem:[%s28196_s5 + $0x164] ss:$8 sps:$4 sm:$0xff]  }
 0x7fb   :  { %14882 = vmatpush1.bf16.msra.mxu0 %v21062_v3  ;;  %v21128_v3 = vld [vmem:[%s28196_s5 + $0x140] ss:$8 sps:$4 sm:$0xff]  }
 0x7fc   :  { %14883 = vmatprep.subr.bf16.mxu0 %v21067_v63  ;;  %15327 = vmatpush1.bf16.msra.mxu1 %v21110_v47  ;;  %v21133_v63 = vld [vmem:[%s28196_s5 + $0x154] ss:$8 sps:$4 sm:$0xff]   ;;  %v21134_v47 = vld [vmem:[%s28196_s5 + $0x160] ss:$8 sps:$4 sm:$0xff]  }
 0x7fd   :  { %15328 = vmatprep.subr.bf16.mxu1 %v21115_v9  ;;  %v21139_v9 = vld [vmem:[%s28196_s5 + $0x174] ss:$8 sps:$4 sm:$0xff]  }
 0x7ff   :  { %14884 = vmatpush1.bf16.msra.mxu0 %v21065_v59  ;;  %v21131_v59 = vld [vmem:[%s28196_s5 + $0x150] ss:$8 sps:$4 sm:$0xff]  }
 0x800   :  { %15329 = vmatpush1.bf16.msra.mxu1 %v21113_v27  ;;  %15576 = vmatprep.subr.bf16.mxu0 %v21166_v16  ;;  %v21137_v27 = vld [vmem:[%s28196_s5 + $0x170] ss:$8 sps:$4 sm:$0xff]   ;;  %v21145_v16 = vld [vmem:[%s28196_s5 + $0x194] ss:$8 sps:$4 sm:$0xff]  }
 0x802   :  { %14886 = vmatmul.mubr.bf16.vlgmr.msra.gmra.mrb[112].mxu0 %v27724_v10  ;;  %v21118_v10 = vld [vmem:[%s28196_s5 + $0x104] ss:$8 sps:$4 sm:$0xff]  }
 0x803   :  { %15339 = vmatprep.subr.bf16.mxu1 %v21118_v10  ;;  %15577 = vmatpush1.bf16.msra.mxu0 %v21164_v20  ;;  %v21142_v10 = vld [vmem:[%s28196_s5 + $0x184] ss:$8 sps:$4 sm:$0xff]   ;;  %v21140_v20 = vld [vmem:[%s28196_s5 + $0x180] ss:$8 sps:$4 sm:$0xff]  }
 0x804   :  { %15578 = vmatprep.subr.bf16.mxu0 %v21169_v17  ;;  %v21143_v17 = vld [vmem:[%s28196_s5 + $0x190] ss:$8 sps:$4 sm:$0xff]  }
 0x807   :  { %15579 = vmatpush1.bf16.msra.mxu0 %v21167_v12  ;;  %v21148_v12 = vld [vmem:[%s28196_s5 + $0x1a4] ss:$8 sps:$4 sm:$0xff]  }
 0x808   :  { %15580 = vmatprep.subr.bf16.mxu0 %v21172_v18  ;;  %v21146_v18 = vld [vmem:[%s28196_s5 + $0x1a0] ss:$8 sps:$4 sm:$0xff]  }
 0x80b   :  { %15581 = vmatpush1.bf16.msra.mxu0 %v21170_v31  ;;  %v21151_v31 = vld [vmem:[%s28196_s5 + $0x1b4] ss:$8 sps:$4 sm:$0xff]  }
 0x80c   :  { %15582 = vmatprep.subr.bf16.mxu0 %v21175_v24  ;;  %v21149_v24 = vld [vmem:[%s28196_s5 + $0x1b0] ss:$8 sps:$4 sm:$0xff]  }
 0x80f   :  { %15583 = vmatpush1.bf16.msra.mxu0 %v21173_v25  ;;  %v21154_v25 = vld [vmem:[%s28196_s5 + $0x1c4] ss:$8 sps:$4 sm:$0xff]  }
 0x810   :  { %15584 = vmatprep.subr.bf16.mxu0 %v21178_v53  ;;  %v21152_v53 = vld [vmem:[%s28196_s5 + $0x1c0] ss:$8 sps:$4 sm:$0xff]  }
 0x813   :  { %15585 = vmatpush1.bf16.msra.mxu0 %v21176_v11  ;;  %v21157_v11 = vld [vmem:[%s28196_s5 + $0x1d4] ss:$8 sps:$4 sm:$0xff]  }
 0x814   :  { %15586 = vmatprep.subr.bf16.mxu0 %v21181_v13  ;;  %v21155_v13 = vld [vmem:[%s28196_s5 + $0x1d0] ss:$8 sps:$4 sm:$0xff]  }
 0x817   :  { %15587 = vmatpush1.bf16.msra.mxu0 %v21179_v60  ;;  %v21160_v60 = vld [vmem:[%s28196_s5 + $0x1e4] ss:$8 sps:$4 sm:$0xff]  }
 0x818   :  { %15588 = vmatprep.subr.bf16.mxu0 %v21184_v0  ;;  %v13277_v0 = vrot.slane %v28000_v29, %v12954_v38  ;;  %v21161_v38 = vld [vmem:[%s28196_s5 + $0x1f0] ss:$8 sps:$4 sm:$0xff]  }
 0x81b   :  { %15589 = vmatpush1.bf16.msra.mxu0 %v21182_v15  ;;  %v21158_v15 = vld [vmem:[%s28196_s5 + $0x1e0] ss:$8 sps:$4 sm:$0xff]  }
 0x81c   :  { %15590 = vmatprep.subr.bf16.mxu0 %v21187_v57  ;;  %v13281_v57 = vrot.slane %v28000_v29, %v12958_v46  ;;  %v21206_v29 = vld [vmem:[%s28197_s7 + $0xe0] ss:$8 sps:$4 sm:$0xff]  }
 0x81f   :  { %15591 = vmatpush1.bf16.msra.mxu0 %v21185_v45  ;;  %v21163_v45 = vld [vmem:[%s28196_s5 + $0x1f4] ss:$8 sps:$4 sm:$0xff]  }
 0x820   :  { %15592 = vmatprep.subr.bf16.mxu0 %v21190_v33 }
 0x823   :  { %15593 = vmatpush1.bf16.msra.mxu0 %v21188_v19 }
 0x824   :  { %15594 = vmatprep.subr.bf16.mxu0 %v21193_v52 }
 0x827   :  { %15595 = vmatpush1.bf16.msra.mxu0 %v21191_v37 }
 0x828   :  { %15596 = vmatprep.subr.bf16.mxu0 %v21196_v30 }
 0x82b   :  { %15597 = vmatpush1.bf16.msra.mxu0 %v21194_v61 }
 0x82c   :  { %15598 = vmatprep.subr.bf16.mxu0 %v21199_v51 }
 0x82f   :  { %15599 = vmatpush1.bf16.msra.mxu0 %v21197_v21 }
 0x830   :  { %15600 = vmatprep.subr.bf16.mxu0 %v21202_v35  ;;  %v21208_v35 = vld [vmem:[%s28197_s7 + $0xe4] ss:$8 sps:$4 sm:$0xff]  }
 0x833   :  { %15601 = vmatpush1.bf16.msra.mxu0 %v21200_v32  ;;  %v21211_v32 = vld [vmem:[%s28197_s7 + $0xf4] ss:$8 sps:$4 sm:$0xff]  }
 0x834   :  { %15602 = vmatprep.subr.bf16.mxu0 %v21205_v8  ;;  %v21209_v8 = vld [vmem:[%s28197_s7 + $0xf0] ss:$8 sps:$4 sm:$0xff]  }
 0x837   :  { %15603 = vmatpush1.bf16.msra.mxu0 %v21203_v26 }
 0x838   :  { %15604 = vmatprep.subr.bf16.mxu0 %v21208_v35 }
 0x83b   :  { %15605 = vmatpush1.bf16.msra.mxu0 %v21206_v29 }
 0x83c   :  { %15606 = vmatprep.subr.bf16.mxu0 %v21211_v32 }
 0x83f   :  { %15607 = vmatpush1.bf16.msra.mxu0 %v21209_v8 }
 0x896   :  { %v14723_v2 = vpop.f32.mrb[108].mxu1 }
 0x897   :  { %v17988_v55 = vadd.f32 %v14723_v2, %v13269_v41  ;;  %v14725_v44 = vpop.f32.mrb[109].mxu1  ;;  %v21212_v41 = vld [vmem:[%s28199_s9 + $0x40] sm:$0xff]  }
 0x898   :  { %v17989_v50 = vadd.f32 %v14725_v44, %v13273_v28  ;;  %v14727_v54 = vpop.f32.mrb[110].mxu1  ;;  %17966 = vmatprep.subr.bf16.mxu0 %v21212_v41  ;;  %v14966_v28 = vld [vmem:[%s28200_s6] sm:$0x3] }
 0x899   :  { %v14894_v39 = vmax.f32 %v17988_v55, 0.0  ;;  %v14728_v56 = vpop.f32.mrb[111].mxu1  ;;  %v14971_v26 = vrot.slane %v14966_v28, %v27032_v40  ;;  %v14975_v2 = vrot.slane %v14966_v28, %v26834_v62 }
 0x89a   :  { %v14895_v34 = vmax.f32 %v17989_v50, 0.0 }
 0x89b   :  { %v14898_v7 = vpack.c.bf16 %v14894_v39, %v14894_v39 }
 0x89c   :  { %v14899_v42 = vpack.c.bf16 %v14895_v34, %v14895_v34 }
 0x89e   :  { %15330 = vmatprep.mubr.bf16.mxu1 %v14899_v42 }
 0x89f   :  { %15331 = vmatmul.mubr.bf16.vlgmr.msra.gmra.mrb[112].mxu1 %v14898_v7  ;;  %v21213_v7 = vld [vmem:[%s28199_s9] sm:$0xff]  }
 0x8a0   :  { %15340 = vmatpush1.bf16.msra.mxu1 %v21116_v48 }
 0x8a1   :  { %15341 = vmatprep.subr.bf16.mxu1 %v21121_v49 }
 0x8a4   :  { %15342 = vmatpush1.bf16.msra.mxu1 %v21119_v23  ;;  %v21214_v23 = vld [vmem:[%s28199_s9 + $0x48] sm:$0xff]  }
 0x8a5   :  { %15343 = vmatprep.subr.bf16.mxu1 %v21124_v43  ;;  %v21215_v43 = vld [vmem:[%s28199_s9 + $0x8] sm:$0xff]  }
 0x8a8   :  { %15344 = vmatpush1.bf16.msra.mxu1 %v21122_v58  ;;  %v21216_v58 = vld [vmem:[%s28199_s9 + $0x50] sm:$0xff]  }
 0x8a9   :  { %15345 = vmatprep.subr.bf16.mxu1 %v21127_v4  ;;  %v21217_v4 = vld [vmem:[%s28199_s9 + $0x10] sm:$0xff]  }
 0x8ac   :  { %15346 = vmatpush1.bf16.msra.mxu1 %v21125_v6  ;;  %v21218_v6 = vld [vmem:[%s28199_s9 + $0x58] sm:$0xff]  }
 0x8ad   :  { %15347 = vmatprep.subr.bf16.mxu1 %v21130_v36  ;;  %v21219_v36 = vld [vmem:[%s28199_s9 + $0x18] sm:$0xff]  }
 0x8b0   :  { %15348 = vmatpush1.bf16.msra.mxu1 %v21128_v3  ;;  %v21220_v3 = vld [vmem:[%s28199_s9 + $0x60] sm:$0xff]  }
 0x8b1   :  { %15349 = vmatprep.subr.bf16.mxu1 %v21133_v63  ;;  %v21221_v63 = vld [vmem:[%s28199_s9 + $0x20] sm:$0xff]  }
 0x8b4   :  { %15350 = vmatpush1.bf16.msra.mxu1 %v21131_v59  ;;  %v21222_v59 = vld [vmem:[%s28199_s9 + $0x68] sm:$0xff]  }
 0x8b5   :  { %15351 = vmatprep.subr.bf16.mxu1 %v21136_v5  ;;  %v21223_v5 = vld [vmem:[%s28199_s9 + $0x28] sm:$0xff]  }
 0x8b8   :  { %15352 = vmatpush1.bf16.msra.mxu1 %v21134_v47  ;;  %v21224_v47 = vld [vmem:[%s28199_s9 + $0x70] sm:$0xff]  }
 0x8b9   :  { %15353 = vmatprep.subr.bf16.mxu1 %v21139_v9  ;;  %v21225_v9 = vld [vmem:[%s28199_s9 + $0x30] sm:$0xff]  }
 0x8bc   :  { %15354 = vmatpush1.bf16.msra.mxu1 %v21137_v27  ;;  %v21226_v27 = vld [vmem:[%s28199_s9 + $0x78] sm:$0xff]  }
 0x8bd   :  { %15355 = vmatprep.subr.bf16.mxu1 %v21142_v10  ;;  %v21227_v10 = vld [vmem:[%s28199_s9 + $0x38] sm:$0xff]  }
 0x8c0   :  { %15356 = vmatpush1.bf16.msra.mxu1 %v21140_v20  ;;  %v15617_v20 = vld [vmem:[%s28201_s8] sm:$0x3] }
 0x8c1   :  { %15357 = vmatprep.subr.bf16.mxu1 %v21145_v16  ;;  %v15622_v16 = vrot.slane %v15617_v20, %v27032_v40 }
 0x8c4   :  { %15358 = vmatpush1.bf16.msra.mxu1 %v21143_v17 }
 0x8c5   :  { %15359 = vmatprep.subr.bf16.mxu1 %v21148_v12  ;;  %v15626_v12 = vrot.slane %v15617_v20, %v26834_v62  ;;  %v17949_v62 = vld [vmem:[%s28202_s10] ss:$0 sm:$0xff] }
 0x8c8   :  { %15360 = vmatpush1.bf16.msra.mxu1 %v21146_v18 }
 0x8c9   :  { %15361 = vmatprep.subr.bf16.mxu1 %v21151_v31 }
 0x8cc   :  { %15362 = vmatpush1.bf16.msra.mxu1 %v21149_v24 }
 0x8cd   :  { %15363 = vmatprep.subr.bf16.mxu1 %v21154_v25 }
 0x8d0   :  { %15364 = vmatpush1.bf16.msra.mxu1 %v21152_v53 }
 0x8d1   :  { %15365 = vmatprep.subr.bf16.mxu1 %v21157_v11 }
 0x8d4   :  { %15366 = vmatpush1.bf16.msra.mxu1 %v21155_v13 }
 0x8d5   :  { %15367 = vmatprep.subr.bf16.mxu1 %v21160_v60  ;;  %v14887_v33 = vpop.f32.mrb[112].mxu0 }
 0x8d6   :  { %v17990_v19 = vadd.f32 %v14887_v33, %v13277_v0  ;;  %v14889_v52 = vpop.f32.mrb[113].mxu0 }
 0x8d7   :  { %v17991_v37 = vadd.f32 %v14889_v52, %v13281_v57  ;;  %v14891_v30 = vpop.f32.mrb[114].mxu0 }
 0x8d8   :  { %15368 = vmatpush1.bf16.msra.mxu1 %v21158_v15  ;;  %v14896_v61 = vmax.f32 %v17990_v19, 0.0  ;;  %v14892_v14 = vpop.f32.mrb[115].mxu0 }
 0x8d9   :  { %15369 = vmatprep.subr.bf16.mxu1 %v21163_v45  ;;  %v14897_v51 = vmax.f32 %v17991_v37, 0.0 }
 0x8da   :  { %v14900_v21 = vpack.c.bf16 %v14896_v61, %v14896_v61 }
 0x8db   :  { %v14901_v46 = vpack.c.bf16 %v14897_v51, %v14897_v51 }
 0x8dc   :  { %15370 = vmatpush1.bf16.msra.mxu1 %v21161_v38 }
 0x8dd   :  { %15371 = vmatprep.mubr.bf16.mxu1 %v14901_v46 }
 0x8df   :  { %15372 = vmatmul.mubr.bf16.vlgmr.msra.gmra.mrb[112].mxu1 %v14900_v21 }
 0x9b2   :  { %v15373_v55 = vpop.f32.mrb[112].mxu1 }
 0x9b3   :  { %v17992_v44 = vadd.f32 %v15373_v55, %v14971_v26  ;;  %v15375_v50 = vpop.f32.mrb[113].mxu1 }
 0x9b4   :  { %v17993_v54 = vadd.f32 %v15375_v50, %v14975_v2  ;;  %v15377_v39 = vpop.f32.mrb[114].mxu1 }
 0x9b5   :  { %v15380_v56 = vmax.f32 %v17992_v44, 0.0  ;;  %v15378_v34 = vpop.f32.mrb[115].mxu1 }
 0x9b6   :  { %v15381_v42 = vmax.f32 %v17993_v54, 0.0 }
 0x9b7   :  { %v15382_v49 = vpack.c.bf16 %v15380_v56, %v15380_v56 }
 0x9b8   :  { %v15383_v48 = vpack.c.bf16 %v15381_v42, %v15381_v42 }
 0x9ba   :  { %15608 = vmatprep.mubr.bf16.mxu0 %v15383_v48 }
 0x9bb   :  { %15609 = vmatmul.mubr.bf16.vlgmr.msra.gmra.mrb[116].mxu0 %v15382_v49 }
 0x9bc   :  { %17967 = vmatpush3.bf16.msra.mxu0 %v21213_v7 }
 0x9bd   :  { %17968 = vmatprep.subr.bf16.mxu0 %v21214_v23 }
 0x9c0   :  { %17969 = vmatpush3.bf16.msra.mxu0 %v21215_v43 }
 0x9c1   :  { %17970 = vmatprep.subr.bf16.mxu0 %v21216_v58 }
 0x9c4   :  { %17971 = vmatpush3.bf16.msra.mxu0 %v21217_v4 }
 0x9c5   :  { %17972 = vmatprep.subr.bf16.mxu0 %v21218_v6 }
 0x9c8   :  { %17973 = vmatpush3.bf16.msra.mxu0 %v21219_v36 }
 0x9c9   :  { %17974 = vmatprep.subr.bf16.mxu0 %v21220_v3 }
 0x9cc   :  { %17975 = vmatpush3.bf16.msra.mxu0 %v21221_v63 }
 0x9cd   :  { %17976 = vmatprep.subr.bf16.mxu0 %v21222_v59 }
 0x9d0   :  { %17977 = vmatpush3.bf16.msra.mxu0 %v21223_v5 }
 0x9d1   :  { %17978 = vmatprep.subr.bf16.mxu0 %v21224_v47 }
 0x9d4   :  { %17979 = vmatpush3.bf16.msra.mxu0 %v21225_v9 }
 0x9d5   :  { %17980 = vmatprep.subr.bf16.mxu0 %v21226_v27 }
 0x9d8   :  { %17981 = vmatpush3.bf16.msra.mxu0 %v21227_v10 }
 0xa8e   :  { %v15610_v17 = vpop.f32.mrb[116].mxu0 }
 0xa8f   :  { %v15611_v18 = vadd.f32 %v15610_v17, %v27799_v22  ;;  %v15612_v31 = vpop.f32.mrb[117].mxu0 }
 0xa90   :  { %v15613_v24 = vadd.f32 %v15612_v31, %v27802_v1  ;;  %v15614_v25 = vpop.f32.mrb[118].mxu0 }
 0xa91   :  { %v15629_v53 = vadd.f32 %v15622_v16, %v15611_v18  ;;  %v15615_v11 = vpop.f32.mrb[119].mxu0 }
 0xa92   :  { %v15630_v13 = vadd.f32 %v15626_v12, %v15613_v24 }
 0xa93   :  { %v15631_v60 = vmax.f32 %v15629_v53, 0.0 }
 0xa94   :  { %v15632_v0 = vmax.f32 %v15630_v13, 0.0 }
 0xa95   :  { %v15633_v57 = vpack.c.bf16 %v15631_v60, %v15631_v60 }
 0xa96   :  { %v15634_v15 = vpack.c.bf16 %v15632_v0, %v15632_v0 }
 0xa98   :  { %15802 = vmatprep.mubr.bf16.mxu0 %v15634_v15 }
 0xa99   :  { %15803 = vmatmul.mubr.bf16.vlgmr.msra.gmra.mrb[120].mxu0 %v15633_v57 }
 0xb6c   :  { %v17982_v45 = vpop.f32.mrb[120].mxu0 }
 0xb6d   :  { %v17983_v40 = vpop.f32.mrb[121].mxu0 }
 0xb6e   :  { %v17984_v22 = vadd.f32 %v17983_v40, %v17982_v45  ;;  %v17985_v33 = vpop.f32.mrb[122].mxu0 }
 0xb6f   :  { %v17986_v19 = vpop.f32.mrb[123].mxu0 }
 0xb70   :  { %v15805_v1 = vadd.f32 %v17984_v22, %v17949_v62 }
 0xb72   :  { %15810 = vst [vmem:[%s28203_s11] sm:$0xff] %v15805_v1 }

</bundles_post_ra>
